<compile_context>
chip_gen: v6e
topology: v6e:2x2x1
jax: 0.10.0
libtpu: 0.0.40
codegen_flags: <defaults>
</compile_context>

<pallas_src>
import math

import jax
import jax.numpy as jnp
from jax import lax
from jax.experimental import pallas as pl
from jax.experimental.pallas import tpu as pltpu

# ---- small, TPU-friendly configuration of LearnedPooling(latent_dim, sizes_downsample) ----
LATENT = 32
SIZES_DOWN = (128, 32, 16)      # [S0, S1, S2]  (module default is [1026, 64, 32])
ENC_FEATURES = (3, 32, 64)      # fixed inside LearnedPooling.__init__
S0, S1, S2 = SIZES_DOWN
C0, C1, C2 = ENC_FEATURES       # C0=3 input coords
J = LATENT
CPAD = 8                        # input coord channels padded 3 -> 8 (aligned sublane concat)
COUT_PAD = 8                    # output coord channels padded 3 -> 8 (full-tile stores)
LANE_W = 192                    # lane width of the packed 2-D weight slab (max fused conv K)
BATCH = 2


# --------------------------------------------------------------------------
# parameter init (deterministic, PyTorch-style uniform(-1/sqrt(fan_in), ...))
# --------------------------------------------------------------------------
def init_params(key):
    ks = iter(jax.random.split(key, 22))

    def u(shape, fan_in):
        bound = 1.0 / math.sqrt(fan_in)
        return jax.random.uniform(next(ks), shape, jnp.float32, -bound, bound)

    p = {}
    # Encoder: Conv1d(3,32,3,p=1), Linear(S0,S1), ELU, Conv1d(32,64,3,p=1), Linear(S1,S2), ELU
    p["enc_conv1_w"] = u((C1, C0, 3), C0 * 3); p["enc_conv1_b"] = u((C1,), C0 * 3)
    p["enc_lin1_w"] = u((S1, S0), S0);         p["enc_lin1_b"] = u((S1,), S0)
    p["enc_conv2_w"] = u((C2, C1, 3), C1 * 3); p["enc_conv2_b"] = u((C2,), C1 * 3)
    p["enc_lin2_w"] = u((S2, S1), S1);         p["enc_lin2_b"] = u((S2,), S1)
    # Encoder final Linear(C2*S2, J)
    p["enc_out_w"] = u((J, C2 * S2), C2 * S2); p["enc_out_b"] = u((J,), C2 * S2)
    # Decoder: Linear(J, C2*S2), then [Linear(S2,S1), Conv1d(64,32), ELU],
    #          [Linear(S1,S0), Conv1d(32,32), ELU], Conv1d(32,3)
    p["dec_in_w"] = u((C2 * S2, J), J);        p["dec_in_b"] = u((C2 * S2,), J)
    p["dec_lin1_w"] = u((S1, S2), S2);         p["dec_lin1_b"] = u((S1,), S2)
    p["dec_conv1_w"] = u((C1, C2, 3), C2 * 3); p["dec_conv1_b"] = u((C1,), C2 * 3)
    p["dec_lin2_w"] = u((S0, S1), S1);         p["dec_lin2_b"] = u((S0,), S1)
    p["dec_conv2_w"] = u((C1, C1, 3), C1 * 3); p["dec_conv2_b"] = u((C1,), C1 * 3)
    p["last_conv_w"] = u((3, C1, 3), C1 * 3);  p["last_conv_b"] = u((3,), C1 * 3)
    return p


# --------------------------------------------------------------------------
# glue: fuse conv weights, re-layout, and pack everything into 3 buffers (done ONCE)
# --------------------------------------------------------------------------
def _conv_fused(w, pad_in=None, pad_out=None):
    # (Cout, Cin, 3) -> (Cout, 3*Cin) matching z = concat([prev, x, next], axis=0)
    cout, cin, k = w.shape
    if pad_in is not None and pad_in != cin:
        w = jnp.pad(w, ((0, 0), (0, pad_in - cin), (0, 0)))
        cin = pad_in
    wf = jnp.transpose(w, (0, 2, 1)).reshape(cout, k * cin)
    if pad_out is not None and pad_out != cout:
        wf = jnp.pad(wf, ((0, pad_out - cout), (0, 0)))
    return wf


def prepare_weights(p):
    """Returns (w2d_slab, offsets, eout_w3, din_w3).

    w2d_slab: every 2-D weight/bias padded to LANE_W lanes and stacked at 8-aligned
    row offsets -> one DMA.  eout_w3/din_w3 are the two big 3-D weights, laid out so the
    kernel only ever indexes their LEADING axis.
    """
    pieces = {
        "ec1_w": _conv_fused(p["enc_conv1_w"], pad_in=CPAD),     # (C1, 3*CPAD)
        "ec1_b": p["enc_conv1_b"][:, None],                      # (C1, 1)
        "el1_w": p["enc_lin1_w"].T,                              # (S0, S1)
        "el1_b": p["enc_lin1_b"][None, :],                       # (1, S1)
        "ec2_w": _conv_fused(p["enc_conv2_w"]),                  # (C2, 3*C1)
        "ec2_b": p["enc_conv2_b"][:, None],                      # (C2, 1)
        "el2_w": p["enc_lin2_w"].T,                              # (S1, S2)
        "el2_b": p["enc_lin2_b"][None, :],                       # (1, S2)
        "eout_b": p["enc_out_b"][None, :],                       # (1, J)
        "din_b": p["dec_in_b"].reshape(C2, S2),                  # (C2, S2)
        "dl1_w": p["dec_lin1_w"].T,                              # (S2, S1)
        "dl1_b": p["dec_lin1_b"][None, :],                       # (1, S1)
        "dc1_w": _conv_fused(p["dec_conv1_w"]),                  # (C1, 3*C2)
        "dc1_b": p["dec_conv1_b"][:, None],                      # (C1, 1)
        "dl2_w": p["dec_lin2_w"].T,                              # (S1, S0)
        "dl2_b": p["dec_lin2_b"][None, :],                       # (1, S0)
        "dc2_w": _conv_fused(p["dec_conv2_w"]),                  # (C1, 3*C1)
        "dc2_b": p["dec_conv2_b"][:, None],                      # (C1, 1)
        "dlast_w": _conv_fused(p["last_conv_w"], pad_out=COUT_PAD),   # (8, 3*C1)
        "dlast_b": jnp.pad(p["last_conv_b"], (0, COUT_PAD - 3))[:, None],  # (8, 1)
    }
    offs = {}
    rows = []
    r = 0
    for name, a in pieces.items():
        rr, cc = a.shape
        rows.append(jnp.pad(a.astype(jnp.float32),
                            ((0, (-rr) % 8), (0, LANE_W - cc))))
        offs[name] = (r, rr, cc)
        r += rr + ((-rr) % 8)
    w2d = jnp.concatenate(rows, axis=0)                          # (648, 192)

    # flatten(C2*S2)->Linear(J): weight as (S2, C2, J), leading-axis indexed per s
    eout_w = jnp.transpose(p["enc_out_w"].reshape(J, C2, S2), (2, 1, 0)).astype(jnp.float32)
    # Linear(J, C2*S2)->view(C2, S2): weight as (J, C2, S2), leading-axis indexed per j
    din_w = jnp.transpose(p["dec_in_w"].reshape(C2, S2, J), (2, 0, 1)).astype(jnp.float32)
    return w2d, offs, eout_w, din_w


# --------------------------------------------------------------------------
# Pallas kernel (channels-first, batch sublane-stacked: activations are (BT*C, L))
# --------------------------------------------------------------------------
def _elu(v):
    return jnp.where(v > 0, v, jnp.exp(v) - 1.0)


def _make_kernel(offs, bt):
    def kernel(x_ref, w_ref, eout_ref, din_ref, out_ref):
        def W(name):
            r0, rr, cc = offs[name]
            return w_ref[r0:r0 + rr, 0:cc]     # static, 8-aligned sublane slice of the slab

        def conv(h, cin, wname, bname, not_first, not_last):
            # h: (bt*cin, L); Conv1d(k=3, pad=1) fused into ONE matmul per sample.
            w = W(wname)
            bias = W(bname)
            L = h.shape[1]
            prev = jnp.where(not_first, pltpu.roll(h, shift=1, axis=1), 0.0)     # h[:, l-1]
            nxt = jnp.where(not_last, pltpu.roll(h, shift=L - 1, axis=1), 0.0)   # h[:, l+1]
            outs = []
            for t in range(bt):                               # batch is on sublanes -> no leak
                sl = slice(t * cin, (t + 1) * cin)
                z = jnp.concatenate([prev[sl], h[sl], nxt[sl]], axis=0)          # (3*cin, L)
                outs.append(jnp.dot(w, z, preferred_element_type=jnp.float32) + bias)
            return jnp.concatenate(outs, axis=0) if bt > 1 else outs[0]          # (bt*cout, L)

        def linear(h, wname, bname):
            # spatial Linear: one wide matmul over the whole batch tile (M = bt*C)
            return jnp.dot(h, W(wname), preferred_element_type=jnp.float32) + W(bname)

        # conv boundary masks, hoisted once per spatial length
        col0 = lax.broadcasted_iota(jnp.int32, (1, S0), 1)
        col1 = lax.broadcasted_iota(jnp.int32, (1, S1), 1)
        nf0, nl0 = col0 != 0, col0 != (S0 - 1)
        nf1, nl1 = col1 != 0, col1 != (S1 - 1)

        x = x_ref[...].reshape(bt * CPAD, S0)                 # leading-dim collapse (free)

        # ---------------- encoder ----------------
        h = conv(x, CPAD, "ec1_w", "ec1_b", nf0, nl0)         # (bt*C1, S0)
        h = _elu(linear(h, "el1_w", "el1_b"))                 # (bt*C1, S1)
        h = conv(h, C1, "ec2_w", "ec2_b", nf1, nl1)           # (bt*C2, S1)
        h = _elu(linear(h, "el2_w", "el2_b"))                 # (bt*C2, S2)

        # flatten(C2*S2) -> Linear(., J): 2-way-ILP FMA over s, leading-axis weight index.
        h3 = h.reshape(bt, C2, S2)                            # leading split (C2 % 8 == 0)
        accs = [None, None]
        for s in range(S2):
            term = h3[:, :, s:s + 1] * eout_ref[s][None]      # (bt,C2,1)*(1,C2,J)
            k = s & 1
            accs[k] = term if accs[k] is None else accs[k] + term
        tot = accs[0] if accs[1] is None else accs[0] + accs[1]
        lat = tot.sum(axis=1) + W("eout_b")                   # (bt, J)

        # ---------------- decoder ----------------
        # Linear(J, C2*S2) -> view(C2, S2): per-sample 2-way-ILP FMA over the latent dim.
        din_b = W("din_b")                                    # (C2, S2)
        d_parts = []
        for b in range(bt):
            lat_b = lat[b:b + 1, :]                           # (1, J)
            accs = [None, None]
            for j in range(J):
                term = lat_b[:, j:j + 1] * din_ref[j]         # (1,1)*(C2,S2)
                k = j & 1
                accs[k] = term if accs[k] is None else accs[k] + term
            tot = accs[0] if accs[1] is None else accs[0] + accs[1]
            d_parts.append(tot + din_b)                       # (C2, S2)
        d = jnp.concatenate(d_parts, axis=0) if bt > 1 else d_parts[0]   # (bt*C2, S2)

        d = linear(d, "dl1_w", "dl1_b")                       # (bt*C2, S1)
        d = _elu(conv(d, C2, "dc1_w", "dc1_b", nf1, nl1))     # (bt*C1, S1)
        d = linear(d, "dl2_w", "dl2_b")                       # (bt*C1, S0)
        d = _elu(conv(d, C1, "dc2_w", "dc2_b", nf0, nl0))     # (bt*C1, S0)
        d = conv(d, C1, "dlast_w", "dlast_b", nf0, nl0)       # (bt*COUT_PAD, S0), rows 3.. are 0

        out_ref[...] = d.reshape(bt, COUT_PAD, S0).astype(out_ref.dtype)

    return kernel


# --------------------------------------------------------------------------
# wrapper: weights prepared once, forward jitted
# --------------------------------------------------------------------------
def build_forward(params, batch_tile=None):
    w2d, offs, eout_w, din_w = prepare_weights(params)        # hoisted out of the call path

    def forward(x):
        squeeze = (x.ndim == 2)                               # mirror the module's unsqueeze
        if squeeze:
            x = x[None]
        B = x.shape[0]
        bt = batch_tile if batch_tile is not None else min(B, 8)
        Bp = -(-B // bt) * bt                                 # pad batch to a multiple of bt

        # channels-first; pad coord channels 3 -> CPAD so sublane slices/concats are 8-aligned
        xt = jnp.transpose(x.astype(jnp.float32), (0, 2, 1))            # (B, 3, S0)
        xt = jnp.pad(xt, ((0, Bp - B), (0, CPAD - 3), (0, 0)))          # (Bp, CPAD, S0)

        grid = (Bp // bt,)
        out = pl.pallas_call(
            _make_kernel(offs, bt),
            out_shape=jax.ShapeDtypeStruct((Bp, COUT_PAD, S0), jnp.float32),
            grid=grid,
            in_specs=[
                pl.BlockSpec((bt, CPAD, S0), lambda g: (g, 0, 0)),
                pl.BlockSpec(w2d.shape, lambda g: (0, 0)),          # packed 2-D weight slab
                pl.BlockSpec(eout_w.shape, lambda g: (0, 0, 0)),    # (S2, C2, J)
                pl.BlockSpec(din_w.shape, lambda g: (0, 0, 0)),     # (J, C2, S2)
            ],
            out_specs=pl.BlockSpec((bt, COUT_PAD, S0), lambda g: (g, 0, 0)),
            compiler_params=pltpu.CompilerParams(
                dimension_semantics=(("arbitrary",) if grid[0] == 1 else ("parallel",))),
        )(xt, w2d, eout_w, din_w)

        out = jnp.transpose(out[:B, :3, :], (0, 2, 1))                  # (B, S0, 3)
        return out[0] if squeeze else out

    return jax.jit(forward)


# --------------------------------------------------------------------------
# plain-JAX reference (mirrors the PyTorch module exactly, NCL conv layout)
# --------------------------------------------------------------------------
def _conv1d_nch(x, w, b):
    y = lax.conv_general_dilated(
        x, w, (1,), [(1, 1)],
        dimension_numbers=("NCH", "OIH", "NCH"),
        precision=lax.Precision.HIGHEST)
    return y + b[None, :, None]


def reference_forward(x, p):
    squeeze = (x.ndim == 2)
    if squeeze:
        x = x[None]
    mm = lambda a, b: jnp.matmul(a, b, precision=lax.Precision.HIGHEST)

    h = jnp.transpose(x, (0, 2, 1))                                   # (B, 3, S0)
    h = _conv1d_nch(h, p["enc_conv1_w"], p["enc_conv1_b"])
    h = mm(h, p["enc_lin1_w"].T) + p["enc_lin1_b"]
    h = jax.nn.elu(h)
    h = _conv1d_nch(h, p["enc_conv2_w"], p["enc_conv2_b"])
    h = mm(h, p["enc_lin2_w"].T) + p["enc_lin2_b"]
    h = jax.nn.elu(h)
    lat = mm(h.reshape(h.shape[0], -1), p["enc_out_w"].T) + p["enc_out_b"]

    d = mm(lat, p["dec_in_w"].T) + p["dec_in_b"]
    d = d.reshape(d.shape[0], -1, S2)                                 # (B, C2, S2)
    d = mm(d, p["dec_lin1_w"].T) + p["dec_lin1_b"]
    d = _conv1d_nch(d, p["dec_conv1_w"], p["dec_conv1_b"])
    d = jax.nn.elu(d)
    d = mm(d, p["dec_lin2_w"].T) + p["dec_lin2_b"]
    d = _conv1d_nch(d, p["dec_conv2_w"], p["dec_conv2_b"])
    d = jax.nn.elu(d)
    d = _conv1d_nch(d, p["last_conv_w"], p["last_conv_b"])
    d = jnp.transpose(d, (0, 2, 1))                                   # (B, S0, 3)
    return d[0] if squeeze else d


if __name__ == "__main__":
    key = jax.random.PRNGKey(0)
    pkey, xkey = jax.random.split(key)
    params = init_params(pkey)
    x = jax.random.normal(xkey, (BATCH, S0, 3), jnp.float32)

    fwd = build_forward(params)
    out = jax.block_until_ready(fwd(x))

    ref = reference_forward(x, params)
    assert out.shape == (BATCH, S0, 3), out.shape
    if not bool(jnp.allclose(out, ref, atol=2e-3, rtol=2e-3)):
        err = float(jnp.max(jnp.abs(out - ref)))
        raise AssertionError(f"Pallas output mismatch vs reference, max abs err={err}")
    print("KERNEL_OK")
</pallas_src>

<mosaic_0001>
module attributes {stable_mosaic.version = 11 : i64} {
  func.func @kernel(%arg0: i32, %arg1: memref<2x8x128xf32, #tpu.memory_space<vmem>>, %arg2: memref<648x192xf32, #tpu.memory_space<vmem>>, %arg3: memref<16x64x32xf32, #tpu.memory_space<vmem>>, %arg4: memref<32x64x16xf32, #tpu.memory_space<vmem>>, %arg5: memref<2x8x128xf32, #tpu.memory_space<vmem>>) attributes {dimension_semantics = [#tpu.dimension_semantics<arbitrary>], iteration_bounds = array<i64: 1>, scalar_prefetch = 0 : i64, scratch_operands = 0 : i64, tpu.core_type = #tpu.core_type<tc>, window_params = [{transform_indices = @transform_0, window_bounds = array<i64: 2, 8, 128>}, {pipeline_mode = #tpu.pipeline_mode<synchronous>, transform_indices = @transform_1, window_bounds = array<i64: 648, 192>}, {pipeline_mode = #tpu.pipeline_mode<synchronous>, transform_indices = @transform_2, window_bounds = array<i64: 16, 64, 32>}, {pipeline_mode = #tpu.pipeline_mode<synchronous>, transform_indices = @transform_3, window_bounds = array<i64: 32, 64, 16>}, {transform_indices = @transform_4, window_bounds = array<i64: 2, 8, 128>}]} {
    %0 = tpu.iota {dimensions = array<i32: 1>} : vector<1x128xi32>
    %1 = tpu.iota {dimensions = array<i32: 1>} : vector<1x32xi32>
    %c0_i32 = arith.constant 0 : i32
    %2 = vector.broadcast %c0_i32 : i32 to vector<1x128xi32>
    %3 = arith.cmpi ne, %0, %2 : vector<1x128xi32>
    %c127_i32 = arith.constant 127 : i32
    %4 = vector.broadcast %c127_i32 : i32 to vector<1x128xi32>
    %5 = arith.cmpi ne, %0, %4 : vector<1x128xi32>
    %c0_i32_0 = arith.constant 0 : i32
    %6 = vector.broadcast %c0_i32_0 : i32 to vector<1x32xi32>
    %7 = arith.cmpi ne, %1, %6 : vector<1x32xi32>
    %c31_i32 = arith.constant 31 : i32
    %8 = vector.broadcast %c31_i32 : i32 to vector<1x32xi32>
    %9 = arith.cmpi ne, %1, %8 : vector<1x32xi32>
    %c0 = arith.constant 0 : index
    %c0_1 = arith.constant 0 : index
    %c0_2 = arith.constant 0 : index
    %10 = vector.load %arg1[%c0, %c0_1, %c0_2] : memref<2x8x128xf32, #tpu.memory_space<vmem>>, vector<2x8x128xf32>
    %11 = vector.shape_cast %10 : vector<2x8x128xf32> to vector<16x128xf32>
    %c0_3 = arith.constant 0 : index
    %c0_4 = arith.constant 0 : index
    %12 = vector.load %arg2[%c0_3, %c0_4] : memref<648x192xf32, #tpu.memory_space<vmem>>, vector<32x24xf32>
    %c32 = arith.constant 32 : index
    %c0_5 = arith.constant 0 : index
    %13 = vector.load %arg2[%c32, %c0_5] : memref<648x192xf32, #tpu.memory_space<vmem>>, vector<32x1xf32>
    %c1_i32 = arith.constant 1 : i32
    %14 = tpu.dynamic_rotate %11 by %c1_i32 dim 1 : vector<16x128xf32>, i32 -> vector<16x128xf32>
    %cst = arith.constant 0.000000e+00 : f32
    %15 = vector.shape_cast %3 : vector<1x128xi1> to vector<1x128xi1>
    %16 = vector.broadcast %15 : vector<1x128xi1> to vector<16x128xi1>
    %17 = vector.broadcast %cst : f32 to vector<16x128xf32>
    %18 = arith.select %16, %14, %17 : vector<16x128xi1>, vector<16x128xf32>
    %c127_i32_6 = arith.constant 127 : i32
    %19 = tpu.dynamic_rotate %11 by %c127_i32_6 dim 1 : vector<16x128xf32>, i32 -> vector<16x128xf32>
    %cst_7 = arith.constant 0.000000e+00 : f32
    %20 = vector.shape_cast %5 : vector<1x128xi1> to vector<1x128xi1>
    %21 = vector.broadcast %20 : vector<1x128xi1> to vector<16x128xi1>
    %22 = vector.broadcast %cst_7 : f32 to vector<16x128xf32>
    %23 = arith.select %21, %19, %22 : vector<16x128xi1>, vector<16x128xf32>
    %24 = vector.extract_strided_slice %18 {offsets = [0, 0], sizes = [8, 128], strides = [1, 1]} : vector<16x128xf32> to vector<8x128xf32>
    %25 = vector.extract_strided_slice %11 {offsets = [0, 0], sizes = [8, 128], strides = [1, 1]} : vector<16x128xf32> to vector<8x128xf32>
    %26 = vector.extract_strided_slice %23 {offsets = [0, 0], sizes = [8, 128], strides = [1, 1]} : vector<16x128xf32> to vector<8x128xf32>
    %27 = tpu.concatenate %24, %25, %26 in 0 : vector<8x128xf32>, vector<8x128xf32>, vector<8x128xf32> -> vector<24x128xf32>
    %cst_8 = arith.constant dense<0.000000e+00> : vector<32x128xf32>
    %28 = tpu.matmul %12, %27, %cst_8 {dimension_numbers = #tpu.dot_dimension_numbers<[1], [0], [0], [1], [0, 0, 1, 1], [], []>} : vector<32x24xf32>, vector<24x128xf32>, vector<32x128xf32> -> vector<32x128xf32>
    %29 = vector.broadcast %13 : vector<32x1xf32> to vector<32x128xf32>
    %30 = arith.addf %28, %29 : vector<32x128xf32>
    %31 = vector.extract_strided_slice %18 {offsets = [8, 0], sizes = [8, 128], strides = [1, 1]} : vector<16x128xf32> to vector<8x128xf32>
    %32 = vector.extract_strided_slice %11 {offsets = [8, 0], sizes = [8, 128], strides = [1, 1]} : vector<16x128xf32> to vector<8x128xf32>
    %33 = vector.extract_strided_slice %23 {offsets = [8, 0], sizes = [8, 128], strides = [1, 1]} : vector<16x128xf32> to vector<8x128xf32>
    %34 = tpu.concatenate %31, %32, %33 in 0 : vector<8x128xf32>, vector<8x128xf32>, vector<8x128xf32> -> vector<24x128xf32>
    %cst_9 = arith.constant dense<0.000000e+00> : vector<32x128xf32>
    %35 = tpu.matmul %12, %34, %cst_9 {dimension_numbers = #tpu.dot_dimension_numbers<[1], [0], [0], [1], [0, 0, 1, 1], [], []>} : vector<32x24xf32>, vector<24x128xf32>, vector<32x128xf32> -> vector<32x128xf32>
    %36 = vector.broadcast %13 : vector<32x1xf32> to vector<32x128xf32>
    %37 = arith.addf %35, %36 : vector<32x128xf32>
    %38 = tpu.concatenate %30, %37 in 0 : vector<32x128xf32>, vector<32x128xf32> -> vector<64x128xf32>
    %c64 = arith.constant 64 : index
    %c0_10 = arith.constant 0 : index
    %39 = vector.load %arg2[%c64, %c0_10] : memref<648x192xf32, #tpu.memory_space<vmem>>, vector<128x32xf32>
    %cst_11 = arith.constant dense<0.000000e+00> : vector<64x32xf32>
    %40 = tpu.matmul %38, %39, %cst_11 {dimension_numbers = #tpu.dot_dimension_numbers<[1], [0], [0], [1], [0, 0, 1, 1], [], []>} : vector<64x128xf32>, vector<128x32xf32>, vector<64x32xf32> -> vector<64x32xf32>
    %c192 = arith.constant 192 : index
    %c0_12 = arith.constant 0 : index
    %41 = vector.load %arg2[%c192, %c0_12] : memref<648x192xf32, #tpu.memory_space<vmem>>, vector<1x32xf32>
    %42 = vector.broadcast %41 : vector<1x32xf32> to vector<64x32xf32>
    %43 = arith.addf %40, %42 : vector<64x32xf32>
    %cst_13 = arith.constant 0.000000e+00 : f32
    %44 = vector.broadcast %cst_13 : f32 to vector<64x32xf32>
    %45 = arith.cmpf ogt, %43, %44 : vector<64x32xf32>
    %46 = math.exp %43 : vector<64x32xf32>
    %cst_14 = arith.constant 1.000000e+00 : f32
    %47 = vector.broadcast %cst_14 : f32 to vector<64x32xf32>
    %48 = arith.subf %46, %47 : vector<64x32xf32>
    %49 = arith.select %45, %43, %48 : vector<64x32xi1>, vector<64x32xf32>
    %c200 = arith.constant 200 : index
    %c0_15 = arith.constant 0 : index
    %50 = vector.load %arg2[%c200, %c0_15] : memref<648x192xf32, #tpu.memory_space<vmem>>, vector<64x96xf32>
    %c264 = arith.constant 264 : index
    %c0_16 = arith.constant 0 : index
    %51 = vector.load %arg2[%c264, %c0_16] : memref<648x192xf32, #tpu.memory_space<vmem>>, vector<64x1xf32>
    %c1_i32_17 = arith.constant 1 : i32
    %52 = tpu.dynamic_rotate %49 by %c1_i32_17 dim 1 : vector<64x32xf32>, i32 -> vector<64x32xf32>
    %cst_18 = arith.constant 0.000000e+00 : f32
    %53 = vector.shape_cast %7 : vector<1x32xi1> to vector<1x32xi1>
    %54 = vector.broadcast %53 : vector<1x32xi1> to vector<64x32xi1>
    %55 = vector.broadcast %cst_18 : f32 to vector<64x32xf32>
    %56 = arith.select %54, %52, %55 : vector<64x32xi1>, vector<64x32xf32>
    %c31_i32_19 = arith.constant 31 : i32
    %57 = tpu.dynamic_rotate %49 by %c31_i32_19 dim 1 : vector<64x32xf32>, i32 -> vector<64x32xf32>
    %cst_20 = arith.constant 0.000000e+00 : f32
    %58 = vector.shape_cast %9 : vector<1x32xi1> to vector<1x32xi1>
    %59 = vector.broadcast %58 : vector<1x32xi1> to vector<64x32xi1>
    %60 = vector.broadcast %cst_20 : f32 to vector<64x32xf32>
    %61 = arith.select %59, %57, %60 : vector<64x32xi1>, vector<64x32xf32>
    %62 = vector.extract_strided_slice %56 {offsets = [0, 0], sizes = [32, 32], strides = [1, 1]} : vector<64x32xf32> to vector<32x32xf32>
    %63 = vector.extract_strided_slice %49 {offsets = [0, 0], sizes = [32, 32], strides = [1, 1]} : vector<64x32xf32> to vector<32x32xf32>
    %64 = vector.extract_strided_slice %61 {offsets = [0, 0], sizes = [32, 32], strides = [1, 1]} : vector<64x32xf32> to vector<32x32xf32>
    %65 = tpu.concatenate %62, %63, %64 in 0 : vector<32x32xf32>, vector<32x32xf32>, vector<32x32xf32> -> vector<96x32xf32>
    %cst_21 = arith.constant dense<0.000000e+00> : vector<64x32xf32>
    %66 = tpu.matmul %50, %65, %cst_21 {dimension_numbers = #tpu.dot_dimension_numbers<[1], [0], [0], [1], [0, 0, 1, 1], [], []>} : vector<64x96xf32>, vector<96x32xf32>, vector<64x32xf32> -> vector<64x32xf32>
    %67 = vector.broadcast %51 : vector<64x1xf32> to vector<64x32xf32>
    %68 = arith.addf %66, %67 : vector<64x32xf32>
    %69 = vector.extract_strided_slice %56 {offsets = [32, 0], sizes = [32, 32], strides = [1, 1]} : vector<64x32xf32> to vector<32x32xf32>
    %70 = vector.extract_strided_slice %49 {offsets = [32, 0], sizes = [32, 32], strides = [1, 1]} : vector<64x32xf32> to vector<32x32xf32>
    %71 = vector.extract_strided_slice %61 {offsets = [32, 0], sizes = [32, 32], strides = [1, 1]} : vector<64x32xf32> to vector<32x32xf32>
    %72 = tpu.concatenate %69, %70, %71 in 0 : vector<32x32xf32>, vector<32x32xf32>, vector<32x32xf32> -> vector<96x32xf32>
    %cst_22 = arith.constant dense<0.000000e+00> : vector<64x32xf32>
    %73 = tpu.matmul %50, %72, %cst_22 {dimension_numbers = #tpu.dot_dimension_numbers<[1], [0], [0], [1], [0, 0, 1, 1], [], []>} : vector<64x96xf32>, vector<96x32xf32>, vector<64x32xf32> -> vector<64x32xf32>
    %74 = vector.broadcast %51 : vector<64x1xf32> to vector<64x32xf32>
    %75 = arith.addf %73, %74 : vector<64x32xf32>
    %76 = tpu.concatenate %68, %75 in 0 : vector<64x32xf32>, vector<64x32xf32> -> vector<128x32xf32>
    %c328 = arith.constant 328 : index
    %c0_23 = arith.constant 0 : index
    %77 = vector.load %arg2[%c328, %c0_23] : memref<648x192xf32, #tpu.memory_space<vmem>>, vector<32x16xf32>
    %cst_24 = arith.constant dense<0.000000e+00> : vector<128x16xf32>
    %78 = tpu.matmul %76, %77, %cst_24 {dimension_numbers = #tpu.dot_dimension_numbers<[1], [0], [0], [1], [0, 0, 1, 1], [], []>} : vector<128x32xf32>, vector<32x16xf32>, vector<128x16xf32> -> vector<128x16xf32>
    %c360 = arith.constant 360 : index
    %c0_25 = arith.constant 0 : index
    %79 = vector.load %arg2[%c360, %c0_25] : memref<648x192xf32, #tpu.memory_space<vmem>>, vector<1x16xf32>
    %80 = vector.broadcast %79 : vector<1x16xf32> to vector<128x16xf32>
    %81 = arith.addf %78, %80 : vector<128x16xf32>
    %cst_26 = arith.constant 0.000000e+00 : f32
    %82 = vector.broadcast %cst_26 : f32 to vector<128x16xf32>
    %83 = arith.cmpf ogt, %81, %82 : vector<128x16xf32>
    %84 = math.exp %81 : vector<128x16xf32>
    %cst_27 = arith.constant 1.000000e+00 : f32
    %85 = vector.broadcast %cst_27 : f32 to vector<128x16xf32>
    %86 = arith.subf %84, %85 : vector<128x16xf32>
    %87 = arith.select %83, %81, %86 : vector<128x16xi1>, vector<128x16xf32>
    %88 = vector.shape_cast %87 : vector<128x16xf32> to vector<2x64x16xf32>
    %89 = vector.extract_strided_slice %88 {offsets = [0, 0, 0], sizes = [2, 64, 1], strides = [1, 1, 1]} : vector<2x64x16xf32> to vector<2x64x1xf32>
    %c0_28 = arith.constant 0 : index
    %c0_29 = arith.constant 0 : index
    %c0_30 = arith.constant 0 : index
    %90 = vector.load %arg3[%c0_28, %c0_29, %c0_30] : memref<16x64x32xf32, #tpu.memory_space<vmem>>, vector<1x64x32xf32>
    %91 = vector.shape_cast %90 : vector<1x64x32xf32> to vector<64x32xf32>
    %92 = vector.shape_cast %91 : vector<64x32xf32> to vector<1x64x32xf32>
    %93 = vector.broadcast %89 : vector<2x64x1xf32> to vector<2x64x32xf32>
    %94 = vector.broadcast %92 : vector<1x64x32xf32> to vector<2x64x32xf32>
    %95 = arith.mulf %93, %94 : vector<2x64x32xf32>
    %96 = vector.extract_strided_slice %88 {offsets = [0, 0, 1], sizes = [2, 64, 1], strides = [1, 1, 1]} : vector<2x64x16xf32> to vector<2x64x1xf32>
    %c1 = arith.constant 1 : index
    %c0_31 = arith.constant 0 : index
    %c0_32 = arith.constant 0 : index
    %97 = vector.load %arg3[%c1, %c0_31, %c0_32] : memref<16x64x32xf32, #tpu.memory_space<vmem>>, vector<1x64x32xf32>
    %98 = vector.shape_cast %97 : vector<1x64x32xf32> to vector<64x32xf32>
    %99 = vector.shape_cast %98 : vector<64x32xf32> to vector<1x64x32xf32>
    %100 = vector.broadcast %96 : vector<2x64x1xf32> to vector<2x64x32xf32>
    %101 = vector.broadcast %99 : vector<1x64x32xf32> to vector<2x64x32xf32>
    %102 = arith.mulf %100, %101 : vector<2x64x32xf32>
    %103 = vector.extract_strided_slice %88 {offsets = [0, 0, 2], sizes = [2, 64, 1], strides = [1, 1, 1]} : vector<2x64x16xf32> to vector<2x64x1xf32>
    %c2 = arith.constant 2 : index
    %c0_33 = arith.constant 0 : index
    %c0_34 = arith.constant 0 : index
    %104 = vector.load %arg3[%c2, %c0_33, %c0_34] : memref<16x64x32xf32, #tpu.memory_space<vmem>>, vector<1x64x32xf32>
    %105 = vector.shape_cast %104 : vector<1x64x32xf32> to vector<64x32xf32>
    %106 = vector.shape_cast %105 : vector<64x32xf32> to vector<1x64x32xf32>
    %107 = vector.broadcast %103 : vector<2x64x1xf32> to vector<2x64x32xf32>
    %108 = vector.broadcast %106 : vector<1x64x32xf32> to vector<2x64x32xf32>
    %109 = arith.mulf %107, %108 : vector<2x64x32xf32>
    %110 = arith.addf %95, %109 : vector<2x64x32xf32>
    %111 = vector.extract_strided_slice %88 {offsets = [0, 0, 3], sizes = [2, 64, 1], strides = [1, 1, 1]} : vector<2x64x16xf32> to vector<2x64x1xf32>
    %c3 = arith.constant 3 : index
    %c0_35 = arith.constant 0 : index
    %c0_36 = arith.constant 0 : index
    %112 = vector.load %arg3[%c3, %c0_35, %c0_36] : memref<16x64x32xf32, #tpu.memory_space<vmem>>, vector<1x64x32xf32>
    %113 = vector.shape_cast %112 : vector<1x64x32xf32> to vector<64x32xf32>
    %114 = vector.shape_cast %113 : vector<64x32xf32> to vector<1x64x32xf32>
    %115 = vector.broadcast %111 : vector<2x64x1xf32> to vector<2x64x32xf32>
    %116 = vector.broadcast %114 : vector<1x64x32xf32> to vector<2x64x32xf32>
    %117 = arith.mulf %115, %116 : vector<2x64x32xf32>
    %118 = arith.addf %102, %117 : vector<2x64x32xf32>
    %119 = vector.extract_strided_slice %88 {offsets = [0, 0, 4], sizes = [2, 64, 1], strides = [1, 1, 1]} : vector<2x64x16xf32> to vector<2x64x1xf32>
    %c4 = arith.constant 4 : index
    %c0_37 = arith.constant 0 : index
    %c0_38 = arith.constant 0 : index
    %120 = vector.load %arg3[%c4, %c0_37, %c0_38] : memref<16x64x32xf32, #tpu.memory_space<vmem>>, vector<1x64x32xf32>
    %121 = vector.shape_cast %120 : vector<1x64x32xf32> to vector<64x32xf32>
    %122 = vector.shape_cast %121 : vector<64x32xf32> to vector<1x64x32xf32>
    %123 = vector.broadcast %119 : vector<2x64x1xf32> to vector<2x64x32xf32>
    %124 = vector.broadcast %122 : vector<1x64x32xf32> to vector<2x64x32xf32>
    %125 = arith.mulf %123, %124 : vector<2x64x32xf32>
    %126 = arith.addf %110, %125 : vector<2x64x32xf32>
    %127 = vector.extract_strided_slice %88 {offsets = [0, 0, 5], sizes = [2, 64, 1], strides = [1, 1, 1]} : vector<2x64x16xf32> to vector<2x64x1xf32>
    %c5 = arith.constant 5 : index
    %c0_39 = arith.constant 0 : index
    %c0_40 = arith.constant 0 : index
    %128 = vector.load %arg3[%c5, %c0_39, %c0_40] : memref<16x64x32xf32, #tpu.memory_space<vmem>>, vector<1x64x32xf32>
    %129 = vector.shape_cast %128 : vector<1x64x32xf32> to vector<64x32xf32>
    %130 = vector.shape_cast %129 : vector<64x32xf32> to vector<1x64x32xf32>
    %131 = vector.broadcast %127 : vector<2x64x1xf32> to vector<2x64x32xf32>
    %132 = vector.broadcast %130 : vector<1x64x32xf32> to vector<2x64x32xf32>
    %133 = arith.mulf %131, %132 : vector<2x64x32xf32>
    %134 = arith.addf %118, %133 : vector<2x64x32xf32>
    %135 = vector.extract_strided_slice %88 {offsets = [0, 0, 6], sizes = [2, 64, 1], strides = [1, 1, 1]} : vector<2x64x16xf32> to vector<2x64x1xf32>
    %c6 = arith.constant 6 : index
    %c0_41 = arith.constant 0 : index
    %c0_42 = arith.constant 0 : index
    %136 = vector.load %arg3[%c6, %c0_41, %c0_42] : memref<16x64x32xf32, #tpu.memory_space<vmem>>, vector<1x64x32xf32>
    %137 = vector.shape_cast %136 : vector<1x64x32xf32> to vector<64x32xf32>
    %138 = vector.shape_cast %137 : vector<64x32xf32> to vector<1x64x32xf32>
    %139 = vector.broadcast %135 : vector<2x64x1xf32> to vector<2x64x32xf32>
    %140 = vector.broadcast %138 : vector<1x64x32xf32> to vector<2x64x32xf32>
    %141 = arith.mulf %139, %140 : vector<2x64x32xf32>
    %142 = arith.addf %126, %141 : vector<2x64x32xf32>
    %143 = vector.extract_strided_slice %88 {offsets = [0, 0, 7], sizes = [2, 64, 1], strides = [1, 1, 1]} : vector<2x64x16xf32> to vector<2x64x1xf32>
    %c7 = arith.constant 7 : index
    %c0_43 = arith.constant 0 : index
    %c0_44 = arith.constant 0 : index
    %144 = vector.load %arg3[%c7, %c0_43, %c0_44] : memref<16x64x32xf32, #tpu.memory_space<vmem>>, vector<1x64x32xf32>
    %145 = vector.shape_cast %144 : vector<1x64x32xf32> to vector<64x32xf32>
    %146 = vector.shape_cast %145 : vector<64x32xf32> to vector<1x64x32xf32>
    %147 = vector.broadcast %143 : vector<2x64x1xf32> to vector<2x64x32xf32>
    %148 = vector.broadcast %146 : vector<1x64x32xf32> to vector<2x64x32xf32>
    %149 = arith.mulf %147, %148 : vector<2x64x32xf32>
    %150 = arith.addf %134, %149 : vector<2x64x32xf32>
    %151 = vector.extract_strided_slice %88 {offsets = [0, 0, 8], sizes = [2, 64, 1], strides = [1, 1, 1]} : vector<2x64x16xf32> to vector<2x64x1xf32>
    %c8 = arith.constant 8 : index
    %c0_45 = arith.constant 0 : index
    %c0_46 = arith.constant 0 : index
    %152 = vector.load %arg3[%c8, %c0_45, %c0_46] : memref<16x64x32xf32, #tpu.memory_space<vmem>>, vector<1x64x32xf32>
    %153 = vector.shape_cast %152 : vector<1x64x32xf32> to vector<64x32xf32>
    %154 = vector.shape_cast %153 : vector<64x32xf32> to vector<1x64x32xf32>
    %155 = vector.broadcast %151 : vector<2x64x1xf32> to vector<2x64x32xf32>
    %156 = vector.broadcast %154 : vector<1x64x32xf32> to vector<2x64x32xf32>
    %157 = arith.mulf %155, %156 : vector<2x64x32xf32>
    %158 = arith.addf %142, %157 : vector<2x64x32xf32>
    %159 = vector.extract_strided_slice %88 {offsets = [0, 0, 9], sizes = [2, 64, 1], strides = [1, 1, 1]} : vector<2x64x16xf32> to vector<2x64x1xf32>
    %c9 = arith.constant 9 : index
    %c0_47 = arith.constant 0 : index
    %c0_48 = arith.constant 0 : index
    %160 = vector.load %arg3[%c9, %c0_47, %c0_48] : memref<16x64x32xf32, #tpu.memory_space<vmem>>, vector<1x64x32xf32>
    %161 = vector.shape_cast %160 : vector<1x64x32xf32> to vector<64x32xf32>
    %162 = vector.shape_cast %161 : vector<64x32xf32> to vector<1x64x32xf32>
    %163 = vector.broadcast %159 : vector<2x64x1xf32> to vector<2x64x32xf32>
    %164 = vector.broadcast %162 : vector<1x64x32xf32> to vector<2x64x32xf32>
    %165 = arith.mulf %163, %164 : vector<2x64x32xf32>
    %166 = arith.addf %150, %165 : vector<2x64x32xf32>
    %167 = vector.extract_strided_slice %88 {offsets = [0, 0, 10], sizes = [2, 64, 1], strides = [1, 1, 1]} : vector<2x64x16xf32> to vector<2x64x1xf32>
    %c10 = arith.constant 10 : index
    %c0_49 = arith.constant 0 : index
    %c0_50 = arith.constant 0 : index
    %168 = vector.load %arg3[%c10, %c0_49, %c0_50] : memref<16x64x32xf32, #tpu.memory_space<vmem>>, vector<1x64x32xf32>
    %169 = vector.shape_cast %168 : vector<1x64x32xf32> to vector<64x32xf32>
    %170 = vector.shape_cast %169 : vector<64x32xf32> to vector<1x64x32xf32>
    %171 = vector.broadcast %167 : vector<2x64x1xf32> to vector<2x64x32xf32>
    %172 = vector.broadcast %170 : vector<1x64x32xf32> to vector<2x64x32xf32>
    %173 = arith.mulf %171, %172 : vector<2x64x32xf32>
    %174 = arith.addf %158, %173 : vector<2x64x32xf32>
    %175 = vector.extract_strided_slice %88 {offsets = [0, 0, 11], sizes = [2, 64, 1], strides = [1, 1, 1]} : vector<2x64x16xf32> to vector<2x64x1xf32>
    %c11 = arith.constant 11 : index
    %c0_51 = arith.constant 0 : index
    %c0_52 = arith.constant 0 : index
    %176 = vector.load %arg3[%c11, %c0_51, %c0_52] : memref<16x64x32xf32, #tpu.memory_space<vmem>>, vector<1x64x32xf32>
    %177 = vector.shape_cast %176 : vector<1x64x32xf32> to vector<64x32xf32>
    %178 = vector.shape_cast %177 : vector<64x32xf32> to vector<1x64x32xf32>
    %179 = vector.broadcast %175 : vector<2x64x1xf32> to vector<2x64x32xf32>
    %180 = vector.broadcast %178 : vector<1x64x32xf32> to vector<2x64x32xf32>
    %181 = arith.mulf %179, %180 : vector<2x64x32xf32>
    %182 = arith.addf %166, %181 : vector<2x64x32xf32>
    %183 = vector.extract_strided_slice %88 {offsets = [0, 0, 12], sizes = [2, 64, 1], strides = [1, 1, 1]} : vector<2x64x16xf32> to vector<2x64x1xf32>
    %c12 = arith.constant 12 : index
    %c0_53 = arith.constant 0 : index
    %c0_54 = arith.constant 0 : index
    %184 = vector.load %arg3[%c12, %c0_53, %c0_54] : memref<16x64x32xf32, #tpu.memory_space<vmem>>, vector<1x64x32xf32>
    %185 = vector.shape_cast %184 : vector<1x64x32xf32> to vector<64x32xf32>
    %186 = vector.shape_cast %185 : vector<64x32xf32> to vector<1x64x32xf32>
    %187 = vector.broadcast %183 : vector<2x64x1xf32> to vector<2x64x32xf32>
    %188 = vector.broadcast %186 : vector<1x64x32xf32> to vector<2x64x32xf32>
    %189 = arith.mulf %187, %188 : vector<2x64x32xf32>
    %190 = arith.addf %174, %189 : vector<2x64x32xf32>
    %191 = vector.extract_strided_slice %88 {offsets = [0, 0, 13], sizes = [2, 64, 1], strides = [1, 1, 1]} : vector<2x64x16xf32> to vector<2x64x1xf32>
    %c13 = arith.constant 13 : index
    %c0_55 = arith.constant 0 : index
    %c0_56 = arith.constant 0 : index
    %192 = vector.load %arg3[%c13, %c0_55, %c0_56] : memref<16x64x32xf32, #tpu.memory_space<vmem>>, vector<1x64x32xf32>
    %193 = vector.shape_cast %192 : vector<1x64x32xf32> to vector<64x32xf32>
    %194 = vector.shape_cast %193 : vector<64x32xf32> to vector<1x64x32xf32>
    %195 = vector.broadcast %191 : vector<2x64x1xf32> to vector<2x64x32xf32>
    %196 = vector.broadcast %194 : vector<1x64x32xf32> to vector<2x64x32xf32>
    %197 = arith.mulf %195, %196 : vector<2x64x32xf32>
    %198 = arith.addf %182, %197 : vector<2x64x32xf32>
    %199 = vector.extract_strided_slice %88 {offsets = [0, 0, 14], sizes = [2, 64, 1], strides = [1, 1, 1]} : vector<2x64x16xf32> to vector<2x64x1xf32>
    %c14 = arith.constant 14 : index
    %c0_57 = arith.constant 0 : index
    %c0_58 = arith.constant 0 : index
    %200 = vector.load %arg3[%c14, %c0_57, %c0_58] : memref<16x64x32xf32, #tpu.memory_space<vmem>>, vector<1x64x32xf32>
    %201 = vector.shape_cast %200 : vector<1x64x32xf32> to vector<64x32xf32>
    %202 = vector.shape_cast %201 : vector<64x32xf32> to vector<1x64x32xf32>
    %203 = vector.broadcast %199 : vector<2x64x1xf32> to vector<2x64x32xf32>
    %204 = vector.broadcast %202 : vector<1x64x32xf32> to vector<2x64x32xf32>
    %205 = arith.mulf %203, %204 : vector<2x64x32xf32>
    %206 = arith.addf %190, %205 : vector<2x64x32xf32>
    %207 = vector.extract_strided_slice %88 {offsets = [0, 0, 15], sizes = [2, 64, 1], strides = [1, 1, 1]} : vector<2x64x16xf32> to vector<2x64x1xf32>
    %c15 = arith.constant 15 : index
    %c0_59 = arith.constant 0 : index
    %c0_60 = arith.constant 0 : index
    %208 = vector.load %arg3[%c15, %c0_59, %c0_60] : memref<16x64x32xf32, #tpu.memory_space<vmem>>, vector<1x64x32xf32>
    %209 = vector.shape_cast %208 : vector<1x64x32xf32> to vector<64x32xf32>
    %210 = vector.shape_cast %209 : vector<64x32xf32> to vector<1x64x32xf32>
    %211 = vector.broadcast %207 : vector<2x64x1xf32> to vector<2x64x32xf32>
    %212 = vector.broadcast %210 : vector<1x64x32xf32> to vector<2x64x32xf32>
    %213 = arith.mulf %211, %212 : vector<2x64x32xf32>
    %214 = arith.addf %198, %213 : vector<2x64x32xf32>
    %215 = arith.addf %206, %214 : vector<2x64x32xf32>
    %cst_61 = arith.constant dense<0.000000e+00> : vector<2x32xf32>
    %216 = vector.multi_reduction <add>, %215, %cst_61 [1] : vector<2x64x32xf32> to vector<2x32xf32>
    %c368 = arith.constant 368 : index
    %c0_62 = arith.constant 0 : index
    %217 = vector.load %arg2[%c368, %c0_62] : memref<648x192xf32, #tpu.memory_space<vmem>>, vector<1x32xf32>
    %218 = vector.broadcast %217 : vector<1x32xf32> to vector<2x32xf32>
    %219 = arith.addf %216, %218 : vector<2x32xf32>
    %c376 = arith.constant 376 : index
    %c0_63 = arith.constant 0 : index
    %220 = vector.load %arg2[%c376, %c0_63] : memref<648x192xf32, #tpu.memory_space<vmem>>, vector<64x16xf32>
    %221 = vector.extract_strided_slice %219 {offsets = [0, 0], sizes = [1, 32], strides = [1, 1]} : vector<2x32xf32> to vector<1x32xf32>
    %222 = vector.extract_strided_slice %221 {offsets = [0, 0], sizes = [1, 1], strides = [1, 1]} : vector<1x32xf32> to vector<1x1xf32>
    %c0_64 = arith.constant 0 : index
    %c0_65 = arith.constant 0 : index
    %c0_66 = arith.constant 0 : index
    %223 = vector.load %arg4[%c0_64, %c0_65, %c0_66] : memref<32x64x16xf32, #tpu.memory_space<vmem>>, vector<1x64x16xf32>
    %224 = vector.shape_cast %223 : vector<1x64x16xf32> to vector<64x16xf32>
    %225 = vector.broadcast %222 : vector<1x1xf32> to vector<64x16xf32>
    %226 = arith.mulf %225, %224 : vector<64x16xf32>
    %227 = vector.extract_strided_slice %221 {offsets = [0, 1], sizes = [1, 1], strides = [1, 1]} : vector<1x32xf32> to vector<1x1xf32>
    %c1_67 = arith.constant 1 : index
    %c0_68 = arith.constant 0 : index
    %c0_69 = arith.constant 0 : index
    %228 = vector.load %arg4[%c1_67, %c0_68, %c0_69] : memref<32x64x16xf32, #tpu.memory_space<vmem>>, vector<1x64x16xf32>
    %229 = vector.shape_cast %228 : vector<1x64x16xf32> to vector<64x16xf32>
    %230 = vector.broadcast %227 : vector<1x1xf32> to vector<64x16xf32>
    %231 = arith.mulf %230, %229 : vector<64x16xf32>
    %232 = vector.extract_strided_slice %221 {offsets = [0, 2], sizes = [1, 1], strides = [1, 1]} : vector<1x32xf32> to vector<1x1xf32>
    %c2_70 = arith.constant 2 : index
    %c0_71 = arith.constant 0 : index
    %c0_72 = arith.constant 0 : index
    %233 = vector.load %arg4[%c2_70, %c0_71, %c0_72] : memref<32x64x16xf32, #tpu.memory_space<vmem>>, vector<1x64x16xf32>
    %234 = vector.shape_cast %233 : vector<1x64x16xf32> to vector<64x16xf32>
    %235 = vector.broadcast %232 : vector<1x1xf32> to vector<64x16xf32>
    %236 = arith.mulf %235, %234 : vector<64x16xf32>
    %237 = arith.addf %226, %236 : vector<64x16xf32>
    %238 = vector.extract_strided_slice %221 {offsets = [0, 3], sizes = [1, 1], strides = [1, 1]} : vector<1x32xf32> to vector<1x1xf32>
    %c3_73 = arith.constant 3 : index
    %c0_74 = arith.constant 0 : index
    %c0_75 = arith.constant 0 : index
    %239 = vector.load %arg4[%c3_73, %c0_74, %c0_75] : memref<32x64x16xf32, #tpu.memory_space<vmem>>, vector<1x64x16xf32>
    %240 = vector.shape_cast %239 : vector<1x64x16xf32> to vector<64x16xf32>
    %241 = vector.broadcast %238 : vector<1x1xf32> to vector<64x16xf32>
    %242 = arith.mulf %241, %240 : vector<64x16xf32>
    %243 = arith.addf %231, %242 : vector<64x16xf32>
    %244 = vector.extract_strided_slice %221 {offsets = [0, 4], sizes = [1, 1], strides = [1, 1]} : vector<1x32xf32> to vector<1x1xf32>
    %c4_76 = arith.constant 4 : index
    %c0_77 = arith.constant 0 : index
    %c0_78 = arith.constant 0 : index
    %245 = vector.load %arg4[%c4_76, %c0_77, %c0_78] : memref<32x64x16xf32, #tpu.memory_space<vmem>>, vector<1x64x16xf32>
    %246 = vector.shape_cast %245 : vector<1x64x16xf32> to vector<64x16xf32>
    %247 = vector.broadcast %244 : vector<1x1xf32> to vector<64x16xf32>
    %248 = arith.mulf %247, %246 : vector<64x16xf32>
    %249 = arith.addf %237, %248 : vector<64x16xf32>
    %250 = vector.extract_strided_slice %221 {offsets = [0, 5], sizes = [1, 1], strides = [1, 1]} : vector<1x32xf32> to vector<1x1xf32>
    %c5_79 = arith.constant 5 : index
    %c0_80 = arith.constant 0 : index
    %c0_81 = arith.constant 0 : index
    %251 = vector.load %arg4[%c5_79, %c0_80, %c0_81] : memref<32x64x16xf32, #tpu.memory_space<vmem>>, vector<1x64x16xf32>
    %252 = vector.shape_cast %251 : vector<1x64x16xf32> to vector<64x16xf32>
    %253 = vector.broadcast %250 : vector<1x1xf32> to vector<64x16xf32>
    %254 = arith.mulf %253, %252 : vector<64x16xf32>
    %255 = arith.addf %243, %254 : vector<64x16xf32>
    %256 = vector.extract_strided_slice %221 {offsets = [0, 6], sizes = [1, 1], strides = [1, 1]} : vector<1x32xf32> to vector<1x1xf32>
    %c6_82 = arith.constant 6 : index
    %c0_83 = arith.constant 0 : index
    %c0_84 = arith.constant 0 : index
    %257 = vector.load %arg4[%c6_82, %c0_83, %c0_84] : memref<32x64x16xf32, #tpu.memory_space<vmem>>, vector<1x64x16xf32>
    %258 = vector.shape_cast %257 : vector<1x64x16xf32> to vector<64x16xf32>
    %259 = vector.broadcast %256 : vector<1x1xf32> to vector<64x16xf32>
    %260 = arith.mulf %259, %258 : vector<64x16xf32>
    %261 = arith.addf %249, %260 : vector<64x16xf32>
    %262 = vector.extract_strided_slice %221 {offsets = [0, 7], sizes = [1, 1], strides = [1, 1]} : vector<1x32xf32> to vector<1x1xf32>
    %c7_85 = arith.constant 7 : index
    %c0_86 = arith.constant 0 : index
    %c0_87 = arith.constant 0 : index
    %263 = vector.load %arg4[%c7_85, %c0_86, %c0_87] : memref<32x64x16xf32, #tpu.memory_space<vmem>>, vector<1x64x16xf32>
    %264 = vector.shape_cast %263 : vector<1x64x16xf32> to vector<64x16xf32>
    %265 = vector.broadcast %262 : vector<1x1xf32> to vector<64x16xf32>
    %266 = arith.mulf %265, %264 : vector<64x16xf32>
    %267 = arith.addf %255, %266 : vector<64x16xf32>
    %268 = vector.extract_strided_slice %221 {offsets = [0, 8], sizes = [1, 1], strides = [1, 1]} : vector<1x32xf32> to vector<1x1xf32>
    %c8_88 = arith.constant 8 : index
    %c0_89 = arith.constant 0 : index
    %c0_90 = arith.constant 0 : index
    %269 = vector.load %arg4[%c8_88, %c0_89, %c0_90] : memref<32x64x16xf32, #tpu.memory_space<vmem>>, vector<1x64x16xf32>
    %270 = vector.shape_cast %269 : vector<1x64x16xf32> to vector<64x16xf32>
    %271 = vector.broadcast %268 : vector<1x1xf32> to vector<64x16xf32>
    %272 = arith.mulf %271, %270 : vector<64x16xf32>
    %273 = arith.addf %261, %272 : vector<64x16xf32>
    %274 = vector.extract_strided_slice %221 {offsets = [0, 9], sizes = [1, 1], strides = [1, 1]} : vector<1x32xf32> to vector<1x1xf32>
    %c9_91 = arith.constant 9 : index
    %c0_92 = arith.constant 0 : index
    %c0_93 = arith.constant 0 : index
    %275 = vector.load %arg4[%c9_91, %c0_92, %c0_93] : memref<32x64x16xf32, #tpu.memory_space<vmem>>, vector<1x64x16xf32>
    %276 = vector.shape_cast %275 : vector<1x64x16xf32> to vector<64x16xf32>
    %277 = vector.broadcast %274 : vector<1x1xf32> to vector<64x16xf32>
    %278 = arith.mulf %277, %276 : vector<64x16xf32>
    %279 = arith.addf %267, %278 : vector<64x16xf32>
    %280 = vector.extract_strided_slice %221 {offsets = [0, 10], sizes = [1, 1], strides = [1, 1]} : vector<1x32xf32> to vector<1x1xf32>
    %c10_94 = arith.constant 10 : index
    %c0_95 = arith.constant 0 : index
    %c0_96 = arith.constant 0 : index
    %281 = vector.load %arg4[%c10_94, %c0_95, %c0_96] : memref<32x64x16xf32, #tpu.memory_space<vmem>>, vector<1x64x16xf32>
    %282 = vector.shape_cast %281 : vector<1x64x16xf32> to vector<64x16xf32>
    %283 = vector.broadcast %280 : vector<1x1xf32> to vector<64x16xf32>
    %284 = arith.mulf %283, %282 : vector<64x16xf32>
    %285 = arith.addf %273, %284 : vector<64x16xf32>
    %286 = vector.extract_strided_slice %221 {offsets = [0, 11], sizes = [1, 1], strides = [1, 1]} : vector<1x32xf32> to vector<1x1xf32>
    %c11_97 = arith.constant 11 : index
    %c0_98 = arith.constant 0 : index
    %c0_99 = arith.constant 0 : index
    %287 = vector.load %arg4[%c11_97, %c0_98, %c0_99] : memref<32x64x16xf32, #tpu.memory_space<vmem>>, vector<1x64x16xf32>
    %288 = vector.shape_cast %287 : vector<1x64x16xf32> to vector<64x16xf32>
    %289 = vector.broadcast %286 : vector<1x1xf32> to vector<64x16xf32>
    %290 = arith.mulf %289, %288 : vector<64x16xf32>
    %291 = arith.addf %279, %290 : vector<64x16xf32>
    %292 = vector.extract_strided_slice %221 {offsets = [0, 12], sizes = [1, 1], strides = [1, 1]} : vector<1x32xf32> to vector<1x1xf32>
    %c12_100 = arith.constant 12 : index
    %c0_101 = arith.constant 0 : index
    %c0_102 = arith.constant 0 : index
    %293 = vector.load %arg4[%c12_100, %c0_101, %c0_102] : memref<32x64x16xf32, #tpu.memory_space<vmem>>, vector<1x64x16xf32>
    %294 = vector.shape_cast %293 : vector<1x64x16xf32> to vector<64x16xf32>
    %295 = vector.broadcast %292 : vector<1x1xf32> to vector<64x16xf32>
    %296 = arith.mulf %295, %294 : vector<64x16xf32>
    %297 = arith.addf %285, %296 : vector<64x16xf32>
    %298 = vector.extract_strided_slice %221 {offsets = [0, 13], sizes = [1, 1], strides = [1, 1]} : vector<1x32xf32> to vector<1x1xf32>
    %c13_103 = arith.constant 13 : index
    %c0_104 = arith.constant 0 : index
    %c0_105 = arith.constant 0 : index
    %299 = vector.load %arg4[%c13_103, %c0_104, %c0_105] : memref<32x64x16xf32, #tpu.memory_space<vmem>>, vector<1x64x16xf32>
    %300 = vector.shape_cast %299 : vector<1x64x16xf32> to vector<64x16xf32>
    %301 = vector.broadcast %298 : vector<1x1xf32> to vector<64x16xf32>
    %302 = arith.mulf %301, %300 : vector<64x16xf32>
    %303 = arith.addf %291, %302 : vector<64x16xf32>
    %304 = vector.extract_strided_slice %221 {offsets = [0, 14], sizes = [1, 1], strides = [1, 1]} : vector<1x32xf32> to vector<1x1xf32>
    %c14_106 = arith.constant 14 : index
    %c0_107 = arith.constant 0 : index
    %c0_108 = arith.constant 0 : index
    %305 = vector.load %arg4[%c14_106, %c0_107, %c0_108] : memref<32x64x16xf32, #tpu.memory_space<vmem>>, vector<1x64x16xf32>
    %306 = vector.shape_cast %305 : vector<1x64x16xf32> to vector<64x16xf32>
    %307 = vector.broadcast %304 : vector<1x1xf32> to vector<64x16xf32>
    %308 = arith.mulf %307, %306 : vector<64x16xf32>
    %309 = arith.addf %297, %308 : vector<64x16xf32>
    %310 = vector.extract_strided_slice %221 {offsets = [0, 15], sizes = [1, 1], strides = [1, 1]} : vector<1x32xf32> to vector<1x1xf32>
    %c15_109 = arith.constant 15 : index
    %c0_110 = arith.constant 0 : index
    %c0_111 = arith.constant 0 : index
    %311 = vector.load %arg4[%c15_109, %c0_110, %c0_111] : memref<32x64x16xf32, #tpu.memory_space<vmem>>, vector<1x64x16xf32>
    %312 = vector.shape_cast %311 : vector<1x64x16xf32> to vector<64x16xf32>
    %313 = vector.broadcast %310 : vector<1x1xf32> to vector<64x16xf32>
    %314 = arith.mulf %313, %312 : vector<64x16xf32>
    %315 = arith.addf %303, %314 : vector<64x16xf32>
    %316 = vector.extract_strided_slice %221 {offsets = [0, 16], sizes = [1, 1], strides = [1, 1]} : vector<1x32xf32> to vector<1x1xf32>
    %c16 = arith.constant 16 : index
    %c0_112 = arith.constant 0 : index
    %c0_113 = arith.constant 0 : index
    %317 = vector.load %arg4[%c16, %c0_112, %c0_113] : memref<32x64x16xf32, #tpu.memory_space<vmem>>, vector<1x64x16xf32>
    %318 = vector.shape_cast %317 : vector<1x64x16xf32> to vector<64x16xf32>
    %319 = vector.broadcast %316 : vector<1x1xf32> to vector<64x16xf32>
    %320 = arith.mulf %319, %318 : vector<64x16xf32>
    %321 = arith.addf %309, %320 : vector<64x16xf32>
    %322 = vector.extract_strided_slice %221 {offsets = [0, 17], sizes = [1, 1], strides = [1, 1]} : vector<1x32xf32> to vector<1x1xf32>
    %c17 = arith.constant 17 : index
    %c0_114 = arith.constant 0 : index
    %c0_115 = arith.constant 0 : index
    %323 = vector.load %arg4[%c17, %c0_114, %c0_115] : memref<32x64x16xf32, #tpu.memory_space<vmem>>, vector<1x64x16xf32>
    %324 = vector.shape_cast %323 : vector<1x64x16xf32> to vector<64x16xf32>
    %325 = vector.broadcast %322 : vector<1x1xf32> to vector<64x16xf32>
    %326 = arith.mulf %325, %324 : vector<64x16xf32>
    %327 = arith.addf %315, %326 : vector<64x16xf32>
    %328 = vector.extract_strided_slice %221 {offsets = [0, 18], sizes = [1, 1], strides = [1, 1]} : vector<1x32xf32> to vector<1x1xf32>
    %c18 = arith.constant 18 : index
    %c0_116 = arith.constant 0 : index
    %c0_117 = arith.constant 0 : index
    %329 = vector.load %arg4[%c18, %c0_116, %c0_117] : memref<32x64x16xf32, #tpu.memory_space<vmem>>, vector<1x64x16xf32>
    %330 = vector.shape_cast %329 : vector<1x64x16xf32> to vector<64x16xf32>
    %331 = vector.broadcast %328 : vector<1x1xf32> to vector<64x16xf32>
    %332 = arith.mulf %331, %330 : vector<64x16xf32>
    %333 = arith.addf %321, %332 : vector<64x16xf32>
    %334 = vector.extract_strided_slice %221 {offsets = [0, 19], sizes = [1, 1], strides = [1, 1]} : vector<1x32xf32> to vector<1x1xf32>
    %c19 = arith.constant 19 : index
    %c0_118 = arith.constant 0 : index
    %c0_119 = arith.constant 0 : index
    %335 = vector.load %arg4[%c19, %c0_118, %c0_119] : memref<32x64x16xf32, #tpu.memory_space<vmem>>, vector<1x64x16xf32>
    %336 = vector.shape_cast %335 : vector<1x64x16xf32> to vector<64x16xf32>
    %337 = vector.broadcast %334 : vector<1x1xf32> to vector<64x16xf32>
    %338 = arith.mulf %337, %336 : vector<64x16xf32>
    %339 = arith.addf %327, %338 : vector<64x16xf32>
    %340 = vector.extract_strided_slice %221 {offsets = [0, 20], sizes = [1, 1], strides = [1, 1]} : vector<1x32xf32> to vector<1x1xf32>
    %c20 = arith.constant 20 : index
    %c0_120 = arith.constant 0 : index
    %c0_121 = arith.constant 0 : index
    %341 = vector.load %arg4[%c20, %c0_120, %c0_121] : memref<32x64x16xf32, #tpu.memory_space<vmem>>, vector<1x64x16xf32>
    %342 = vector.shape_cast %341 : vector<1x64x16xf32> to vector<64x16xf32>
    %343 = vector.broadcast %340 : vector<1x1xf32> to vector<64x16xf32>
    %344 = arith.mulf %343, %342 : vector<64x16xf32>
    %345 = arith.addf %333, %344 : vector<64x16xf32>
    %346 = vector.extract_strided_slice %221 {offsets = [0, 21], sizes = [1, 1], strides = [1, 1]} : vector<1x32xf32> to vector<1x1xf32>
    %c21 = arith.constant 21 : index
    %c0_122 = arith.constant 0 : index
    %c0_123 = arith.constant 0 : index
    %347 = vector.load %arg4[%c21, %c0_122, %c0_123] : memref<32x64x16xf32, #tpu.memory_space<vmem>>, vector<1x64x16xf32>
    %348 = vector.shape_cast %347 : vector<1x64x16xf32> to vector<64x16xf32>
    %349 = vector.broadcast %346 : vector<1x1xf32> to vector<64x16xf32>
    %350 = arith.mulf %349, %348 : vector<64x16xf32>
    %351 = arith.addf %339, %350 : vector<64x16xf32>
    %352 = vector.extract_strided_slice %221 {offsets = [0, 22], sizes = [1, 1], strides = [1, 1]} : vector<1x32xf32> to vector<1x1xf32>
    %c22 = arith.constant 22 : index
    %c0_124 = arith.constant 0 : index
    %c0_125 = arith.constant 0 : index
    %353 = vector.load %arg4[%c22, %c0_124, %c0_125] : memref<32x64x16xf32, #tpu.memory_space<vmem>>, vector<1x64x16xf32>
    %354 = vector.shape_cast %353 : vector<1x64x16xf32> to vector<64x16xf32>
    %355 = vector.broadcast %352 : vector<1x1xf32> to vector<64x16xf32>
    %356 = arith.mulf %355, %354 : vector<64x16xf32>
    %357 = arith.addf %345, %356 : vector<64x16xf32>
    %358 = vector.extract_strided_slice %221 {offsets = [0, 23], sizes = [1, 1], strides = [1, 1]} : vector<1x32xf32> to vector<1x1xf32>
    %c23 = arith.constant 23 : index
    %c0_126 = arith.constant 0 : index
    %c0_127 = arith.constant 0 : index
    %359 = vector.load %arg4[%c23, %c0_126, %c0_127] : memref<32x64x16xf32, #tpu.memory_space<vmem>>, vector<1x64x16xf32>
    %360 = vector.shape_cast %359 : vector<1x64x16xf32> to vector<64x16xf32>
    %361 = vector.broadcast %358 : vector<1x1xf32> to vector<64x16xf32>
    %362 = arith.mulf %361, %360 : vector<64x16xf32>
    %363 = arith.addf %351, %362 : vector<64x16xf32>
    %364 = vector.extract_strided_slice %221 {offsets = [0, 24], sizes = [1, 1], strides = [1, 1]} : vector<1x32xf32> to vector<1x1xf32>
    %c24 = arith.constant 24 : index
    %c0_128 = arith.constant 0 : index
    %c0_129 = arith.constant 0 : index
    %365 = vector.load %arg4[%c24, %c0_128, %c0_129] : memref<32x64x16xf32, #tpu.memory_space<vmem>>, vector<1x64x16xf32>
    %366 = vector.shape_cast %365 : vector<1x64x16xf32> to vector<64x16xf32>
    %367 = vector.broadcast %364 : vector<1x1xf32> to vector<64x16xf32>
    %368 = arith.mulf %367, %366 : vector<64x16xf32>
    %369 = arith.addf %357, %368 : vector<64x16xf32>
    %370 = vector.extract_strided_slice %221 {offsets = [0, 25], sizes = [1, 1], strides = [1, 1]} : vector<1x32xf32> to vector<1x1xf32>
    %c25 = arith.constant 25 : index
    %c0_130 = arith.constant 0 : index
    %c0_131 = arith.constant 0 : index
    %371 = vector.load %arg4[%c25, %c0_130, %c0_131] : memref<32x64x16xf32, #tpu.memory_space<vmem>>, vector<1x64x16xf32>
    %372 = vector.shape_cast %371 : vector<1x64x16xf32> to vector<64x16xf32>
    %373 = vector.broadcast %370 : vector<1x1xf32> to vector<64x16xf32>
    %374 = arith.mulf %373, %372 : vector<64x16xf32>
    %375 = arith.addf %363, %374 : vector<64x16xf32>
    %376 = vector.extract_strided_slice %221 {offsets = [0, 26], sizes = [1, 1], strides = [1, 1]} : vector<1x32xf32> to vector<1x1xf32>
    %c26 = arith.constant 26 : index
    %c0_132 = arith.constant 0 : index
    %c0_133 = arith.constant 0 : index
    %377 = vector.load %arg4[%c26, %c0_132, %c0_133] : memref<32x64x16xf32, #tpu.memory_space<vmem>>, vector<1x64x16xf32>
    %378 = vector.shape_cast %377 : vector<1x64x16xf32> to vector<64x16xf32>
    %379 = vector.broadcast %376 : vector<1x1xf32> to vector<64x16xf32>
    %380 = arith.mulf %379, %378 : vector<64x16xf32>
    %381 = arith.addf %369, %380 : vector<64x16xf32>
    %382 = vector.extract_strided_slice %221 {offsets = [0, 27], sizes = [1, 1], strides = [1, 1]} : vector<1x32xf32> to vector<1x1xf32>
    %c27 = arith.constant 27 : index
    %c0_134 = arith.constant 0 : index
    %c0_135 = arith.constant 0 : index
    %383 = vector.load %arg4[%c27, %c0_134, %c0_135] : memref<32x64x16xf32, #tpu.memory_space<vmem>>, vector<1x64x16xf32>
    %384 = vector.shape_cast %383 : vector<1x64x16xf32> to vector<64x16xf32>
    %385 = vector.broadcast %382 : vector<1x1xf32> to vector<64x16xf32>
    %386 = arith.mulf %385, %384 : vector<64x16xf32>
    %387 = arith.addf %375, %386 : vector<64x16xf32>
    %388 = vector.extract_strided_slice %221 {offsets = [0, 28], sizes = [1, 1], strides = [1, 1]} : vector<1x32xf32> to vector<1x1xf32>
    %c28 = arith.constant 28 : index
    %c0_136 = arith.constant 0 : index
    %c0_137 = arith.constant 0 : index
    %389 = vector.load %arg4[%c28, %c0_136, %c0_137] : memref<32x64x16xf32, #tpu.memory_space<vmem>>, vector<1x64x16xf32>
    %390 = vector.shape_cast %389 : vector<1x64x16xf32> to vector<64x16xf32>
    %391 = vector.broadcast %388 : vector<1x1xf32> to vector<64x16xf32>
    %392 = arith.mulf %391, %390 : vector<64x16xf32>
    %393 = arith.addf %381, %392 : vector<64x16xf32>
    %394 = vector.extract_strided_slice %221 {offsets = [0, 29], sizes = [1, 1], strides = [1, 1]} : vector<1x32xf32> to vector<1x1xf32>
    %c29 = arith.constant 29 : index
    %c0_138 = arith.constant 0 : index
    %c0_139 = arith.constant 0 : index
    %395 = vector.load %arg4[%c29, %c0_138, %c0_139] : memref<32x64x16xf32, #tpu.memory_space<vmem>>, vector<1x64x16xf32>
    %396 = vector.shape_cast %395 : vector<1x64x16xf32> to vector<64x16xf32>
    %397 = vector.broadcast %394 : vector<1x1xf32> to vector<64x16xf32>
    %398 = arith.mulf %397, %396 : vector<64x16xf32>
    %399 = arith.addf %387, %398 : vector<64x16xf32>
    %400 = vector.extract_strided_slice %221 {offsets = [0, 30], sizes = [1, 1], strides = [1, 1]} : vector<1x32xf32> to vector<1x1xf32>
    %c30 = arith.constant 30 : index
    %c0_140 = arith.constant 0 : index
    %c0_141 = arith.constant 0 : index
    %401 = vector.load %arg4[%c30, %c0_140, %c0_141] : memref<32x64x16xf32, #tpu.memory_space<vmem>>, vector<1x64x16xf32>
    %402 = vector.shape_cast %401 : vector<1x64x16xf32> to vector<64x16xf32>
    %403 = vector.broadcast %400 : vector<1x1xf32> to vector<64x16xf32>
    %404 = arith.mulf %403, %402 : vector<64x16xf32>
    %405 = arith.addf %393, %404 : vector<64x16xf32>
    %406 = vector.extract_strided_slice %221 {offsets = [0, 31], sizes = [1, 1], strides = [1, 1]} : vector<1x32xf32> to vector<1x1xf32>
    %c31 = arith.constant 31 : index
    %c0_142 = arith.constant 0 : index
    %c0_143 = arith.constant 0 : index
    %407 = vector.load %arg4[%c31, %c0_142, %c0_143] : memref<32x64x16xf32, #tpu.memory_space<vmem>>, vector<1x64x16xf32>
    %408 = vector.shape_cast %407 : vector<1x64x16xf32> to vector<64x16xf32>
    %409 = vector.broadcast %406 : vector<1x1xf32> to vector<64x16xf32>
    %410 = arith.mulf %409, %408 : vector<64x16xf32>
    %411 = arith.addf %399, %410 : vector<64x16xf32>
    %412 = arith.addf %405, %411 : vector<64x16xf32>
    %413 = arith.addf %412, %220 : vector<64x16xf32>
    %414 = vector.extract_strided_slice %219 {offsets = [1, 0], sizes = [1, 32], strides = [1, 1]} : vector<2x32xf32> to vector<1x32xf32>
    %415 = vector.extract_strided_slice %414 {offsets = [0, 0], sizes = [1, 1], strides = [1, 1]} : vector<1x32xf32> to vector<1x1xf32>
    %c0_144 = arith.constant 0 : index
    %c0_145 = arith.constant 0 : index
    %c0_146 = arith.constant 0 : index
    %416 = vector.load %arg4[%c0_144, %c0_145, %c0_146] : memref<32x64x16xf32, #tpu.memory_space<vmem>>, vector<1x64x16xf32>
    %417 = vector.shape_cast %416 : vector<1x64x16xf32> to vector<64x16xf32>
    %418 = vector.broadcast %415 : vector<1x1xf32> to vector<64x16xf32>
    %419 = arith.mulf %418, %417 : vector<64x16xf32>
    %420 = vector.extract_strided_slice %414 {offsets = [0, 1], sizes = [1, 1], strides = [1, 1]} : vector<1x32xf32> to vector<1x1xf32>
    %c1_147 = arith.constant 1 : index
    %c0_148 = arith.constant 0 : index
    %c0_149 = arith.constant 0 : index
    %421 = vector.load %arg4[%c1_147, %c0_148, %c0_149] : memref<32x64x16xf32, #tpu.memory_space<vmem>>, vector<1x64x16xf32>
    %422 = vector.shape_cast %421 : vector<1x64x16xf32> to vector<64x16xf32>
    %423 = vector.broadcast %420 : vector<1x1xf32> to vector<64x16xf32>
    %424 = arith.mulf %423, %422 : vector<64x16xf32>
    %425 = vector.extract_strided_slice %414 {offsets = [0, 2], sizes = [1, 1], strides = [1, 1]} : vector<1x32xf32> to vector<1x1xf32>
    %c2_150 = arith.constant 2 : index
    %c0_151 = arith.constant 0 : index
    %c0_152 = arith.constant 0 : index
    %426 = vector.load %arg4[%c2_150, %c0_151, %c0_152] : memref<32x64x16xf32, #tpu.memory_space<vmem>>, vector<1x64x16xf32>
    %427 = vector.shape_cast %426 : vector<1x64x16xf32> to vector<64x16xf32>
    %428 = vector.broadcast %425 : vector<1x1xf32> to vector<64x16xf32>
    %429 = arith.mulf %428, %427 : vector<64x16xf32>
    %430 = arith.addf %419, %429 : vector<64x16xf32>
    %431 = vector.extract_strided_slice %414 {offsets = [0, 3], sizes = [1, 1], strides = [1, 1]} : vector<1x32xf32> to vector<1x1xf32>
    %c3_153 = arith.constant 3 : index
    %c0_154 = arith.constant 0 : index
    %c0_155 = arith.constant 0 : index
    %432 = vector.load %arg4[%c3_153, %c0_154, %c0_155] : memref<32x64x16xf32, #tpu.memory_space<vmem>>, vector<1x64x16xf32>
    %433 = vector.shape_cast %432 : vector<1x64x16xf32> to vector<64x16xf32>
    %434 = vector.broadcast %431 : vector<1x1xf32> to vector<64x16xf32>
    %435 = arith.mulf %434, %433 : vector<64x16xf32>
    %436 = arith.addf %424, %435 : vector<64x16xf32>
    %437 = vector.extract_strided_slice %414 {offsets = [0, 4], sizes = [1, 1], strides = [1, 1]} : vector<1x32xf32> to vector<1x1xf32>
    %c4_156 = arith.constant 4 : index
    %c0_157 = arith.constant 0 : index
    %c0_158 = arith.constant 0 : index
    %438 = vector.load %arg4[%c4_156, %c0_157, %c0_158] : memref<32x64x16xf32, #tpu.memory_space<vmem>>, vector<1x64x16xf32>
    %439 = vector.shape_cast %438 : vector<1x64x16xf32> to vector<64x16xf32>
    %440 = vector.broadcast %437 : vector<1x1xf32> to vector<64x16xf32>
    %441 = arith.mulf %440, %439 : vector<64x16xf32>
    %442 = arith.addf %430, %441 : vector<64x16xf32>
    %443 = vector.extract_strided_slice %414 {offsets = [0, 5], sizes = [1, 1], strides = [1, 1]} : vector<1x32xf32> to vector<1x1xf32>
    %c5_159 = arith.constant 5 : index
    %c0_160 = arith.constant 0 : index
    %c0_161 = arith.constant 0 : index
    %444 = vector.load %arg4[%c5_159, %c0_160, %c0_161] : memref<32x64x16xf32, #tpu.memory_space<vmem>>, vector<1x64x16xf32>
    %445 = vector.shape_cast %444 : vector<1x64x16xf32> to vector<64x16xf32>
    %446 = vector.broadcast %443 : vector<1x1xf32> to vector<64x16xf32>
    %447 = arith.mulf %446, %445 : vector<64x16xf32>
    %448 = arith.addf %436, %447 : vector<64x16xf32>
    %449 = vector.extract_strided_slice %414 {offsets = [0, 6], sizes = [1, 1], strides = [1, 1]} : vector<1x32xf32> to vector<1x1xf32>
    %c6_162 = arith.constant 6 : index
    %c0_163 = arith.constant 0 : index
    %c0_164 = arith.constant 0 : index
    %450 = vector.load %arg4[%c6_162, %c0_163, %c0_164] : memref<32x64x16xf32, #tpu.memory_space<vmem>>, vector<1x64x16xf32>
    %451 = vector.shape_cast %450 : vector<1x64x16xf32> to vector<64x16xf32>
    %452 = vector.broadcast %449 : vector<1x1xf32> to vector<64x16xf32>
    %453 = arith.mulf %452, %451 : vector<64x16xf32>
    %454 = arith.addf %442, %453 : vector<64x16xf32>
    %455 = vector.extract_strided_slice %414 {offsets = [0, 7], sizes = [1, 1], strides = [1, 1]} : vector<1x32xf32> to vector<1x1xf32>
    %c7_165 = arith.constant 7 : index
    %c0_166 = arith.constant 0 : index
    %c0_167 = arith.constant 0 : index
    %456 = vector.load %arg4[%c7_165, %c0_166, %c0_167] : memref<32x64x16xf32, #tpu.memory_space<vmem>>, vector<1x64x16xf32>
    %457 = vector.shape_cast %456 : vector<1x64x16xf32> to vector<64x16xf32>
    %458 = vector.broadcast %455 : vector<1x1xf32> to vector<64x16xf32>
    %459 = arith.mulf %458, %457 : vector<64x16xf32>
    %460 = arith.addf %448, %459 : vector<64x16xf32>
    %461 = vector.extract_strided_slice %414 {offsets = [0, 8], sizes = [1, 1], strides = [1, 1]} : vector<1x32xf32> to vector<1x1xf32>
    %c8_168 = arith.constant 8 : index
    %c0_169 = arith.constant 0 : index
    %c0_170 = arith.constant 0 : index
    %462 = vector.load %arg4[%c8_168, %c0_169, %c0_170] : memref<32x64x16xf32, #tpu.memory_space<vmem>>, vector<1x64x16xf32>
    %463 = vector.shape_cast %462 : vector<1x64x16xf32> to vector<64x16xf32>
    %464 = vector.broadcast %461 : vector<1x1xf32> to vector<64x16xf32>
    %465 = arith.mulf %464, %463 : vector<64x16xf32>
    %466 = arith.addf %454, %465 : vector<64x16xf32>
    %467 = vector.extract_strided_slice %414 {offsets = [0, 9], sizes = [1, 1], strides = [1, 1]} : vector<1x32xf32> to vector<1x1xf32>
    %c9_171 = arith.constant 9 : index
    %c0_172 = arith.constant 0 : index
    %c0_173 = arith.constant 0 : index
    %468 = vector.load %arg4[%c9_171, %c0_172, %c0_173] : memref<32x64x16xf32, #tpu.memory_space<vmem>>, vector<1x64x16xf32>
    %469 = vector.shape_cast %468 : vector<1x64x16xf32> to vector<64x16xf32>
    %470 = vector.broadcast %467 : vector<1x1xf32> to vector<64x16xf32>
    %471 = arith.mulf %470, %469 : vector<64x16xf32>
    %472 = arith.addf %460, %471 : vector<64x16xf32>
    %473 = vector.extract_strided_slice %414 {offsets = [0, 10], sizes = [1, 1], strides = [1, 1]} : vector<1x32xf32> to vector<1x1xf32>
    %c10_174 = arith.constant 10 : index
    %c0_175 = arith.constant 0 : index
    %c0_176 = arith.constant 0 : index
    %474 = vector.load %arg4[%c10_174, %c0_175, %c0_176] : memref<32x64x16xf32, #tpu.memory_space<vmem>>, vector<1x64x16xf32>
    %475 = vector.shape_cast %474 : vector<1x64x16xf32> to vector<64x16xf32>
    %476 = vector.broadcast %473 : vector<1x1xf32> to vector<64x16xf32>
    %477 = arith.mulf %476, %475 : vector<64x16xf32>
    %478 = arith.addf %466, %477 : vector<64x16xf32>
    %479 = vector.extract_strided_slice %414 {offsets = [0, 11], sizes = [1, 1], strides = [1, 1]} : vector<1x32xf32> to vector<1x1xf32>
    %c11_177 = arith.constant 11 : index
    %c0_178 = arith.constant 0 : index
    %c0_179 = arith.constant 0 : index
    %480 = vector.load %arg4[%c11_177, %c0_178, %c0_179] : memref<32x64x16xf32, #tpu.memory_space<vmem>>, vector<1x64x16xf32>
    %481 = vector.shape_cast %480 : vector<1x64x16xf32> to vector<64x16xf32>
    %482 = vector.broadcast %479 : vector<1x1xf32> to vector<64x16xf32>
    %483 = arith.mulf %482, %481 : vector<64x16xf32>
    %484 = arith.addf %472, %483 : vector<64x16xf32>
    %485 = vector.extract_strided_slice %414 {offsets = [0, 12], sizes = [1, 1], strides = [1, 1]} : vector<1x32xf32> to vector<1x1xf32>
    %c12_180 = arith.constant 12 : index
    %c0_181 = arith.constant 0 : index
    %c0_182 = arith.constant 0 : index
    %486 = vector.load %arg4[%c12_180, %c0_181, %c0_182] : memref<32x64x16xf32, #tpu.memory_space<vmem>>, vector<1x64x16xf32>
    %487 = vector.shape_cast %486 : vector<1x64x16xf32> to vector<64x16xf32>
    %488 = vector.broadcast %485 : vector<1x1xf32> to vector<64x16xf32>
    %489 = arith.mulf %488, %487 : vector<64x16xf32>
    %490 = arith.addf %478, %489 : vector<64x16xf32>
    %491 = vector.extract_strided_slice %414 {offsets = [0, 13], sizes = [1, 1], strides = [1, 1]} : vector<1x32xf32> to vector<1x1xf32>
    %c13_183 = arith.constant 13 : index
    %c0_184 = arith.constant 0 : index
    %c0_185 = arith.constant 0 : index
    %492 = vector.load %arg4[%c13_183, %c0_184, %c0_185] : memref<32x64x16xf32, #tpu.memory_space<vmem>>, vector<1x64x16xf32>
    %493 = vector.shape_cast %492 : vector<1x64x16xf32> to vector<64x16xf32>
    %494 = vector.broadcast %491 : vector<1x1xf32> to vector<64x16xf32>
    %495 = arith.mulf %494, %493 : vector<64x16xf32>
    %496 = arith.addf %484, %495 : vector<64x16xf32>
    %497 = vector.extract_strided_slice %414 {offsets = [0, 14], sizes = [1, 1], strides = [1, 1]} : vector<1x32xf32> to vector<1x1xf32>
    %c14_186 = arith.constant 14 : index
    %c0_187 = arith.constant 0 : index
    %c0_188 = arith.constant 0 : index
    %498 = vector.load %arg4[%c14_186, %c0_187, %c0_188] : memref<32x64x16xf32, #tpu.memory_space<vmem>>, vector<1x64x16xf32>
    %499 = vector.shape_cast %498 : vector<1x64x16xf32> to vector<64x16xf32>
    %500 = vector.broadcast %497 : vector<1x1xf32> to vector<64x16xf32>
    %501 = arith.mulf %500, %499 : vector<64x16xf32>
    %502 = arith.addf %490, %501 : vector<64x16xf32>
    %503 = vector.extract_strided_slice %414 {offsets = [0, 15], sizes = [1, 1], strides = [1, 1]} : vector<1x32xf32> to vector<1x1xf32>
    %c15_189 = arith.constant 15 : index
    %c0_190 = arith.constant 0 : index
    %c0_191 = arith.constant 0 : index
    %504 = vector.load %arg4[%c15_189, %c0_190, %c0_191] : memref<32x64x16xf32, #tpu.memory_space<vmem>>, vector<1x64x16xf32>
    %505 = vector.shape_cast %504 : vector<1x64x16xf32> to vector<64x16xf32>
    %506 = vector.broadcast %503 : vector<1x1xf32> to vector<64x16xf32>
    %507 = arith.mulf %506, %505 : vector<64x16xf32>
    %508 = arith.addf %496, %507 : vector<64x16xf32>
    %509 = vector.extract_strided_slice %414 {offsets = [0, 16], sizes = [1, 1], strides = [1, 1]} : vector<1x32xf32> to vector<1x1xf32>
    %c16_192 = arith.constant 16 : index
    %c0_193 = arith.constant 0 : index
    %c0_194 = arith.constant 0 : index
    %510 = vector.load %arg4[%c16_192, %c0_193, %c0_194] : memref<32x64x16xf32, #tpu.memory_space<vmem>>, vector<1x64x16xf32>
    %511 = vector.shape_cast %510 : vector<1x64x16xf32> to vector<64x16xf32>
    %512 = vector.broadcast %509 : vector<1x1xf32> to vector<64x16xf32>
    %513 = arith.mulf %512, %511 : vector<64x16xf32>
    %514 = arith.addf %502, %513 : vector<64x16xf32>
    %515 = vector.extract_strided_slice %414 {offsets = [0, 17], sizes = [1, 1], strides = [1, 1]} : vector<1x32xf32> to vector<1x1xf32>
    %c17_195 = arith.constant 17 : index
    %c0_196 = arith.constant 0 : index
    %c0_197 = arith.constant 0 : index
    %516 = vector.load %arg4[%c17_195, %c0_196, %c0_197] : memref<32x64x16xf32, #tpu.memory_space<vmem>>, vector<1x64x16xf32>
    %517 = vector.shape_cast %516 : vector<1x64x16xf32> to vector<64x16xf32>
    %518 = vector.broadcast %515 : vector<1x1xf32> to vector<64x16xf32>
    %519 = arith.mulf %518, %517 : vector<64x16xf32>
    %520 = arith.addf %508, %519 : vector<64x16xf32>
    %521 = vector.extract_strided_slice %414 {offsets = [0, 18], sizes = [1, 1], strides = [1, 1]} : vector<1x32xf32> to vector<1x1xf32>
    %c18_198 = arith.constant 18 : index
    %c0_199 = arith.constant 0 : index
    %c0_200 = arith.constant 0 : index
    %522 = vector.load %arg4[%c18_198, %c0_199, %c0_200] : memref<32x64x16xf32, #tpu.memory_space<vmem>>, vector<1x64x16xf32>
    %523 = vector.shape_cast %522 : vector<1x64x16xf32> to vector<64x16xf32>
    %524 = vector.broadcast %521 : vector<1x1xf32> to vector<64x16xf32>
    %525 = arith.mulf %524, %523 : vector<64x16xf32>
    %526 = arith.addf %514, %525 : vector<64x16xf32>
    %527 = vector.extract_strided_slice %414 {offsets = [0, 19], sizes = [1, 1], strides = [1, 1]} : vector<1x32xf32> to vector<1x1xf32>
    %c19_201 = arith.constant 19 : index
    %c0_202 = arith.constant 0 : index
    %c0_203 = arith.constant 0 : index
    %528 = vector.load %arg4[%c19_201, %c0_202, %c0_203] : memref<32x64x16xf32, #tpu.memory_space<vmem>>, vector<1x64x16xf32>
    %529 = vector.shape_cast %528 : vector<1x64x16xf32> to vector<64x16xf32>
    %530 = vector.broadcast %527 : vector<1x1xf32> to vector<64x16xf32>
    %531 = arith.mulf %530, %529 : vector<64x16xf32>
    %532 = arith.addf %520, %531 : vector<64x16xf32>
    %533 = vector.extract_strided_slice %414 {offsets = [0, 20], sizes = [1, 1], strides = [1, 1]} : vector<1x32xf32> to vector<1x1xf32>
    %c20_204 = arith.constant 20 : index
    %c0_205 = arith.constant 0 : index
    %c0_206 = arith.constant 0 : index
    %534 = vector.load %arg4[%c20_204, %c0_205, %c0_206] : memref<32x64x16xf32, #tpu.memory_space<vmem>>, vector<1x64x16xf32>
    %535 = vector.shape_cast %534 : vector<1x64x16xf32> to vector<64x16xf32>
    %536 = vector.broadcast %533 : vector<1x1xf32> to vector<64x16xf32>
    %537 = arith.mulf %536, %535 : vector<64x16xf32>
    %538 = arith.addf %526, %537 : vector<64x16xf32>
    %539 = vector.extract_strided_slice %414 {offsets = [0, 21], sizes = [1, 1], strides = [1, 1]} : vector<1x32xf32> to vector<1x1xf32>
    %c21_207 = arith.constant 21 : index
    %c0_208 = arith.constant 0 : index
    %c0_209 = arith.constant 0 : index
    %540 = vector.load %arg4[%c21_207, %c0_208, %c0_209] : memref<32x64x16xf32, #tpu.memory_space<vmem>>, vector<1x64x16xf32>
    %541 = vector.shape_cast %540 : vector<1x64x16xf32> to vector<64x16xf32>
    %542 = vector.broadcast %539 : vector<1x1xf32> to vector<64x16xf32>
    %543 = arith.mulf %542, %541 : vector<64x16xf32>
    %544 = arith.addf %532, %543 : vector<64x16xf32>
    %545 = vector.extract_strided_slice %414 {offsets = [0, 22], sizes = [1, 1], strides = [1, 1]} : vector<1x32xf32> to vector<1x1xf32>
    %c22_210 = arith.constant 22 : index
    %c0_211 = arith.constant 0 : index
    %c0_212 = arith.constant 0 : index
    %546 = vector.load %arg4[%c22_210, %c0_211, %c0_212] : memref<32x64x16xf32, #tpu.memory_space<vmem>>, vector<1x64x16xf32>
    %547 = vector.shape_cast %546 : vector<1x64x16xf32> to vector<64x16xf32>
    %548 = vector.broadcast %545 : vector<1x1xf32> to vector<64x16xf32>
    %549 = arith.mulf %548, %547 : vector<64x16xf32>
    %550 = arith.addf %538, %549 : vector<64x16xf32>
    %551 = vector.extract_strided_slice %414 {offsets = [0, 23], sizes = [1, 1], strides = [1, 1]} : vector<1x32xf32> to vector<1x1xf32>
    %c23_213 = arith.constant 23 : index
    %c0_214 = arith.constant 0 : index
    %c0_215 = arith.constant 0 : index
    %552 = vector.load %arg4[%c23_213, %c0_214, %c0_215] : memref<32x64x16xf32, #tpu.memory_space<vmem>>, vector<1x64x16xf32>
    %553 = vector.shape_cast %552 : vector<1x64x16xf32> to vector<64x16xf32>
    %554 = vector.broadcast %551 : vector<1x1xf32> to vector<64x16xf32>
    %555 = arith.mulf %554, %553 : vector<64x16xf32>
    %556 = arith.addf %544, %555 : vector<64x16xf32>
    %557 = vector.extract_strided_slice %414 {offsets = [0, 24], sizes = [1, 1], strides = [1, 1]} : vector<1x32xf32> to vector<1x1xf32>
    %c24_216 = arith.constant 24 : index
    %c0_217 = arith.constant 0 : index
    %c0_218 = arith.constant 0 : index
    %558 = vector.load %arg4[%c24_216, %c0_217, %c0_218] : memref<32x64x16xf32, #tpu.memory_space<vmem>>, vector<1x64x16xf32>
    %559 = vector.shape_cast %558 : vector<1x64x16xf32> to vector<64x16xf32>
    %560 = vector.broadcast %557 : vector<1x1xf32> to vector<64x16xf32>
    %561 = arith.mulf %560, %559 : vector<64x16xf32>
    %562 = arith.addf %550, %561 : vector<64x16xf32>
    %563 = vector.extract_strided_slice %414 {offsets = [0, 25], sizes = [1, 1], strides = [1, 1]} : vector<1x32xf32> to vector<1x1xf32>
    %c25_219 = arith.constant 25 : index
    %c0_220 = arith.constant 0 : index
    %c0_221 = arith.constant 0 : index
    %564 = vector.load %arg4[%c25_219, %c0_220, %c0_221] : memref<32x64x16xf32, #tpu.memory_space<vmem>>, vector<1x64x16xf32>
    %565 = vector.shape_cast %564 : vector<1x64x16xf32> to vector<64x16xf32>
    %566 = vector.broadcast %563 : vector<1x1xf32> to vector<64x16xf32>
    %567 = arith.mulf %566, %565 : vector<64x16xf32>
    %568 = arith.addf %556, %567 : vector<64x16xf32>
    %569 = vector.extract_strided_slice %414 {offsets = [0, 26], sizes = [1, 1], strides = [1, 1]} : vector<1x32xf32> to vector<1x1xf32>
    %c26_222 = arith.constant 26 : index
    %c0_223 = arith.constant 0 : index
    %c0_224 = arith.constant 0 : index
    %570 = vector.load %arg4[%c26_222, %c0_223, %c0_224] : memref<32x64x16xf32, #tpu.memory_space<vmem>>, vector<1x64x16xf32>
    %571 = vector.shape_cast %570 : vector<1x64x16xf32> to vector<64x16xf32>
    %572 = vector.broadcast %569 : vector<1x1xf32> to vector<64x16xf32>
    %573 = arith.mulf %572, %571 : vector<64x16xf32>
    %574 = arith.addf %562, %573 : vector<64x16xf32>
    %575 = vector.extract_strided_slice %414 {offsets = [0, 27], sizes = [1, 1], strides = [1, 1]} : vector<1x32xf32> to vector<1x1xf32>
    %c27_225 = arith.constant 27 : index
    %c0_226 = arith.constant 0 : index
    %c0_227 = arith.constant 0 : index
    %576 = vector.load %arg4[%c27_225, %c0_226, %c0_227] : memref<32x64x16xf32, #tpu.memory_space<vmem>>, vector<1x64x16xf32>
    %577 = vector.shape_cast %576 : vector<1x64x16xf32> to vector<64x16xf32>
    %578 = vector.broadcast %575 : vector<1x1xf32> to vector<64x16xf32>
    %579 = arith.mulf %578, %577 : vector<64x16xf32>
    %580 = arith.addf %568, %579 : vector<64x16xf32>
    %581 = vector.extract_strided_slice %414 {offsets = [0, 28], sizes = [1, 1], strides = [1, 1]} : vector<1x32xf32> to vector<1x1xf32>
    %c28_228 = arith.constant 28 : index
    %c0_229 = arith.constant 0 : index
    %c0_230 = arith.constant 0 : index
    %582 = vector.load %arg4[%c28_228, %c0_229, %c0_230] : memref<32x64x16xf32, #tpu.memory_space<vmem>>, vector<1x64x16xf32>
    %583 = vector.shape_cast %582 : vector<1x64x16xf32> to vector<64x16xf32>
    %584 = vector.broadcast %581 : vector<1x1xf32> to vector<64x16xf32>
    %585 = arith.mulf %584, %583 : vector<64x16xf32>
    %586 = arith.addf %574, %585 : vector<64x16xf32>
    %587 = vector.extract_strided_slice %414 {offsets = [0, 29], sizes = [1, 1], strides = [1, 1]} : vector<1x32xf32> to vector<1x1xf32>
    %c29_231 = arith.constant 29 : index
    %c0_232 = arith.constant 0 : index
    %c0_233 = arith.constant 0 : index
    %588 = vector.load %arg4[%c29_231, %c0_232, %c0_233] : memref<32x64x16xf32, #tpu.memory_space<vmem>>, vector<1x64x16xf32>
    %589 = vector.shape_cast %588 : vector<1x64x16xf32> to vector<64x16xf32>
    %590 = vector.broadcast %587 : vector<1x1xf32> to vector<64x16xf32>
    %591 = arith.mulf %590, %589 : vector<64x16xf32>
    %592 = arith.addf %580, %591 : vector<64x16xf32>
    %593 = vector.extract_strided_slice %414 {offsets = [0, 30], sizes = [1, 1], strides = [1, 1]} : vector<1x32xf32> to vector<1x1xf32>
    %c30_234 = arith.constant 30 : index
    %c0_235 = arith.constant 0 : index
    %c0_236 = arith.constant 0 : index
    %594 = vector.load %arg4[%c30_234, %c0_235, %c0_236] : memref<32x64x16xf32, #tpu.memory_space<vmem>>, vector<1x64x16xf32>
    %595 = vector.shape_cast %594 : vector<1x64x16xf32> to vector<64x16xf32>
    %596 = vector.broadcast %593 : vector<1x1xf32> to vector<64x16xf32>
    %597 = arith.mulf %596, %595 : vector<64x16xf32>
    %598 = arith.addf %586, %597 : vector<64x16xf32>
    %599 = vector.extract_strided_slice %414 {offsets = [0, 31], sizes = [1, 1], strides = [1, 1]} : vector<1x32xf32> to vector<1x1xf32>
    %c31_237 = arith.constant 31 : index
    %c0_238 = arith.constant 0 : index
    %c0_239 = arith.constant 0 : index
    %600 = vector.load %arg4[%c31_237, %c0_238, %c0_239] : memref<32x64x16xf32, #tpu.memory_space<vmem>>, vector<1x64x16xf32>
    %601 = vector.shape_cast %600 : vector<1x64x16xf32> to vector<64x16xf32>
    %602 = vector.broadcast %599 : vector<1x1xf32> to vector<64x16xf32>
    %603 = arith.mulf %602, %601 : vector<64x16xf32>
    %604 = arith.addf %592, %603 : vector<64x16xf32>
    %605 = arith.addf %598, %604 : vector<64x16xf32>
    %606 = arith.addf %605, %220 : vector<64x16xf32>
    %607 = tpu.concatenate %413, %606 in 0 : vector<64x16xf32>, vector<64x16xf32> -> vector<128x16xf32>
    %c440 = arith.constant 440 : index
    %c0_240 = arith.constant 0 : index
    %608 = vector.load %arg2[%c440, %c0_240] : memref<648x192xf32, #tpu.memory_space<vmem>>, vector<16x32xf32>
    %cst_241 = arith.constant dense<0.000000e+00> : vector<128x32xf32>
    %609 = tpu.matmul %607, %608, %cst_241 {dimension_numbers = #tpu.dot_dimension_numbers<[1], [0], [0], [1], [0, 0, 1, 1], [], []>} : vector<128x16xf32>, vector<16x32xf32>, vector<128x32xf32> -> vector<128x32xf32>
    %c456 = arith.constant 456 : index
    %c0_242 = arith.constant 0 : index
    %610 = vector.load %arg2[%c456, %c0_242] : memref<648x192xf32, #tpu.memory_space<vmem>>, vector<1x32xf32>
    %611 = vector.broadcast %610 : vector<1x32xf32> to vector<128x32xf32>
    %612 = arith.addf %609, %611 : vector<128x32xf32>
    %c464 = arith.constant 464 : index
    %c0_243 = arith.constant 0 : index
    %613 = vector.load %arg2[%c464, %c0_243] : memref<648x192xf32, #tpu.memory_space<vmem>>, vector<32x192xf32>
    %c496 = arith.constant 496 : index
    %c0_244 = arith.constant 0 : index
    %614 = vector.load %arg2[%c496, %c0_244] : memref<648x192xf32, #tpu.memory_space<vmem>>, vector<32x1xf32>
    %c1_i32_245 = arith.constant 1 : i32
    %615 = tpu.dynamic_rotate %612 by %c1_i32_245 dim 1 : vector<128x32xf32>, i32 -> vector<128x32xf32>
    %cst_246 = arith.constant 0.000000e+00 : f32
    %616 = vector.shape_cast %7 : vector<1x32xi1> to vector<1x32xi1>
    %617 = vector.broadcast %616 : vector<1x32xi1> to vector<128x32xi1>
    %618 = vector.broadcast %cst_246 : f32 to vector<128x32xf32>
    %619 = arith.select %617, %615, %618 : vector<128x32xi1>, vector<128x32xf32>
    %c31_i32_247 = arith.constant 31 : i32
    %620 = tpu.dynamic_rotate %612 by %c31_i32_247 dim 1 : vector<128x32xf32>, i32 -> vector<128x32xf32>
    %cst_248 = arith.constant 0.000000e+00 : f32
    %621 = vector.shape_cast %9 : vector<1x32xi1> to vector<1x32xi1>
    %622 = vector.broadcast %621 : vector<1x32xi1> to vector<128x32xi1>
    %623 = vector.broadcast %cst_248 : f32 to vector<128x32xf32>
    %624 = arith.select %622, %620, %623 : vector<128x32xi1>, vector<128x32xf32>
    %625 = vector.extract_strided_slice %619 {offsets = [0, 0], sizes = [64, 32], strides = [1, 1]} : vector<128x32xf32> to vector<64x32xf32>
    %626 = vector.extract_strided_slice %612 {offsets = [0, 0], sizes = [64, 32], strides = [1, 1]} : vector<128x32xf32> to vector<64x32xf32>
    %627 = vector.extract_strided_slice %624 {offsets = [0, 0], sizes = [64, 32], strides = [1, 1]} : vector<128x32xf32> to vector<64x32xf32>
    %628 = tpu.concatenate %625, %626, %627 in 0 : vector<64x32xf32>, vector<64x32xf32>, vector<64x32xf32> -> vector<192x32xf32>
    %cst_249 = arith.constant dense<0.000000e+00> : vector<32x32xf32>
    %629 = tpu.matmul %613, %628, %cst_249 {dimension_numbers = #tpu.dot_dimension_numbers<[1], [0], [0], [1], [0, 0, 1, 1], [], []>} : vector<32x192xf32>, vector<192x32xf32>, vector<32x32xf32> -> vector<32x32xf32>
    %630 = vector.broadcast %614 : vector<32x1xf32> to vector<32x32xf32>
    %631 = arith.addf %629, %630 : vector<32x32xf32>
    %632 = vector.extract_strided_slice %619 {offsets = [64, 0], sizes = [64, 32], strides = [1, 1]} : vector<128x32xf32> to vector<64x32xf32>
    %633 = vector.extract_strided_slice %612 {offsets = [64, 0], sizes = [64, 32], strides = [1, 1]} : vector<128x32xf32> to vector<64x32xf32>
    %634 = vector.extract_strided_slice %624 {offsets = [64, 0], sizes = [64, 32], strides = [1, 1]} : vector<128x32xf32> to vector<64x32xf32>
    %635 = tpu.concatenate %632, %633, %634 in 0 : vector<64x32xf32>, vector<64x32xf32>, vector<64x32xf32> -> vector<192x32xf32>
    %cst_250 = arith.constant dense<0.000000e+00> : vector<32x32xf32>
    %636 = tpu.matmul %613, %635, %cst_250 {dimension_numbers = #tpu.dot_dimension_numbers<[1], [0], [0], [1], [0, 0, 1, 1], [], []>} : vector<32x192xf32>, vector<192x32xf32>, vector<32x32xf32> -> vector<32x32xf32>
    %637 = vector.broadcast %614 : vector<32x1xf32> to vector<32x32xf32>
    %638 = arith.addf %636, %637 : vector<32x32xf32>
    %639 = tpu.concatenate %631, %638 in 0 : vector<32x32xf32>, vector<32x32xf32> -> vector<64x32xf32>
    %cst_251 = arith.constant 0.000000e+00 : f32
    %640 = vector.broadcast %cst_251 : f32 to vector<64x32xf32>
    %641 = arith.cmpf ogt, %639, %640 : vector<64x32xf32>
    %642 = math.exp %639 : vector<64x32xf32>
    %cst_252 = arith.constant 1.000000e+00 : f32
    %643 = vector.broadcast %cst_252 : f32 to vector<64x32xf32>
    %644 = arith.subf %642, %643 : vector<64x32xf32>
    %645 = arith.select %641, %639, %644 : vector<64x32xi1>, vector<64x32xf32>
    %c528 = arith.constant 528 : index
    %c0_253 = arith.constant 0 : index
    %646 = vector.load %arg2[%c528, %c0_253] : memref<648x192xf32, #tpu.memory_space<vmem>>, vector<32x128xf32>
    %cst_254 = arith.constant dense<0.000000e+00> : vector<64x128xf32>
    %647 = tpu.matmul %645, %646, %cst_254 {dimension_numbers = #tpu.dot_dimension_numbers<[1], [0], [0], [1], [0, 0, 1, 1], [], []>} : vector<64x32xf32>, vector<32x128xf32>, vector<64x128xf32> -> vector<64x128xf32>
    %c560 = arith.constant 560 : index
    %c0_255 = arith.constant 0 : index
    %648 = vector.load %arg2[%c560, %c0_255] : memref<648x192xf32, #tpu.memory_space<vmem>>, vector<1x128xf32>
    %649 = vector.broadcast %648 : vector<1x128xf32> to vector<64x128xf32>
    %650 = arith.addf %647, %649 : vector<64x128xf32>
    %c568 = arith.constant 568 : index
    %c0_256 = arith.constant 0 : index
    %651 = vector.load %arg2[%c568, %c0_256] : memref<648x192xf32, #tpu.memory_space<vmem>>, vector<32x96xf32>
    %c600 = arith.constant 600 : index
    %c0_257 = arith.constant 0 : index
    %652 = vector.load %arg2[%c600, %c0_257] : memref<648x192xf32, #tpu.memory_space<vmem>>, vector<32x1xf32>
    %c1_i32_258 = arith.constant 1 : i32
    %653 = tpu.dynamic_rotate %650 by %c1_i32_258 dim 1 : vector<64x128xf32>, i32 -> vector<64x128xf32>
    %cst_259 = arith.constant 0.000000e+00 : f32
    %654 = vector.shape_cast %3 : vector<1x128xi1> to vector<1x128xi1>
    %655 = vector.broadcast %654 : vector<1x128xi1> to vector<64x128xi1>
    %656 = vector.broadcast %cst_259 : f32 to vector<64x128xf32>
    %657 = arith.select %655, %653, %656 : vector<64x128xi1>, vector<64x128xf32>
    %c127_i32_260 = arith.constant 127 : i32
    %658 = tpu.dynamic_rotate %650 by %c127_i32_260 dim 1 : vector<64x128xf32>, i32 -> vector<64x128xf32>
    %cst_261 = arith.constant 0.000000e+00 : f32
    %659 = vector.shape_cast %5 : vector<1x128xi1> to vector<1x128xi1>
    %660 = vector.broadcast %659 : vector<1x128xi1> to vector<64x128xi1>
    %661 = vector.broadcast %cst_261 : f32 to vector<64x128xf32>
    %662 = arith.select %660, %658, %661 : vector<64x128xi1>, vector<64x128xf32>
    %663 = vector.extract_strided_slice %657 {offsets = [0, 0], sizes = [32, 128], strides = [1, 1]} : vector<64x128xf32> to vector<32x128xf32>
    %664 = vector.extract_strided_slice %650 {offsets = [0, 0], sizes = [32, 128], strides = [1, 1]} : vector<64x128xf32> to vector<32x128xf32>
    %665 = vector.extract_strided_slice %662 {offsets = [0, 0], sizes = [32, 128], strides = [1, 1]} : vector<64x128xf32> to vector<32x128xf32>
    %666 = tpu.concatenate %663, %664, %665 in 0 : vector<32x128xf32>, vector<32x128xf32>, vector<32x128xf32> -> vector<96x128xf32>
    %cst_262 = arith.constant dense<0.000000e+00> : vector<32x128xf32>
    %667 = tpu.matmul %651, %666, %cst_262 {dimension_numbers = #tpu.dot_dimension_numbers<[1], [0], [0], [1], [0, 0, 1, 1], [], []>} : vector<32x96xf32>, vector<96x128xf32>, vector<32x128xf32> -> vector<32x128xf32>
    %668 = vector.broadcast %652 : vector<32x1xf32> to vector<32x128xf32>
    %669 = arith.addf %667, %668 : vector<32x128xf32>
    %670 = vector.extract_strided_slice %657 {offsets = [32, 0], sizes = [32, 128], strides = [1, 1]} : vector<64x128xf32> to vector<32x128xf32>
    %671 = vector.extract_strided_slice %650 {offsets = [32, 0], sizes = [32, 128], strides = [1, 1]} : vector<64x128xf32> to vector<32x128xf32>
    %672 = vector.extract_strided_slice %662 {offsets = [32, 0], sizes = [32, 128], strides = [1, 1]} : vector<64x128xf32> to vector<32x128xf32>
    %673 = tpu.concatenate %670, %671, %672 in 0 : vector<32x128xf32>, vector<32x128xf32>, vector<32x128xf32> -> vector<96x128xf32>
    %cst_263 = arith.constant dense<0.000000e+00> : vector<32x128xf32>
    %674 = tpu.matmul %651, %673, %cst_263 {dimension_numbers = #tpu.dot_dimension_numbers<[1], [0], [0], [1], [0, 0, 1, 1], [], []>} : vector<32x96xf32>, vector<96x128xf32>, vector<32x128xf32> -> vector<32x128xf32>
    %675 = vector.broadcast %652 : vector<32x1xf32> to vector<32x128xf32>
    %676 = arith.addf %674, %675 : vector<32x128xf32>
    %677 = tpu.concatenate %669, %676 in 0 : vector<32x128xf32>, vector<32x128xf32> -> vector<64x128xf32>
    %cst_264 = arith.constant 0.000000e+00 : f32
    %678 = vector.broadcast %cst_264 : f32 to vector<64x128xf32>
    %679 = arith.cmpf ogt, %677, %678 : vector<64x128xf32>
    %680 = math.exp %677 : vector<64x128xf32>
    %cst_265 = arith.constant 1.000000e+00 : f32
    %681 = vector.broadcast %cst_265 : f32 to vector<64x128xf32>
    %682 = arith.subf %680, %681 : vector<64x128xf32>
    %683 = arith.select %679, %677, %682 : vector<64x128xi1>, vector<64x128xf32>
    %c632 = arith.constant 632 : index
    %c0_266 = arith.constant 0 : index
    %684 = vector.load %arg2[%c632, %c0_266] : memref<648x192xf32, #tpu.memory_space<vmem>>, vector<8x96xf32>
    %c640 = arith.constant 640 : index
    %c0_267 = arith.constant 0 : index
    %685 = vector.load %arg2[%c640, %c0_267] : memref<648x192xf32, #tpu.memory_space<vmem>>, vector<8x1xf32>
    %c1_i32_268 = arith.constant 1 : i32
    %686 = tpu.dynamic_rotate %683 by %c1_i32_268 dim 1 : vector<64x128xf32>, i32 -> vector<64x128xf32>
    %cst_269 = arith.constant 0.000000e+00 : f32
    %687 = vector.shape_cast %3 : vector<1x128xi1> to vector<1x128xi1>
    %688 = vector.broadcast %687 : vector<1x128xi1> to vector<64x128xi1>
    %689 = vector.broadcast %cst_269 : f32 to vector<64x128xf32>
    %690 = arith.select %688, %686, %689 : vector<64x128xi1>, vector<64x128xf32>
    %c127_i32_270 = arith.constant 127 : i32
    %691 = tpu.dynamic_rotate %683 by %c127_i32_270 dim 1 : vector<64x128xf32>, i32 -> vector<64x128xf32>
    %cst_271 = arith.constant 0.000000e+00 : f32
    %692 = vector.shape_cast %5 : vector<1x128xi1> to vector<1x128xi1>
    %693 = vector.broadcast %692 : vector<1x128xi1> to vector<64x128xi1>
    %694 = vector.broadcast %cst_271 : f32 to vector<64x128xf32>
    %695 = arith.select %693, %691, %694 : vector<64x128xi1>, vector<64x128xf32>
    %696 = vector.extract_strided_slice %690 {offsets = [0, 0], sizes = [32, 128], strides = [1, 1]} : vector<64x128xf32> to vector<32x128xf32>
    %697 = vector.extract_strided_slice %683 {offsets = [0, 0], sizes = [32, 128], strides = [1, 1]} : vector<64x128xf32> to vector<32x128xf32>
    %698 = vector.extract_strided_slice %695 {offsets = [0, 0], sizes = [32, 128], strides = [1, 1]} : vector<64x128xf32> to vector<32x128xf32>
    %699 = tpu.concatenate %696, %697, %698 in 0 : vector<32x128xf32>, vector<32x128xf32>, vector<32x128xf32> -> vector<96x128xf32>
    %cst_272 = arith.constant dense<0.000000e+00> : vector<8x128xf32>
    %700 = tpu.matmul %684, %699, %cst_272 {dimension_numbers = #tpu.dot_dimension_numbers<[1], [0], [0], [1], [0, 0, 1, 1], [], []>} : vector<8x96xf32>, vector<96x128xf32>, vector<8x128xf32> -> vector<8x128xf32>
    %701 = vector.broadcast %685 : vector<8x1xf32> to vector<8x128xf32>
    %702 = arith.addf %700, %701 : vector<8x128xf32>
    %703 = vector.extract_strided_slice %690 {offsets = [32, 0], sizes = [32, 128], strides = [1, 1]} : vector<64x128xf32> to vector<32x128xf32>
    %704 = vector.extract_strided_slice %683 {offsets = [32, 0], sizes = [32, 128], strides = [1, 1]} : vector<64x128xf32> to vector<32x128xf32>
    %705 = vector.extract_strided_slice %695 {offsets = [32, 0], sizes = [32, 128], strides = [1, 1]} : vector<64x128xf32> to vector<32x128xf32>
    %706 = tpu.concatenate %703, %704, %705 in 0 : vector<32x128xf32>, vector<32x128xf32>, vector<32x128xf32> -> vector<96x128xf32>
    %cst_273 = arith.constant dense<0.000000e+00> : vector<8x128xf32>
    %707 = tpu.matmul %684, %706, %cst_273 {dimension_numbers = #tpu.dot_dimension_numbers<[1], [0], [0], [1], [0, 0, 1, 1], [], []>} : vector<8x96xf32>, vector<96x128xf32>, vector<8x128xf32> -> vector<8x128xf32>
    %708 = vector.broadcast %685 : vector<8x1xf32> to vector<8x128xf32>
    %709 = arith.addf %707, %708 : vector<8x128xf32>
    %710 = tpu.concatenate %702, %709 in 0 : vector<8x128xf32>, vector<8x128xf32> -> vector<16x128xf32>
    %711 = vector.shape_cast %710 : vector<16x128xf32> to vector<2x8x128xf32>
    %c0_274 = arith.constant 0 : index
    %c0_275 = arith.constant 0 : index
    %c0_276 = arith.constant 0 : index
    %712 = vector.load %arg5[%c0_274, %c0_275, %c0_276] : memref<2x8x128xf32, #tpu.memory_space<vmem>>, vector<2x8x128xf32>
    tpu.vector_store %arg5[%c0_274, %c0_275, %c0_276], %711 {strides = array<i32>} : memref<2x8x128xf32, #tpu.memory_space<vmem>>, vector<2x8x128xf32>,
    return
  }
  func.func @transform_0(%arg0: i32) -> (i32, i32, i32) {
    %c0_i32 = arith.constant 0 : i32
    %c0_i32_0 = arith.constant 0 : i32
    %c0_i32_1 = arith.constant 0 : i32
    return %arg0, %c0_i32, %c0_i32_0 : i32, i32, i32
  }
  func.func @transform_1(%arg0: i32) -> (i32, i32) {
    %c0_i32 = arith.constant 0 : i32
    %c0_i32_0 = arith.constant 0 : i32
    %c0_i32_1 = arith.constant 0 : i32
    return %c0_i32, %c0_i32_0 : i32, i32
  }
  func.func @transform_2(%arg0: i32) -> (i32, i32, i32) {
    %c0_i32 = arith.constant 0 : i32
    %c0_i32_0 = arith.constant 0 : i32
    %c0_i32_1 = arith.constant 0 : i32
    %c0_i32_2 = arith.constant 0 : i32
    return %c0_i32, %c0_i32_0, %c0_i32_1 : i32, i32, i32
  }
  func.func @transform_3(%arg0: i32) -> (i32, i32, i32) {
    %c0_i32 = arith.constant 0 : i32
    %c0_i32_0 = arith.constant 0 : i32
    %c0_i32_1 = arith.constant 0 : i32
    %c0_i32_2 = arith.constant 0 : i32
    return %c0_i32, %c0_i32_0, %c0_i32_1 : i32, i32, i32
  }
  func.func @transform_4(%arg0: i32) -> (i32, i32, i32) {
    %c0_i32 = arith.constant 0 : i32
    %c0_i32_0 = arith.constant 0 : i32
    %c0_i32_1 = arith.constant 0 : i32
    return %arg0, %c0_i32, %c0_i32_0 : i32, i32, i32
  }
}

</mosaic_0001>

<bundles_post_ra>
// kernel: forward.1
= control target key start
LH: loop header
LB: loop body
LE: loop exit
PB: predicated region body
PF: predicated region fallthrough
CT: control target
= control target key end

     0   :  { %9 = vsyncpa [#allocation3], 0  ;;  %s10845_s0 = inlined_call_operand.vmem [shape: f32[2,8,128], index: 0, kind: input, shape index: {}]   ;;  %s10846_s1 = inlined_call_operand.hbm [shape: f32[648,192], index: 1, kind: input, shape index: {}]   ;;  %s10847_s2 = inlined_call_operand.hbm [shape: f32[16,64,32], index: 2, kind: input, shape index: {}]   ;;  %s10848_s3 = inlined_call_operand.hbm [shape: f32[32,64,16], index: 3, kind: input, shape index: {}]   ;;  %s10849_s4 = inlined_call_operand.vmem [shape: f32[2,8,128], index: 4, kind: output, shape index: {}]  }
   0x1   :  { %10 = vsyncpa [#allocation5], 0  ;;  %s7528_s15 = smov [#allocation4]  }
   0x2   :  { %s30_s16 = sshll.u32 %s7528_s15, 4  ;;  %s31_s16 = int_to_ptr.vmem [resolvable:$true] %s30_s16 }
   0x3   :  { %s7472_s17 = scalar_lea.vmem %s31_s16, 16384  ;;  %p7477_p1 = scmp.lt.s32.totalorder %s31_s16, %s31_s16 }
   0x4   :  { %p7473_p0 = scmp.ne.s32.totalorder %s31_s16, %s7472_s17  ;;  %p7478_p2 = scmp.lt.s32.totalorder %s7472_s17, %s7472_s17 }
   0x6   :  { %p7479_p3 = por %p7478_p2, %p7477_p1 }
   0x8   :  { %p7480_p4 = pnand %p7479_p3, %p7473_p0 }
   0xa   :  { %7483 = shalt.err (!%p7480_p4)
}
   0xb   :  { %s7529_s18 = smov 128   ;;  %s7530_s19 = smov 8  }
   0xc   :  { %36 = dma.hbm_to_vmem [thread:$0]  %s10847_s2, 16384, %s31_s16, [#allocation5], %s7529_s18, %s7529_s18, %s7530_s19  }
   0xd   :  { %s7531_s22 = smov [#allocation2]  }
   0xe   :  { %s18_s23 = sshll.u32 %s7531_s22, 4  ;;  %s19_s23 = int_to_ptr.vmem [resolvable:$true] %s18_s23 }
   0xf   :  { %s7492_s24 = scalar_lea.vmem %s19_s23, 20736  ;;  %p7497_p6 = scmp.lt.s32.totalorder %s19_s23, %s19_s23 }
  0x10   :  { %p7493_p5 = scmp.ne.s32.totalorder %s19_s23, %s7492_s24  ;;  %p7498_p7 = scmp.lt.s32.totalorder %s7492_s24, %s7492_s24 }
  0x12   :  { %p7499_p8 = por %p7498_p7, %p7497_p6 }
  0x14   :  { %p7500_p9 = pnand %p7499_p8, %p7493_p5 }
  0x16   :  { %7503 = shalt.err (!%p7500_p9)
}
  0x17   :  { %s7532_s25 = smov 256   ;;  %s7533_s26 = smov 16  }
  0x18   :  { %24 = dma.hbm_to_vmem [thread:$0]  %s10846_s1, 20736, %s19_s23, [#allocation3], %s7532_s25, %s7532_s25, %s7533_s26  }
  0x19   :  { %s7534_s29 = smov [#allocation6]  }
  0x1a   :  { %s42_s30 = sshll.u32 %s7534_s29, 4  ;;  %s43_s30 = int_to_ptr.vmem [resolvable:$true] %s42_s30 }
  0x1b   :  { %s7512_s2 = scalar_lea.vmem %s43_s30, 32768  ;;  %p7517_p11 = scmp.lt.s32.totalorder %s43_s30, %s43_s30 }
  0x1c   :  { %p7513_p10 = scmp.ne.s32.totalorder %s43_s30, %s7512_s2  ;;  %p7518_p12 = scmp.lt.s32.totalorder %s7512_s2, %s7512_s2 }
  0x1e   :  { %p7519_p13 = por %p7518_p12, %p7517_p11 }
  0x20   :  { %p7520_p0 = pnand %p7519_p13, %p7513_p10 }
  0x22   :  { %7523 = shalt.err (!%p7520_p0)
}
  0x23   :  { %48 = dma.hbm_to_vmem [thread:$0]  %s10848_s3, 32768, %s43_s30, [#allocation5], %s7529_s18, %s7529_s18, %s7530_s19  }
  0x24   :  { %7524 = dma.done.wait [#allocation3], 20736  }
  0x25   :  { %7525 = vsyncadd [#allocation3], 4294946560 }
  0x26   :  { %7526 = dma.done.wait [#allocation5], 49152  }
  0x27   :  { %7527 = vsyncadd [#allocation5], 4294918144  ;;  %vm109_vm0 = vcmask 195584   ;;  %v10868_v0 = vmov 0   ;;  %v64_v1 = vld [vmem:[%s10845_s0 + $0x8] sm:$0xff]  ;;  %v63_v2 = vld [vmem:[%s10845_s0] sm:$0xff]  ;;  %v58_v16 = vlaneseq }
  0x28   :  { %6750 = vset.pattern.permute.xlu0 %v10868_v0  ;;  %6751 = vset.pattern.permute.xlu1 %v10868_v0  ;;  %v65_v3 = vld [vmem:[#allocation2] sm:$0xff]  ;;  %s7536_s3 = smov 127   ;;  %s10914_s10 = smov 1   ;;  %v70_v5 = vld [vmem:[#allocation2 + $0x50] sm:$0xff]  ;;  %vm470_vm11 = vcmask 1047808   ;;  %vm633_vm12 = vcmask 785408  }
  0x29   :  { %83 = vrot.lane.b32.xlu1 %v64_v1, %s7536_s3  ;;  %81 = vrot.lane.b32.xlu0 %v63_v2, %s7536_s3  ;;  %v69_v4 = vld [vmem:[#allocation2 + $0x40] sm:$0xff]  ;;  %v72_v6 = vld [vmem:[#allocation2 + $0x70] sm:$0xff]  ;;  %v7634_v17 = vand.u32 127, %v58_v16  ;;  %s10918_s0 = smov 32   ;;  %s10921_s11 = smov 97   ;;  %vm873_vm14 = vcmask 261120  }
  0x2a   :  { %6236 = vmatprep.mubr.msk.f32.mxu0 %vm109_vm0, %v65_v3  ;;  %6248 = vmatprep.mubr.msk.f32.mxu1 %vm109_vm0, %v65_v3  ;;  %v71_v7 = vld [vmem:[#allocation2 + $0x60] sm:$0xff]  ;;  %v462_v9 = vld [vmem:[#allocation2 + $0x210] sm:$0xff]  ;;  %s7555_s12 = smov 125   ;;  %s7556_s13 = smov 123  }
  0x2b   :  { %v463_v8 = vld [vmem:[#allocation2 + $0x220] sm:$0xff]  ;;  %v464_v11 = vld [vmem:[#allocation2 + $0x230] sm:$0xff]  ;;  %10923 = vst [vmem:[#allocation9_spill] sm:$0xff] %v7634_v17  ;;  %vm61_vm1 = vcmp.ne.s32.totalorder %v7634_v17, 127  ;;  %vm60_vm2 = vcmp.ne.s32.totalorder %v7634_v17, 0  ;;  %vm62_vm13 = vcmp.ne.s32.totalorder %v7634_v17, 31 }
  0x2c   :  { %v465_v10 = vld [vmem:[#allocation2 + $0x240] sm:$0xff]  ;;  %v466_v13 = vld [vmem:[#allocation2 + $0x250] sm:$0xff]  ;;  %s7557_s14 = smov 121   ;;  %s7558_s15 = smov 119  }
  0x2d   :  { %75 = vrot.lane.b32.xlu1 %v64_v1, %s10914_s10  ;;  %73 = vrot.lane.b32.xlu0 %v63_v2, %s10914_s10  ;;  %v467_v12 = vld [vmem:[#allocation2 + $0x260] sm:$0xff]  ;;  %v468_v15 = vld [vmem:[#allocation2 + $0x270] sm:$0xff]  ;;  %s7559_s16 = smov 117   ;;  %s7560_s17 = smov 115  }
  0x2e   :  { %v469_v14 = vld [vmem:[#allocation2 + $0x280] sm:$0xff]  ;;  %v66_v22 = vld [vmem:[#allocation2 + $0x10] sm:$0xff]  ;;  %s7561_s18 = smov 113   ;;  %s7562_s19 = smov 111  }
  0x2f   :  { %v67_v23 = vld [vmem:[#allocation2 + $0x20] sm:$0xff]  ;;  %v307_v24 = vld [vmem:[#allocation2 + $0x170] sm:$0xff]  ;;  %s7563_s20 = smov 109   ;;  %s7564_s21 = smov 107  }
  0x30   :  { %v68_v25 = vld [vmem:[#allocation2 + $0x30] sm:$0xff]  ;;  %v306_v26 = vld [vmem:[#allocation2 + $0x160] sm:$0xff]  ;;  %s7565_s22 = smov 105   ;;  %s7566_s23 = smov 103  }
  0x31   :  { %91 = vperm.xlu0 %6750, %v69_v4   ;;  %96 = vperm.xlu1 %6751, %v70_v5   ;;  %v305_v27 = vld [vmem:[#allocation2 + $0x150] sm:$0xff]  ;;  %v304_v28 = vld [vmem:[#allocation2 + $0x140] sm:$0xff]  ;;  %s7567_s24 = smov 101   ;;  %s7568_s25 = smov 99  }
  0x32   :  { %v303_v29 = vld [vmem:[#allocation2 + $0x130] sm:$0xff]  ;;  %v302_v30 = vld [vmem:[#allocation2 + $0x120] sm:$0xff]  ;;  %s7569_s26 = smov 126   ;;  %s7570_s27 = smov 124  }
  0x33   :  { %v301_v31 = vld [vmem:[#allocation2 + $0x110] sm:$0xff]  ;;  %v300_v32 = vld [vmem:[#allocation2 + $0x100] sm:$0xff]  ;;  %s7571_s28 = smov 122   ;;  %s7572_s29 = smov 120  }
  0x34   :  { %v299_v33 = vld [vmem:[#allocation2 + $0xf0] sm:$0xff]  ;;  %v298_v34 = vld [vmem:[#allocation2 + $0xe0] sm:$0xff]  ;;  %s7573_s30 = smov 118   ;;  %s7574_s2 = smov 116  }
  0x35   :  { %106 = vperm.xlu0 %6750, %v72_v6   ;;  %101 = vperm.xlu1 %6751, %v71_v7   ;;  %v297_v35 = vld [vmem:[#allocation2 + $0xd0] sm:$0xff]  ;;  %v296_v36 = vld [vmem:[#allocation2 + $0xc0] sm:$0xff]  ;;  %s7575_s5 = smov 114   ;;  %s7576_s6 = smov 112  }
  0x36   :  { %v295_v37 = vld [vmem:[#allocation2 + $0xb0] sm:$0xff]  ;;  %v294_v38 = vld [vmem:[#allocation2 + $0xa0] sm:$0xff]  ;;  %s7577_s1 = smov 110   ;;  %s7578_s7 = smov 108  }
  0x37   :  { %v293_v39 = vld [vmem:[#allocation2 + $0x90] sm:$0xff]  ;;  %v292_v40 = vld [vmem:[#allocation2 + $0x80] sm:$0xff]  ;;  %s7579_s8 = smov 106   ;;  %s7580_s9 = smov 104  }
  0x38   :  { %v308_v61 = vld [vmem:[#allocation2 + $0x180] ss:$0 sm:$0xff]  ;;  %s7581_s10 = smov 102  }
  0x39   :  { %600 = vperm.xlu0 %6750, %v463_v8   ;;  %595 = vperm.xlu1 %6751, %v462_v9  }
  0x3d   :  { %610 = vperm.xlu0 %6750, %v465_v10   ;;  %605 = vperm.xlu1 %6751, %v464_v11  }
  0x41   :  { %620 = vperm.xlu0 %6750, %v467_v12   ;;  %615 = vperm.xlu1 %6751, %v466_v13  }
  0x45   :  { %630 = vperm.xlu0 %6750, %v469_v14   ;;  %625 = vperm.xlu1 %6751, %v468_v15  }
  0x9b   :  { %v84_v18 = vpop.permute.xlu1 %83  ;;  %v82_v19 = vpop.permute.xlu0 %81 }
  0x9c   :  { %6230 = vmatprep.subr.msk.mxu0 %vm61_vm1, %v82_v19  ;;  %6242 = vmatprep.subr.msk.mxu1 %vm61_vm1, %v84_v18 }
  0x9d   :  { %6231 = vmatpush3.msk.msra.mxu0 %vm61_vm1, %v82_v19  ;;  %6243 = vmatpush3.msk.msra.mxu1 %vm61_vm1, %v84_v18 }
  0x9e   :  { %6232 = vmatprep.subr.mxu0 %v63_v2  ;;  %6244 = vmatprep.subr.mxu1 %v64_v1 }
  0x9f   :  { %6245 = vmatpush3.msra.mxu1 %v64_v1  ;;  %v76_v20 = vpop.permute.xlu1 %75  ;;  %6233 = vmatpush3.msra.mxu0 %v63_v2  ;;  %v74_v21 = vpop.permute.xlu0 %73 }
  0xa0   :  { %6234 = vmatprep.subr.msk.mxu0 %vm60_vm2, %v74_v21  ;;  %6246 = vmatprep.subr.msk.mxu1 %vm60_vm2, %v76_v20 }
  0xa1   :  { %6235 = vmatpush3.msk.msra.mxu0 %vm60_vm2, %v74_v21  ;;  %6247 = vmatpush3.msk.msra.mxu1 %vm60_vm2, %v76_v20 }
  0xa2   :  { %6237 = vmatmul.mubr.msk.f32.vlgmr.msra.gmra.mxu0 %vm109_vm0, %v66_v22  ;;  %6249 = vmatmul.mubr.msk.f32.vlgmr.msra.gmra.mxu1 %vm109_vm0, %v66_v22 }
  0xa3   :  { %6239 = vmatprep.mubr.msk.f32.mxu0 %vm109_vm0, %v67_v23  ;;  %6251 = vmatprep.mubr.msk.f32.mxu1 %vm109_vm0, %v67_v23 }
  0xa4   :  { %6254 = vmatprep.subr.mxu0 %v307_v24 }
  0xa5   :  { %6255 = vmatpush3.msra.mxu0 %v307_v24 }
  0xa6   :  { %6240 = vmatmul.mubr.msk.f32.gmra.mxu0 %vm109_vm0, %v68_v25  ;;  %6252 = vmatmul.mubr.msk.f32.gmra.mxu1 %vm109_vm0, %v68_v25 }
  0xa7   :  { %6256 = vmatprep.subr.mxu0 %v306_v26 }
  0xa8   :  { %6257 = vmatpush3.msra.mxu0 %v306_v26 }
  0xa9   :  { %6258 = vmatprep.subr.mxu0 %v305_v27 }
  0xaa   :  { %6259 = vmatpush3.msra.mxu0 %v305_v27 }
  0xab   :  { %6260 = vmatprep.subr.mxu0 %v304_v28 }
  0xac   :  { %6261 = vmatpush3.msra.mxu0 %v304_v28  ;;  %v97_v41 = vpop.permute.xlu1 %96  ;;  %v92_v44 = vpop.permute.xlu0 %91 }
  0xad   :  { %6262 = vmatprep.subr.mxu0 %v303_v29 }
  0xae   :  { %6263 = vmatpush3.msra.mxu0 %v303_v29 }
  0xaf   :  { %6264 = vmatprep.subr.mxu0 %v302_v30 }
  0xb0   :  { %6265 = vmatpush3.msra.mxu0 %v302_v30  ;;  %v102_v50 = vpop.permute.xlu1 %101  ;;  %v107_v53 = vpop.permute.xlu0 %106 }
  0xb1   :  { %6266 = vmatprep.subr.mxu0 %v301_v31 }
  0xb2   :  { %6267 = vmatpush3.msra.mxu0 %v301_v31 }
  0xb3   :  { %6268 = vmatprep.subr.mxu0 %v300_v32 }
  0xb4   :  { %6269 = vmatpush3.msra.mxu0 %v300_v32 }
  0xb5   :  { %6270 = vmatprep.subr.mxu0 %v299_v33 }
  0xb6   :  { %6271 = vmatpush3.msra.mxu0 %v299_v33 }
  0xb7   :  { %6272 = vmatprep.subr.mxu0 %v298_v34 }
  0xb8   :  { %6273 = vmatpush3.msra.mxu0 %v298_v34 }
  0xb9   :  { %6274 = vmatprep.subr.mxu0 %v297_v35 }
  0xba   :  { %6275 = vmatpush3.msra.mxu0 %v297_v35 }
  0xbb   :  { %6276 = vmatprep.subr.mxu0 %v296_v36 }
  0xbc   :  { %6277 = vmatpush3.msra.mxu0 %v296_v36 }
  0xbd   :  { %6278 = vmatprep.subr.mxu0 %v295_v37 }
  0xbe   :  { %6279 = vmatpush3.msra.mxu0 %v295_v37 }
  0xbf   :  { %6280 = vmatprep.subr.mxu0 %v294_v38 }
  0xc0   :  { %6281 = vmatpush3.msra.mxu0 %v294_v38 }
  0xc1   :  { %6282 = vmatprep.subr.mxu0 %v293_v39 }
  0xc2   :  { %6283 = vmatpush3.msra.mxu0 %v293_v39 }
  0xc3   :  { %6284 = vmatprep.subr.mxu0 %v292_v40 }
  0xc4   :  { %6285 = vmatpush3.msra.mxu0 %v292_v40 }
 0x162   :  { %v6238_v42 = vpop.f32.mrf.mxu0  ;;  %v6250_v43 = vpop.f32.mrf.mxu1 }
 0x163   :  { %v194_v48 = vadd.f32 %v6238_v42, %v97_v41  ;;  %v279_v58 = vadd.f32 %v6250_v43, %v97_v41 }
 0x164   :  { %v188_v45 = vpop.f32.mrf.mxu0  ;;  %v273_v46 = vpop.f32.mrf.mxu1 }
 0x165   :  { %v189_v47 = vadd.f32 %v188_v45, %v92_v44  ;;  %v274_v56 = vadd.f32 %v273_v46, %v92_v44 }
 0x166   :  { %v6241_v49 = vpop.f32.mrf.mxu0  ;;  %v6253_v51 = vpop.f32.mrf.mxu1 }
 0x167   :  { %6286 = vmatprep.mubr.f32.mxu0 %v189_v47  ;;  %v204_v55 = vadd.f32 %v6241_v49, %v107_v53  ;;  %v289_v60 = vadd.f32 %v6253_v51, %v107_v53  ;;  %v7694_v49 = vpop.permute.xlu0 %600 }
 0x168   :  { %v198_v52 = vpop.f32.mrf.mxu0  ;;  %6287 = vmatmul.mubr.f32.vlgmr.msra.gmra.mxu0 %v194_v48  ;;  %v283_v57 = vpop.f32.mrf.mxu1 }
 0x169   :  { %v199_v54 = vadd.f32 %v198_v52, %v102_v50  ;;  %v284_v59 = vadd.f32 %v283_v57, %v102_v50  ;;  %v7692_v48 = vpop.permute.xlu1 %595 }
 0x16b   :  { %6289 = vmatprep.mubr.f32.mxu0 %v199_v54  ;;  %v7698_v51 = vpop.permute.xlu0 %610 }
 0x16c   :  { %6290 = vmatmul.mubr.f32.gmra.mxu0 %v204_v55 }
 0x16d   :  { %6292 = vmatprep.mubr.f32.mxu0 %v274_v56  ;;  %v7696_v50 = vpop.permute.xlu1 %605 }
 0x16f   :  { %v7702_v53 = vpop.permute.xlu0 %620 }
 0x170   :  { %6293 = vmatmul.mubr.f32.gmra.mxu0 %v279_v58 }
 0x171   :  { %6295 = vmatprep.mubr.f32.mxu0 %v284_v59  ;;  %v7700_v52 = vpop.permute.xlu1 %615 }
 0x173   :  { %v7706_v55 = vpop.permute.xlu0 %630 }
 0x174   :  { %6296 = vmatmul.mubr.f32.gmra.mxu0 %v289_v60 }
 0x175   :  { %v7704_v54 = vpop.permute.xlu1 %625 }
 0x228   :  { %v6288_v62 = vpop.f32.mrf.mxu0 }
 0x229   :  { %v381_v63 = vadd.f32 %v6288_v62, %v308_v61 }
 0x22a   :  { %v375_v1 = vpop.f32.mrf.mxu0 }
 0x22b   :  { %v424_v2 = vmul.f32 1.442695, %v381_v63  ;;  %v376_v3 = vadd.f32 %v375_v1, %v308_v61  ;;  %vm415_vm3 = vcmp.gt.f32.partialorder %v381_v63, 0.0 }
 0x22c   :  { %v6291_v4 = vpop.f32.mrf.mxu0 }
 0x22d   :  { %7009 = vpow2.f32 %v424_v2  ;;  %v422_v5 = vmul.f32 1.442695, %v376_v3  ;;  %v391_v6 = vadd.f32 %v6291_v4, %v308_v61  ;;  %vm414_vm4 = vcmp.gt.f32.partialorder %v376_v3, 0.0 }
 0x22e   :  { %v385_v7 = vpop.f32.mrf.mxu0 }
 0x22f   :  { %7011 = vpow2.f32 %v422_v5  ;;  %v428_v8 = vmul.f32 1.442695, %v391_v6  ;;  %v386_v9 = vadd.f32 %v385_v7, %v308_v61  ;;  %vm417_vm5 = vcmp.gt.f32.partialorder %v391_v6, 0.0 }
 0x230   :  { %v6294_v10 = vpop.f32.mrf.mxu0 }
 0x231   :  { %7013 = vpow2.f32 %v428_v8  ;;  %v426_v11 = vmul.f32 1.442695, %v386_v9  ;;  %v401_v12 = vadd.f32 %v6294_v10, %v308_v61  ;;  %vm416_vm6 = vcmp.gt.f32.partialorder %v386_v9, 0.0 }
 0x232   :  { %v395_v13 = vpop.f32.mrf.mxu0 }
 0x233   :  { %7015 = vpow2.f32 %v426_v11  ;;  %v432_v14 = vmul.f32 1.442695, %v401_v12  ;;  %v396_v15 = vadd.f32 %v395_v13, %v308_v61  ;;  %vm419_vm7 = vcmp.gt.f32.partialorder %v401_v12, 0.0 }
 0x234   :  { %v6297_v16 = vpop.f32.mrf.mxu0 }
 0x235   :  { %7017 = vpow2.f32 %v432_v14  ;;  %v430_v18 = vmul.f32 1.442695, %v396_v15  ;;  %v411_v19 = vadd.f32 %v6297_v16, %v308_v61  ;;  %vm418_vm8 = vcmp.gt.f32.partialorder %v396_v15, 0.0 }
 0x236   :  { %v405_v20 = vpop.f32.mrf.mxu0 }
 0x237   :  { %7019 = vpow2.f32 %v430_v18  ;;  %v436_v21 = vmul.f32 1.442695, %v411_v19  ;;  %v406_v22 = vadd.f32 %v405_v20, %v308_v61  ;;  %vm421_vm9 = vcmp.gt.f32.partialorder %v411_v19, 0.0 }
 0x239   :  { %7021 = vpow2.f32 %v436_v21  ;;  %v434_v23 = vmul.f32 1.442695, %v406_v22  ;;  %vm420_vm10 = vcmp.gt.f32.partialorder %v406_v22, 0.0 }
 0x23a   :  { %v7010_v24 = vpop.eup %7009 }
 0x23b   :  { %v5851_v25 = vadd.f32 -1.0, %v7010_v24  ;;  %7023 = vpow2.f32 %v434_v23 }
 0x23c   :  { %v7012_v26 = vpop.eup %7011 }
 0x23d   :  { %v7660_v27 = vsel %vm415_vm3, %v381_v63, %v5851_v25  ;;  %v5850_v28 = vadd.f32 -1.0, %v7012_v26 }
 0x23e   :  { %v7014_v29 = vpop.eup %7013  ;;  %474 = vrot.lane.b32.xlu1 %v7660_v27, %s10918_s0 }
 0x23f   :  { %v7664_v30 = vsel %vm414_vm4, %v376_v3, %v5850_v28  ;;  %v5853_v31 = vadd.f32 -1.0, %v7014_v29  ;;  %v871_v28 = vld [vmem:[#allocation2 + $0x2c0] sm:$0xff]  ;;  %v870_v29 = vld [vmem:[#allocation2 + $0x2b0] sm:$0xff] }
 0x240   :  { %v7016_v32 = vpop.eup %7015  ;;  %471 = vrot.lane.b32.xlu0 %v7664_v30, %s10918_s0  ;;  %6370 = vmatprep.subr.mxu0 %v871_v28 }
 0x241   :  { %v7668_v33 = vsel %vm417_vm5, %v391_v6, %v5853_v31  ;;  %v5852_v34 = vadd.f32 -1.0, %v7016_v32  ;;  %6371 = vmatpush3.msra.mxu0 %v871_v28  ;;  %v869_v31 = vld [vmem:[#allocation2 + $0x2a0] sm:$0xff] }
 0x242   :  { %v7018_v35 = vpop.eup %7017  ;;  %480 = vrot.lane.b32.xlu1 %v7668_v33, %s10918_s0  ;;  %6372 = vmatprep.subr.mxu0 %v870_v29 }
 0x243   :  { %v7672_v36 = vsel %vm416_vm6, %v386_v9, %v5852_v34  ;;  %v5855_v37 = vadd.f32 -1.0, %v7018_v35  ;;  %6373 = vmatpush3.msra.mxu0 %v870_v29  ;;  %v10854_v29 = vmov 2  }
 0x244   :  { %v7020_v38 = vpop.eup %7019  ;;  %477 = vrot.lane.b32.xlu0 %v7672_v36, %s10918_s0  ;;  %6374 = vmatprep.subr.mxu0 %v869_v31 }
 0x245   :  { %v7676_v39 = vsel %vm419_vm7, %v401_v12, %v5855_v37  ;;  %v5854_v40 = vadd.f32 -1.0, %v7020_v38  ;;  %6375 = vmatpush3.msra.mxu0 %v869_v31  ;;  %6753 = vset.pattern.permute.xlu1 %v10854_v29 }
 0x246   :  { %v7022_v41 = vpop.eup %7021  ;;  %486 = vrot.lane.b32.xlu1 %v7676_v39, %s10918_s0 }
 0x247   :  { %v7680_v42 = vsel %vm418_vm8, %v396_v15, %v5854_v40  ;;  %v5857_v43 = vadd.f32 -1.0, %v7022_v41 }
 0x248   :  { %v7024_v44 = vpop.eup %7023  ;;  %483 = vrot.lane.b32.xlu0 %v7680_v42, %s10918_s0 }
 0x249   :  { %v7684_v45 = vsel %vm421_vm9, %v411_v19, %v5857_v43  ;;  %v5856_v46 = vadd.f32 -1.0, %v7024_v44 }
 0x24a   :  { %492 = vrot.lane.b32.xlu1 %v7684_v45, %s10918_s0 }
 0x24b   :  { %v7688_v47 = vsel %vm420_vm10, %v406_v22, %v5856_v46  ;;  %v7753_v22 = vld [vmem:[#allocation2 + $0x190] sm:$0xff] }
 0x24c   :  { %489 = vrot.lane.b32.xlu0 %v7688_v47, %s10918_s0  ;;  %6322 = vmatprep.mubr.msk.f32.mxu1 %vm633_vm12, %v7753_v22 }
 0x2b0   :  { %v475_v56 = vpop.permute.xlu1 %474 }
 0x2b1   :  { %v476_v57 = vsel %vm470_vm11, %v475_v56, %v7660_v27 }
 0x2b2   :  { %497 = vrot.lane.b32.xlu1 %v476_v57, %s10918_s0  ;;  %v472_v58 = vpop.permute.xlu0 %471 }
 0x2b3   :  { %v473_v59 = vsel %vm470_vm11, %v472_v58, %v7664_v30  ;;  %v457_v58 = vld [vmem:[#allocation2 + $0x1c0] sm:$0xff] }
 0x2b4   :  { %v481_v60 = vpop.permute.xlu1 %480  ;;  %495 = vrot.lane.b32.xlu0 %v473_v59, %s10918_s0  ;;  %v458_v59 = vld [vmem:[#allocation2 + $0x1d0] sm:$0xff] }
 0x2b5   :  { %v482_v61 = vsel %vm470_vm11, %v481_v60, %v7668_v33  ;;  %v459_v60 = vld [vmem:[#allocation2 + $0x1e0] sm:$0xff] }
 0x2b6   :  { %501 = vrot.lane.b32.xlu1 %v482_v61, %s10918_s0  ;;  %v478_v62 = vpop.permute.xlu0 %477  ;;  %v460_v61 = vld [vmem:[#allocation2 + $0x1f0] sm:$0xff] }
 0x2b7   :  { %v479_v63 = vsel %vm470_vm11, %v478_v62, %v7672_v36  ;;  %v461_v62 = vld [vmem:[#allocation2 + $0x200] sm:$0xff] }
 0x2b8   :  { %v487_v1 = vpop.permute.xlu1 %486  ;;  %499 = vrot.lane.b32.xlu0 %v479_v63, %s10918_s0 }
 0x2b9   :  { %v488_v2 = vsel %vm470_vm11, %v487_v1, %v7676_v39 }
 0x2ba   :  { %505 = vrot.lane.b32.xlu1 %v488_v2, %s10918_s0  ;;  %v484_v3 = vpop.permute.xlu0 %483 }
 0x2bb   :  { %v485_v4 = vsel %vm470_vm11, %v484_v3, %v7680_v42 }
 0x2bc   :  { %v493_v5 = vpop.permute.xlu1 %492  ;;  %503 = vrot.lane.b32.xlu0 %v485_v4, %s10918_s0 }
 0x2bd   :  { %v494_v6 = vsel %vm470_vm11, %v493_v5, %v7684_v45 }
 0x2be   :  { %509 = vrot.lane.b32.xlu1 %v494_v6, %s10918_s0  ;;  %v490_v7 = vpop.permute.xlu0 %489 }
 0x2bf   :  { %v491_v8 = vsel %vm470_vm11, %v490_v7, %v7688_v47 }
 0x2c0   :  { %507 = vrot.lane.b32.xlu0 %v491_v8, %s10918_s0  ;;  %s7582_s0 = smov 100  }
 0x324   :  { %v498_v9 = vpop.permute.xlu1 %497 }
 0x325   :  { %v512_v10 = vsel %vm470_vm11, %v498_v9, %v7660_v27 }
 0x326   :  { %563 = vrot.lane.b32.xlu1 %v512_v10, %s7536_s3  ;;  %v496_v11 = vpop.permute.xlu0 %495 }
 0x327   :  { %v511_v12 = vsel %vm470_vm11, %v496_v11, %v7664_v30 }
 0x328   :  { %561 = vrot.lane.b32.xlu0 %v511_v12, %s7536_s3  ;;  %v502_v13 = vpop.permute.xlu1 %501 }
 0x329   :  { %v514_v15 = vsel %vm470_vm11, %v502_v13, %v7668_v33 }
 0x32a   :  { %529 = vrot.lane.b32.xlu1 %v512_v10, %s10921_s11  ;;  %v500_v14 = vpop.permute.xlu0 %499 }
 0x32b   :  { %v513_v16 = vsel %vm470_vm11, %v500_v14, %v7672_v36 }
 0x32c   :  { %527 = vrot.lane.b32.xlu0 %v511_v12, %s10921_s11  ;;  %v506_v18 = vpop.permute.xlu1 %505 }
 0x32d   :  { %v516_v20 = vsel %vm470_vm11, %v506_v18, %v7676_v39 }
 0x32e   :  { %567 = vrot.lane.b32.xlu1 %v514_v15, %s7536_s3  ;;  %v504_v19 = vpop.permute.xlu0 %503 }
 0x32f   :  { %v515_v21 = vsel %vm470_vm11, %v504_v19, %v7680_v42 }
 0x330   :  { %565 = vrot.lane.b32.xlu0 %v513_v16, %s7536_s3  ;;  %v510_v23 = vpop.permute.xlu1 %509 }
 0x331   :  { %v518_v25 = vsel %vm470_vm11, %v510_v23, %v7684_v45 }
 0x332   :  { %533 = vrot.lane.b32.xlu1 %v514_v15, %s10921_s11  ;;  %v508_v24 = vpop.permute.xlu0 %507 }
 0x333   :  { %v517_v26 = vsel %vm470_vm11, %v508_v24, %v7688_v47 }
 0x334   :  { %531 = vrot.lane.b32.xlu0 %v513_v16, %s10921_s11 }
 0x336   :  { %571 = vrot.lane.b32.xlu1 %v516_v20, %s7536_s3 }
 0x338   :  { %569 = vrot.lane.b32.xlu0 %v515_v21, %s7536_s3 }
 0x33a   :  { %537 = vrot.lane.b32.xlu1 %v516_v20, %s10921_s11 }
 0x33c   :  { %535 = vrot.lane.b32.xlu0 %v515_v21, %s10921_s11 }
 0x33e   :  { %575 = vrot.lane.b32.xlu1 %v518_v25, %s7536_s3 }
 0x340   :  { %573 = vrot.lane.b32.xlu0 %v517_v26, %s7536_s3 }
 0x342   :  { %541 = vrot.lane.b32.xlu1 %v518_v25, %s10921_s11 }
 0x344   :  { %539 = vrot.lane.b32.xlu0 %v517_v26, %s10921_s11 }
 0x398   :  { %v564_v32 = vpop.permute.xlu1 %563 }
 0x39a   :  { %v562_v34 = vpop.permute.xlu0 %561 }
 0x39c   :  { %v530_v35 = vpop.permute.xlu1 %529 }
 0x39e   :  { %v528_v37 = vpop.permute.xlu0 %527 }
 0x3a0   :  { %v568_v38 = vpop.permute.xlu1 %567 }
 0x3a1   :  { %6298 = vmatprep.subr.msk.mxu1 %vm62_vm13, %v568_v38 }
 0x3a2   :  { %6299 = vmatpush3.msk.msra.mxu1 %vm62_vm13, %v568_v38  ;;  %v566_v40 = vpop.permute.xlu0 %565 }
 0x3a3   :  { %6300 = vmatprep.subr.msk.mxu1 %vm62_vm13, %v566_v40 }
 0x3a4   :  { %6301 = vmatpush3.msk.msra.mxu1 %vm62_vm13, %v566_v40  ;;  %v534_v41 = vpop.permute.xlu1 %533  ;;  %v10870_v40 = vmov 3  }
 0x3a5   :  { %6302 = vmatprep.subr.msk.mxu1 %vm62_vm13, %v564_v32 }
 0x3a6   :  { %6303 = vmatpush3.msk.msra.mxu1 %vm62_vm13, %v564_v32  ;;  %v532_v43 = vpop.permute.xlu0 %531 }
 0x3a7   :  { %6304 = vmatprep.subr.msk.mxu1 %vm62_vm13, %v562_v34 }
 0x3a8   :  { %6305 = vmatpush3.msk.msra.mxu1 %vm62_vm13, %v562_v34  ;;  %v572_v44 = vpop.permute.xlu1 %571 }
 0x3a9   :  { %6306 = vmatprep.subr.mxu1 %v7668_v33 }
 0x3aa   :  { %6307 = vmatpush3.msra.mxu1 %v7668_v33  ;;  %v570_v46 = vpop.permute.xlu0 %569 }
 0x3ab   :  { %6308 = vmatprep.subr.mxu1 %v7672_v36 }
 0x3ac   :  { %6309 = vmatpush3.msra.mxu1 %v7672_v36  ;;  %v538_v56 = vpop.permute.xlu1 %537 }
 0x3ad   :  { %6310 = vmatprep.subr.mxu1 %v7660_v27 }
 0x3ae   :  { %6311 = vmatpush3.msra.mxu1 %v7660_v27  ;;  %v536_v33 = vpop.permute.xlu0 %535  ;;  %v455_v27 = vld [vmem:[#allocation2 + $0x1a0] sm:$0xff] }
 0x3af   :  { %6312 = vmatprep.subr.mxu1 %v7664_v30 }
 0x3b0   :  { %6313 = vmatpush3.msra.mxu1 %v7664_v30  ;;  %v456_v30 = vld [vmem:[#allocation2 + $0x1b0] sm:$0xff]  ;;  %v576_v36 = vpop.permute.xlu1 %575 }
 0x3b1   :  { %6314 = vmatprep.subr.msk.mxu1 %vm60_vm2, %v534_v41 }
 0x3b2   :  { %6315 = vmatpush3.msk.msra.mxu1 %vm60_vm2, %v534_v41  ;;  %v574_v57 = vpop.permute.xlu0 %573  ;;  %v10852_v41 = vmov 1  }
 0x3b3   :  { %6316 = vmatprep.subr.msk.mxu1 %vm60_vm2, %v532_v43 }
 0x3b4   :  { %6317 = vmatpush3.msk.msra.mxu1 %vm60_vm2, %v532_v43  ;;  %v542_v63 = vpop.permute.xlu1 %541  ;;  %v10850_v43 = vmov 4  }
 0x3b5   :  { %6318 = vmatprep.subr.msk.mxu1 %vm60_vm2, %v530_v35 }
 0x3b6   :  { %6319 = vmatpush3.msk.msra.mxu1 %vm60_vm2, %v530_v35 }
 0x3b7   :  { %6320 = vmatprep.subr.msk.mxu1 %vm60_vm2, %v528_v37 }
 0x3b8   :  { %6321 = vmatpush3.msk.msra.mxu1 %vm60_vm2, %v528_v37 }
 0x3b9   :  { %6323 = vmatmul.mubr.msk.f32.vlgmr.msra.gmra.mxu1 %vm633_vm12, %v455_v27  ;;  %6334 = vmatprep.subr.msk.mxu1 %vm62_vm13, %v576_v36 }
 0x3ba   :  { %6335 = vmatpush3.msk.msra.mxu1 %vm62_vm13, %v576_v36  ;;  %6325 = vmatprep.mubr.msk.f32.mxu1 %vm633_vm12, %v456_v30  ;;  %v10880_v36 = vmov 7  }
 0x3bb   :  { %6336 = vmatprep.subr.msk.mxu1 %vm62_vm13, %v574_v57 }
 0x3bc   :  { %6337 = vmatpush3.msk.msra.mxu1 %vm62_vm13, %v574_v57 }
 0x3bd   :  { %6326 = vmatmul.mubr.msk.f32.gmra.mxu1 %vm633_vm12, %v457_v58  ;;  %6338 = vmatprep.subr.msk.mxu1 %vm62_vm13, %v572_v44 }
 0x3be   :  { %6339 = vmatpush3.msk.msra.mxu1 %vm62_vm13, %v572_v44  ;;  %6328 = vmatprep.mubr.msk.f32.mxu1 %vm633_vm12, %v458_v59  ;;  %v10876_v44 = vmov 5  }
 0x3bf   :  { %6340 = vmatprep.subr.msk.mxu1 %vm62_vm13, %v570_v46 }
 0x3c0   :  { %6341 = vmatpush3.msk.msra.mxu1 %vm62_vm13, %v570_v46 }
 0x3c1   :  { %6329 = vmatmul.mubr.msk.f32.gmra.mxu1 %vm633_vm12, %v459_v60  ;;  %6342 = vmatprep.subr.mxu1 %v7684_v45 }
 0x3c2   :  { %6343 = vmatpush3.msra.mxu1 %v7684_v45  ;;  %6331 = vmatprep.mubr.msk.f32.mxu1 %vm633_vm12, %v460_v61  ;;  %v540_v45 = vpop.permute.xlu0 %539 }
 0x3c3   :  { %6344 = vmatprep.subr.mxu1 %v7688_v47 }
 0x3c4   :  { %6345 = vmatpush3.msra.mxu1 %v7688_v47 }
 0x3c5   :  { %6332 = vmatmul.mubr.msk.f32.gmra.mxu1 %vm633_vm12, %v461_v62  ;;  %6346 = vmatprep.subr.mxu1 %v7676_v39 }
 0x3c6   :  { %6347 = vmatpush3.msra.mxu1 %v7676_v39  ;;  %6358 = vmatprep.mubr.msk.f32.mxu1 %vm633_vm12, %v7753_v22  ;;  %v868_v39 = vld [vmem:[#allocation2 + $0x290] sm:$0xff] }
 0x3c7   :  { %6348 = vmatprep.subr.mxu1 %v7680_v42  ;;  %6376 = vmatprep.subr.mxu0 %v868_v39 }
 0x3c8   :  { %6349 = vmatpush3.msra.mxu1 %v7680_v42  ;;  %6377 = vmatpush3.msra.mxu0 %v868_v39 }
 0x3c9   :  { %6350 = vmatprep.subr.msk.mxu1 %vm60_vm2, %v542_v63 }
 0x3ca   :  { %6351 = vmatpush3.msk.msra.mxu1 %vm60_vm2, %v542_v63  ;;  %v10882_v63 = vmov 12  }
 0x3cb   :  { %6352 = vmatprep.subr.msk.mxu1 %vm60_vm2, %v540_v45 }
 0x3cc   :  { %6353 = vmatpush3.msk.msra.mxu1 %vm60_vm2, %v540_v45  ;;  %v10862_v45 = vmov 13  }
 0x3cd   :  { %6354 = vmatprep.subr.msk.mxu1 %vm60_vm2, %v538_v56 }
 0x3ce   :  { %6355 = vmatpush3.msk.msra.mxu1 %vm60_vm2, %v538_v56  ;;  %v10860_v56 = vmov 6  }
 0x3cf   :  { %6356 = vmatprep.subr.msk.mxu1 %vm60_vm2, %v536_v33 }
 0x3d0   :  { %6357 = vmatpush3.msk.msra.mxu1 %vm60_vm2, %v536_v33  ;;  %v10858_v33 = vmov 11  }
 0x3d1   :  { %6359 = vmatmul.mubr.msk.f32.vlgmr.msra.gmra.mxu1 %vm633_vm12, %v455_v27 }
 0x3d2   :  { %6361 = vmatprep.mubr.msk.f32.mxu1 %vm633_vm12, %v456_v30 }
 0x3d5   :  { %6362 = vmatmul.mubr.msk.f32.gmra.mxu1 %vm633_vm12, %v457_v58  ;;  %v10866_v58 = vmov 8  }
 0x3d6   :  { %6364 = vmatprep.mubr.msk.f32.mxu1 %vm633_vm12, %v458_v59 }
 0x3d9   :  { %6365 = vmatmul.mubr.msk.f32.gmra.mxu1 %vm633_vm12, %v459_v60  ;;  %v10872_v60 = vmov 9  }
 0x3da   :  { %6367 = vmatprep.mubr.msk.f32.mxu1 %vm633_vm12, %v460_v61 }
 0x3dd   :  { %6368 = vmatmul.mubr.msk.f32.gmra.mxu1 %vm633_vm12, %v461_v62  ;;  %v10878_v62 = vmov 10  }
 0x479   :  { %v6324_v42 = vpop.f32.mrf.mxu1 }
 0x47a   :  { %v730_v2 = vadd.f32 %v6324_v42, %v7694_v49  ;;  %v10864_v42 = vmov 14  }
 0x47b   :  { %v724_v47 = vpop.f32.mrf.mxu1 }
 0x47c   :  { %v725_v1 = vadd.f32 %v724_v47, %v7692_v48  ;;  %v10856_v47 = vmov 15  }
 0x47d   :  { %v6327_v3 = vpop.f32.mrf.mxu1 }
 0x47e   :  { %6378 = vmatprep.mubr.msk.f32.mxu0 %vm873_vm14, %v725_v1  ;;  %v740_v6 = vadd.f32 %v6327_v3, %v7698_v51 }
 0x47f   :  { %v734_v4 = vpop.f32.mrf.mxu1  ;;  %6379 = vmatmul.mubr.msk.f32.vlgmr.msra.gmra.mxu0 %vm873_vm14, %v730_v2 }
 0x480   :  { %v735_v5 = vadd.f32 %v734_v4, %v7696_v50 }
 0x481   :  { %v6330_v7 = vpop.f32.mrf.mxu1 }
 0x482   :  { %6381 = vmatprep.mubr.msk.f32.mxu0 %vm873_vm14, %v735_v5  ;;  %v750_v10 = vadd.f32 %v6330_v7, %v7702_v53 }
 0x483   :  { %v744_v8 = vpop.f32.mrf.mxu1  ;;  %6382 = vmatmul.mubr.msk.f32.gmra.mxu0 %vm873_vm14, %v740_v6 }
 0x484   :  { %v745_v9 = vadd.f32 %v744_v8, %v7700_v52 }
 0x485   :  { %v6333_v11 = vpop.f32.mrf.mxu1 }
 0x486   :  { %6384 = vmatprep.mubr.msk.f32.mxu0 %vm873_vm14, %v745_v9  ;;  %v760_v14 = vadd.f32 %v6333_v11, %v7706_v55 }
 0x487   :  { %v754_v12 = vpop.f32.mrf.mxu1  ;;  %6385 = vmatmul.mubr.msk.f32.gmra.mxu0 %vm873_vm14, %v750_v10 }
 0x488   :  { %v755_v13 = vadd.f32 %v754_v12, %v7704_v54 }
 0x48a   :  { %6387 = vmatprep.mubr.msk.f32.mxu0 %vm873_vm14, %v755_v13 }
 0x48b   :  { %6388 = vmatmul.mubr.msk.f32.gmra.mxu0 %vm873_vm14, %v760_v14 }
 0x491   :  { %v6360_v15 = vpop.f32.mrf.mxu1 }
 0x492   :  { %v835_v19 = vadd.f32 %v6360_v15, %v7694_v49 }
 0x493   :  { %v829_v16 = vpop.f32.mrf.mxu1 }
 0x494   :  { %v830_v18 = vadd.f32 %v829_v16, %v7692_v48 }
 0x495   :  { %v6363_v20 = vpop.f32.mrf.mxu1 }
 0x496   :  { %6390 = vmatprep.mubr.msk.f32.mxu0 %vm873_vm14, %v830_v18  ;;  %v845_v23 = vadd.f32 %v6363_v20, %v7698_v51 }
 0x497   :  { %v839_v21 = vpop.f32.mrf.mxu1  ;;  %6391 = vmatmul.mubr.msk.f32.gmra.mxu0 %vm873_vm14, %v835_v19 }
 0x498   :  { %v840_v22 = vadd.f32 %v839_v21, %v7696_v50 }
 0x499   :  { %v6366_v24 = vpop.f32.mrf.mxu1 }
 0x49a   :  { %6393 = vmatprep.mubr.msk.f32.mxu0 %vm873_vm14, %v840_v22  ;;  %v855_v49 = vadd.f32 %v6366_v24, %v7702_v53 }
 0x49b   :  { %v849_v25 = vpop.f32.mrf.mxu1  ;;  %6394 = vmatmul.mubr.msk.f32.gmra.mxu0 %vm873_vm14, %v845_v23 }
 0x49c   :  { %v850_v48 = vadd.f32 %v849_v25, %v7700_v52  ;;  %v7898_v52 = vld [vmem:[#allocation2 + $0x2d0] ss:$0 sm:$0xff] }
 0x49d   :  { %v6369_v26 = vpop.f32.mrf.mxu1 }
 0x49e   :  { %6396 = vmatprep.mubr.msk.f32.mxu0 %vm873_vm14, %v850_v48  ;;  %v865_v51 = vadd.f32 %v6369_v26, %v7706_v55 }
 0x49f   :  { %v859_v28 = vpop.f32.mrf.mxu1  ;;  %6397 = vmatmul.mubr.msk.f32.gmra.mxu0 %vm873_vm14, %v855_v49 }
 0x4a0   :  { %v860_v50 = vadd.f32 %v859_v28, %v7704_v54 }
 0x4a2   :  { %6399 = vmatprep.mubr.msk.f32.mxu0 %vm873_vm14, %v860_v50 }
 0x4a3   :  { %6400 = vmatmul.mubr.msk.f32.gmra.mxu0 %vm873_vm14, %v865_v51 }
 0x53f   :  { %v6380_v53 = vpop.f32.mrf.mxu0 }
 0x540   :  { %v994_v31 = vadd.f32 %v6380_v53, %v7898_v52 }
 0x541   :  { %v988_v34 = vpop.f32.mrf.mxu0 }
 0x542   :  { %v1085_v32 = vmul.f32 1.442695, %v994_v31  ;;  %v989_v35 = vadd.f32 %v988_v34, %v7898_v52  ;;  %vm1068_vm15 = vcmp.gt.f32.partialorder %v994_v31, 0.0 }
 0x543   :  { %v6383_v57 = vpop.f32.mrf.mxu0 }
 0x544   :  { %7025 = vpow2.f32 %v1085_v32  ;;  %v1083_v54 = vmul.f32 1.442695, %v989_v35  ;;  %vm1067_vm0 = vcmp.gt.f32.partialorder %v989_v35, 0.0  ;;  %v1004_v59 = vadd.f32 %v6383_v57, %v7898_v52 }
 0x545   :  { %v998_v2 = vpop.f32.mrf.mxu0 }
 0x546   :  { %7027 = vpow2.f32 %v1083_v54  ;;  %v1089_v61 = vmul.f32 1.442695, %v1004_v59  ;;  %vm1070_vm3 = vcmp.gt.f32.partialorder %v1004_v59, 0.0  ;;  %v999_v4 = vadd.f32 %v998_v2, %v7898_v52 }
 0x547   :  { %v6386_v8 = vpop.f32.mrf.mxu0 }
 0x548   :  { %7029 = vpow2.f32 %v1089_v61  ;;  %v1087_v5 = vmul.f32 1.442695, %v999_v4  ;;  %vm1069_vm4 = vcmp.gt.f32.partialorder %v999_v4, 0.0  ;;  %v1014_v10 = vadd.f32 %v6386_v8, %v7898_v52 }
 0x549   :  { %v1008_v15 = vpop.f32.mrf.mxu0 }
 0x54a   :  { %7031 = vpow2.f32 %v1087_v5  ;;  %v1093_v11 = vmul.f32 1.442695, %v1014_v10  ;;  %vm1072_vm5 = vcmp.gt.f32.partialorder %v1014_v10, 0.0  ;;  %v1009_v16 = vadd.f32 %v1008_v15, %v7898_v52 }
 0x54b   :  { %v6389_v21 = vpop.f32.mrf.mxu0 }
 0x54c   :  { %7033 = vpow2.f32 %v1093_v11  ;;  %v1091_v19 = vmul.f32 1.442695, %v1009_v16  ;;  %v1024_v23 = vadd.f32 %v6389_v21, %v7898_v52  ;;  %vm1071_vm6 = vcmp.gt.f32.partialorder %v1009_v16, 0.0 }
 0x54d   :  { %v1018_v49 = vpop.f32.mrf.mxu0 }
 0x54e   :  { %7035 = vpow2.f32 %v1091_v19  ;;  %v1097_v25 = vmul.f32 1.442695, %v1024_v23  ;;  %v1019_v50 = vadd.f32 %v1018_v49, %v7898_v52  ;;  %vm1074_vm7 = vcmp.gt.f32.partialorder %v1024_v23, 0.0 }
 0x550   :  { %7037 = vpow2.f32 %v1097_v25  ;;  %vm1073_vm8 = vcmp.gt.f32.partialorder %v1019_v50, 0.0 }
 0x551   :  { %v7026_v37 = vpop.eup %7025 }
 0x552   :  { %v5907_v55 = vadd.f32 -1.0, %v7026_v37 }
 0x553   :  { %v7028_v46 = vpop.eup %7027 }
 0x554   :  { %v7902_v38 = vsel %vm1068_vm15, %v994_v31, %v5907_v55  ;;  %v5906_v27 = vadd.f32 -1.0, %v7028_v46  ;;  %v1095_v31 = vmul.f32 1.442695, %v1019_v50 }
 0x555   :  { %1354 = vperm.xlu1 %6753, %v7902_v38   ;;  %1162 = vperm.xlu0 %6750, %v7902_v38   ;;  %v7030_v39 = vpop.eup %7029 }
 0x556   :  { %v7918_v30 = vsel %vm1067_vm0, %v989_v35, %v5906_v27  ;;  %v5909_v1 = vadd.f32 -1.0, %v7030_v39  ;;  %7039 = vpow2.f32 %v1095_v31 }
 0x557   :  { %v7032_v6 = vpop.eup %7031 }
 0x558   :  { %v7949_v3 = vsel %vm1070_vm3, %v1004_v59, %v5909_v1  ;;  %v5908_v7 = vadd.f32 -1.0, %v7032_v6 }
 0x559   :  { %6754 = vset.pattern.permute.xlu1 %v10870_v40  ;;  %6752 = vset.pattern.permute.xlu0 %v10852_v41  ;;  %v7034_v12 = vpop.eup %7033 }
 0x55a   :  { %1459 = vperm.xlu1 %6754, %v7902_v38   ;;  %1265 = vperm.xlu0 %6752, %v7902_v38   ;;  %v7976_v9 = vsel %vm1069_vm4, %v999_v4, %v5908_v7  ;;  %v5911_v13 = vadd.f32 -1.0, %v7034_v12 }
 0x55b   :  { %v7036_v48 = vpop.eup %7035 }
 0x55c   :  { %v8003_v14 = vsel %vm1072_vm5, %v1014_v10, %v5911_v13  ;;  %v5910_v28 = vadd.f32 -1.0, %v7036_v48 }
 0x55d   :  { %v7038_v34 = vpop.eup %7037 }
 0x55e   :  { %6755 = vset.pattern.permute.xlu1 %v10850_v43  ;;  %6756 = vset.pattern.permute.xlu0 %v10876_v44  ;;  %v8048_v53 = vsel %vm1071_vm6, %v1009_v16, %v5910_v28  ;;  %v5913_v54 = vadd.f32 -1.0, %v7038_v34 }
 0x55f   :  { %1564 = vperm.xlu1 %6755, %v7902_v38   ;;  %1669 = vperm.xlu0 %6756, %v7902_v38  }
 0x560   :  { %v8068_v55 = vsel %vm1074_vm7, %v1024_v23, %v5913_v54  ;;  %vm4511_vm7 = vcmask 130048  }
 0x563   :  { %6757 = vset.pattern.permute.xlu1 %v10860_v56  ;;  %6762 = vset.pattern.permute.xlu0 %v10858_v33 }
 0x564   :  { %1774 = vperm.xlu1 %6757, %v7902_v38   ;;  %2299 = vperm.xlu0 %6762, %v7902_v38  }
 0x568   :  { %6758 = vset.pattern.permute.xlu1 %v10880_v36  ;;  %6770 = vset.pattern.permute.xlu0 %v10870_v40 }
 0x569   :  { %1879 = vperm.xlu1 %6758, %v7902_v38   ;;  %1455 = vperm.xlu0 %6770, %v7918_v30  }
 0x56d   :  { %6759 = vset.pattern.permute.xlu1 %v10866_v58  ;;  %6771 = vset.pattern.permute.xlu0 %v10850_v43 }
 0x56e   :  { %1984 = vperm.xlu1 %6759, %v7902_v38   ;;  %1560 = vperm.xlu0 %6771, %v7918_v30  }
 0x572   :  { %6760 = vset.pattern.permute.xlu1 %v10872_v60  ;;  %6774 = vset.pattern.permute.xlu0 %v10880_v36 }
 0x573   :  { %2089 = vperm.xlu1 %6760, %v7902_v38   ;;  %1875 = vperm.xlu0 %6774, %v7918_v30  }
 0x577   :  { %6761 = vset.pattern.permute.xlu1 %v10878_v62  ;;  %6776 = vset.pattern.permute.xlu0 %v10872_v60 }
 0x578   :  { %2194 = vperm.xlu1 %6761, %v7902_v38   ;;  %2085 = vperm.xlu0 %6776, %v7918_v30  }
 0x57c   :  { %6763 = vset.pattern.permute.xlu1 %v10882_v63  ;;  %6777 = vset.pattern.permute.xlu0 %v10878_v62 }
 0x57d   :  { %2404 = vperm.xlu1 %6763, %v7902_v38   ;;  %2190 = vperm.xlu0 %6777, %v7918_v30  }
 0x581   :  { %6764 = vset.pattern.permute.xlu1 %v10862_v45  ;;  %6780 = vset.pattern.permute.xlu0 %v10862_v45 }
 0x582   :  { %2509 = vperm.xlu1 %6764, %v7902_v38   ;;  %2505 = vperm.xlu0 %6780, %v7918_v30  }
 0x586   :  { %6765 = vset.pattern.permute.xlu1 %v10864_v42  ;;  %6782 = vset.pattern.permute.xlu0 %v10856_v47 }
 0x587   :  { %2614 = vperm.xlu1 %6765, %v7902_v38   ;;  %2715 = vperm.xlu0 %6782, %v7918_v30  }
 0x58b   :  { %6766 = vset.pattern.permute.xlu1 %v10856_v47  ;;  %6785 = vset.pattern.permute.xlu0 %v10854_v29 }
 0x58c   :  { %2719 = vperm.xlu1 %6766, %v7902_v38   ;;  %1362 = vperm.xlu0 %6785, %v7949_v3   ;;  %v7040_v38 = vpop.eup %7039 }
 0x58d   :  { %v5912_v27 = vadd.f32 -1.0, %v7040_v38 }
 0x58f   :  { %v8082_v59 = vsel %vm1073_vm8, %v1019_v50, %v5912_v27  ;;  %vm4977_vm8 = vcmask 523264  }
 0x590   :  { %6767 = vset.pattern.permute.xlu1 %v10868_v0  ;;  %6787 = vset.pattern.permute.xlu0 %v10850_v43 }
 0x591   :  { %1572 = vperm.xlu0 %6787, %v7949_v3   ;;  %1157 = vperm.xlu1 %6767, %v7918_v30  }
 0x595   :  { %6790 = vset.pattern.permute.xlu0 %v10880_v36  ;;  %6768 = vset.pattern.permute.xlu1 %v10852_v41 }
 0x596   :  { %1887 = vperm.xlu0 %6790, %v7949_v3   ;;  %1261 = vperm.xlu1 %6768, %v7918_v30  }
 0x59a   :  { %6791 = vset.pattern.permute.xlu0 %v10866_v58  ;;  %6769 = vset.pattern.permute.xlu1 %v10854_v29 }
 0x59b   :  { %1992 = vperm.xlu0 %6791, %v7949_v3   ;;  %1350 = vperm.xlu1 %6769, %v7918_v30  }
 0x59f   :  { %6793 = vset.pattern.permute.xlu0 %v10878_v62  ;;  %6772 = vset.pattern.permute.xlu1 %v10876_v44 }
 0x5a0   :  { %2202 = vperm.xlu0 %6793, %v7949_v3   ;;  %1665 = vperm.xlu1 %6772, %v7918_v30  }
 0x5a4   :  { %6797 = vset.pattern.permute.xlu0 %v10864_v42  ;;  %6773 = vset.pattern.permute.xlu1 %v10860_v56 }
 0x5a5   :  { %2622 = vperm.xlu0 %6797, %v7949_v3   ;;  %1770 = vperm.xlu1 %6773, %v7918_v30  }
 0x5a9   :  { %6800 = vset.pattern.permute.xlu0 %v10852_v41  ;;  %6775 = vset.pattern.permute.xlu1 %v10866_v58 }
 0x5aa   :  { %1269 = vperm.xlu0 %6800, %v7976_v9   ;;  %1980 = vperm.xlu1 %6775, %v7918_v30  }
 0x5ae   :  { %6804 = vset.pattern.permute.xlu0 %v10876_v44  ;;  %6778 = vset.pattern.permute.xlu1 %v10858_v33 }
 0x5af   :  { %1673 = vperm.xlu0 %6804, %v7976_v9   ;;  %2295 = vperm.xlu1 %6778, %v7918_v30  }
 0x5b3   :  { %6806 = vset.pattern.permute.xlu0 %v10880_v36  ;;  %6779 = vset.pattern.permute.xlu1 %v10882_v63 }
 0x5b4   :  { %1883 = vperm.xlu0 %6806, %v7976_v9   ;;  %2400 = vperm.xlu1 %6779, %v7918_v30  }
 0x5b8   :  { %6810 = vset.pattern.permute.xlu0 %v10858_v33  ;;  %6781 = vset.pattern.permute.xlu1 %v10864_v42 }
 0x5b9   :  { %2303 = vperm.xlu0 %6810, %v7976_v9   ;;  %2610 = vperm.xlu1 %6781, %v7918_v30   ;;  %v6392_v30 = vpop.f32.mrf.mxu0 }
 0x5ba   :  { %v1034_v61 = vadd.f32 %v6392_v30, %v7898_v52 }
 0x5bc   :  { %v1101_v1 = vmul.f32 1.442695, %v1034_v61  ;;  %vm1076_vm9 = vcmp.gt.f32.partialorder %v1034_v61, 0.0 }
 0x5bd   :  { %6812 = vset.pattern.permute.xlu0 %v10862_v45  ;;  %6783 = vset.pattern.permute.xlu1 %v10868_v0 }
 0x5be   :  { %2513 = vperm.xlu0 %6812, %v7976_v9   ;;  %1172 = vperm.xlu1 %6783, %v7949_v3   ;;  %7041 = vpow2.f32 %v1101_v1 }
 0x5c2   :  { %6813 = vset.pattern.permute.xlu0 %v10864_v42  ;;  %6784 = vset.pattern.permute.xlu1 %v10852_v41 }
 0x5c3   :  { %2618 = vperm.xlu0 %6813, %v7976_v9   ;;  %1273 = vperm.xlu1 %6784, %v7949_v3  }
 0x5c7   :  { %6816 = vset.pattern.permute.xlu0 %v10852_v41  ;;  %6786 = vset.pattern.permute.xlu1 %v10870_v40 }
 0x5c8   :  { %1281 = vperm.xlu0 %6816, %v8003_v14   ;;  %1467 = vperm.xlu1 %6786, %v7949_v3  }
 0x5cb   :  { %v7042_v5 = vpop.eup %7041 }
 0x5cc   :  { %6820 = vset.pattern.permute.xlu0 %v10876_v44  ;;  %6788 = vset.pattern.permute.xlu1 %v10876_v44  ;;  %v5915_v7 = vadd.f32 -1.0, %v7042_v5 }
 0x5cd   :  { %1685 = vperm.xlu0 %6820, %v8003_v14   ;;  %1677 = vperm.xlu1 %6788, %v7949_v3  }
 0x5ce   :  { %v8121_v10 = vsel %vm1076_vm9, %v1034_v61, %v5915_v7 }
 0x5d0   :  { %v8014_v18 = vpop.permute.xlu1 %1354  ;;  %v8129_v12 = vpop.permute.xlu0 %1162 }
 0x5d1   :  { %6822 = vset.pattern.permute.xlu0 %v10880_v36  ;;  %6789 = vset.pattern.permute.xlu1 %v10860_v56 }
 0x5d2   :  { %1895 = vperm.xlu0 %6822, %v8003_v14   ;;  %1782 = vperm.xlu1 %6789, %v7949_v3  }
 0x5d5   :  { %v8020_v20 = vpop.permute.xlu1 %1459  ;;  %v8139_v15 = vpop.permute.xlu0 %1265 }
 0x5d6   :  { %6823 = vset.pattern.permute.xlu0 %v10866_v58  ;;  %6792 = vset.pattern.permute.xlu1 %v10872_v60 }
 0x5d7   :  { %2000 = vperm.xlu0 %6823, %v8003_v14   ;;  %2097 = vperm.xlu1 %6792, %v7949_v3  }
 0x5da   :  { %v8026_v22 = vpop.permute.xlu1 %1564  ;;  %v8150_v23 = vpop.permute.xlu0 %1669 }
 0x5db   :  { %6826 = vset.pattern.permute.xlu0 %v10858_v33  ;;  %6794 = vset.pattern.permute.xlu1 %v10858_v33 }
 0x5dc   :  { %2315 = vperm.xlu0 %6826, %v8003_v14   ;;  %2307 = vperm.xlu1 %6794, %v7949_v3  }
 0x5df   :  { %v8033_v24 = vpop.permute.xlu1 %1774  ;;  %v8158_v48 = vpop.permute.xlu0 %2299 }
 0x5e0   :  { %6828 = vset.pattern.permute.xlu0 %v10862_v45  ;;  %6795 = vset.pattern.permute.xlu1 %v10882_v63 }
 0x5e1   :  { %2525 = vperm.xlu0 %6828, %v8003_v14   ;;  %2412 = vperm.xlu1 %6795, %v7949_v3  }
 0x5e4   :  { %v8039_v26 = vpop.permute.xlu1 %1879  ;;  %v8166_v28 = vpop.permute.xlu0 %1455 }
 0x5e5   :  { %6830 = vset.pattern.permute.xlu0 %v10856_v47  ;;  %6796 = vset.pattern.permute.xlu1 %v10862_v45 }
 0x5e6   :  { %2735 = vperm.xlu0 %6830, %v8003_v14   ;;  %2517 = vperm.xlu1 %6796, %v7949_v3  }
 0x5e9   :  { %v8046_v51 = vpop.permute.xlu1 %1984  ;;  %v8176_v54 = vpop.permute.xlu0 %1560 }
 0x5ea   :  { %6832 = vset.pattern.permute.xlu0 %v10852_v41  ;;  %6798 = vset.pattern.permute.xlu1 %v10856_v47 }
 0x5eb   :  { %1277 = vperm.xlu0 %6832, %v8048_v53   ;;  %2727 = vperm.xlu1 %6798, %v7949_v3  }
 0x5ee   :  { %v8054_v32 = vpop.permute.xlu1 %2089  ;;  %v8188_v61 = vpop.permute.xlu0 %1875 }
 0x5ef   :  { %6835 = vset.pattern.permute.xlu0 %v10850_v43  ;;  %6799 = vset.pattern.permute.xlu1 %v10868_v0 }
 0x5f0   :  { %1576 = vperm.xlu0 %6835, %v8048_v53   ;;  %1167 = vperm.xlu1 %6799, %v7976_v9  }
 0x5f3   :  { %v8060_v35 = vpop.permute.xlu1 %2194 }
 0x5f4   :  { %6842 = vset.pattern.permute.xlu0 %v10858_v33  ;;  %6801 = vset.pattern.permute.xlu1 %v10854_v29 }
 0x5f5   :  { %2311 = vperm.xlu0 %6842, %v8048_v53   ;;  %1358 = vperm.xlu1 %6801, %v7976_v9  }
 0x5f8   :  { %v8066_v37 = vpop.permute.xlu1 %2404 }
 0x5f9   :  { %6848 = vset.pattern.permute.xlu0 %v10852_v41  ;;  %6802 = vset.pattern.permute.xlu1 %v10870_v40 }
 0x5fa   :  { %1289 = vperm.xlu0 %6848, %v8068_v55   ;;  %1463 = vperm.xlu1 %6802, %v7976_v9  }
 0x5fd   :  { %v8074_v46 = vpop.permute.xlu1 %2509 }
 0x5fe   :  { %6852 = vset.pattern.permute.xlu0 %v10876_v44  ;;  %6803 = vset.pattern.permute.xlu1 %v10850_v43 }
 0x5ff   :  { %1693 = vperm.xlu0 %6852, %v8068_v55   ;;  %1568 = vperm.xlu1 %6803, %v7976_v9  }
 0x602   :  { %v8080_v57 = vpop.permute.xlu1 %2614 }
 0x603   :  { %6865 = vset.pattern.permute.xlu0 %v10854_v29  ;;  %6805 = vset.pattern.permute.xlu1 %v10860_v56 }
 0x604   :  { %1374 = vperm.xlu0 %6865, %v8082_v59   ;;  %1778 = vperm.xlu1 %6805, %v7976_v9  }
 0x607   :  { %v8089_v39 = vpop.permute.xlu1 %2719 }
 0x608   :  { %6867 = vset.pattern.permute.xlu0 %v10850_v43  ;;  %6807 = vset.pattern.permute.xlu1 %v10866_v58 }
 0x609   :  { %1584 = vperm.xlu0 %6867, %v8082_v59   ;;  %1988 = vperm.xlu1 %6807, %v7976_v9  }
 0x60c   :  { %v8095_v2 = vpop.permute.xlu1 %1157 }
 0x60d   :  { %6871 = vset.pattern.permute.xlu0 %v10866_v58  ;;  %6808 = vset.pattern.permute.xlu1 %v10872_v60 }
 0x60e   :  { %2004 = vperm.xlu0 %6871, %v8082_v59   ;;  %2093 = vperm.xlu1 %6808, %v7976_v9  }
 0x611   :  { %v8101_v3 = vpop.permute.xlu1 %1261 }
 0x612   :  { %6873 = vset.pattern.permute.xlu0 %v10878_v62  ;;  %6809 = vset.pattern.permute.xlu1 %v10878_v62 }
 0x613   :  { %2214 = vperm.xlu0 %6873, %v8082_v59   ;;  %2198 = vperm.xlu1 %6809, %v7976_v9  }
 0x616   :  { %v8107_v4 = vpop.permute.xlu1 %1350 }
 0x617   :  { %6875 = vset.pattern.permute.xlu0 %v10882_v63  ;;  %6811 = vset.pattern.permute.xlu1 %v10882_v63 }
 0x618   :  { %2424 = vperm.xlu0 %6875, %v8082_v59   ;;  %2408 = vperm.xlu1 %6811, %v7976_v9  }
 0x61b   :  { %v8113_v6 = vpop.permute.xlu1 %1665 }
 0x61c   :  { %6877 = vset.pattern.permute.xlu0 %v10864_v42  ;;  %6814 = vset.pattern.permute.xlu1 %v10856_v47 }
 0x61d   :  { %2634 = vperm.xlu0 %6877, %v8082_v59   ;;  %2723 = vperm.xlu1 %6814, %v7976_v9   ;;  %v1028_v9 = vpop.f32.mrf.mxu0 }
 0x61e   :  { %v1029_v16 = vadd.f32 %v1028_v9, %v7898_v52  ;;  %v8199_v9 = vpop.permute.xlu0 %2085 }
 0x61f   :  { %v6395_v1 = vpop.f32.mrf.mxu0 }
 0x620   :  { %v8119_v8 = vpop.permute.xlu1 %1770  ;;  %v1099_v21 = vmul.f32 1.442695, %v1029_v16  ;;  %vm1075_vm10 = vcmp.gt.f32.partialorder %v1029_v16, 0.0  ;;  %v1044_v7 = vadd.f32 %v6395_v1, %v7898_v52 }
 0x621   :  { %6879 = vset.pattern.permute.xlu0 %v10868_v0  ;;  %6815 = vset.pattern.permute.xlu1 %v10868_v0 }
 0x622   :  { %1182 = vperm.xlu1 %6815, %v8003_v14   ;;  %1202 = vperm.xlu0 %6879, %v8121_v10   ;;  %7043 = vpow2.f32 %v1099_v21  ;;  %v8207_v21 = vpop.permute.xlu0 %2190  ;;  %vm1078_vm15 = vcmp.gt.f32.partialorder %v1044_v7, 0.0 }
 0x625   :  { %v8127_v11 = vpop.permute.xlu1 %1980 }
 0x626   :  { %6817 = vset.pattern.permute.xlu1 %v10854_v29  ;;  %6882 = vset.pattern.permute.xlu0 %v10870_v40 }
 0x627   :  { %1370 = vperm.xlu1 %6817, %v8003_v14   ;;  %1491 = vperm.xlu0 %6882, %v8121_v10  }
 0x62a   :  { %v8135_v13 = vpop.permute.xlu1 %2295 }
 0x62b   :  { %6818 = vset.pattern.permute.xlu1 %v10870_v40  ;;  %6884 = vset.pattern.permute.xlu0 %v10876_v44 }
 0x62c   :  { %1475 = vperm.xlu1 %6818, %v8003_v14   ;;  %1701 = vperm.xlu0 %6884, %v8121_v10  }
 0x62f   :  { %v8144_v19 = vpop.permute.xlu1 %2400  ;;  %v7044_v31 = vpop.eup %7043 }
 0x630   :  { %6819 = vset.pattern.permute.xlu1 %v10850_v43  ;;  %6886 = vset.pattern.permute.xlu0 %v10880_v36  ;;  %v5914_v38 = vadd.f32 -1.0, %v7044_v31 }
 0x631   :  { %1580 = vperm.xlu1 %6819, %v8003_v14   ;;  %1911 = vperm.xlu0 %6886, %v8121_v10  }
 0x632   :  { %v8184_v30 = vsel %vm1075_vm10, %v1029_v16, %v5914_v38  ;;  %v8215_v38 = vpop.permute.xlu0 %2505 }
 0x634   :  { %v8152_v25 = vpop.permute.xlu1 %2610 }
 0x635   :  { %6821 = vset.pattern.permute.xlu1 %v10860_v56  ;;  %6888 = vset.pattern.permute.xlu0 %v10872_v60 }
 0x636   :  { %1790 = vperm.xlu1 %6821, %v8003_v14   ;;  %2121 = vperm.xlu0 %6888, %v8121_v10  }
 0x639   :  { %v8160_v49 = vpop.permute.xlu1 %1172 }
 0x63a   :  { %6824 = vset.pattern.permute.xlu1 %v10872_v60  ;;  %6890 = vset.pattern.permute.xlu0 %v10858_v33 }
 0x63b   :  { %2105 = vperm.xlu1 %6824, %v8003_v14   ;;  %2331 = vperm.xlu0 %6890, %v8121_v10  }
 0x63e   :  { %v8168_v50 = vpop.permute.xlu1 %1273 }
 0x63f   :  { %10924 = vst [vmem:[#allocation10_spill] sm:$0xff] %v8168_v50  ;;  %6825 = vset.pattern.permute.xlu1 %v10878_v62  ;;  %6892 = vset.pattern.permute.xlu0 %v10862_v45 }
 0x640   :  { %2210 = vperm.xlu1 %6825, %v8003_v14   ;;  %2541 = vperm.xlu0 %6892, %v8121_v10  }
 0x643   :  { %v8174_v34 = vpop.permute.xlu1 %1467 }
 0x644   :  { %6827 = vset.pattern.permute.xlu1 %v10882_v63  ;;  %6894 = vset.pattern.permute.xlu0 %v10856_v47 }
 0x645   :  { %2420 = vperm.xlu1 %6827, %v8003_v14   ;;  %2751 = vperm.xlu0 %6894, %v8121_v10  }
 0x648   :  { %v8182_v27 = vpop.permute.xlu1 %1677 }
 0x649   :  { %10925 = vst [vmem:[#allocation11_spill] sm:$0xff] %v8182_v27  ;;  %6829 = vset.pattern.permute.xlu1 %v10864_v42  ;;  %6897 = vset.pattern.permute.xlu0 %v10854_v29 }
 0x64a   :  { %2630 = vperm.xlu1 %6829, %v8003_v14   ;;  %1382 = vperm.xlu0 %6897, %v8184_v30   ;;  %v1105_v14 = vmul.f32 1.442695, %v1044_v7 }
 0x64c   :  { %7045 = vpow2.f32 %v1105_v14 }
 0x64d   :  { %v8192_v5 = vpop.permute.xlu1 %1782 }
 0x64e   :  { %10926 = vst [vmem:[#allocation12_spill] sm:$0xff] %v8192_v5  ;;  %6831 = vset.pattern.permute.xlu1 %v10868_v0  ;;  %6899 = vset.pattern.permute.xlu0 %v10850_v43  ;;  %v8225_v43 = vpop.permute.xlu0 %2715 }
 0x64f   :  { %1177 = vperm.xlu1 %6831, %v8048_v53   ;;  %1592 = vperm.xlu0 %6899, %v8184_v30   ;;  %10931 = vst [vmem:[#allocation17_spill] sm:$0xff] %v8225_v43 }
 0x652   :  { %v8201_v16 = vpop.permute.xlu1 %2097  ;;  %v8235_v33 = vpop.permute.xlu0 %1362 }
 0x653   :  { %10927 = vst [vmem:[#allocation13_spill] sm:$0xff] %v8201_v16  ;;  %6833 = vset.pattern.permute.xlu1 %v10854_v29  ;;  %6901 = vset.pattern.permute.xlu0 %v10860_v56 }
 0x654   :  { %1366 = vperm.xlu1 %6833, %v8048_v53   ;;  %1802 = vperm.xlu0 %6901, %v8184_v30  }
 0x657   :  { %v8209_v31 = vpop.permute.xlu1 %2307 }
 0x658   :  { %10928 = vst [vmem:[#allocation14_spill] sm:$0xff] %v8209_v31  ;;  %6834 = vset.pattern.permute.xlu1 %v10870_v40  ;;  %6903 = vset.pattern.permute.xlu0 %v10866_v58  ;;  %v10950_v31 = vmov 15  }
 0x659   :  { %1471 = vperm.xlu1 %6834, %v8048_v53   ;;  %2012 = vperm.xlu0 %6903, %v8184_v30   ;;  %v7046_v41 = vpop.eup %7045 }
 0x65a   :  { %v5917_v47 = vadd.f32 -1.0, %v7046_v41  ;;  %v8247_v41 = vpop.permute.xlu0 %1572 }
 0x65b   :  { %10935 = vst [vmem:[#allocation21_spill] sm:$0xff] %v8247_v41  ;;  %v10980_v41 = vmov 10  }
 0x65c   :  { %v8217_v1 = vpop.permute.xlu1 %2412  ;;  %v8241_v45 = vsel %vm1078_vm15, %v1044_v7, %v5917_v47  ;;  %v1038_v7 = vpop.f32.mrf.mxu0 }
 0x65d   :  { %10929 = vst [vmem:[#allocation15_spill] sm:$0xff] %v8217_v1  ;;  %6836 = vset.pattern.permute.xlu1 %v10876_v44  ;;  %6905 = vset.pattern.permute.xlu0 %v10878_v62  ;;  %10934 = vst [vmem:[#allocation20_spill] sm:$0xff] %v8241_v45  ;;  %v10946_v1 = vmov 14  }
 0x65e   :  { %1681 = vperm.xlu1 %6836, %v8048_v53   ;;  %2222 = vperm.xlu0 %6905, %v8184_v30   ;;  %v8255_v47 = vpop.permute.xlu0 %1887 }
 0x65f   :  { %10937 = vst [vmem:[#allocation23_spill] sm:$0xff] %v8255_v47  ;;  %v10959_v47 = vmov 1  }
 0x661   :  { %v8223_v14 = vpop.permute.xlu1 %2517 }
 0x662   :  { %10930 = vst [vmem:[#allocation16_spill] sm:$0xff] %v8223_v14  ;;  %6837 = vset.pattern.permute.xlu1 %v10860_v56  ;;  %6907 = vset.pattern.permute.xlu0 %v10882_v63  ;;  %v10944_v14 = vmov 9  }
 0x663   :  { %1786 = vperm.xlu1 %6837, %v8048_v53   ;;  %2432 = vperm.xlu0 %6907, %v8184_v30  }
 0x666   :  { %v8231_v29 = vpop.permute.xlu1 %2727 }
 0x667   :  { %10932 = vst [vmem:[#allocation18_spill] sm:$0xff] %v8231_v29  ;;  %6838 = vset.pattern.permute.xlu1 %v10880_v36  ;;  %6909 = vset.pattern.permute.xlu0 %v10864_v42 }
 0x668   :  { %1891 = vperm.xlu1 %6838, %v8048_v53   ;;  %2642 = vperm.xlu0 %6909, %v8184_v30  }
 0x66b   :  { %v8239_v56 = vpop.permute.xlu1 %1167 }
 0x66c   :  { %10933 = vst [vmem:[#allocation19_spill] sm:$0xff] %v8239_v56  ;;  %6839 = vset.pattern.permute.xlu1 %v10866_v58  ;;  %6911 = vset.pattern.permute.xlu0 %v10868_v0  ;;  %v1039_v0 = vadd.f32 %v1038_v7, %v7898_v52  ;;  %v10943_v7 = vmov 13  }
 0x66d   :  { %1996 = vperm.xlu1 %6839, %v8048_v53   ;;  %1212 = vperm.xlu0 %6911, %v8241_v45  }
 0x66e   :  { %v1103_v17 = vmul.f32 1.442695, %v1039_v0  ;;  %vm1077_vm0 = vcmp.gt.f32.partialorder %v1039_v0, 0.0 }
 0x670   :  { %v8249_v42 = vpop.permute.xlu1 %1358  ;;  %7047 = vpow2.f32 %v1103_v17 }
 0x671   :  { %10936 = vst [vmem:[#allocation22_spill] sm:$0xff] %v8249_v42  ;;  %6840 = vset.pattern.permute.xlu1 %v10872_v60  ;;  %6914 = vset.pattern.permute.xlu0 %v10870_v40  ;;  %v8264_v40 = vpop.permute.xlu0 %1992 }
 0x672   :  { %2101 = vperm.xlu1 %6840, %v8048_v53   ;;  %1499 = vperm.xlu0 %6914, %v8241_v45   ;;  %10939 = vst [vmem:[#allocation25_spill] sm:$0xff] %v8264_v40  ;;  %v10958_v40 = vmov 2  }
 0x675   :  { %v8257_v58 = vpop.permute.xlu1 %1463  ;;  %v8274_v29 = vpop.permute.xlu0 %2202 }
 0x676   :  { %10938 = vst [vmem:[#allocation24_spill] sm:$0xff] %v8257_v58  ;;  %6841 = vset.pattern.permute.xlu1 %v10878_v62  ;;  %6916 = vset.pattern.permute.xlu0 %v10876_v44  ;;  %v6398_v44 = vpop.f32.mrf.mxu0  ;;  %10942 = vst [vmem:[#allocation28_spill] sm:$0xff] %v8274_v29  ;;  %v10951_v29 = vmov 12  }
 0x677   :  { %2206 = vperm.xlu1 %6841, %v8048_v53   ;;  %1709 = vperm.xlu0 %6916, %v8241_v45  }
 0x679   :  { %v8285_v17 = vpop.permute.xlu0 %2622 }
 0x67a   :  { %v8266_v60 = vpop.permute.xlu1 %1568  ;;  %10948 = vst [vmem:[#allocation30_spill] sm:$0xff] %v8285_v17  ;;  %v10954_v17 = vmov 0  }
 0x67b   :  { %10940 = vst [vmem:[#allocation26_spill] sm:$0xff] %v8266_v60  ;;  %6843 = vset.pattern.permute.xlu1 %v10882_v63  ;;  %6918 = vset.pattern.permute.xlu0 %v10880_v36  ;;  %v1054_v36 = vadd.f32 %v6398_v44, %v7898_v52  ;;  %v10947_v60 = vmov 11  }
 0x67c   :  { %2416 = vperm.xlu1 %6843, %v8048_v53   ;;  %1919 = vperm.xlu0 %6918, %v8241_v45  }
 0x67d   :  { %v8295_v44 = vpop.permute.xlu0 %1269  ;;  %vm1080_vm3 = vcmp.gt.f32.partialorder %v1054_v36, 0.0 }
 0x67e   :  { %10952 = vst [vmem:[#allocation32_spill] sm:$0xff] %v8295_v44 }
 0x67f   :  { %v8272_v62 = vpop.permute.xlu1 %1778 }
 0x680   :  { %10941 = vst [vmem:[#allocation27_spill] sm:$0xff] %v8272_v62  ;;  %6844 = vset.pattern.permute.xlu1 %v10943_v7  ;;  %6920 = vset.pattern.permute.xlu0 %v10944_v14  ;;  %v1109_v62 = vmul.f32 1.442695, %v1054_v36 }
 0x681   :  { %2521 = vperm.xlu1 %6844, %v8048_v53   ;;  %2129 = vperm.xlu0 %6920, %v8241_v45  }
 0x682   :  { %7049 = vpow2.f32 %v1109_v62  ;;  %v8303_v62 = vpop.permute.xlu0 %1673 }
 0x683   :  { %10955 = vst [vmem:[#allocation34_spill] sm:$0xff] %v8303_v62  ;;  %v10962_v62 = vmov 3  }
 0x684   :  { %v8281_v63 = vpop.permute.xlu1 %1988 }
 0x685   :  { %10945 = vst [vmem:[#allocation29_spill] sm:$0xff] %v8281_v63  ;;  %6845 = vset.pattern.permute.xlu1 %v10946_v1  ;;  %6922 = vset.pattern.permute.xlu0 %v10947_v60  ;;  %v7048_v63 = vpop.eup %7047 }
 0x686   :  { %2626 = vperm.xlu1 %6845, %v8048_v53   ;;  %2339 = vperm.xlu0 %6922, %v8241_v45   ;;  %v5916_v16 = vadd.f32 -1.0, %v7048_v63  ;;  %v8313_v43 = vpop.permute.xlu0 %1883 }
 0x687   :  { %10960 = vst [vmem:[#allocation37_spill] sm:$0xff] %v8313_v43  ;;  %v10966_v43 = vmov 4  }
 0x689   :  { %v8289_v56 = vpop.permute.xlu1 %2093 }
 0x68a   :  { %10949 = vst [vmem:[#allocation31_spill] sm:$0xff] %v8289_v56  ;;  %6846 = vset.pattern.permute.xlu1 %v10950_v31  ;;  %6923 = vset.pattern.permute.xlu0 %v10951_v29  ;;  %v8307_v56 = vsel %vm1077_vm0, %v1039_v0, %v5916_v16  ;;  %v8326_v5 = vpop.permute.xlu0 %2303 }
 0x68b   :  { %2731 = vperm.xlu1 %6846, %v8048_v53   ;;  %2444 = vperm.xlu0 %6923, %v8241_v45   ;;  %10957 = vst [vmem:[#allocation36_spill] sm:$0xff] %v8307_v56  ;;  %10965 = vst [vmem:[#allocation41_spill] sm:$0xff] %v8326_v5 }
 0x68e   :  { %v8297_v42 = vpop.permute.xlu1 %2198 }
 0x68f   :  { %10953 = vst [vmem:[#allocation33_spill] sm:$0xff] %v8297_v42  ;;  %6847 = vset.pattern.permute.xlu1 %v10954_v17  ;;  %6925 = vset.pattern.permute.xlu0 %v10946_v1  ;;  %v7050_v63 = vpop.eup %7049  ;;  %v1048_v42 = vpop.f32.mrf.mxu0 }
 0x690   :  { %1192 = vperm.xlu1 %6847, %v8068_v55   ;;  %2654 = vperm.xlu0 %6925, %v8241_v45   ;;  %v5919_v0 = vadd.f32 -1.0, %v7050_v63  ;;  %v1049_v16 = vadd.f32 %v1048_v42, %v7898_v52  ;;  %v10968_v42 = vmov 6  }
 0x691   :  { %v6401_v5 = vpop.f32.mrf.mxu0 }
 0x692   :  { %v8324_v44 = vsel %vm1080_vm3, %v1054_v36, %v5919_v0  ;;  %v8336_v36 = vpop.permute.xlu0 %2513  ;;  %vm1079_vm4 = vcmp.gt.f32.partialorder %v1049_v16, 0.0 }
 0x693   :  { %v8305_v53 = vpop.permute.xlu1 %2408  ;;  %10964 = vst [vmem:[#allocation40_spill] sm:$0xff] %v8324_v44  ;;  %10969 = vst [vmem:[#allocation43_spill] sm:$0xff] %v8336_v36 }
 0x694   :  { %10956 = vst [vmem:[#allocation35_spill] sm:$0xff] %v8305_v53  ;;  %6849 = vset.pattern.permute.xlu1 %v10958_v40  ;;  %6928 = vset.pattern.permute.xlu0 %v10959_v47 }
 0x695   :  { %1378 = vperm.xlu1 %6849, %v8068_v55   ;;  %1301 = vperm.xlu0 %6928, %v8307_v56  }
 0x698   :  { %v8315_v45 = vpop.permute.xlu1 %2723 }
 0x699   :  { %10961 = vst [vmem:[#allocation38_spill] sm:$0xff] %v8315_v45  ;;  %6850 = vset.pattern.permute.xlu1 %v10962_v62  ;;  %6942 = vset.pattern.permute.xlu0 %v10950_v31  ;;  %v1107_v45 = vmul.f32 1.442695, %v1049_v16 }
 0x69a   :  { %1483 = vperm.xlu1 %6850, %v8068_v55   ;;  %2755 = vperm.xlu0 %6942, %v8307_v56   ;;  %v10971_v56 = vmov 7  }
 0x69b   :  { %7051 = vpow2.f32 %v1107_v45  ;;  %v8346_v45 = vpop.permute.xlu0 %2618 }
 0x69c   :  { %10972 = vst [vmem:[#allocation45_spill] sm:$0xff] %v8346_v45 }
 0x69d   :  { %v8322_v53 = vpop.permute.xlu1 %1182 }
 0x69e   :  { %10963 = vst [vmem:[#allocation39_spill] sm:$0xff] %v8322_v53  ;;  %6851 = vset.pattern.permute.xlu1 %v10966_v43  ;;  %6944 = vset.pattern.permute.xlu0 %v10959_v47 }
 0x69f   :  { %1588 = vperm.xlu1 %6851, %v8068_v55   ;;  %1313 = vperm.xlu0 %6944, %v8324_v44   ;;  %v8354_v36 = vpop.permute.xlu0 %1281 }
 0x6a0   :  { %10975 = vst [vmem:[#allocation47_spill] sm:$0xff] %v8354_v36 }
 0x6a2   :  { %v8332_v63 = vpop.permute.xlu1 %1370 }
 0x6a3   :  { %10967 = vst [vmem:[#allocation42_spill] sm:$0xff] %v8332_v63  ;;  %6853 = vset.pattern.permute.xlu1 %v10968_v42  ;;  %6952 = vset.pattern.permute.xlu0 %v10944_v14  ;;  %v10974_v63 = vmov 8   ;;  %v8363_v50 = vpop.permute.xlu0 %1685 }
 0x6a4   :  { %1798 = vperm.xlu1 %6853, %v8068_v55   ;;  %2137 = vperm.xlu0 %6952, %v8324_v44   ;;  %10977 = vst [vmem:[#allocation49_spill] sm:$0xff] %v8363_v50 }
 0x6a7   :  { %v8340_v0 = vpop.permute.xlu1 %1475 }
 0x6a8   :  { %10970 = vst [vmem:[#allocation44_spill] sm:$0xff] %v8340_v0  ;;  %6854 = vset.pattern.permute.xlu1 %v10971_v56  ;;  %6954 = vset.pattern.permute.xlu0 %v10947_v60  ;;  %v7052_v0 = vpop.eup %7051 }
 0x6a9   :  { %1903 = vperm.xlu1 %6854, %v8068_v55   ;;  %2347 = vperm.xlu0 %6954, %v8324_v44   ;;  %v5918_v45 = vadd.f32 -1.0, %v7052_v0 }
 0x6ab   :  { %v8367_v36 = vsel %vm1079_vm4, %v1049_v16, %v5918_v45  ;;  %v1058_v16 = vpop.f32.mrf.mxu0 }
 0x6ac   :  { %v8348_v53 = vpop.permute.xlu1 %1580  ;;  %10979 = vst [vmem:[#allocation51_spill] sm:$0xff] %v8367_v36 }
 0x6ad   :  { %10973 = vst [vmem:[#allocation46_spill] sm:$0xff] %v8348_v53  ;;  %6855 = vset.pattern.permute.xlu1 %v10974_v63  ;;  %6955 = vset.pattern.permute.xlu0 %v10951_v29  ;;  %v1064_v53 = vadd.f32 %v6401_v5, %v7898_v52  ;;  %v8375_v5 = vpop.permute.xlu0 %1895 }
 0x6ae   :  { %2008 = vperm.xlu1 %6855, %v8068_v55   ;;  %2452 = vperm.xlu0 %6955, %v8324_v44   ;;  %10982 = vst [vmem:[#allocation53_spill] sm:$0xff] %v8375_v5 }
 0x6af   :  { %vm1082_vm5 = vcmp.gt.f32.partialorder %v1064_v53, 0.0 }
 0x6b1   :  { %v8356_v27 = vpop.permute.xlu1 %1790 }
 0x6b2   :  { %10976 = vst [vmem:[#allocation48_spill] sm:$0xff] %v8356_v27  ;;  %6856 = vset.pattern.permute.xlu1 %v10944_v14  ;;  %6958 = vset.pattern.permute.xlu0 %v10950_v31  ;;  %v1113_v27 = vmul.f32 1.442695, %v1064_v53 }
 0x6b3   :  { %2113 = vperm.xlu1 %6856, %v8068_v55   ;;  %2767 = vperm.xlu0 %6958, %v8324_v44   ;;  %v8385_v44 = vpop.permute.xlu0 %2000 }
 0x6b4   :  { %7053 = vpow2.f32 %v1113_v27  ;;  %10984 = vst [vmem:[#allocation55_spill] sm:$0xff] %v8385_v44  ;;  %v1059_v27 = vadd.f32 %v1058_v16, %v7898_v52 }
 0x6b6   :  { %v8365_v58 = vpop.permute.xlu1 %2105  ;;  %vm1081_vm6 = vcmp.gt.f32.partialorder %v1059_v27, 0.0 }
 0x6b7   :  { %10978 = vst [vmem:[#allocation50_spill] sm:$0xff] %v8365_v58  ;;  %6857 = vset.pattern.permute.xlu1 %v10980_v41  ;;  %6961 = vset.pattern.permute.xlu0 %v10958_v40  ;;  %v1111_v58 = vmul.f32 1.442695, %v1059_v27 }
 0x6b8   :  { %2218 = vperm.xlu1 %6857, %v8068_v55   ;;  %1398 = vperm.xlu0 %6961, %v8367_v36  }
 0x6b9   :  { %7055 = vpow2.f32 %v1111_v58 }
 0x6bb   :  { %v8373_v0 = vpop.permute.xlu1 %2210 }
 0x6bc   :  { %10981 = vst [vmem:[#allocation52_spill] sm:$0xff] %v8373_v0  ;;  %6858 = vset.pattern.permute.xlu1 %v10947_v60  ;;  %6963 = vset.pattern.permute.xlu0 %v10966_v43 }
 0x6bd   :  { %2323 = vperm.xlu1 %6858, %v8068_v55   ;;  %1608 = vperm.xlu0 %6963, %v8367_v36  }
 0x6c0   :  { %v8381_v45 = vpop.permute.xlu1 %2420 }
 0x6c1   :  { %10983 = vst [vmem:[#allocation54_spill] sm:$0xff] %v8381_v45  ;;  %6859 = vset.pattern.permute.xlu1 %v10951_v29  ;;  %6965 = vset.pattern.permute.xlu0 %v10968_v42  ;;  %v8396_v45 = vpop.permute.xlu0 %2315  ;;  %v7054_v44 = vpop.eup %7053 }
 0x6c2   :  { %2428 = vperm.xlu1 %6859, %v8068_v55   ;;  %1818 = vperm.xlu0 %6965, %v8367_v36   ;;  %v5921_v52 = vadd.f32 -1.0, %v7054_v44 }
 0x6c4   :  { %v8408_v50 = vsel %vm1082_vm5, %v1064_v53, %v5921_v52 }
 0x6c5   :  { %v8390_v0 = vpop.permute.xlu1 %2630  ;;  %v8404_v16 = vpop.permute.xlu0 %2525  ;;  %10989 = vst [vmem:[#allocation60_spill] sm:$0xff] %v8408_v50 }
 0x6c6   :  { %10985 = vst [vmem:[#allocation56_spill] sm:$0xff] %v8390_v0  ;;  %6860 = vset.pattern.permute.xlu1 %v10943_v7  ;;  %6967 = vset.pattern.permute.xlu0 %v10974_v63  ;;  %10987 = vst [vmem:[#allocation58_spill] sm:$0xff] %v8404_v16  ;;  %v7056_v53 = vpop.eup %7055 }
 0x6c7   :  { %2533 = vperm.xlu1 %6860, %v8068_v55   ;;  %2028 = vperm.xlu0 %6967, %v8367_v36  }
 0x6c9   :  { %v8414_v58 = vpop.permute.xlu0 %2735 }
 0x6ca   :  { %v8398_v5 = vpop.permute.xlu1 %1177  ;;  %10990 = vst [vmem:[#allocation61_spill] sm:$0xff] %v8414_v58  ;;  %v1762_v58 = vld [vmem:[#allocation4 + $0x188] sm:$0xff] }
 0x6cb   :  { %10986 = vst [vmem:[#allocation57_spill] sm:$0xff] %v8398_v5  ;;  %6861 = vset.pattern.permute.xlu1 %v10946_v1  ;;  %6974 = vset.pattern.permute.xlu0 %v10950_v31 }
 0x6cc   :  { %2638 = vperm.xlu1 %6861, %v8068_v55   ;;  %2763 = vperm.xlu0 %6974, %v8367_v36  }
 0x6cd   :  { %v8424_v36 = vpop.permute.xlu0 %1277 }
 0x6ce   :  { %10993 = vst [vmem:[#allocation64_spill] sm:$0xff] %v8424_v36  ;;  %v10998_v36 = vmov 5  }
 0x6cf   :  { %v8406_v0 = vpop.permute.xlu1 %1366 }
 0x6d0   :  { %10988 = vst [vmem:[#allocation59_spill] sm:$0xff] %v8406_v0  ;;  %6862 = vset.pattern.permute.xlu1 %v10950_v31  ;;  %6977 = vset.pattern.permute.xlu0 %v10958_v40 }
 0x6d1   :  { %2743 = vperm.xlu1 %6862, %v8068_v55   ;;  %1410 = vperm.xlu0 %6977, %v8408_v50   ;;  %v5920_v55 = vadd.f32 -1.0, %v7056_v53 }
 0x6d3   :  { %v8432_v0 = vsel %vm1081_vm6, %v1059_v27, %v5920_v55 }
 0x6d4   :  { %v8416_v44 = vpop.permute.xlu1 %1471  ;;  %10995 = vst [vmem:[#allocation66_spill] sm:$0xff] %v8432_v0 }
 0x6d5   :  { %10991 = vst [vmem:[#allocation62_spill] sm:$0xff] %v8416_v44  ;;  %6863 = vset.pattern.permute.xlu1 %v10954_v17  ;;  %6984 = vset.pattern.permute.xlu0 %v10944_v14 }
 0x6d6   :  { %1187 = vperm.xlu1 %6863, %v8082_v59   ;;  %2145 = vperm.xlu0 %6984, %v8408_v50  }
 0x6d9   :  { %v8422_v52 = vpop.permute.xlu1 %1681 }
 0x6da   :  { %10992 = vst [vmem:[#allocation63_spill] sm:$0xff] %v8422_v52  ;;  %6864 = vset.pattern.permute.xlu1 %v10959_v47  ;;  %6990 = vset.pattern.permute.xlu0 %v10950_v31  ;;  %v8436_v52 = vpop.permute.xlu0 %1576 }
 0x6db   :  { %1285 = vperm.xlu1 %6864, %v8082_v59   ;;  %2775 = vperm.xlu0 %6990, %v8408_v50   ;;  %10996 = vst [vmem:[#allocation67_spill] sm:$0xff] %v8436_v52  ;;  %v1147_v52 = vld [vmem:[#allocation4] sm:$0xff] }
 0x6de   :  { %v8430_v5 = vpop.permute.xlu1 %1786  ;;  %v8446_v27 = vpop.permute.xlu0 %2311 }
 0x6df   :  { %10994 = vst [vmem:[#allocation65_spill] sm:$0xff] %v8430_v5  ;;  %6866 = vset.pattern.permute.xlu1 %v10962_v62  ;;  %6991 = vset.pattern.permute.xlu0 %v10954_v17  ;;  %10999 = vst [vmem:[#allocation69_spill] sm:$0xff] %v8446_v27 }
 0x6e0   :  { %1479 = vperm.xlu1 %6866, %v8082_v59   ;;  %1227 = vperm.xlu0 %6991, %v8432_v0  }
 0x6e2   :  { %v8454_v50 = vpop.permute.xlu0 %1289 }
 0x6e3   :  { %v8440_v53 = vpop.permute.xlu1 %1891  ;;  %11001 = vst [vmem:[#allocation71_spill] sm:$0xff] %v8454_v50 }
 0x6e4   :  { %10997 = vst [vmem:[#allocation68_spill] sm:$0xff] %v8440_v53  ;;  %6868 = vset.pattern.permute.xlu1 %v10998_v36  ;;  %6994 = vset.pattern.permute.xlu0 %v10962_v62 }
 0x6e5   :  { %1689 = vperm.xlu1 %6868, %v8082_v59   ;;  %1511 = vperm.xlu0 %6994, %v8432_v0  }
 0x6e8   :  { %v8448_v55 = vpop.permute.xlu1 %1996 }
 0x6e9   :  { %11000 = vst [vmem:[#allocation70_spill] sm:$0xff] %v8448_v55  ;;  %6869 = vset.pattern.permute.xlu1 %v10968_v42  ;;  %6996 = vset.pattern.permute.xlu0 %v10998_v36  ;;  %v8462_v55 = vpop.permute.xlu0 %1693 }
 0x6ea   :  { %1794 = vperm.xlu1 %6869, %v8082_v59   ;;  %1721 = vperm.xlu0 %6996, %v8432_v0   ;;  %11003 = vst [vmem:[#allocation73_spill] sm:$0xff] %v8462_v55 }
 0x6ed   :  { %v8456_v5 = vpop.permute.xlu1 %2101 }
 0x6ee   :  { %11002 = vst [vmem:[#allocation72_spill] sm:$0xff] %v8456_v5  ;;  %6870 = vset.pattern.permute.xlu1 %v10971_v56  ;;  %6997 = vset.pattern.permute.xlu0 %v10968_v42  ;;  %v8472_v5 = vpop.permute.xlu0 %1374 }
 0x6ef   :  { %1899 = vperm.xlu1 %6870, %v8082_v59   ;;  %1826 = vperm.xlu0 %6997, %v8432_v0   ;;  %11006 = vst [vmem:[#allocation76_spill] sm:$0xff] %v8472_v5 }
 0x6f2   :  { %v8464_v27 = vpop.permute.xlu1 %2206  ;;  %v8482_v55 = vpop.permute.xlu0 %1584 }
 0x6f3   :  { %11004 = vst [vmem:[#allocation74_spill] sm:$0xff] %v8464_v27  ;;  %6872 = vset.pattern.permute.xlu1 %v10944_v14  ;;  %6999 = vset.pattern.permute.xlu0 %v10974_v63  ;;  %11008 = vst [vmem:[#allocation78_spill] sm:$0xff] %v8482_v55 }
 0x6f4   :  { %2109 = vperm.xlu1 %6872, %v8082_v59   ;;  %2036 = vperm.xlu0 %6999, %v8432_v0  }
 0x6f7   :  { %v8470_v50 = vpop.permute.xlu1 %2416 }
 0x6f8   :  { %11005 = vst [vmem:[#allocation75_spill] sm:$0xff] %v8470_v50  ;;  %6874 = vset.pattern.permute.xlu1 %v10947_v60  ;;  %7003 = vset.pattern.permute.xlu0 %v10951_v29 }
 0x6f9   :  { %2319 = vperm.xlu1 %6874, %v8082_v59   ;;  %2456 = vperm.xlu0 %7003, %v8432_v0  }
 0x6fc   :  { %v8478_v27 = vpop.permute.xlu1 %2521 }
 0x6fd   :  { %11007 = vst [vmem:[#allocation77_spill] sm:$0xff] %v8478_v27  ;;  %6876 = vset.pattern.permute.xlu1 %v10943_v7  ;;  %7005 = vset.pattern.permute.xlu0 %v10946_v1 }
 0x6fe   :  { %2529 = vperm.xlu1 %6876, %v8082_v59   ;;  %2666 = vperm.xlu0 %7005, %v8432_v0  }
 0x701   :  { %v8486_v50 = vpop.permute.xlu1 %2626 }
 0x702   :  { %11009 = vst [vmem:[#allocation79_spill] sm:$0xff] %v8486_v50  ;;  %6878 = vset.pattern.permute.xlu1 %v10950_v31  ;;  %7007 = vset.pattern.permute.xlu0 %v10954_v17 }
 0x703   :  { %2739 = vperm.xlu1 %6878, %v8082_v59  }
 0x706   :  { %v8491_v5 = vpop.permute.xlu1 %2731 }
 0x707   :  { %11010 = vst [vmem:[#allocation80_spill] sm:$0xff] %v8491_v5  ;;  %6880 = vset.pattern.permute.xlu1 %v10959_v47 }
 0x708   :  { %1297 = vperm.xlu1 %6880, %v8121_v10  }
 0x70b   :  { %v8495_v27 = vpop.permute.xlu1 %1192 }
 0x70c   :  { %11011 = vst [vmem:[#allocation81_spill] sm:$0xff] %v8495_v27  ;;  %6881 = vset.pattern.permute.xlu1 %v10958_v40 }
 0x70d   :  { %1386 = vperm.xlu1 %6881, %v8121_v10  }
 0x710   :  { %v8499_v0 = vpop.permute.xlu1 %1378 }
 0x711   :  { %11012 = vst [vmem:[#allocation82_spill] sm:$0xff] %v8499_v0  ;;  %6883 = vset.pattern.permute.xlu1 %v10966_v43  ;;  %v1552_v43 = vld [vmem:[#allocation4 + $0x108] sm:$0xff] }
 0x712   :  { %1596 = vperm.xlu1 %6883, %v8121_v10  }
 0x715   :  { %v8503_v50 = vpop.permute.xlu1 %1483 }
 0x716   :  { %11013 = vst [vmem:[#allocation83_spill] sm:$0xff] %v8503_v50  ;;  %6885 = vset.pattern.permute.xlu1 %v10968_v42  ;;  %v1148_v50 = vld [vmem:[#allocation4 + $0x8] sm:$0xff] }
 0x717   :  { %1806 = vperm.xlu1 %6885, %v8121_v10   ;;  %v1657_v42 = vld [vmem:[#allocation4 + $0x148] sm:$0xff] }
 0x718   :  { %v1729_v44 = vmul.f32 %v8150_v23, %v1657_v42 }
 0x71a   :  { %v8507_v59 = vpop.permute.xlu1 %1588 }
 0x71b   :  { %11014 = vst [vmem:[#allocation84_spill] sm:$0xff] %v8507_v59  ;;  %6887 = vset.pattern.permute.xlu1 %v10974_v63  ;;  %v1656_v63 = vld [vmem:[#allocation4 + $0x140] sm:$0xff] }
 0x71c   :  { %2016 = vperm.xlu1 %6887, %v8121_v10  }
 0x71f   :  { %v8511_v27 = vpop.permute.xlu1 %1798 }
 0x720   :  { %11015 = vst [vmem:[#allocation85_spill] sm:$0xff] %v8511_v27  ;;  %6889 = vset.pattern.permute.xlu1 %v10980_v41  ;;  %v1447_v27 = vld [vmem:[#allocation4 + $0xc8] sm:$0xff] }
 0x721   :  { %2226 = vperm.xlu1 %6889, %v8121_v10  }
 0x724   :  { %v8515_v0 = vpop.permute.xlu1 %1903 }
 0x725   :  { %11016 = vst [vmem:[#allocation86_spill] sm:$0xff] %v8515_v0  ;;  %6891 = vset.pattern.permute.xlu1 %v10951_v29  ;;  %v1252_v29 = vld [vmem:[#allocation4 + $0x40] sm:$0xff]  ;;  %v1253_v0 = vld [vmem:[#allocation4 + $0x48] sm:$0xff] }
 0x726   :  { %2436 = vperm.xlu1 %6891, %v8121_v10   ;;  %v1325_v55 = vmul.f32 %v8139_v15, %v1253_v0  ;;  %v1624_v15 = vmul.f32 %v8026_v22, %v1552_v43  ;;  %v2077_v0 = vld [vmem:[#allocation4 + $0x248] sm:$0xff] }
 0x727   :  { %v2149_v22 = vmul.f32 %v8054_v32, %v2077_v0  ;;  %v2707_v0 = vld [vmem:[#allocation4 + $0x3c8] sm:$0xff] }
 0x729   :  { %v8519_v5 = vpop.permute.xlu1 %2008 }
 0x72a   :  { %11017 = vst [vmem:[#allocation87_spill] sm:$0xff] %v8519_v5  ;;  %6893 = vset.pattern.permute.xlu1 %v10946_v1  ;;  %v1446_v5 = vld [vmem:[#allocation4 + $0xc0] sm:$0xff] }
 0x72b   :  { %2646 = vperm.xlu1 %6893, %v8121_v10   ;;  %v1342_v10 = vld [vmem:[#allocation4 + $0x88] sm:$0xff]  ;;  %v1518_v53 = vmul.f32 %v8166_v28, %v1446_v5  ;;  %v1866_v28 = vld [vmem:[#allocation4 + $0x1c0] sm:$0xff]  ;;  %v1235_v5 = vmul.f32 %v8095_v2, %v1147_v52 }
 0x72c   :  { %v1414_v40 = vmul.f32 %v8014_v18, %v1342_v10  ;;  %v1938_v2 = vmul.f32 %v8188_v61, %v1866_v28  ;;  %v1971_v52 = vld [vmem:[#allocation4 + $0x200] sm:$0xff]  ;;  %v2392_v61 = vld [vmem:[#allocation4 + $0x308] sm:$0xff] }
 0x72e   :  { %v8523_v59 = vpop.permute.xlu1 %2113 }
 0x72f   :  { %11018 = vst [vmem:[#allocation88_spill] sm:$0xff] %v8523_v59  ;;  %6895 = vset.pattern.permute.xlu1 %v10954_v17  ;;  %v1324_v59 = vmul.f32 %v8101_v3, %v1252_v29  ;;  %v1341_v17 = vld [vmem:[#allocation4 + $0x80] sm:$0xff]  ;;  %v1236_v29 = vmul.f32 %v8129_v12, %v1148_v50  ;;  %v1867_v3 = vld [vmem:[#allocation4 + $0x1c8] sm:$0xff] }
 0x730   :  { %1197 = vperm.xlu1 %6895, %v8184_v30   ;;  %v1551_v12 = vld [vmem:[#allocation4 + $0x100] sm:$0xff] }
 0x731   :  { %v1534_v16 = vadd.f32 %v1518_v53, %v1324_v59  ;;  %v1430_v23 = vadd.f32 %v1414_v40, %v1236_v29  ;;  %v2287_v40 = vld [vmem:[#allocation4 + $0x2c8] sm:$0xff] }
 0x733   :  { %v8527_v41 = vpop.permute.xlu1 %2218  ;;  %v1640_v53 = vadd.f32 %v1624_v15, %v1430_v23  ;;  %v1150_v15 = vld [vmem:[#allocation4 + $0x18] sm:$0xff] }
 0x734   :  { %11019 = vst [vmem:[#allocation89_spill] sm:$0xff] %v8527_v41  ;;  %6896 = vset.pattern.permute.xlu1 %v10959_v47  ;;  %v1519_v41 = vmul.f32 %v8020_v20, %v1447_v27  ;;  %v2076_v27 = vld [vmem:[#allocation4 + $0x240] sm:$0xff] }
 0x735   :  { %1293 = vperm.xlu1 %6896, %v8184_v30   ;;  %v2148_v29 = vmul.f32 %v8199_v9, %v2076_v27  ;;  %v2602_v9 = vld [vmem:[#allocation4 + $0x388] sm:$0xff] }
 0x736   :  { %v1535_v18 = vadd.f32 %v1519_v41, %v1325_v55  ;;  %v1623_v41 = vmul.f32 %v8176_v54, %v1551_v12  ;;  %v2043_v54 = vmul.f32 %v8127_v11, %v1971_v52  ;;  %v1344_v12 = vld [vmem:[#allocation4 + $0x98] sm:$0xff] }
 0x737   :  { %v1554_v52 = vld [vmem:[#allocation4 + $0x118] sm:$0xff] }
 0x738   :  { %v8531_v1 = vpop.permute.xlu1 %2323  ;;  %v1745_v43 = vadd.f32 %v1729_v44, %v1535_v18  ;;  %v2497_v44 = vld [vmem:[#allocation4 + $0x348] sm:$0xff]  ;;  %v2464_v18 = vmul.f32 %v8066_v37, %v2392_v61 }
 0x739   :  { %11020 = vst [vmem:[#allocation90_spill] sm:$0xff] %v8531_v1  ;;  %6898 = vset.pattern.permute.xlu1 %v10962_v62  ;;  %v1728_v1 = vmul.f32 %v8113_v6, %v1656_v63  ;;  %v1413_v62 = vmul.f32 %v8107_v4, %v1341_v17  ;;  %v1939_v6 = vmul.f32 %v8039_v26, %v1867_v3  ;;  %v1761_v4 = vld [vmem:[#allocation4 + $0x180] sm:$0xff]  ;;  %v1972_v63 = vld [vmem:[#allocation4 + $0x208] sm:$0xff] }
 0x73a   :  { %1487 = vperm.xlu1 %6898, %v8184_v30   ;;  %v1834_v17 = vmul.f32 %v8033_v24, %v1762_v58  ;;  %v2182_v26 = vld [vmem:[#allocation4 + $0x288] sm:$0xff]  ;;  %v2569_v11 = vmul.f32 %v8074_v46, %v2497_v44  ;;  %v11021_v44 = vld [vmem:[#allocation21_spill] sm:$0xff] }
 0x73b   :  { %v1744_v50 = vadd.f32 %v1728_v1, %v1534_v16  ;;  %v1429_v42 = vadd.f32 %v1413_v62, %v1235_v5  ;;  %v1833_v1 = vmul.f32 %v8119_v8, %v1761_v4  ;;  %v2286_v16 = vld [vmem:[#allocation4 + $0x2c0] sm:$0xff]  ;;  %v1955_v24 = vadd.f32 %v1939_v6, %v1745_v43 }
 0x73c   :  { %v2044_v62 = vmul.f32 %v8046_v51, %v1972_v63  ;;  %v1850_v32 = vadd.f32 %v1834_v17, %v1640_v53  ;;  %v2254_v8 = vmul.f32 %v8060_v35, %v2182_v26  ;;  %v2358_v3 = vmul.f32 %v8135_v13, %v2286_v16  ;;  %v2181_v6 = vld [vmem:[#allocation4 + $0x280] sm:$0xff]  ;;  %v1659_v16 = vld [vmem:[#allocation4 + $0x158] sm:$0xff] }
 0x73d   :  { %v8544_v20 = vpop.permute.xlu1 %2428  ;;  %v1954_v58 = vadd.f32 %v1938_v2, %v1744_v50  ;;  %v1639_v59 = vadd.f32 %v1623_v41, %v1429_v42  ;;  %v2165_v10 = vadd.f32 %v2149_v22, %v1955_v24  ;;  %v2359_v51 = vmul.f32 %v8158_v48, %v2287_v40  ;;  %v2391_v4 = vld [vmem:[#allocation4 + $0x300] sm:$0xff]  ;;  %v1449_v22 = vld [vmem:[#allocation4 + $0xd8] sm:$0xff]  ;;  %v1448_v41 = vld [vmem:[#allocation4 + $0xd0] sm:$0xff] }
 0x73e   :  { %6900 = vset.pattern.permute.xlu1 %v10998_v36  ;;  %v2060_v5 = vadd.f32 %v2044_v62, %v1850_v32  ;;  %v2496_v35 = vld [vmem:[#allocation4 + $0x340] sm:$0xff]  ;;  %v1238_v13 = vmul.f32 %v8160_v49, %v1150_v15  ;;  %v2779_v42 = vmul.f32 %v8089_v39, %v2707_v0  ;;  %v2253_v46 = vmul.f32 %v8207_v21, %v2181_v6  ;;  %v1255_v39 = vld [vmem:[#allocation4 + $0x58] sm:$0xff]  ;;  %v1254_v24 = vld [vmem:[#allocation4 + $0x50] sm:$0xff] }
 0x73f   :  { %1697 = vperm.xlu1 %6900, %v8184_v30   ;;  %v1849_v28 = vadd.f32 %v1833_v1, %v1639_v59  ;;  %v2164_v50 = vadd.f32 %v2148_v29, %v1954_v58  ;;  %v2375_v63 = vadd.f32 %v2359_v51, %v2165_v10  ;;  %v2601_v43 = vld [vmem:[#allocation4 + $0x380] sm:$0xff]  ;;  %v1416_v2 = vmul.f32 %v8235_v33, %v1344_v12  ;;  %v1764_v40 = vld [vmem:[#allocation4 + $0x198] sm:$0xff]  ;;  %v1658_v6 = vld [vmem:[#allocation4 + $0x150] sm:$0xff] }
 0x740   :  { %v2270_v48 = vadd.f32 %v2254_v8, %v2060_v5  ;;  %v2463_v53 = vmul.f32 %v8144_v19, %v2391_v4  ;;  %v2568_v27 = vmul.f32 %v8215_v38, %v2496_v35  ;;  %v2674_v1 = vmul.f32 %v8080_v57, %v2602_v9  ;;  %v2706_v19 = vld [vmem:[#allocation4 + $0x3c0] sm:$0xff]  ;;  %v11022_v38 = vld [vmem:[#allocation24_spill] sm:$0xff]  ;;  %v11023_v8 = vld [vmem:[#allocation10_spill] sm:$0xff] }
 0x741   :  { %v2059_v17 = vadd.f32 %v2043_v54, %v1849_v28  ;;  %v2374_v37 = vadd.f32 %v2358_v3, %v2164_v50  ;;  %v2585_v26 = vadd.f32 %v2569_v11, %v2375_v63  ;;  %v2673_v58 = vmul.f32 %v8152_v25, %v2601_v43  ;;  %v11024_v3 = vld [vmem:[#allocation11_spill] sm:$0xff]  ;;  %v11025_v25 = vld [vmem:[#allocation12_spill] sm:$0xff]  ;;  %v11027_v5 = vld [vmem:[#allocation17_spill] sm:$0xff] }
 0x742   :  { %v8556_v55 = vpop.permute.xlu1 %2533  ;;  %v2480_v49 = vadd.f32 %v2464_v18, %v2270_v48  ;;  %v1432_v21 = vadd.f32 %v1416_v2, %v1238_v13  ;;  %v1521_v33 = vmul.f32 %v8174_v34, %v1449_v22  ;;  %v1626_v59 = vmul.f32 %v11021_v44, %v1554_v52  ;;  %v11026_v0 = vld [vmem:[#allocation32_spill] sm:$0xff]  ;;  %v1343_v43 = vld [vmem:[#allocation4 + $0x90] sm:$0xff] }
 0x743   :  { %6902 = vset.pattern.permute.xlu1 %v10971_v56  ;;  %v2269_v62 = vadd.f32 %v2253_v46, %v2059_v17  ;;  %v2795_v61 = vadd.f32 %v2779_v42, %v2585_v26  ;;  %v2584_v54 = vadd.f32 %v2568_v27, %v2374_v37  ;;  %v1520_v10 = vmul.f32 %v11022_v38, %v1448_v41  ;;  %v1869_v35 = vld [vmem:[#allocation4 + $0x1d8] sm:$0xff]  ;;  %v11028_v46 = vld [vmem:[#allocation34_spill] sm:$0xff]  ;;  %v1868_v52 = vld [vmem:[#allocation4 + $0x1d0] sm:$0xff] }
 0x744   :  { %1907 = vperm.xlu1 %6902, %v8184_v30   ;;  %v1327_v29 = vmul.f32 %v11023_v8, %v1255_v39  ;;  %v1731_v15 = vmul.f32 %v11024_v3, %v1659_v16  ;;  %v1836_v51 = vmul.f32 %v11025_v25, %v1764_v40  ;;  %v2690_v34 = vadd.f32 %v2674_v1, %v2480_v49  ;;  %v1974_v9 = vld [vmem:[#allocation4 + $0x218] sm:$0xff]  ;;  %v11029_v41 = vld [vmem:[#allocation23_spill] sm:$0xff]  ;;  %v11030_v26 = vld [vmem:[#allocation25_spill] sm:$0xff] }
 0x745   :  { %v2479_v57 = vadd.f32 %v2463_v53, %v2269_v62  ;;  %v1326_v28 = vmul.f32 %v11026_v0, %v1254_v24  ;;  %v2778_v18 = vmul.f32 %v11027_v5, %v2706_v19  ;;  %v1642_v50 = vadd.f32 %v1626_v59, %v1432_v21  ;;  %v2079_v17 = vld [vmem:[#allocation4 + $0x258] sm:$0xff]  ;;  %v11031_v39 = vld [vmem:[#allocation13_spill] sm:$0xff]  ;;  %v1149_v40 = vld [vmem:[#allocation4 + $0x10] sm:$0xff] }
 0x746   :  { %v1537_v12 = vadd.f32 %v1521_v33, %v1327_v29  ;;  %v2811_v4 = vadd.f32 %v2795_v61, %v2690_v34  ;;  %v2184_v22 = vld [vmem:[#allocation4 + $0x298] sm:$0xff]  ;;  %v1730_v2 = vmul.f32 %v11028_v46, %v1658_v6  ;;  %v1941_v49 = vmul.f32 %v11029_v41, %v1869_v35  ;;  %v1553_v24 = vld [vmem:[#allocation4 + $0x110] sm:$0xff]  ;;  %v11032_v19 = vld [vmem:[#allocation22_spill] sm:$0xff] }
 0x747   :  { %v8568_v23 = vpop.permute.xlu1 %2638  ;;  %v2689_v11 = vadd.f32 %v2673_v58, %v2479_v57  ;;  %v1536_v13 = vadd.f32 %v1520_v10, %v1326_v28  ;;  %v2794_v63 = vadd.f32 %v2778_v18, %v2584_v54  ;;  %v1852_v37 = vadd.f32 %v1836_v51, %v1642_v50  ;;  %v2289_v53 = vld [vmem:[#allocation4 + $0x2d8] sm:$0xff]  ;;  %v2078_v62 = vld [vmem:[#allocation4 + $0x250] sm:$0xff]  ;;  %v11034_v57 = vld [vmem:[#allocation14_spill] sm:$0xff] }
 0x748   :  { %6904 = vset.pattern.permute.xlu1 %v10944_v14  ;;  %v1747_v42 = vadd.f32 %v1731_v15, %v1537_v12  ;;  %v2046_v27 = vmul.f32 %v11030_v26, %v1974_v9  ;;  %v2151_v16 = vmul.f32 %v11031_v39, %v2079_v17  ;;  %v2827_v58 = vsel %vm873_vm14, %v2811_v4, 0.0  ;;  %v2604_v21 = vld [vmem:[#allocation4 + $0x398] sm:$0xff]  ;;  %v1763_v3 = vld [vmem:[#allocation4 + $0x190] sm:$0xff]  ;;  %v11035_v25 = vld [vmem:[#allocation37_spill] sm:$0xff] }
 0x749   :  { %2117 = vperm.xlu1 %6904, %v8184_v30   ;;  %v2810_v1 = vadd.f32 %v2794_v63, %v2689_v11  ;;  %v2394_v33 = vld [vmem:[#allocation4 + $0x318] sm:$0xff]  ;;  %v1415_v61 = vmul.f32 %v11032_v19, %v1343_v43  ;;  %v1746_v44 = vadd.f32 %v1730_v2, %v1536_v13  ;;  %v2361_v8 = vmul.f32 %v11034_v57, %v2289_v53  ;;  %v2288_v34 = vld [vmem:[#allocation4 + $0x2d0] sm:$0xff]  ;;  %v11037_v18 = vld [vmem:[#allocation26_spill] sm:$0xff] }
 0x74a   :  { %v11033_v59 = vld [vmem:[#allocation28_spill] sm:$0xff]  ;;  %v2062_v38 = vadd.f32 %v2046_v27, %v1852_v37  ;;  %v1957_v10 = vadd.f32 %v1941_v49, %v1747_v42  ;;  %v1940_v51 = vmul.f32 %v11035_v25, %v1868_v52  ;;  %v2498_v0 = vld [vmem:[#allocation4 + $0x350] sm:$0xff]  ;;  %v1625_v6 = vmul.f32 %v11037_v18, %v1553_v24  ;;  %v11039_v50 = vld [vmem:[#allocation30_spill] sm:$0xff] }
 0x74b   :  { %v2256_v54 = vmul.f32 %v11033_v59, %v2184_v22  ;;  %v2499_v29 = vld [vmem:[#allocation4 + $0x358] sm:$0xff]  ;;  %v11036_v28 = vld [vmem:[#allocation19_spill] sm:$0xff]  ;;  %v2676_v4 = vmul.f32 %v11039_v50, %v2604_v21  ;;  %v2826_v35 = vsel %vm873_vm14, %v2810_v1, 0.0  ;;  %v1451_v41 = vld [vmem:[#allocation4 + $0xe8] sm:$0xff] }
 0x74c   :  { %v8581_v32 = vpop.permute.xlu1 %2743  ;;  %v1237_v5 = vmul.f32 %v11036_v28, %v1149_v40  ;;  %v11038_v11 = vld [vmem:[#allocation31_spill] sm:$0xff]  ;;  %v2167_v9 = vadd.f32 %v2151_v16, %v1957_v10  ;;  %v2709_v63 = vld [vmem:[#allocation4 + $0x3d8] sm:$0xff]  ;;  %v1956_v53 = vadd.f32 %v1940_v51, %v1746_v44  ;;  %v11043_v49 = vld [vmem:[#allocation41_spill] sm:$0xff] }
 0x74d   :  { %6906 = vset.pattern.permute.xlu1 %v10947_v60  ;;  %v2150_v12 = vmul.f32 %v11038_v11, %v2078_v62  ;;  %v11040_v17 = vld [vmem:[#allocation15_spill] sm:$0xff]  ;;  %v11041_v43 = vld [vmem:[#allocation16_spill] sm:$0xff]  ;;  %v2360_v26 = vmul.f32 %v11043_v49, %v2288_v34  ;;  %v1257_v1 = vld [vmem:[#allocation4 + $0x68] sm:$0xff]  ;;  %v2272_v24 = vadd.f32 %v2256_v54, %v2062_v38 }
 0x74e   :  { %2327 = vperm.xlu1 %6906, %v8184_v30   ;;  %v2466_v13 = vmul.f32 %v11040_v17, %v2394_v33  ;;  %v1973_v42 = vld [vmem:[#allocation4 + $0x210] sm:$0xff]  ;;  %v2571_v22 = vmul.f32 %v11041_v43, %v2499_v29  ;;  %v1431_v46 = vadd.f32 %v1415_v61, %v1237_v5  ;;  %v1661_v16 = vld [vmem:[#allocation4 + $0x168] sm:$0xff]  ;;  %v2377_v40 = vadd.f32 %v2361_v8, %v2167_v9  ;;  %v11046_v10 = vld [vmem:[#allocation29_spill] sm:$0xff] }
 0x74f   :  { %v2603_v37 = vld [vmem:[#allocation4 + $0x390] sm:$0xff]  ;;  %v1871_v21 = vld [vmem:[#allocation4 + $0x1e8] sm:$0xff]  ;;  %v2045_v57 = vmul.f32 %v11046_v10, %v1973_v42  ;;  %v2166_v44 = vadd.f32 %v2150_v12, %v1956_v53  ;;  %v11047_v25 = vld [vmem:[#allocation45_spill] sm:$0xff] }
 0x750   :  { %v11042_v2 = vld [vmem:[#allocation27_spill] sm:$0xff]  ;;  %v2291_v33 = vld [vmem:[#allocation4 + $0x2e8] sm:$0xff]  ;;  %v1641_v61 = vadd.f32 %v1625_v6, %v1431_v46  ;;  %v8628_v51 = vmul.f32 %v11047_v25, %v2603_v37  ;;  %v2482_v34 = vadd.f32 %v2466_v13, %v2272_v24  ;;  %v11048_v54 = vld [vmem:[#allocation44_spill] sm:$0xff]  ;;  %v2587_v18 = vadd.f32 %v2571_v22, %v2377_v40  ;;  %v8645_v22 = vpop.permute.xlu0 %2004 }
 0x751   :  { %v8592_v48 = vpop.permute.xlu1 %1187  ;;  %v1835_v52 = vmul.f32 %v11042_v2, %v1763_v3  ;;  %v11044_v27 = vld [vmem:[#allocation43_spill] sm:$0xff]  ;;  %v11045_v19 = vld [vmem:[#allocation18_spill] sm:$0xff]  ;;  %v8625_v3 = vadd.f32 %v2827_v58, %v2826_v35  ;;  %v1523_v38 = vmul.f32 %v11048_v54, %v1451_v41  ;;  %v11050_v12 = vld [vmem:[#allocation33_spill] sm:$0xff]  ;;  %v8643_v43 = vmul.f32 %v8396_v45, %v2291_v33 }
 0x752   :  { %6908 = vset.pattern.permute.xlu1 %v10943_v7  ;;  %v8619_v39 = vmul.f32 %v11044_v27, %v2498_v0  ;;  %v2183_v62 = vld [vmem:[#allocation4 + $0x290] sm:$0xff]  ;;  %v2781_v59 = vmul.f32 %v11045_v19, %v2709_v63  ;;  %v2501_v5 = vld [vmem:[#allocation4 + $0x368] sm:$0xff]  ;;  %v11051_v58 = vld [vmem:[#allocation20_spill] sm:$0xff]  ;;  %v2376_v49 = vadd.f32 %v2360_v26, %v2166_v44 }
 0x753   :  { %2537 = vperm.xlu1 %6908, %v8184_v30   ;;  %v2393_v8 = vld [vmem:[#allocation4 + $0x310] sm:$0xff]  ;;  %v2711_v6 = vld [vmem:[#allocation4 + $0x3e8] sm:$0xff]  ;;  %v1851_v11 = vadd.f32 %v1835_v52, %v1641_v61  ;;  %v2255_v50 = vmul.f32 %v11050_v12, %v2183_v62  ;;  %v11052_v35 = vld [vmem:[#allocation49_spill] sm:$0xff]  ;;  %v2692_v62 = vadd.f32 %v2676_v4, %v2482_v34  ;;  %v11061_v4 = vmov 2  }
 0x754   :  { %v11049_v0 = vld [vmem:[#allocation47_spill] sm:$0xff]  ;;  %v1346_v9 = vld [vmem:[#allocation4 + $0xa8] sm:$0xff]  ;;  %v1733_v17 = vmul.f32 %v11052_v35, %v1661_v16  ;;  %v11053_v63 = vld [vmem:[#allocation53_spill] sm:$0xff]  ;;  %v2797_v53 = vadd.f32 %v2781_v59, %v2587_v18 }
 0x755   :  { %v1329_v28 = vmul.f32 %v11049_v0, %v1257_v1  ;;  %v8637_v13 = vmul.f32 %v11053_v63, %v1871_v21  ;;  %v11054_v42 = vld [vmem:[#allocation55_spill] sm:$0xff]  ;;  %v1256_v46 = vld [vmem:[#allocation4 + $0x60] sm:$0xff]  ;;  %v2061_v41 = vadd.f32 %v2045_v57, %v1851_v11  ;;  %v1152_v16 = vld [vmem:[#allocation4 + $0x28] sm:$0xff] }
 0x756   :  { %v8604_v15 = vpop.permute.xlu1 %1285  ;;  %v2708_v2 = vld [vmem:[#allocation4 + $0x3d0] sm:$0xff]  ;;  %v1450_v52 = vld [vmem:[#allocation4 + $0xe0] sm:$0xff]  ;;  %v1556_v40 = vld [vmem:[#allocation4 + $0x128] sm:$0xff] }
 0x757   :  { %6910 = vset.pattern.permute.xlu1 %v10950_v31  ;;  %v11055_v27 = vld [vmem:[#allocation35_spill] sm:$0xff]  ;;  %v1345_v24 = vld [vmem:[#allocation4 + $0xa0] sm:$0xff]  ;;  %v11056_v21 = vld [vmem:[#allocation58_spill] sm:$0xff]  ;;  %v1539_v33 = vadd.f32 %v1523_v38, %v1329_v28  ;;  %v2271_v59 = vadd.f32 %v2255_v50, %v2061_v41  ;;  %v8665_v50 = vadd.f32 %v2797_v53, %v2692_v62 }
 0x758   :  { %2747 = vperm.xlu1 %6910, %v8184_v30   ;;  %v1976_v30 = vld [vmem:[#allocation4 + $0x228] sm:$0xff]  ;;  %v2465_v1 = vmul.f32 %v11055_v27, %v2393_v8  ;;  %v1660_v61 = vld [vmem:[#allocation4 + $0x160] sm:$0xff]  ;;  %v11062_v34 = vld [vmem:[#allocation64_spill] sm:$0xff] }
 0x759   :  { %v8640_v37 = vmul.f32 %v11054_v42, %v1976_v30  ;;  %v8649_v30 = vmul.f32 %v11056_v21, %v2501_v5  ;;  %v11057_v19 = vld [vmem:[#allocation42_spill] sm:$0xff]  ;;  %v11058_v25 = vld [vmem:[#allocation61_spill] sm:$0xff]  ;;  %v1328_v5 = vmul.f32 %v11062_v34, %v1256_v46  ;;  %v11063_v12 = vld [vmem:[#allocation39_spill] sm:$0xff]  ;;  %v2215_v46 = vpop.permute.xlu0 %2214 }
 0x75a   :  { %v1418_v45 = vmul.f32 %v11057_v19, %v1346_v9  ;;  %v8655_v54 = vmul.f32 %v11058_v25, %v2711_v6  ;;  %v11059_v26 = vld [vmem:[#allocation38_spill] sm:$0xff]  ;;  %v1151_v8 = vld [vmem:[#allocation4 + $0x20] sm:$0xff]  ;;  %v1240_v38 = vmul.f32 %v11063_v12, %v1152_v16  ;;  %v11065_v35 = vld [vmem:[#allocation59_spill] sm:$0xff]  ;;  %v1749_v25 = vadd.f32 %v1733_v17, %v1539_v33 }
 0x75b   :  { %v8623_v29 = vpop.permute.xlu1 %1479  ;;  %v2780_v57 = vmul.f32 %v11059_v26, %v2708_v2  ;;  %v1766_v44 = vld [vmem:[#allocation4 + $0x1a8] sm:$0xff]  ;;  %v1555_v11 = vld [vmem:[#allocation4 + $0x120] sm:$0xff]  ;;  %v1417_v63 = vmul.f32 %v11065_v35, %v1345_v24  ;;  %v2481_v2 = vadd.f32 %v2465_v1, %v2271_v59  ;;  %v11066_v27 = vld [vmem:[#allocation63_spill] sm:$0xff] }
 0x75c   :  { %6912 = vset.pattern.permute.xlu1 %v10959_v47  ;;  %v11060_v0 = vld [vmem:[#allocation62_spill] sm:$0xff]  ;;  %v1870_v6 = vld [vmem:[#allocation4 + $0x1e0] sm:$0xff]  ;;  %v1732_v21 = vmul.f32 %v11066_v27, %v1660_v61  ;;  %v1434_v19 = vadd.f32 %v1418_v45, %v1240_v38  ;;  %v11067_v16 = vld [vmem:[#allocation48_spill] sm:$0xff] }
 0x75d   :  { %1305 = vperm.xlu1 %6912, %v11051_v58   ;;  %v1522_v18 = vmul.f32 %v11060_v0, %v1450_v52  ;;  %v11064_v28 = vld [vmem:[#allocation46_spill] sm:$0xff]  ;;  %v2290_v42 = vld [vmem:[#allocation4 + $0x2e0] sm:$0xff]  ;;  %v2586_v52 = vadd.f32 %v8619_v39, %v2376_v49  ;;  %v1838_v26 = vmul.f32 %v11067_v16, %v1766_v44  ;;  %v1153_v34 = vld [vmem:[#allocation4 + $0x30] sm:$0xff]  ;;  %v11075_v16 = vmov 4  }
 0x75e   :  { %v1628_v9 = vmul.f32 %v11064_v28, %v1556_v40  ;;  %v2081_v41 = vld [vmem:[#allocation4 + $0x268] sm:$0xff]  ;;  %v11068_v40 = vld [vmem:[#allocation57_spill] sm:$0xff]  ;;  %v11069_v12 = vld [vmem:[#allocation67_spill] sm:$0xff] }
 0x75f   :  { %v1239_v0 = vmul.f32 %v11068_v40, %v1151_v8  ;;  %v2080_v24 = vld [vmem:[#allocation4 + $0x260] sm:$0xff]  ;;  %v1627_v28 = vmul.f32 %v11069_v12, %v1555_v11  ;;  %v8672_v53 = vld [vmem:[#allocation4 + $0x78] sm:$0xff]  ;;  %v2796_v62 = vadd.f32 %v2780_v57, %v2586_v52  ;;  %v1538_v1 = vadd.f32 %v1522_v18, %v1328_v5  ;;  %v1347_v17 = vld [vmem:[#allocation4 + $0xb0] sm:$0xff] }
 0x760   :  { %v8652_v10 = vpop.permute.xlu1 %1689  ;;  %11070 = vst [vmem:[#allocation21_spill] sm:$0xff] %v8672_v53  ;;  %v1765_v59 = vld [vmem:[#allocation4 + $0x1a0] sm:$0xff]  ;;  %v11071_v39 = vld [vmem:[#allocation68_spill] sm:$0xff]  ;;  %v1644_v33 = vadd.f32 %v1628_v9, %v1434_v19  ;;  %v11074_v44 = vld [vmem:[#allocation50_spill] sm:$0xff]  ;;  %v2691_v11 = vadd.f32 %v8628_v51, %v2481_v2 }
 0x761   :  { %6913 = vset.pattern.permute.xlu1 %v11061_v4  ;;  %v1942_v49 = vmul.f32 %v11071_v39, %v1870_v6  ;;  %v11072_v61 = vld [vmem:[#allocation69_spill] sm:$0xff]  ;;  %v8676_v45 = vld [vmem:[#allocation4 + $0x178] sm:$0xff]  ;;  %v2153_v8 = vmul.f32 %v11074_v44, %v2081_v41  ;;  %v1433_v38 = vadd.f32 %v1417_v63, %v1239_v0  ;;  %v2186_v40 = vld [vmem:[#allocation4 + $0x2a8] sm:$0xff]  ;;  %v1748_v57 = vadd.f32 %v1732_v21, %v1538_v1 }
 0x762   :  { %1394 = vperm.xlu1 %6913, %v11051_v58   ;;  %v2362_v27 = vmul.f32 %v11072_v61, %v2290_v42  ;;  %11073 = vst [vmem:[#allocation24_spill] sm:$0xff] %v8676_v45  ;;  %v1975_v18 = vld [vmem:[#allocation4 + $0x220] sm:$0xff]  ;;  %v11076_v5 = vld [vmem:[#allocation72_spill] sm:$0xff]  ;;  %v1241_v6 = vmul.f32 %v8592_v48, %v1153_v34  ;;  %v11077_v42 = vld [vmem:[#allocation71_spill] sm:$0xff]  ;;  %v1854_v41 = vadd.f32 %v1838_v26, %v1644_v33 }
 0x763   :  { %v2152_v52 = vmul.f32 %v11076_v5, %v2080_v24  ;;  %v1331_v12 = vmul.f32 %v11077_v42, %v8672_v53  ;;  %v1557_v9 = vld [vmem:[#allocation4 + $0x130] sm:$0xff]  ;;  %v1959_v63 = vadd.f32 %v8637_v13, %v1749_v25  ;;  %v11078_v0 = vld [vmem:[#allocation65_spill] sm:$0xff]  ;;  %v11080_v21 = vld [vmem:[#allocation76_spill] sm:$0xff]  ;;  %v2812_v48 = vadd.f32 %v2796_v62, %v2691_v11  ;;  %v2425_v42 = vpop.permute.xlu0 %2424 }
 0x764   :  { %v1977_v19 = vld [vmem:[#allocation4 + $0x230] sm:$0xff]  ;;  %v1837_v39 = vmul.f32 %v11078_v0, %v1765_v59  ;;  %v11079_v51 = vld [vmem:[#allocation73_spill] sm:$0xff]  ;;  %v1419_v24 = vmul.f32 %v11080_v21, %v1347_v17  ;;  %v1958_v34 = vadd.f32 %v1942_v49, %v1748_v57  ;;  %v8693_v44 = vld [vmem:[#allocation4 + $0xf8] sm:$0xff]  ;;  %v1643_v13 = vadd.f32 %v1627_v28, %v1433_v38 }
 0x765   :  { %v1795_v35 = vpop.permute.xlu1 %1794  ;;  %v8690_v2 = vmul.f32 %v11079_v51, %v8676_v45  ;;  %v2187_v1 = vld [vmem:[#allocation4 + $0x2b0] sm:$0xff]  ;;  %v2185_v61 = vld [vmem:[#allocation4 + $0x2a0] sm:$0xff]  ;;  %11081 = vst [vmem:[#allocation10_spill] sm:$0xff] %v8693_v44  ;;  %v2169_v53 = vadd.f32 %v2153_v8, %v1959_v63  ;;  %v11082_v26 = vld [vmem:[#allocation52_spill] sm:$0xff]  ;;  %v8701_v62 = vmul.f32 %v8645_v22, %v1977_v19  ;;  %v11085_v57 = vmov 6  }
 0x766   :  { %6915 = vset.pattern.permute.xlu1 %v11075_v16  ;;  %v2397_v5 = vld [vmem:[#allocation4 + $0x330] sm:$0xff]  ;;  %v2258_v33 = vmul.f32 %v11082_v26, %v2186_v40  ;;  %v11083_v25 = vld [vmem:[#allocation70_spill] sm:$0xff]  ;;  %v2500_v0 = vld [vmem:[#allocation4 + $0x360] sm:$0xff]  ;;  %v2168_v49 = vadd.f32 %v2152_v52, %v1958_v34  ;;  %v1435_v11 = vadd.f32 %v1419_v24, %v1241_v6  ;;  %v2064_v8 = vadd.f32 %v8640_v37, %v1854_v41 }
 0x767   :  { %1604 = vperm.xlu1 %6915, %v11051_v58   ;;  %v2047_v59 = vmul.f32 %v11083_v25, %v1975_v18  ;;  %v1767_v47 = vld [vmem:[#allocation4 + $0x1b0] sm:$0xff]  ;;  %v11084_v45 = vld [vmem:[#allocation78_spill] sm:$0xff]  ;;  %v1853_v63 = vadd.f32 %v1837_v39, %v1643_v13  ;;  %v2395_v38 = vld [vmem:[#allocation4 + $0x320] sm:$0xff]  ;;  %v8711_v22 = vmul.f32 %v2425_v42, %v2397_v5  ;;  %v8717_v41 = vsel %vm873_vm14, %v2812_v48, 0.0 }
 0x768   :  { %v1629_v17 = vmul.f32 %v11084_v45, %v1557_v9  ;;  %v11086_v40 = vld [vmem:[#allocation74_spill] sm:$0xff]  ;;  %v2710_v18 = vld [vmem:[#allocation4 + $0x3e0] sm:$0xff]  ;;  %v11087_v21 = vld [vmem:[#allocation83_spill] sm:$0xff]  ;;  %v8709_v45 = vmul.f32 %v2215_v46, %v2187_v1  ;;  %v1839_v37 = vmul.f32 %v1795_v35, %v1767_v47  ;;  %v2379_v39 = vadd.f32 %v8643_v43, %v2169_v53 }
 0x769   :  { %v2257_v28 = vmul.f32 %v11086_v40, %v2185_v61  ;;  %v1525_v26 = vmul.f32 %v11087_v21, %v8693_v44  ;;  %v2396_v52 = vld [vmem:[#allocation4 + $0x328] sm:$0xff]  ;;  %v11088_v6 = vld [vmem:[#allocation77_spill] sm:$0xff]  ;;  %v8714_v19 = vld [vmem:[#allocation4 + $0xb8] sm:$0xff]  ;;  %v2274_v24 = vadd.f32 %v2258_v33, %v2064_v8  ;;  %v2063_v61 = vadd.f32 %v2047_v59, %v1853_v63 }
 0x76a   :  { %v8697_v51 = vpop.permute.xlu1 %1899  ;;  %v2572_v9 = vmul.f32 %v11088_v6, %v2500_v0  ;;  %11089 = vst [vmem:[#allocation11_spill] sm:$0xff] %v8714_v19  ;;  %v2606_v34 = vld [vmem:[#allocation4 + $0x3a8] sm:$0xff]  ;;  %v2605_v13 = vld [vmem:[#allocation4 + $0x3a0] sm:$0xff]  ;;  %v1452_v25 = vld [vmem:[#allocation4 + $0xf0] sm:$0xff]  ;;  %v2378_v5 = vadd.f32 %v2362_v27, %v2168_v49  ;;  %v1645_v35 = vadd.f32 %v1629_v17, %v1435_v11  ;;  %v11097_v49 = vmov 8  }
 0x76b   :  { %6917 = vset.pattern.permute.xlu1 %v11085_v57  ;;  %v11090_v46 = vld [vmem:[#allocation75_spill] sm:$0xff]  ;;  %v11091_v42 = vld [vmem:[#allocation80_spill] sm:$0xff]  ;;  %v11093_v6 = vld [vmem:[#allocation54_spill] sm:$0xff]  ;;  %v2273_v53 = vadd.f32 %v2257_v28, %v2063_v61  ;;  %v1541_v8 = vadd.f32 %v1525_v26, %v1331_v12  ;;  %v1524_v11 = vmul.f32 %v8623_v29, %v1452_v25 }
 0x76c   :  { %1814 = vperm.xlu1 %6917, %v11051_v58   ;;  %v2467_v1 = vmul.f32 %v11090_v46, %v2395_v38  ;;  %v2782_v40 = vmul.f32 %v11091_v42, %v2710_v18  ;;  %v8722_v21 = vld [vmem:[#allocation4 + $0x38] sm:$0xff]  ;;  %v2468_v43 = vmul.f32 %v11093_v6, %v2396_v52  ;;  %v11094_v33 = vld [vmem:[#allocation82_spill] sm:$0xff]  ;;  %v8731_v63 = vld [vmem:[#allocation4 + $0x70] sm:$0xff]  ;;  %v2588_v38 = vadd.f32 %v2572_v9, %v2378_v5 }
 0x76d   :  { %v8724_v0 = vld [vmem:[#allocation4 + $0x138] sm:$0xff]  ;;  %v1420_v59 = vmul.f32 %v11094_v33, %v8714_v19  ;;  %11095 = vst [vmem:[#allocation32_spill] sm:$0xff] %v8731_v63  ;;  %v8733_v27 = vld [vmem:[#allocation4 + $0x170] sm:$0xff]  ;;  %v1855_v28 = vadd.f32 %v1839_v37, %v1645_v35  ;;  %v11100_v26 = vld [vmem:[#allocation81_spill] sm:$0xff]  ;;  %v1330_v37 = vmul.f32 %v8604_v15, %v8731_v63 }
 0x76e   :  { %11092 = vst [vmem:[#allocation12_spill] sm:$0xff] %v8724_v0  ;;  %v8726_v47 = vld [vmem:[#allocation4 + $0x1f8] sm:$0xff]  ;;  %11096 = vst [vmem:[#allocation17_spill] sm:$0xff] %v8733_v27  ;;  %v11098_v18 = vld [vmem:[#allocation79_spill] sm:$0xff]  ;;  %v1242_v61 = vmul.f32 %v11100_v26, %v8722_v21  ;;  %v2798_v19 = vadd.f32 %v2782_v40, %v2588_v38  ;;  %v1751_v26 = vadd.f32 %v8690_v2, %v1541_v8 }
 0x76f   :  { %v2110_v48 = vpop.permute.xlu1 %2109  ;;  %v2677_v46 = vmul.f32 %v11098_v18, %v2605_v13  ;;  %v8737_v42 = vld [vmem:[#allocation4 + $0x1b8] sm:$0xff]  ;;  %v11102_v9 = vld [vmem:[#allocation86_spill] sm:$0xff]  ;;  %v1872_v5 = vld [vmem:[#allocation4 + $0x1f0] sm:$0xff]  ;;  %v2483_v18 = vadd.f32 %v2467_v1, %v2273_v53  ;;  %v2065_v15 = vadd.f32 %v8701_v62, %v1855_v28  ;;  %v2484_v62 = vadd.f32 %v2468_v43, %v2274_v24 }
 0x770   :  { %6919 = vset.pattern.permute.xlu1 %v11097_v49  ;;  %v8739_v17 = vld [vmem:[#allocation4 + $0x278] sm:$0xff]  ;;  %v1945_v13 = vmul.f32 %v11102_v9, %v8726_v47  ;;  %v1436_v25 = vadd.f32 %v1420_v59, %v1242_v61  ;;  %v11104_v35 = vld [vmem:[#allocation85_spill] sm:$0xff]  ;;  %v2082_v40 = vld [vmem:[#allocation4 + $0x270] sm:$0xff]  ;;  %v1944_v63 = vmul.f32 %v8697_v51, %v1872_v5 }
 0x771   :  { %2024 = vperm.xlu1 %6919, %v11051_v58   ;;  %v11099_v52 = vld [vmem:[#allocation56_spill] sm:$0xff]  ;;  %v2693_v38 = vadd.f32 %v2677_v46, %v2483_v18  ;;  %v11108_v8 = vld [vmem:[#allocation90_spill] sm:$0xff]  ;;  %v2292_v46 = vld [vmem:[#allocation4 + $0x2f0] sm:$0xff]  ;;  %v2154_v51 = vmul.f32 %v2110_v48, %v2082_v40 }
 0x772   :  { %v2678_v12 = vmul.f32 %v11099_v52, %v2606_v34  ;;  %v11101_v6 = vld [vmem:[#allocation84_spill] sm:$0xff]  ;;  %v1734_v34 = vmul.f32 %v8652_v10, %v8733_v27  ;;  %v1840_v52 = vmul.f32 %v11104_v35, %v8737_v42  ;;  %v11106_v10 = vmov 10   ;;  %v11107_v35 = vld [vmem:[#allocation87_spill] sm:$0xff] }
 0x773   :  { %v1630_v33 = vmul.f32 %v11101_v6, %v8724_v0  ;;  %v8750_v44 = vld [vmem:[#allocation4 + $0x238] sm:$0xff]  ;;  %v1540_v0 = vadd.f32 %v1524_v11, %v1330_v37  ;;  %v1961_v61 = vadd.f32 %v1945_v13, %v1751_v26  ;;  %v2589_v11 = vadd.f32 %v8649_v30, %v2379_v39  ;;  %v11110_v13 = vld [vmem:[#allocation89_spill] sm:$0xff] }
 0x774   :  { %11103 = vst [vmem:[#allocation34_spill] sm:$0xff] %v8750_v44  ;;  %v8752_v29 = vld [vmem:[#allocation4 + $0x2f8] sm:$0xff]  ;;  %v2320_v53 = vpop.permute.xlu1 %2319  ;;  %v2050_v2 = vmul.f32 %v11107_v35, %v8750_v44  ;;  %v2814_v5 = vadd.f32 %v2798_v19, %v2693_v38  ;;  %v2502_v35 = vld [vmem:[#allocation4 + $0x370] sm:$0xff]  ;;  %v2275_v44 = vadd.f32 %v8709_v45, %v2065_v15  ;;  %v2830_v19 = vadd.f32 %v8717_v41, %v8625_v3 }
 0x775   :  { %v11105_v6 = vld [vmem:[#allocation88_spill] sm:$0xff]  ;;  %6921 = vset.pattern.permute.xlu1 %v11106_v10  ;;  %v1646_v59 = vadd.f32 %v1630_v33, %v1436_v25  ;;  %v1750_v28 = vadd.f32 %v1734_v34, %v1540_v0  ;;  %v2364_v39 = vmul.f32 %v2320_v53, %v2292_v46  ;;  %v2694_v0 = vadd.f32 %v2678_v12, %v2484_v62  ;;  %v2712_v38 = vld [vmem:[#allocation4 + $0x3f0] sm:$0xff] }
 0x776   :  { %v2155_v1 = vmul.f32 %v11105_v6, %v8739_v17  ;;  %v8763_v9 = vld [vmem:[#allocation4 + $0x2b8] sm:$0xff]  ;;  %v2365_v6 = vmul.f32 %v11108_v8, %v8752_v29  ;;  %2234 = vperm.xlu1 %6921, %v11051_v58   ;;  %v2831_v3 = vsel %vm873_vm14, %v8665_v50, 0.0  ;;  %v2799_v41 = vadd.f32 %v8655_v54, %v2589_v11 }
 0x777   :  { %v8772_v27 = vld [vmem:[#allocation4 + $0x378] sm:$0xff]  ;;  %v1856_v18 = vadd.f32 %v1840_v52, %v1646_v59  ;;  %v2260_v37 = vmul.f32 %v11110_v13, %v8763_v9  ;;  %v1960_v30 = vadd.f32 %v1944_v63, %v1750_v28  ;;  %v2607_v52 = vld [vmem:[#allocation4 + $0x3b0] sm:$0xff]  ;;  %v2833_v12 = vsel %vm873_vm14, %v2814_v5, 0.0 }
 0x778   :  { %11109 = vst [vmem:[#allocation23_spill] sm:$0xff] %v8772_v27  ;;  %v2171_v33 = vadd.f32 %v2155_v1, %v1961_v61  ;;  %v8778_v25 = vld [vmem:[#allocation4 + $0x338] sm:$0xff]  ;;  %v2575_v8 = vmul.f32 %v8556_v55, %v8772_v27  ;;  %v2635_v1 = vpop.permute.xlu0 %2634  ;;  %v7093_v27 = vld [vmem:[#allocation4 + $0x1c8] sm:$0xff] }
 0x779   :  { %11111 = vst [vmem:[#allocation25_spill] sm:$0xff] %v8778_v25  ;;  %v8780_v26 = vld [vmem:[#allocation4 + $0x3f8] sm:$0xff]  ;;  %v2530_v24 = vpop.permute.xlu1 %2529  ;;  %v2066_v48 = vadd.f32 %v2050_v2, %v1856_v18  ;;  %v2470_v55 = vmul.f32 %v8544_v20, %v8778_v25  ;;  %v2170_v63 = vadd.f32 %v2154_v51, %v1960_v30  ;;  %v2679_v61 = vmul.f32 %v2635_v1, %v2607_v52  ;;  %v11188_v25 = vld [vmem:[#allocation10_spill] sm:$0xff] }
 0x77a   :  { %v2381_v43 = vadd.f32 %v2365_v6, %v2171_v33  ;;  %v8787_v34 = vld [vmem:[#allocation4 + $0x3b8] sm:$0xff]  ;;  %6924 = vset.pattern.permute.xlu1 %v10943_v7  ;;  %v2785_v45 = vmul.f32 %v8581_v32, %v8780_v26  ;;  %v2574_v40 = vmul.f32 %v2530_v24, %v2502_v35  ;;  %v2485_v32 = vadd.f32 %v8711_v22, %v2275_v44 }
 0x77b   :  { %11112 = vst [vmem:[#allocation13_spill] sm:$0xff] %v8787_v34  ;;  %2549 = vperm.xlu1 %6924, %v11051_v58   ;;  %v2276_v53 = vadd.f32 %v2260_v37, %v2066_v48  ;;  %v2680_v20 = vmul.f32 %v8568_v23, %v8787_v34  ;;  %v2380_v59 = vadd.f32 %v2364_v39, %v2170_v63  ;;  %v11113_v37 = vmov 0   ;;  %v2868_v63 = vld [vmem:[#allocation2 + $0x2e0] ss:$0 sm:$0xff]  ;;  %v7089_v34 = vld [vmem:[#allocation4 + $0x8] sm:$0xff] }
 0x77c   :  { %v2591_v15 = vadd.f32 %v2575_v8, %v2381_v43  ;;  %v2815_v2 = vadd.f32 %v2799_v41, %v2694_v0  ;;  %v2832_v6 = vadd.f32 %v2831_v3, %v2830_v19  ;;  %v2695_v5 = vadd.f32 %v2679_v61, %v2485_v32  ;;  %v11114_v8 = vld [vmem:[#allocation36_spill] sm:$0xff] }
 0x77d   :  { %v2486_v62 = vadd.f32 %v2470_v55, %v2276_v53  ;;  %v2590_v50 = vadd.f32 %v2574_v40, %v2380_v59  ;;  %v11116_v52 = vmov 3   ;;  %v8822_v40 = vpop.permute.xlu0 %1202 }
 0x77e   :  { %v2740_v46 = vpop.permute.xlu1 %2739  ;;  %v2801_v28 = vadd.f32 %v2785_v45, %v2591_v15  ;;  %v2834_v54 = vadd.f32 %v2833_v12, %v2832_v6  ;;  %v2835_v23 = vsel %vm873_vm14, %v2815_v2, 0.0 }
 0x77f   :  { %v2784_v51 = vmul.f32 %v2740_v46, %v2712_v38  ;;  %6926 = vset.pattern.permute.xlu1 %v10950_v31  ;;  %v2696_v11 = vadd.f32 %v2680_v20, %v2486_v62 }
 0x780   :  { %2759 = vperm.xlu1 %6926, %v11051_v58   ;;  %v2836_v13 = vadd.f32 %v2835_v23, %v2834_v54  ;;  %v11128_v23 = vmov 14  }
 0x781   :  { %v2800_v18 = vadd.f32 %v2784_v51, %v2590_v50  ;;  %v2817_v33 = vadd.f32 %v2801_v28, %v2696_v11  ;;  %v8834_v53 = vpop.permute.xlu0 %1491  ;;  %v11125_v51 = vmov 12  }
 0x783   :  { %v2816_v44 = vadd.f32 %v2800_v18, %v2695_v5  ;;  %v8805_v22 = vpop.permute.xlu1 %1297  ;;  %v2839_v39 = vsel %vm873_vm14, %v2817_v33, 0.0 }
 0x784   :  { %6927 = vset.pattern.permute.xlu1 %v11113_v37 }
 0x785   :  { %v2837_v35 = vsel %vm873_vm14, %v2816_v44, 0.0  ;;  %1207 = vperm.xlu1 %6927, %v11114_v8   ;;  %v8842_v15 = vpop.permute.xlu0 %1701 }
 0x786   :  { %v2838_v30 = vadd.f32 %v2837_v35, %v2836_v13  ;;  %v11130_v13 = vld [vmem:[#allocation40_spill] sm:$0xff] }
 0x788   :  { %v2840_v58 = vadd.f32 %v2839_v39, %v2838_v30  ;;  %v8811_v24 = vpop.permute.xlu1 %1386 }
 0x789   :  { %6929 = vset.pattern.permute.xlu1 %v11061_v4  ;;  %v8852_v59 = vpop.permute.xlu0 %1911 }
 0x78a   :  { %v2841_v19 = vrot.slane %v2840_v58, 4  ;;  %1390 = vperm.xlu1 %6929, %v11114_v8  }
 0x78c   :  { %v2842_v0 = vadd.f32 %v2841_v19, %v2840_v58 }
 0x78d   :  { %v8815_v48 = vpop.permute.xlu1 %1596  ;;  %v8862_v2 = vpop.permute.xlu0 %2121 }
 0x78e   :  { %11115 = vst [vmem:[#allocation22_spill] sm:$0xff] %v8815_v48  ;;  %v2843_v43 = vrot.slane %v2842_v0, 2  ;;  %6930 = vset.pattern.permute.xlu1 %v11116_v52  ;;  %v9203_v48 = vmul.f32 %v7093_v27, %v8852_v59  ;;  %v11191_v59 = vld [vmem:[#allocation21_spill] sm:$0xff] }
 0x78f   :  { %1495 = vperm.xlu1 %6930, %v11114_v8  }
 0x790   :  { %v2844_v1 = vadd.f32 %v2843_v43, %v2842_v0 }
 0x791   :  { %v8873_v46 = vpop.permute.xlu0 %2331 }
 0x792   :  { %v2845_v55 = vrot.slane %v2844_v1, 1  ;;  %v8819_v45 = vpop.permute.xlu1 %1806 }
 0x793   :  { %11117 = vst [vmem:[#allocation28_spill] sm:$0xff] %v8819_v45  ;;  %6931 = vset.pattern.permute.xlu1 %v11075_v16 }
 0x794   :  { %v2846_v3 = vadd.f32 %v2845_v55, %v2844_v1  ;;  %1600 = vperm.xlu1 %6931, %v11114_v8  }
 0x795   :  { %v8882_v28 = vpop.permute.xlu0 %2541 }
 0x796   :  { %v8825_v41 = vadd.f32 %v2868_v63, %v2846_v3 }
 0x797   :  { %v8827_v12 = vpop.permute.xlu1 %2016 }
 0x798   :  { %11118 = vst [vmem:[#allocation14_spill] sm:$0xff] %v8827_v12  ;;  %6932 = vset.pattern.permute.xlu1 %v10998_v36  ;;  %2960 = vrot.lane.b32.xlu0 %v8825_v41, %s7555_s12  ;;  %6564 = vpush %v8825_v41  ;;  %v7090_v12 = vld [vmem:[#allocation4 + $0xc8] sm:$0xff] }
 0x799   :  { %1705 = vperm.xlu1 %6932, %v11114_v8   ;;  %v8892_v54 = vpop.permute.xlu0 %2751 }
 0x79c   :  { %v8836_v38 = vpop.permute.xlu1 %2226  ;;  %3020 = vrot.lane.b32.xlu0 %v8825_v41, %s7556_s13 }
 0x79d   :  { %11119 = vst [vmem:[#allocation37_spill] sm:$0xff] %v8836_v38  ;;  %6933 = vset.pattern.permute.xlu1 %v11085_v57  ;;  %v8900_v5 = vpop.permute.xlu0 %1382 }
 0x79e   :  { %1810 = vperm.xlu1 %6933, %v11114_v8  }
 0x7a0   :  { %3080 = vrot.lane.b32.xlu0 %v8825_v41, %s7557_s14 }
 0x7a1   :  { %v8846_v20 = vpop.permute.xlu1 %2436  ;;  %v8912_v44 = vpop.permute.xlu0 %1592 }
 0x7a2   :  { %11120 = vst [vmem:[#allocation19_spill] sm:$0xff] %v8846_v20  ;;  %6934 = vset.pattern.permute.xlu1 %v10971_v56 }
 0x7a3   :  { %1915 = vperm.xlu1 %6934, %v11114_v8  }
 0x7a4   :  { %3140 = vrot.lane.b32.xlu0 %v8825_v41, %s7558_s15 }
 0x7a6   :  { %v8854_v32 = vpop.permute.xlu1 %2646 }
 0x7a7   :  { %11121 = vst [vmem:[#allocation26_spill] sm:$0xff] %v8854_v32  ;;  %6935 = vset.pattern.permute.xlu1 %v11097_v49 }
 0x7a8   :  { %2020 = vperm.xlu1 %6935, %v11114_v8   ;;  %3200 = vrot.lane.b32.xlu0 %v8825_v41, %s7559_s16 }
 0x7ab   :  { %v8860_v61 = vpop.permute.xlu1 %1197 }
 0x7ac   :  { %6936 = vset.pattern.permute.xlu1 %v10944_v14  ;;  %3260 = vrot.lane.b32.xlu0 %v8825_v41, %s7560_s17 }
 0x7ad   :  { %2125 = vperm.xlu1 %6936, %v11114_v8  }
 0x7b0   :  { %v8868_v6 = vpop.permute.xlu1 %1293  ;;  %3320 = vrot.lane.b32.xlu0 %v8825_v41, %s7561_s18 }
 0x7b1   :  { %11122 = vst [vmem:[#allocation31_spill] sm:$0xff] %v8868_v6  ;;  %6937 = vset.pattern.permute.xlu1 %v11106_v10  ;;  %v7091_v6 = vld [vmem:[#allocation4 + $0x148] sm:$0xff] }
 0x7b2   :  { %2230 = vperm.xlu1 %6937, %v11114_v8  }
 0x7b4   :  { %3380 = vrot.lane.b32.xlu0 %v8825_v41, %s7562_s19 }
 0x7b5   :  { %v8878_v62 = vpop.permute.xlu1 %1487 }
 0x7b6   :  { %11123 = vst [vmem:[#allocation30_spill] sm:$0xff] %v8878_v62  ;;  %6938 = vset.pattern.permute.xlu1 %v10947_v60 }
 0x7b7   :  { %2335 = vperm.xlu1 %6938, %v11114_v8  }
 0x7b8   :  { %3440 = vrot.lane.b32.xlu0 %v8825_v41, %s7563_s20 }
 0x7ba   :  { %v8886_v50 = vpop.permute.xlu1 %1697 }
 0x7bb   :  { %11124 = vst [vmem:[#allocation15_spill] sm:$0xff] %v8886_v50  ;;  %6939 = vset.pattern.permute.xlu1 %v11125_v51  ;;  %v1527_v50 = vmul.f32 %v7090_v12, %v8834_v53  ;;  %v7095_v12 = vld [vmem:[#allocation4 + $0x2c8] sm:$0xff] }
 0x7bc   :  { %2440 = vperm.xlu1 %6939, %v11114_v8   ;;  %3500 = vrot.lane.b32.xlu0 %v8825_v41, %s7564_s21  ;;  %v9209_v53 = vmul.f32 %v7095_v12, %v8873_v46  ;;  %v7100_v46 = vld [vmem:[#allocation4 + $0x100] sm:$0xff] }
 0x7bd   :  { %v1631_v12 = vmul.f32 %v7100_v46, %v8912_v44  ;;  %v7104_v44 = vld [vmem:[#allocation4 + $0x300] sm:$0xff]  ;;  %v11193_v46 = vld [vmem:[#allocation11_spill] sm:$0xff] }
 0x7be   :  { %11190 = vst [vmem:[#allocation40_spill] sm:$0xff] %v9209_v53  ;;  %v7101_v53 = vld [vmem:[#allocation4 + $0x180] sm:$0xff] }
 0x7bf   :  { %v8894_v11 = vpop.permute.xlu1 %1907 }
 0x7c0   :  { %11126 = vst [vmem:[#allocation16_spill] sm:$0xff] %v8894_v11  ;;  %6940 = vset.pattern.permute.xlu1 %v10943_v7  ;;  %3560 = vrot.lane.b32.xlu0 %v8825_v41, %s7565_s22  ;;  %v9194_v11 = vmul.f32 %v7089_v34, %v8822_v40  ;;  %v7094_v34 = vld [vmem:[#allocation4 + $0x248] sm:$0xff] }
 0x7c1   :  { %2545 = vperm.xlu1 %6940, %v11114_v8   ;;  %v9206_v40 = vmul.f32 %v7094_v34, %v8862_v2  ;;  %v7099_v34 = vld [vmem:[#allocation4 + $0x80] sm:$0xff] }
 0x7c2   :  { %11187 = vst [vmem:[#allocation89_spill] sm:$0xff] %v9194_v11  ;;  %v11192_v11 = vld [vmem:[#allocation24_spill] sm:$0xff] }
 0x7c3   :  { %11189 = vst [vmem:[#allocation36_spill] sm:$0xff] %v9206_v40  ;;  %v1421_v40 = vmul.f32 %v7099_v34, %v8900_v5  ;;  %v7110_v34 = vld [vmem:[#allocation4 + $0x258] sm:$0xff] }
 0x7c4   :  { %v8902_v18 = vpop.permute.xlu1 %2117  ;;  %3620 = vrot.lane.b32.xlu0 %v8825_v41, %s7566_s23 }
 0x7c5   :  { %11127 = vst [vmem:[#allocation27_spill] sm:$0xff] %v8902_v18  ;;  %6941 = vset.pattern.permute.xlu1 %v11128_v23 }
 0x7c6   :  { %2650 = vperm.xlu1 %6941, %v11114_v8   ;;  %v8921_v8 = vpop.permute.xlu0 %1802 }
 0x7c8   :  { %3680 = vrot.lane.b32.xlu0 %v8825_v41, %s7567_s24 }
 0x7c9   :  { %v8910_v33 = vpop.permute.xlu1 %2327 }
 0x7ca   :  { %11129 = vst [vmem:[#allocation41_spill] sm:$0xff] %v8910_v33  ;;  %6943 = vset.pattern.permute.xlu1 %v11113_v37 }
 0x7cb   :  { %1222 = vperm.xlu1 %6943, %v11130_v13  }
 0x7cc   :  { %3740 = vrot.lane.b32.xlu0 %v8825_v41, %s7568_s25 }
 0x7ce   :  { %v8918_v35 = vpop.permute.xlu1 %2537 }
 0x7cf   :  { %11131 = vst [vmem:[#allocation43_spill] sm:$0xff] %v8918_v35  ;;  %6945 = vset.pattern.permute.xlu1 %v11061_v4 }
 0x7d0   :  { %1402 = vperm.xlu1 %6945, %v11130_v13   ;;  %3800 = vrot.lane.b32.xlu0 %v8825_v41, %s10921_s11  ;;  %s7583_s11 = smov 98  }
 0x7d3   :  { %v8926_v30 = vpop.permute.xlu1 %2747 }
 0x7d4   :  { %11132 = vst [vmem:[#allocation18_spill] sm:$0xff] %v8926_v30  ;;  %6946 = vset.pattern.permute.xlu1 %v11116_v52 }
 0x7d5   :  { %1507 = vperm.xlu1 %6946, %v11130_v13  }
 0x7d8   :  { %v8930_v39 = vpop.permute.xlu1 %1305 }
 0x7d9   :  { %11133 = vst [vmem:[#allocation29_spill] sm:$0xff] %v8930_v39  ;;  %6947 = vset.pattern.permute.xlu1 %v11075_v16  ;;  %v7092_v39 = vld [vmem:[#allocation4 + $0x48] sm:$0xff] }
 0x7da   :  { %1612 = vperm.xlu1 %6947, %v11130_v13   ;;  %v1333_v45 = vmul.f32 %v7092_v39, %v8805_v22  ;;  %v7098_v39 = vld [vmem:[#allocation4] sm:$0xff] }
 0x7db   :  { %v1243_v27 = vmul.f32 %v7098_v39, %v8860_v61  ;;  %v7103_v61 = vld [vmem:[#allocation4 + $0x280] sm:$0xff] }
 0x7dd   :  { %v8934_v58 = vpop.permute.xlu1 %1394 }
 0x7de   :  { %11134 = vst [vmem:[#allocation45_spill] sm:$0xff] %v8934_v58  ;;  %6948 = vset.pattern.permute.xlu1 %v10998_v36 }
 0x7df   :  { %1717 = vperm.xlu1 %6948, %v11130_v13  }
 0x7e2   :  { %v8938_v19 = vpop.permute.xlu1 %1604 }
 0x7e3   :  { %11135 = vst [vmem:[#allocation44_spill] sm:$0xff] %v8938_v19  ;;  %6949 = vset.pattern.permute.xlu1 %v11085_v57 }
 0x7e4   :  { %1822 = vperm.xlu1 %6949, %v11130_v13  }
 0x7e7   :  { %v8942_v0 = vpop.permute.xlu1 %1814 }
 0x7e8   :  { %11136 = vst [vmem:[#allocation47_spill] sm:$0xff] %v8942_v0  ;;  %6950 = vset.pattern.permute.xlu1 %v10971_v56  ;;  %v11144_v0 = vmov 1  }
 0x7e9   :  { %1927 = vperm.xlu1 %6950, %v11130_v13  }
 0x7ec   :  { %v8946_v43 = vpop.permute.xlu1 %2024 }
 0x7ed   :  { %11137 = vst [vmem:[#allocation33_spill] sm:$0xff] %v8946_v43  ;;  %6951 = vset.pattern.permute.xlu1 %v11097_v49 }
 0x7ee   :  { %2032 = vperm.xlu1 %6951, %v11130_v13  }
 0x7f1   :  { %v8950_v1 = vpop.permute.xlu1 %2234 }
 0x7f2   :  { %11138 = vst [vmem:[#allocation20_spill] sm:$0xff] %v8950_v1  ;;  %6953 = vset.pattern.permute.xlu1 %v11106_v10  ;;  %v11142_v1 = vld [vmem:[#allocation51_spill] sm:$0xff] }
 0x7f3   :  { %2242 = vperm.xlu1 %6953, %v11130_v13  }
 0x7f6   :  { %v8954_v55 = vpop.permute.xlu1 %2549 }
 0x7f7   :  { %11139 = vst [vmem:[#allocation49_spill] sm:$0xff] %v8954_v55  ;;  %6956 = vset.pattern.permute.xlu1 %v10943_v7 }
 0x7f8   :  { %2557 = vperm.xlu1 %6956, %v11130_v13  }
 0x7fb   :  { %v8958_v63 = vpop.permute.xlu1 %2759 }
 0x7fc   :  { %11140 = vst [vmem:[#allocation53_spill] sm:$0xff] %v8958_v63  ;;  %6957 = vset.pattern.permute.xlu1 %v11128_v23 }
 0x7fd   :  { %2662 = vperm.xlu1 %6957, %v11130_v13  }
 0x800   :  { %v8962_v3 = vpop.permute.xlu1 %1207 }
 0x801   :  { %11141 = vst [vmem:[#allocation55_spill] sm:$0xff] %v8962_v3  ;;  %6959 = vset.pattern.permute.xlu1 %v11113_v37 }
 0x802   :  { %1217 = vperm.xlu1 %6959, %v11142_v1  }
 0x805   :  { %v8966_v43 = vpop.permute.xlu1 %1390 }
 0x806   :  { %11143 = vst [vmem:[#allocation35_spill] sm:$0xff] %v8966_v43  ;;  %6960 = vset.pattern.permute.xlu1 %v11144_v0 }
 0x807   :  { %1309 = vperm.xlu1 %6960, %v11142_v1  }
 0x80a   :  { %v8970_v55 = vpop.permute.xlu1 %1495 }
 0x80b   :  { %11145 = vst [vmem:[#allocation58_spill] sm:$0xff] %v8970_v55  ;;  %6962 = vset.pattern.permute.xlu1 %v11116_v52 }
 0x80c   :  { %1503 = vperm.xlu1 %6962, %v11142_v1  }
 0x80f   :  { %v8974_v63 = vpop.permute.xlu1 %1600 }
 0x810   :  { %11146 = vst [vmem:[#allocation42_spill] sm:$0xff] %v8974_v63  ;;  %6964 = vset.pattern.permute.xlu1 %v10998_v36 }
 0x811   :  { %1713 = vperm.xlu1 %6964, %v11142_v1  }
 0x814   :  { %v8978_v13 = vpop.permute.xlu1 %1705 }
 0x815   :  { %11147 = vst [vmem:[#allocation61_spill] sm:$0xff] %v8978_v13  ;;  %6966 = vset.pattern.permute.xlu1 %v10971_v56 }
 0x816   :  { %1923 = vperm.xlu1 %6966, %v11142_v1  }
 0x819   :  { %v8982_v3 = vpop.permute.xlu1 %1810 }
 0x81a   :  { %11148 = vst [vmem:[#allocation38_spill] sm:$0xff] %v8982_v3  ;;  %6968 = vset.pattern.permute.xlu1 %v10944_v14 }
 0x81b   :  { %2133 = vperm.xlu1 %6968, %v11142_v1  }
 0x81e   :  { %v8986_v55 = vpop.permute.xlu1 %1915 }
 0x81f   :  { %11149 = vst [vmem:[#allocation62_spill] sm:$0xff] %v8986_v55  ;;  %6969 = vset.pattern.permute.xlu1 %v11106_v10 }
 0x820   :  { %2238 = vperm.xlu1 %6969, %v11142_v1  }
 0x823   :  { %v8990_v63 = vpop.permute.xlu1 %2020 }
 0x824   :  { %11150 = vst [vmem:[#allocation64_spill] sm:$0xff] %v8990_v63  ;;  %6970 = vset.pattern.permute.xlu1 %v10947_v60 }
 0x825   :  { %2343 = vperm.xlu1 %6970, %v11142_v1  }
 0x828   :  { %v8994_v13 = vpop.permute.xlu1 %2125 }
 0x829   :  { %11151 = vst [vmem:[#allocation39_spill] sm:$0xff] %v8994_v13  ;;  %6971 = vset.pattern.permute.xlu1 %v11125_v51  ;;  %v11155_v13 = vld [vmem:[#allocation60_spill] sm:$0xff] }
 0x82a   :  { %2448 = vperm.xlu1 %6971, %v11142_v1  }
 0x82d   :  { %v8998_v3 = vpop.permute.xlu1 %2230 }
 0x82e   :  { %11152 = vst [vmem:[#allocation46_spill] sm:$0xff] %v8998_v3  ;;  %6972 = vset.pattern.permute.xlu1 %v10943_v7  ;;  %v9014_v3 = vpop.permute.xlu0 %2012 }
 0x82f   :  { %2553 = vperm.xlu1 %6972, %v11142_v1  }
 0x832   :  { %v9002_v55 = vpop.permute.xlu1 %2335 }
 0x833   :  { %11153 = vst [vmem:[#allocation59_spill] sm:$0xff] %v9002_v55  ;;  %6973 = vset.pattern.permute.xlu1 %v11128_v23 }
 0x834   :  { %2658 = vperm.xlu1 %6973, %v11142_v1   ;;  %v9020_v1 = vpop.permute.xlu0 %2222 }
 0x837   :  { %v9006_v63 = vpop.permute.xlu1 %2440 }
 0x838   :  { %11154 = vst [vmem:[#allocation63_spill] sm:$0xff] %v9006_v63  ;;  %6975 = vset.pattern.permute.xlu1 %v11113_v37  ;;  %v9028_v55 = vpop.permute.xlu0 %2432 }
 0x839   :  { %1232 = vperm.xlu1 %6975, %v11155_v13  }
 0x83c   :  { %v9010_v43 = vpop.permute.xlu1 %2545 }
 0x83d   :  { %11156 = vst [vmem:[#allocation48_spill] sm:$0xff] %v9010_v43  ;;  %6976 = vset.pattern.permute.xlu1 %v11144_v0 }
 0x83e   :  { %1321 = vperm.xlu1 %6976, %v11155_v13  }
 0x841   :  { %v9016_v19 = vpop.permute.xlu1 %2650 }
 0x842   :  { %11157 = vst [vmem:[#allocation57_spill] sm:$0xff] %v9016_v19  ;;  %6978 = vset.pattern.permute.xlu1 %v11116_v52  ;;  %v9035_v52 = vpop.permute.xlu0 %2642 }
 0x843   :  { %1515 = vperm.xlu1 %6978, %v11155_v13  }
 0x846   :  { %v9022_v63 = vpop.permute.xlu1 %1222 }
 0x847   :  { %11158 = vst [vmem:[#allocation67_spill] sm:$0xff] %v9022_v63  ;;  %6979 = vset.pattern.permute.xlu1 %v11075_v16 }
 0x848   :  { %1620 = vperm.xlu1 %6979, %v11155_v13  }
 0x84b   :  { %v9026_v43 = vpop.permute.xlu1 %1402 }
 0x84c   :  { %11159 = vst [vmem:[#allocation68_spill] sm:$0xff] %v9026_v43  ;;  %6980 = vset.pattern.permute.xlu1 %v10998_v36  ;;  %v9042_v43 = vpop.permute.xlu0 %1212 }
 0x84d   :  { %1725 = vperm.xlu1 %6980, %v11155_v13  }
 0x850   :  { %v9032_v19 = vpop.permute.xlu1 %1507  ;;  %v9048_v36 = vpop.permute.xlu0 %1499 }
 0x851   :  { %11160 = vst [vmem:[#allocation69_spill] sm:$0xff] %v9032_v19  ;;  %6981 = vset.pattern.permute.xlu1 %v11085_v57 }
 0x852   :  { %1830 = vperm.xlu1 %6981, %v11155_v13  }
 0x855   :  { %v9038_v63 = vpop.permute.xlu1 %1612 }
 0x856   :  { %11161 = vst [vmem:[#allocation50_spill] sm:$0xff] %v9038_v63  ;;  %6982 = vset.pattern.permute.xlu1 %v10971_v56  ;;  %v9054_v63 = vpop.permute.xlu0 %1709 }
 0x857   :  { %1935 = vperm.xlu1 %6982, %v11155_v13  }
 0x85a   :  { %v9044_v30 = vpop.permute.xlu1 %1717 }
 0x85b   :  { %11162 = vst [vmem:[#allocation72_spill] sm:$0xff] %v9044_v30  ;;  %6983 = vset.pattern.permute.xlu1 %v11097_v49  ;;  %v9062_v49 = vpop.permute.xlu0 %1919 }
 0x85c   :  { %2040 = vperm.xlu1 %6983, %v11155_v13  }
 0x85f   :  { %v9050_v57 = vpop.permute.xlu1 %1822  ;;  %v9069_v58 = vpop.permute.xlu0 %2129 }
 0x860   :  { %11163 = vst [vmem:[#allocation71_spill] sm:$0xff] %v9050_v57  ;;  %6985 = vset.pattern.permute.xlu1 %v11106_v10 }
 0x861   :  { %2250 = vperm.xlu1 %6985, %v11155_v13  }
 0x864   :  { %v9056_v19 = vpop.permute.xlu1 %1927 }
 0x865   :  { %11164 = vst [vmem:[#allocation65_spill] sm:$0xff] %v9056_v19  ;;  %6986 = vset.pattern.permute.xlu1 %v10947_v60 }
 0x866   :  { %2355 = vperm.xlu1 %6986, %v11155_v13  }
 0x869   :  { %v9060_v30 = vpop.permute.xlu1 %2032 }
 0x86a   :  { %11165 = vst [vmem:[#allocation73_spill] sm:$0xff] %v9060_v30  ;;  %6987 = vset.pattern.permute.xlu1 %v11125_v51  ;;  %v9076_v30 = vpop.permute.xlu0 %2339  ;;  %v11169_v51 = vld [vmem:[#allocation66_spill] sm:$0xff] }
 0x86b   :  { %2460 = vperm.xlu1 %6987, %v11155_v13  }
 0x86e   :  { %v9066_v57 = vpop.permute.xlu1 %2242 }
 0x86f   :  { %11166 = vst [vmem:[#allocation76_spill] sm:$0xff] %v9066_v57  ;;  %6988 = vset.pattern.permute.xlu1 %v10943_v7  ;;  %v9082_v57 = vpop.permute.xlu0 %2444 }
 0x870   :  { %2565 = vperm.xlu1 %6988, %v11155_v13  }
 0x873   :  { %v9072_v19 = vpop.permute.xlu1 %2557 }
 0x874   :  { %11167 = vst [vmem:[#allocation52_spill] sm:$0xff] %v9072_v19  ;;  %6989 = vset.pattern.permute.xlu1 %v11128_v23  ;;  %v9088_v19 = vpop.permute.xlu0 %2654 }
 0x875   :  { %2670 = vperm.xlu1 %6989, %v11155_v13  }
 0x878   :  { %v9078_v35 = vpop.permute.xlu1 %2662 }
 0x879   :  { %11168 = vst [vmem:[#allocation70_spill] sm:$0xff] %v9078_v35  ;;  %6992 = vset.pattern.permute.xlu1 %v11144_v0  ;;  %v9096_v0 = vpop.permute.xlu0 %1301 }
 0x87a   :  { %1317 = vperm.xlu1 %6992, %v11169_v51  }
 0x87d   :  { %v9084_v32 = vpop.permute.xlu1 %1217 }
 0x87e   :  { %11170 = vst [vmem:[#allocation78_spill] sm:$0xff] %v9084_v32  ;;  %6993 = vset.pattern.permute.xlu1 %v11061_v4  ;;  %v9103_v4 = vpop.permute.xlu0 %2755 }
 0x87f   :  { %1406 = vperm.xlu1 %6993, %v11169_v51  }
 0x882   :  { %v9090_v23 = vpop.permute.xlu1 %1309 }
 0x883   :  { %11171 = vst [vmem:[#allocation74_spill] sm:$0xff] %v9090_v23  ;;  %6995 = vset.pattern.permute.xlu1 %v11075_v16  ;;  %v9110_v16 = vpop.permute.xlu0 %1313 }
 0x884   :  { %1616 = vperm.xlu1 %6995, %v11169_v51  }
 0x887   :  { %v9094_v13 = vpop.permute.xlu1 %1503 }
 0x888   :  { %11172 = vst [vmem:[#allocation83_spill] sm:$0xff] %v9094_v13  ;;  %6998 = vset.pattern.permute.xlu1 %v10971_v56  ;;  %v9116_v56 = vpop.permute.xlu0 %2137 }
 0x889   :  { %1931 = vperm.xlu1 %6998, %v11169_v51  }
 0x88c   :  { %v9100_v35 = vpop.permute.xlu1 %1713 }
 0x88d   :  { %11173 = vst [vmem:[#allocation77_spill] sm:$0xff] %v9100_v35  ;;  %7000 = vset.pattern.permute.xlu1 %v10944_v14 }
 0x88e   :  { %2141 = vperm.xlu1 %7000, %v11169_v51  }
 0x891   :  { %v9106_v23 = vpop.permute.xlu1 %1923 }
 0x892   :  { %11174 = vst [vmem:[#allocation75_spill] sm:$0xff] %v9106_v23  ;;  %7001 = vset.pattern.permute.xlu1 %v11106_v10  ;;  %v9122_v23 = vpop.permute.xlu0 %2347 }
 0x893   :  { %2246 = vperm.xlu1 %7001, %v11169_v51  }
 0x896   :  { %v9112_v13 = vpop.permute.xlu1 %2133 }
 0x897   :  { %11175 = vst [vmem:[#allocation80_spill] sm:$0xff] %v9112_v13  ;;  %7002 = vset.pattern.permute.xlu1 %v10947_v60  ;;  %v9130_v60 = vpop.permute.xlu0 %2452 }
 0x898   :  { %2351 = vperm.xlu1 %7002, %v11169_v51   ;;  %11179 = vst [vmem:[#allocation56_spill] sm:$0xff] %v9130_v60 }
 0x89b   :  { %v9118_v14 = vpop.permute.xlu1 %2238 }
 0x89c   :  { %11176 = vst [vmem:[#allocation54_spill] sm:$0xff] %v9118_v14  ;;  %7004 = vset.pattern.permute.xlu1 %v10943_v7 }
 0x89d   :  { %2561 = vperm.xlu1 %7004, %v11169_v51  }
 0x8a0   :  { %v9124_v10 = vpop.permute.xlu1 %2343 }
 0x8a1   :  { %11177 = vst [vmem:[#allocation82_spill] sm:$0xff] %v9124_v10  ;;  %7006 = vset.pattern.permute.xlu1 %v10950_v31  ;;  %v9139_v10 = vpop.permute.xlu0 %2767 }
 0x8a2   :  { %2771 = vperm.xlu1 %7006, %v11169_v51   ;;  %11181 = vst [vmem:[#allocation84_spill] sm:$0xff] %v9139_v10 }
 0x8a5   :  { %v9128_v13 = vpop.permute.xlu1 %2448  ;;  %v9145_v51 = vpop.permute.xlu0 %1398 }
 0x8a6   :  { %11178 = vst [vmem:[#allocation79_spill] sm:$0xff] %v9128_v13  ;;  %2908 = vrot.lane.b32.xlu1 %v8825_v41, %s7536_s3 }
 0x8a7   :  { %7008 = vset.pattern.permute.xlu1 %v11113_v37 }
 0x8a9   :  { %v9153_v60 = vpop.permute.xlu0 %1608 }
 0x8aa   :  { %v9135_v7 = vpop.permute.xlu1 %2553  ;;  %2930 = vrot.lane.b32.xlu1 %v8825_v41, %s7569_s26  ;;  %11183 = vst [vmem:[#allocation85_spill] sm:$0xff] %v9153_v60  ;;  %v1737_v60 = vmul.f32 %v7091_v6, %v8842_v15  ;;  %v7096_v15 = vld [vmem:[#allocation4 + $0x348] sm:$0xff] }
 0x8ab   :  { %11180 = vst [vmem:[#allocation81_spill] sm:$0xff] %v9135_v7  ;;  %v9212_v22 = vmul.f32 %v7096_v15, %v8882_v28  ;;  %v9223_v28 = vmul.f32 %v7101_v53, %v8921_v8  ;;  %v7102_v15 = vld [vmem:[#allocation4 + $0x200] sm:$0xff]  ;;  %v9237_v8 = vmul.f32 %v7104_v44, %v9028_v55  ;;  %v1437_v55 = vadd.f32 %v1421_v40, %v1243_v27  ;;  %v7112_v40 = vld [vmem:[#allocation4 + $0x318] sm:$0xff]  ;;  %v7114_v44 = vld [vmem:[#allocation4 + $0x50] sm:$0xff] }
 0x8ac   :  { %v9267_v27 = vmul.f32 %v7112_v40, %v9082_v57  ;;  %v11199_v40 = vld [vmem:[#allocation30_spill] sm:$0xff] }
 0x8ae   :  { %2990 = vrot.lane.b32.xlu1 %v8825_v41, %s7570_s27 }
 0x8af   :  { %v9143_v31 = vpop.permute.xlu1 %2658 }
 0x8b0   :  { %11182 = vst [vmem:[#allocation86_spill] sm:$0xff] %v9143_v31  ;;  %v9157_v31 = vpop.permute.xlu0 %1818 }
 0x8b1   :  { %11184 = vst [vmem:[#allocation88_spill] sm:$0xff] %v9157_v31 }
 0x8b2   :  { %3050 = vrot.lane.b32.xlu1 %v8825_v41, %s7571_s28 }
 0x8b4   :  { %v9149_v37 = vpop.permute.xlu1 %1232  ;;  %v9165_v14 = vpop.permute.xlu0 %2028 }
 0x8b5   :  { %11185 = vst [vmem:[#allocation87_spill] sm:$0xff] %v9165_v14 }
 0x8b6   :  { %3110 = vrot.lane.b32.xlu1 %v8825_v41, %s7572_s29 }
 0x8b8   :  { %v9169_v32 = vpop.permute.xlu0 %2763 }
 0x8b9   :  { %v1322_v10 = vpop.permute.xlu1 %1321  ;;  %11186 = vst [vmem:[#allocation90_spill] sm:$0xff] %v9169_v32 }
 0x8ba   :  { %3170 = vrot.lane.b32.xlu1 %v8825_v41, %s7573_s30 }
 0x8bc   :  { %v9177_v20 = vpop.permute.xlu0 %1410 }
 0x8be   :  { %v1516_v7 = vpop.permute.xlu1 %1515  ;;  %3230 = vrot.lane.b32.xlu1 %v8825_v41, %s7574_s2 }
 0x8bf   :  { %v1533_v62 = vmul.f32 %v1516_v7, %v11188_v25  ;;  %v7097_v25 = vld [vmem:[#allocation4 + $0x3c8] sm:$0xff]  ;;  %v1339_v7 = vmul.f32 %v1322_v10, %v11191_v59  ;;  %v9229_v10 = vmul.f32 %v7103_v61, %v9020_v1  ;;  %v7106_v1 = vld [vmem:[#allocation4 + $0x18] sm:$0xff] }
 0x8c0   :  { %v9181_v18 = vpop.permute.xlu0 %2145  ;;  %v9215_v6 = vmul.f32 %v7097_v25, %v8892_v54  ;;  %v9226_v54 = vmul.f32 %v7102_v15, %v9014_v3  ;;  %v7105_v3 = vld [vmem:[#allocation4 + $0x380] sm:$0xff]  ;;  %v9243_v59 = vmul.f32 %v7106_v1, %v9042_v43  ;;  %v9257_v43 = vmul.f32 %v7110_v34, %v9069_v58  ;;  %v7111_v15 = vld [vmem:[#allocation4 + $0x2d8] sm:$0xff]  ;;  %v11196_v34 = vld [vmem:[#allocation22_spill] sm:$0xff] }
 0x8c1   :  { %v1549_v5 = vadd.f32 %v1533_v62, %v1339_v7  ;;  %v9240_v53 = vmul.f32 %v7105_v3, %v9035_v52  ;;  %v7109_v7 = vld [vmem:[#allocation4 + $0x1d8] sm:$0xff]  ;;  %v7115_v3 = vld [vmem:[#allocation4 + $0x3d0] sm:$0xff]  ;;  %v2163_v57 = vmul.f32 %v9181_v18, %v8739_v17  ;;  %v7119_v17 = vld [vmem:[#allocation4 + $0x2e8] sm:$0xff] }
 0x8c2   :  { %3290 = vrot.lane.b32.xlu1 %v8825_v41, %s7575_s5  ;;  %v9254_v52 = vmul.f32 %v7109_v7, %v9062_v49  ;;  %v9278_v1 = vmul.f32 %v7115_v3, %v9103_v4  ;;  %v9295_v18 = vmul.f32 %v7119_v17, %v9122_v23  ;;  %v7121_v7 = vld [vmem:[#allocation4 + $0x108] sm:$0xff]  ;;  %v7124_v3 = vld [vmem:[#allocation4 + $0x58] sm:$0xff] }
 0x8c3   :  { %v9163_v13 = vpop.permute.xlu1 %1620 }
 0x8c4   :  { %v9189_v38 = vpop.permute.xlu0 %2775 }
 0x8c6   :  { %3350 = vrot.lane.b32.xlu1 %v8825_v41, %s7576_s6 }
 0x8c8   :  { %v1726_v35 = vpop.permute.xlu1 %1725 }
 0x8c9   :  { %v1743_v2 = vmul.f32 %v1726_v35, %v11192_v11  ;;  %v9231_v11 = vpop.permute.xlu0 %1227  ;;  %v1543_v35 = vadd.f32 %v1527_v50, %v1333_v45  ;;  %v1250_v45 = vmul.f32 %v9149_v37, %v8722_v21  ;;  %v1428_v21 = vmul.f32 %v9177_v20, %v11193_v46  ;;  %v11194_v37 = vld [vmem:[#allocation12_spill] sm:$0xff] }
 0x8ca   :  { %3410 = vrot.lane.b32.xlu1 %v8825_v41, %s7577_s1  ;;  %v9273_v20 = vmul.f32 %v7114_v44, %v9096_v0  ;;  %v1632_v46 = vmul.f32 %v7121_v7, %v11196_v34  ;;  %v11201_v44 = vld [vmem:[#allocation36_spill] sm:$0xff] }
 0x8cb   :  { %v1753_v49 = vadd.f32 %v1737_v60, %v1543_v35  ;;  %v1647_v35 = vadd.f32 %v1631_v12, %v1437_v55 }
 0x8cd   :  { %v9173_v33 = vpop.permute.xlu1 %1830  ;;  %v9282_v60 = vpop.permute.xlu0 %1511  ;;  %v1857_v23 = vadd.f32 %v9223_v28, %v1647_v35 }
 0x8ce   :  { %3470 = vrot.lane.b32.xlu1 %v8825_v41, %s7578_s7 }
 0x8d2   :  { %v1936_v14 = vpop.permute.xlu1 %1935  ;;  %3530 = vrot.lane.b32.xlu1 %v8825_v41, %s7579_s8 }
 0x8d3   :  { %v1953_v39 = vmul.f32 %v1936_v14, %v8726_v47  ;;  %v7107_v47 = vld [vmem:[#allocation4 + $0xd8] sm:$0xff]  ;;  %v1759_v14 = vadd.f32 %v1743_v2, %v1549_v5 }
 0x8d4   :  { %v9248_v62 = vmul.f32 %v7107_v47, %v9048_v36  ;;  %v1638_v36 = vmul.f32 %v9163_v13, %v11194_v37  ;;  %v7113_v5 = vld [vmem:[#allocation4 + $0x398] sm:$0xff]  ;;  %v1444_v13 = vadd.f32 %v1428_v21, %v1250_v45  ;;  %v7117_v45 = vld [vmem:[#allocation4 + $0x88] sm:$0xff] }
 0x8d5   :  { %v1969_v2 = vadd.f32 %v1953_v39, %v1759_v14  ;;  %v9270_v58 = vmul.f32 %v7113_v5, %v9088_v19  ;;  %v7116_v39 = vld [vmem:[#allocation4 + $0x68] sm:$0xff]  ;;  %v1422_v47 = vmul.f32 %v7117_v45, %v8811_v24  ;;  %v2793_v24 = vmul.f32 %v9189_v38, %v8780_v26  ;;  %v11200_v26 = vld [vmem:[#allocation25_spill] sm:$0xff]  ;;  %v1722_v5 = vpop.permute.xlu0 %1721 }
 0x8d6   :  { %3590 = vrot.lane.b32.xlu1 %v8825_v41, %s7580_s9  ;;  %v9286_v0 = vmul.f32 %v7116_v39, %v9110_v16  ;;  %v7120_v16 = vld [vmem:[#allocation4 + $0xa0] sm:$0xff] }
 0x8d7   :  { %v9185_v32 = vpop.permute.xlu1 %2040  ;;  %v2179_v12 = vadd.f32 %v2163_v57, %v1969_v2  ;;  %v11203_v57 = vld [vmem:[#allocation29_spill] sm:$0xff] }
 0x8d8   :  { %v1335_v28 = vmul.f32 %v7124_v3, %v11203_v57  ;;  %v11204_v39 = vld [vmem:[#allocation85_spill] sm:$0xff]  ;;  %v7131_v3 = vld [vmem:[#allocation4 + $0x288] sm:$0xff]  ;;  %v11213_v57 = vld [vmem:[#allocation27_spill] sm:$0xff] }
 0x8da   :  { %3650 = vrot.lane.b32.xlu1 %v8825_v41, %s7581_s10 }
 0x8dc   :  { %v9191_v31 = vpop.permute.xlu1 %2250 }
 0x8de   :  { %3710 = vrot.lane.b32.xlu1 %v8825_v41, %s7582_s0 }
 0x8e1   :  { %v2356_v25 = vpop.permute.xlu1 %2355 }
 0x8e2   :  { %3770 = vrot.lane.b32.xlu1 %v8825_v41, %s7583_s11  ;;  %v7108_v41 = vld [vmem:[#allocation4 + $0x158] sm:$0xff]  ;;  %v2373_v19 = vmul.f32 %v2356_v25, %v8752_v29  ;;  %v1963_v29 = vadd.f32 %v9203_v48, %v1753_v49  ;;  %v9299_v25 = vmul.f32 %v7120_v16, %v9145_v51  ;;  %v11197_v48 = vld [vmem:[#allocation23_spill] sm:$0xff]  ;;  %v7122_v51 = vld [vmem:[#allocation4 + $0xc0] sm:$0xff] }
 0x8e3   :  { %v9251_v50 = vmul.f32 %v7108_v41, %v9054_v63  ;;  %v9264_v63 = vmul.f32 %v7111_v15, %v9076_v30  ;;  %v1848_v30 = vmul.f32 %v9173_v33, %v8737_v42  ;;  %v1654_v42 = vadd.f32 %v1638_v36, %v1444_v13  ;;  %v11195_v33 = vld [vmem:[#allocation34_spill] sm:$0xff]  ;;  %v11198_v36 = vld [vmem:[#allocation89_spill] sm:$0xff]  ;;  %v11202_v13 = vld [vmem:[#allocation28_spill] sm:$0xff] }
 0x8e4   :  { %v2058_v4 = vmul.f32 %v9185_v32, %v11195_v33  ;;  %v7118_v41 = vld [vmem:[#allocation4 + $0x268] sm:$0xff]  ;;  %v2268_v32 = vmul.f32 %v9191_v31, %v8763_v9  ;;  %v2389_v21 = vadd.f32 %v2373_v19, %v2179_v12  ;;  %v1438_v15 = vadd.f32 %v1422_v47, %v11198_v36  ;;  %v7125_v19 = vld [vmem:[#allocation4 + $0x120] sm:$0xff] }
 0x8e5   :  { %v9292_v14 = vmul.f32 %v7118_v41, %v9116_v56  ;;  %v1864_v55 = vadd.f32 %v1848_v30, %v1654_v42  ;;  %v1526_v49 = vmul.f32 %v7122_v51, %v11199_v40  ;;  %v2173_v9 = vadd.f32 %v11201_v44, %v1963_v29  ;;  %v7123_v31 = vld [vmem:[#allocation4 + $0x188] sm:$0xff]  ;;  %v7126_v47 = vld [vmem:[#allocation4 + $0x40] sm:$0xff]  ;;  %v11205_v42 = vld [vmem:[#allocation31_spill] sm:$0xff] }
 0x8e6   :  { %v2461_v61 = vpop.permute.xlu1 %2460  ;;  %v1842_v30 = vmul.f32 %v7123_v31, %v11202_v13  ;;  %v9315_v45 = vmul.f32 %v7125_v19, %v11204_v39  ;;  %v1332_v33 = vmul.f32 %v7126_v47, %v11205_v42  ;;  %v11206_v41 = vld [vmem:[#allocation15_spill] sm:$0xff]  ;;  %v1648_v12 = vadd.f32 %v1632_v46, %v1438_v15  ;;  %v7128_v29 = vld [vmem:[#allocation4 + $0x208] sm:$0xff]  ;;  %v11209_v40 = vld [vmem:[#allocation13_spill] sm:$0xff] }
 0x8e7   :  { %v2074_v2 = vadd.f32 %v2058_v4, %v1864_v55  ;;  %v2478_v38 = vmul.f32 %v2461_v61, %v11200_v26  ;;  %v7127_v4 = vld [vmem:[#allocation4 + $0x140] sm:$0xff]  ;;  %v11207_v16 = vld [vmem:[#allocation14_spill] sm:$0xff]  ;;  %v11210_v31 = vld [vmem:[#allocation88_spill] sm:$0xff] }
 0x8e8   :  { %v1736_v61 = vmul.f32 %v7127_v4, %v11206_v41  ;;  %v2052_v55 = vmul.f32 %v7128_v29, %v11207_v16  ;;  %v7130_v44 = vld [vmem:[#allocation4 + $0x1a0] sm:$0xff]  ;;  %v11211_v46 = vld [vmem:[#allocation40_spill] sm:$0xff]  ;;  %v11214_v39 = vld [vmem:[#allocation87_spill] sm:$0xff] }
 0x8e9   :  { %v2284_v17 = vadd.f32 %v2268_v32, %v2074_v2  ;;  %v9324_v13 = vmul.f32 %v7130_v44, %v11210_v31  ;;  %v1858_v32 = vadd.f32 %v1842_v30, %v1648_v12  ;;  %v2383_v15 = vadd.f32 %v11211_v46, %v2173_v9  ;;  %v7134_v42 = vld [vmem:[#allocation4 + $0x30] sm:$0xff]  ;;  %v1827_v30 = vpop.permute.xlu0 %1826  ;;  %v11216_v12 = vld [vmem:[#allocation41_spill] sm:$0xff] }
 0x8ea   :  { %v1545_v2 = vadd.f32 %v9248_v62, %v1335_v28  ;;  %v7135_v28 = vld [vmem:[#allocation4 + $0x308] sm:$0xff]  ;;  %v11215_v4 = vld [vmem:[#allocation19_spill] sm:$0xff]  ;;  %v7139_v44 = vld [vmem:[#allocation4 + $0x340] sm:$0xff] }
 0x8eb   :  { %v2566_v56 = vpop.permute.xlu1 %2565  ;;  %v2494_v51 = vadd.f32 %v2478_v38, %v2284_v17  ;;  %v7133_v38 = vld [vmem:[#allocation4 + $0x220] sm:$0xff]  ;;  %v2068_v9 = vadd.f32 %v2052_v55, %v1858_v32  ;;  %v2472_v41 = vmul.f32 %v7135_v28, %v11215_v4  ;;  %v11217_v55 = vld [vmem:[#allocation32_spill] sm:$0xff]  ;;  %v11219_v31 = vld [vmem:[#allocation43_spill] sm:$0xff] }
 0x8ec   :  { %v2583_v37 = vmul.f32 %v2566_v56, %v11197_v48  ;;  %v2067_v56 = vadd.f32 %v9226_v54, %v1857_v23  ;;  %v7129_v48 = vld [vmem:[#allocation4 + $0x1c0] sm:$0xff]  ;;  %v9331_v47 = vmul.f32 %v7133_v38, %v11214_v39  ;;  %v2576_v32 = vmul.f32 %v7139_v44, %v11219_v31  ;;  %v7143_v39 = vld [vmem:[#allocation4 + $0x118] sm:$0xff]  ;;  %v7144_v4 = vld [vmem:[#allocation4 + $0x90] sm:$0xff] }
 0x8ed   :  { %v11212_v54 = vld [vmem:[#allocation37_spill] sm:$0xff]  ;;  %v7150_v44 = vld [vmem:[#allocation4 + $0x150] sm:$0xff] }
 0x8ee   :  { %v2599_v35 = vadd.f32 %v2583_v37, %v2389_v21  ;;  %v1542_v21 = vadd.f32 %v1526_v49, %v1332_v33  ;;  %v11208_v37 = vld [vmem:[#allocation16_spill] sm:$0xff]  ;;  %v7132_v49 = vld [vmem:[#allocation4 + $0x240] sm:$0xff]  ;;  %v9334_v33 = vmul.f32 %v7134_v42, %v9231_v11  ;;  %v2277_v62 = vadd.f32 %v9229_v10, %v2067_v56  ;;  %v7138_v56 = vld [vmem:[#allocation4 + $0x388] sm:$0xff] }
 0x8ef   :  { %v1946_v36 = vmul.f32 %v7129_v48, %v11208_v37  ;;  %v7136_v17 = vld [vmem:[#allocation4 + $0x2c0] sm:$0xff]  ;;  %v2593_v11 = vadd.f32 %v9212_v22, %v2383_v15  ;;  %v1755_v37 = vadd.f32 %v9251_v50, %v1545_v2  ;;  %v7141_v15 = vld [vmem:[#allocation4 + $0x1b0] sm:$0xff] }
 0x8f0   :  { %v2809_v7 = vadd.f32 %v2793_v24, %v2599_v35  ;;  %v2671_v34 = vpop.permute.xlu1 %2670  ;;  %v2262_v24 = vmul.f32 %v7131_v3, %v11212_v54  ;;  %v1752_v23 = vadd.f32 %v1736_v61, %v1542_v21  ;;  %v2156_v35 = vmul.f32 %v7132_v49, %v11213_v57  ;;  %v7137_v21 = vld [vmem:[#allocation4 + $0xf0] sm:$0xff]  ;;  %v7140_v54 = vld [vmem:[#allocation4 + $0x98] sm:$0xff]  ;;  %v7142_v49 = vld [vmem:[#allocation4 + $0x3c0] sm:$0xff] }
 0x8f1   :  { %v2688_v26 = vmul.f32 %v2671_v34, %v11209_v40  ;;  %v2366_v29 = vmul.f32 %v7136_v17, %v11216_v12  ;;  %v1532_v48 = vmul.f32 %v7137_v21, %v9282_v60  ;;  %v11218_v40 = vld [vmem:[#allocation26_spill] sm:$0xff]  ;;  %v2487_v3 = vadd.f32 %v9237_v8, %v2277_v62  ;;  %v11221_v60 = vld [vmem:[#allocation45_spill] sm:$0xff]  ;;  %v11223_v8 = vld [vmem:[#allocation44_spill] sm:$0xff] }
 0x8f2   :  { %v1962_v61 = vadd.f32 %v1946_v36, %v1752_v23  ;;  %v2278_v10 = vadd.f32 %v2262_v24, %v2068_v9  ;;  %v1424_v23 = vmul.f32 %v7140_v54, %v11221_v60  ;;  %v9350_v50 = vmul.f32 %v7141_v15, %v1827_v30  ;;  %v11222_v57 = vld [vmem:[#allocation18_spill] sm:$0xff]  ;;  %v7145_v17 = vld [vmem:[#allocation4 + $0xd0] sm:$0xff]  ;;  %v7146_v21 = vld [vmem:[#allocation4 + $0x198] sm:$0xff] }
 0x8f3   :  { %v2704_v19 = vadd.f32 %v2688_v26, %v2494_v51  ;;  %v2682_v26 = vmul.f32 %v7138_v56, %v11218_v40  ;;  %v2803_v38 = vadd.f32 %v9215_v6, %v2593_v11  ;;  %v1634_v42 = vmul.f32 %v7143_v39, %v11223_v8  ;;  %v11225_v12 = vld [vmem:[#allocation58_spill] sm:$0xff]  ;;  %v7147_v11 = vld [vmem:[#allocation4 + $0xb0] sm:$0xff]  ;;  %v11229_v31 = vld [vmem:[#allocation61_spill] sm:$0xff] }
 0x8f4   :  { %v2172_v36 = vadd.f32 %v2156_v35, %v1962_v61  ;;  %v2488_v2 = vadd.f32 %v2472_v41, %v2278_v10  ;;  %v9353_v35 = vpop.permute.xlu0 %2036  ;;  %v11224_v41 = vld [vmem:[#allocation35_spill] sm:$0xff]  ;;  %v1440_v6 = vadd.f32 %v1424_v23, %v9243_v59  ;;  %v7152_v54 = vld [vmem:[#allocation4 + $0x20] sm:$0xff]  ;;  %v11231_v60 = vld [vmem:[#allocation78_spill] sm:$0xff] }
 0x8f5   :  { %v9339_v16 = vadd.f32 %v2809_v7, %v2704_v19  ;;  %v1318_v34 = vpop.permute.xlu1 %1317  ;;  %v11220_v7 = vld [vmem:[#allocation17_spill] sm:$0xff]  ;;  %v2786_v19 = vmul.f32 %v7142_v49, %v11222_v57  ;;  %v1423_v61 = vmul.f32 %v7144_v4, %v11224_v41  ;;  %v11227_v10 = vld [vmem:[#allocation55_spill] sm:$0xff]  ;;  %v1247_v23 = vmul.f32 %v7152_v54, %v11231_v60  ;;  %v11234_v4 = vld [vmem:[#allocation20_spill] sm:$0xff] }
 0x8f6   :  { %v1338_v51 = vmul.f32 %v1318_v34, %v11217_v55  ;;  %v1742_v46 = vmul.f32 %v1722_v5, %v11220_v7  ;;  %v2382_v24 = vadd.f32 %v2366_v29, %v2172_v36  ;;  %v1965_v5 = vadd.f32 %v9254_v52, %v1755_v37  ;;  %v11226_v52 = vld [vmem:[#allocation47_spill] sm:$0xff]  ;;  %v7162_v60 = vld [vmem:[#allocation4 + $0xe8] sm:$0xff] }
 0x8f7   :  { %v2698_v28 = vadd.f32 %v2682_v26, %v2488_v2  ;;  %v1528_v29 = vmul.f32 %v7145_v17, %v11225_v12  ;;  %v2697_v34 = vadd.f32 %v9240_v53, %v2487_v3  ;;  %v7149_v40 = vld [vmem:[#allocation4 + $0x110] sm:$0xff]  ;;  %v11228_v26 = vld [vmem:[#allocation42_spill] sm:$0xff]  ;;  %v1650_v7 = vadd.f32 %v1634_v42, %v1440_v6  ;;  %v11230_v53 = vld [vmem:[#allocation33_spill] sm:$0xff] }
 0x8f8   :  { %v1548_v22 = vadd.f32 %v1532_v48, %v1338_v51  ;;  %v2592_v30 = vadd.f32 %v2576_v32, %v2382_v24  ;;  %v1844_v48 = vmul.f32 %v7146_v21, %v11226_v52  ;;  %v7148_v51 = vld [vmem:[#allocation4 + $0x10] sm:$0xff]  ;;  %v1633_v36 = vmul.f32 %v7149_v40, %v11228_v26  ;;  %v11232_v24 = vld [vmem:[#allocation38_spill] sm:$0xff] }
 0x8f9   :  { %v1245_v56 = vmul.f32 %v7148_v51, %v11227_v10  ;;  %v1738_v32 = vmul.f32 %v7150_v44, %v11229_v31  ;;  %v2175_v59 = vadd.f32 %v9257_v43, %v1965_v5  ;;  %v1544_v15 = vadd.f32 %v1528_v29, %v9273_v20  ;;  %v7153_v2 = vld [vmem:[#allocation4 + $0x190] sm:$0xff]  ;;  %v11235_v29 = vld [vmem:[#allocation64_spill] sm:$0xff]  ;;  %v11237_v44 = vld [vmem:[#allocation46_spill] sm:$0xff] }
 0x8fa   :  { %v1407_v9 = vpop.permute.xlu1 %1406  ;;  %v9358_v62 = vadd.f32 %v1742_v46, %v1548_v22  ;;  %v2802_v55 = vadd.f32 %v2786_v19, %v2592_v30  ;;  %v7151_v46 = vld [vmem:[#allocation4 + $0x218] sm:$0xff]  ;;  %v1843_v49 = vmul.f32 %v7153_v2, %v11232_v24  ;;  %v7154_v57 = vld [vmem:[#allocation4 + $0x1d0] sm:$0xff]  ;;  %v11233_v19 = vld [vmem:[#allocation62_spill] sm:$0xff]  ;;  %v1860_v42 = vadd.f32 %v1844_v48, %v1650_v7 }
 0x8fb   :  { %v1427_v37 = vmul.f32 %v7147_v11, %v1407_v9  ;;  %v2054_v3 = vmul.f32 %v7151_v46, %v11230_v53  ;;  %v1439_v22 = vadd.f32 %v1423_v61, %v1245_v56  ;;  %v1948_v39 = vmul.f32 %v7154_v57, %v11233_v19  ;;  %v9374_v9 = vpop.permute.xlu0 %2456  ;;  %v7155_v30 = vld [vmem:[#allocation4 + $0x298] sm:$0xff]  ;;  %v7156_v5 = vld [vmem:[#allocation4 + $0x130] sm:$0xff]  ;;  %v7161_v53 = vld [vmem:[#allocation4 + $0xe0] sm:$0xff] }
 0x8fc   :  { %v2264_v41 = vmul.f32 %v7155_v30, %v11234_v4  ;;  %v1754_v12 = vadd.f32 %v1738_v32, %v1544_v15  ;;  %v7157_v20 = vld [vmem:[#allocation4 + $0x210] sm:$0xff]  ;;  %v9380_v51 = vadd.f32 %v2803_v38, %v2698_v28  ;;  %v9382_v10 = vadd.f32 %v2802_v55, %v2697_v34  ;;  %v11242_v57 = vld [vmem:[#allocation74_spill] sm:$0xff]  ;;  %v7165_v19 = vld [vmem:[#allocation4 + $0x160] sm:$0xff] }
 0x8fd   :  { %v1443_v43 = vadd.f32 %v1427_v37, %v9334_v33  ;;  %v1649_v61 = vadd.f32 %v1633_v36, %v1439_v22  ;;  %v2053_v6 = vmul.f32 %v7157_v20, %v11235_v29  ;;  %v7158_v21 = vld [vmem:[#allocation4 + $0x250] sm:$0xff]  ;;  %v1441_v48 = vadd.f32 %v9299_v25, %v1247_v23  ;;  %v11240_v23 = vld [vmem:[#allocation69_spill] sm:$0xff]  ;;  %v11244_v4 = vld [vmem:[#allocation48_spill] sm:$0xff] }
 0x8fe   :  { %v11236_v52 = vld [vmem:[#allocation39_spill] sm:$0xff]  ;;  %v2070_v40 = vadd.f32 %v2054_v3, %v1860_v42  ;;  %v1964_v33 = vadd.f32 %v1948_v39, %v1754_v12  ;;  %v9387_v31 = vadd.f32 %v9264_v63, %v2175_v59  ;;  %v1531_v22 = vmul.f32 %v7162_v60, %v11240_v23  ;;  %v11243_v39 = vld [vmem:[#allocation77_spill] sm:$0xff]  ;;  %v11246_v12 = vld [vmem:[#allocation72_spill] sm:$0xff] }
 0x8ff   :  { %v1617_v8 = vpop.permute.xlu1 %1616  ;;  %v2158_v11 = vmul.f32 %v7158_v21, %v11236_v52  ;;  %v1859_v26 = vadd.f32 %v1843_v49, %v1649_v61  ;;  %v7159_v37 = vld [vmem:[#allocation4 + $0x290] sm:$0xff]  ;;  %v9399_v63 = vpop.permute.xlu0 %2666  ;;  %v1651_v24 = vadd.f32 %v9315_v45, %v1441_v48  ;;  %v7164_v49 = vld [vmem:[#allocation4 + $0x60] sm:$0xff]  ;;  %v7168_v61 = vld [vmem:[#allocation4 + $0x168] sm:$0xff] }
 0x900   :  { %v1637_v17 = vmul.f32 %v7156_v5, %v1617_v8  ;;  %v2263_v36 = vmul.f32 %v7159_v37, %v11237_v44  ;;  %v7160_v32 = vld [vmem:[#allocation4 + $0x2d0] sm:$0xff]  ;;  %v9396_v55 = vadd.f32 %v2264_v41, %v2070_v40  ;;  %v1740_v8 = vmul.f32 %v7165_v19, %v11243_v39  ;;  %v11245_v5 = vld [vmem:[#allocation68_spill] sm:$0xff]  ;;  %v11247_v21 = vld [vmem:[#allocation57_spill] sm:$0xff] }
 0x901   :  { %v11238_v7 = vld [vmem:[#allocation59_spill] sm:$0xff]  ;;  %v2069_v3 = vadd.f32 %v2053_v6, %v1859_v26  ;;  %v2174_v54 = vadd.f32 %v2158_v11, %v1964_v33  ;;  %v1741_v20 = vmul.f32 %v7168_v61, %v11246_v12  ;;  %v7170_v11 = vld [vmem:[#allocation4 + $0x1e0] sm:$0xff]  ;;  %v7171_v40 = vld [vmem:[#allocation4 + $0x28] sm:$0xff]  ;;  %v1547_v37 = vadd.f32 %v1531_v22, %v9286_v0 }
 0x902   :  { %v1653_v56 = vadd.f32 %v1637_v17, %v1443_v43  ;;  %v2368_v46 = vmul.f32 %v7160_v32, %v11238_v7  ;;  %v11239_v38 = vld [vmem:[#allocation83_spill] sm:$0xff]  ;;  %v7167_v43 = vld [vmem:[#allocation4 + $0xa8] sm:$0xff]  ;;  %v7174_v60 = vld [vmem:[#allocation4 + $0x260] sm:$0xff] }
 0x903   :  { %v1530_v28 = vmul.f32 %v7161_v53, %v11239_v38  ;;  %v7163_v59 = vld [vmem:[#allocation4 + $0x310] sm:$0xff]  ;;  %v2279_v42 = vadd.f32 %v2263_v36, %v2069_v3  ;;  %v1426_v17 = vmul.f32 %v7167_v43, %v11245_v5  ;;  %v7172_v44 = vld [vmem:[#allocation4 + $0x128] sm:$0xff]  ;;  %v11251_v53 = vld [vmem:[#allocation65_spill] sm:$0xff]  ;;  %v1757_v0 = vadd.f32 %v1741_v20, %v1547_v37 }
 0x904   :  { %v9392_v34 = vadd.f32 %v9350_v50, %v1653_v56  ;;  %v9394_v25 = vpop.permute.xlu1 %1931  ;;  %v11241_v15 = vld [vmem:[#allocation63_spill] sm:$0xff]  ;;  %v1336_v50 = vmul.f32 %v7164_v49, %v11242_v57  ;;  %v2384_v29 = vadd.f32 %v2368_v46, %v2174_v54  ;;  %v11250_v36 = vld [vmem:[#allocation50_spill] sm:$0xff]  ;;  %v9416_v46 = vpop.permute.xlu0 %2960  ;;  %v11252_v23 = vld [vmem:[#allocation80_spill] sm:$0xff] }
 0x905   :  { %v2473_v2 = vmul.f32 %v7163_v59, %v11241_v15  ;;  %v7166_v30 = vld [vmem:[#allocation4 + $0x350] sm:$0xff]  ;;  %v1636_v32 = vmul.f32 %v7172_v44, %v11250_v36  ;;  %v7173_v7 = vld [vmem:[#allocation4 + $0x1e8] sm:$0xff]  ;;  %v2160_v59 = vmul.f32 %v7174_v60, %v11252_v23  ;;  %v1861_v15 = vadd.f32 %v9324_v13, %v1651_v24  ;;  %v7176_v39 = vld [vmem:[#allocation4 + $0x358] sm:$0xff] }
 0x906   :  { %v2578_v41 = vmul.f32 %v7166_v30, %v11244_v4  ;;  %v7169_v6 = vld [vmem:[#allocation4 + $0x390] sm:$0xff]  ;;  %v1546_v52 = vadd.f32 %v1530_v28, %v1336_v50  ;;  %v1951_v38 = vmul.f32 %v7173_v7, %v11251_v53  ;;  %v7175_v22 = vld [vmem:[#allocation4 + $0x1a8] sm:$0xff]  ;;  %v11254_v30 = vld [vmem:[#allocation49_spill] sm:$0xff] }
 0x907   :  { %v2683_v45 = vmul.f32 %v7169_v6, %v11247_v21  ;;  %v11248_v48 = vld [vmem:[#allocation75_spill] sm:$0xff]  ;;  %v2489_v54 = vadd.f32 %v2473_v2, %v2279_v42  ;;  %v2579_v4 = vmul.f32 %v7176_v39, %v11254_v30  ;;  %v7177_v5 = vld [vmem:[#allocation4 + $0x2a0] sm:$0xff]  ;;  %v11255_v61 = vld [vmem:[#allocation54_spill] sm:$0xff]  ;;  %v2071_v20 = vadd.f32 %v9331_v47, %v1861_v15 }
 0x908   :  { %v1950_v56 = vmul.f32 %v7170_v11, %v11248_v48  ;;  %v11249_v26 = vld [vmem:[#allocation67_spill] sm:$0xff]  ;;  %v1756_v28 = vadd.f32 %v1740_v8, %v1546_v52  ;;  %v2594_v49 = vadd.f32 %v2578_v41, %v2384_v29  ;;  %v2265_v12 = vmul.f32 %v7177_v5, %v11255_v61  ;;  %v7178_v2 = vld [vmem:[#allocation4 + $0x2e0] sm:$0xff]  ;;  %v11256_v8 = vld [vmem:[#allocation82_spill] sm:$0xff]  ;;  %v9433_v47 = vpop.permute.xlu0 %3020 }
 0x909   :  { %v1248_v33 = vmul.f32 %v7171_v40, %v11249_v26  ;;  %v9414_v3 = vpop.permute.xlu1 %2141  ;;  %v11253_v50 = vld [vmem:[#allocation71_spill] sm:$0xff]  ;;  %v2370_v42 = vmul.f32 %v7178_v2, %v11256_v8  ;;  %v2699_v6 = vadd.f32 %v2683_v45, %v2489_v54  ;;  %v1967_v52 = vadd.f32 %v1951_v38, %v1757_v0  ;;  %v7179_v13 = vld [vmem:[#allocation4 + $0x228] sm:$0xff]  ;;  %v11257_v24 = vld [vmem:[#allocation73_spill] sm:$0xff] }
 0x90a   :  { %v1846_v19 = vmul.f32 %v7175_v22, %v11253_v50  ;;  %v1966_v43 = vadd.f32 %v1950_v56, %v1756_v28  ;;  %v2056_v41 = vmul.f32 %v7179_v13, %v11257_v24  ;;  %v7180_v29 = vld [vmem:[#allocation4 + $0x320] sm:$0xff]  ;;  %v11258_v11 = vld [vmem:[#allocation79_spill] sm:$0xff]  ;;  %v7182_v37 = vld [vmem:[#allocation4 + $0x3d8] sm:$0xff]  ;;  %v2804_v45 = vadd.f32 %v9278_v1, %v2594_v49 }
 0x90b   :  { %v1442_v57 = vadd.f32 %v1426_v17, %v1248_v33  ;;  %v2475_v48 = vmul.f32 %v7180_v29, %v11258_v11  ;;  %v7181_v40 = vld [vmem:[#allocation4 + $0x360] sm:$0xff]  ;;  %v7183_v7 = vld [vmem:[#allocation4 + $0x2a8] sm:$0xff]  ;;  %v11261_v53 = vld [vmem:[#allocation76_spill] sm:$0xff]  ;;  %v2490_v54 = vadd.f32 %v9267_v27, %v9396_v55  ;;  %v2281_v28 = vadd.f32 %v2265_v12, %v2071_v20 }
 0x90c   :  { %v2176_v17 = vadd.f32 %v2160_v59, %v1966_v43  ;;  %v11259_v56 = vld [vmem:[#allocation81_spill] sm:$0xff]  ;;  %v2266_v38 = vmul.f32 %v7183_v7, %v11261_v53  ;;  %v11262_v59 = vld [vmem:[#allocation86_spill] sm:$0xff]  ;;  %v2820_v0 = vadd.f32 %v2804_v45, %v2699_v6  ;;  %v2177_v22 = vadd.f32 %v9292_v14, %v1967_v52  ;;  %v11263_v50 = vld [vmem:[#allocation56_spill] sm:$0xff]  ;;  %v9450_v29 = vpop.permute.xlu0 %3080 }
 0x90d   :  { %v1652_v21 = vadd.f32 %v1636_v32, %v1442_v57  ;;  %v2580_v26 = vmul.f32 %v7181_v40, %v11259_v56  ;;  %v11260_v44 = vld [vmem:[#allocation53_spill] sm:$0xff]  ;;  %v2595_v57 = vadd.f32 %v2579_v4, %v9387_v31  ;;  %v7185_v49 = vld [vmem:[#allocation4 + $0x328] sm:$0xff]  ;;  %v2491_v27 = vadd.f32 %v2475_v48, %v2281_v28  ;;  %v7187_v5 = vld [vmem:[#allocation4 + $0x230] sm:$0xff] }
 0x90e   :  { %v2247_v33 = vpop.permute.xlu1 %2246  ;;  %v2789_v36 = vmul.f32 %v7182_v37, %v11260_v44  ;;  %v2386_v60 = vadd.f32 %v2370_v42, %v2176_v17  ;;  %v7184_v23 = vld [vmem:[#allocation4 + $0x3a0] sm:$0xff]  ;;  %v11264_v30 = vld [vmem:[#allocation90_spill] sm:$0xff]  ;;  %v2057_v61 = vmul.f32 %v7187_v5, %v9353_v35  ;;  %v11265_v42 = vld [vmem:[#allocation52_spill] sm:$0xff]  ;;  %v2847_v14 = vsel %vm873_vm14, %v9382_v10, 0.0 }
 0x90f   :  { %v1862_v32 = vadd.f32 %v1846_v19, %v1652_v21  ;;  %v2685_v15 = vmul.f32 %v7184_v23, %v11262_v59  ;;  %v2476_v19 = vmul.f32 %v7185_v49, %v11263_v50  ;;  %v7186_v39 = vld [vmem:[#allocation4 + $0x3e0] sm:$0xff]  ;;  %v7188_v8 = vld [vmem:[#allocation4 + $0x368] sm:$0xff]  ;;  %v7189_v21 = vld [vmem:[#allocation4 + $0x1f0] sm:$0xff]  ;;  %v2700_v35 = vadd.f32 %v9270_v58, %v2490_v54 }
 0x910   :  { %v2790_v43 = vmul.f32 %v7186_v39, %v11264_v30  ;;  %v2596_v55 = vadd.f32 %v2580_v26, %v2386_v60  ;;  %v2805_v12 = vadd.f32 %v2789_v36, %v2595_v57  ;;  %v2581_v31 = vmul.f32 %v7188_v8, %v11265_v42  ;;  %v7190_v13 = vld [vmem:[#allocation4 + $0x2b0] sm:$0xff]  ;;  %v7191_v11 = vld [vmem:[#allocation4 + $0x3a8] sm:$0xff] }
 0x911   :  { %v2072_v1 = vadd.f32 %v2056_v41, %v1862_v32  ;;  %v2701_v6 = vadd.f32 %v2685_v15, %v2491_v27  ;;  %v1952_v52 = vmul.f32 %v7189_v21, %v9394_v25  ;;  %v2267_v24 = vmul.f32 %v7190_v13, %v2247_v33  ;;  %v11266_v48 = vld [vmem:[#allocation70_spill] sm:$0xff]  ;;  %v7192_v56 = vld [vmem:[#allocation4 + $0x270] sm:$0xff] }
 0x912   :  { %v2848_v41 = vsel %vm873_vm14, %v9380_v51, 0.0  ;;  %v2850_v17 = vsel %vm873_vm14, %v2820_v0, 0.0  ;;  %v2387_v20 = vadd.f32 %v9295_v18, %v2177_v22  ;;  %v2686_v10 = vmul.f32 %v7191_v11, %v11266_v48  ;;  %v7193_v18 = vld [vmem:[#allocation4 + $0x2f0] sm:$0xff]  ;;  %v7194_v53 = vld [vmem:[#allocation4 + $0x3e8] sm:$0xff]  ;;  %v3141_v0 = vpop.permute.xlu0 %3140 }
 0x913   :  { %v2282_v2 = vadd.f32 %v2266_v38, %v2072_v1  ;;  %v2352_v4 = vpop.permute.xlu1 %2351  ;;  %v2806_v40 = vadd.f32 %v2790_v43, %v2596_v55  ;;  %v2162_v25 = vmul.f32 %v7192_v56, %v9414_v3  ;;  %v2073_v26 = vadd.f32 %v2057_v61, %v9392_v34  ;;  %v11267_v38 = vld [vmem:[#allocation84_spill] sm:$0xff]  ;;  %v7195_v60 = vld [vmem:[#allocation4 + $0x330] sm:$0xff] }
 0x914   :  { %v2849_v33 = vadd.f32 %v2848_v41, %v2847_v14  ;;  %v2821_v37 = vadd.f32 %v2805_v12, %v2700_v35  ;;  %v2597_v51 = vadd.f32 %v2581_v31, %v2387_v20  ;;  %v1968_v36 = vadd.f32 %v1952_v52, %v9358_v62  ;;  %v7196_v59 = vld [vmem:[#allocation4 + $0x370] sm:$0xff] }
 0x915   :  { %v2492_v44 = vadd.f32 %v2476_v19, %v2282_v2  ;;  %v2822_v58 = vadd.f32 %v2806_v40, %v2701_v6  ;;  %v2283_v45 = vadd.f32 %v2267_v24, %v2073_v26  ;;  %v2372_v32 = vmul.f32 %v7193_v18, %v2352_v4  ;;  %v7197_v39 = vld [vmem:[#allocation4 + $0x3b0] sm:$0xff] }
 0x916   :  { %v2791_v54 = vmul.f32 %v7194_v53, %v11267_v38  ;;  %v2851_v28 = vadd.f32 %v2850_v17, %v2849_v33  ;;  %v2477_v3 = vmul.f32 %v7195_v60, %v9374_v9  ;;  %v2178_v34 = vadd.f32 %v2162_v25, %v1968_v36  ;;  %v7198_v9 = vld [vmem:[#allocation4 + $0x3f0] sm:$0xff]  ;;  %v3201_v8 = vpop.permute.xlu0 %3200  ;;  %v2879_v53 = vld [vmem:[#allocation6] sm:$0xff]  ;;  %v2880_v38 = vld [vmem:[#allocation6 + $0x8] sm:$0xff] }
 0x917   :  { %v2702_v23 = vadd.f32 %v2686_v10, %v2492_v44  ;;  %v2852_v57 = vsel %vm873_vm14, %v2821_v37, 0.0  ;;  %v2854_v62 = vsel %vm873_vm14, %v2822_v58, 0.0  ;;  %v2687_v30 = vmul.f32 %v7197_v39, %v9399_v63  ;;  %v7199_v56 = vld [vmem:[#allocation2 + $0x2e0] ss:$0 sm:$0xff] }
 0x918   :  { %v2562_v7 = vpop.permute.xlu1 %2561  ;;  %v2807_v22 = vadd.f32 %v2791_v54, %v2597_v51  ;;  %v2493_v1 = vadd.f32 %v2477_v3, %v2283_v45  ;;  %v2388_v49 = vadd.f32 %v2372_v32, %v2178_v34  ;;  %v2853_v50 = vadd.f32 %v2852_v57, %v2851_v28  ;;  %v4509_v58 = vld [vmem:[#allocation2 + $0x380] sm:$0xff]  ;;  %v4508_v45 = vld [vmem:[#allocation2 + $0x370] sm:$0xff]  ;;  %v2882_v28 = vld [vmem:[#allocation6 + $0x18] sm:$0xff] }
 0x919   :  { %v2582_v15 = vmul.f32 %v7196_v59, %v2562_v7  ;;  %v2860_v63 = vsel %vm873_vm14, %v9339_v16, 0.0  ;;  %6402 = vmatprep.subr.mxu1 %v4509_v58  ;;  %v2881_v54 = vld [vmem:[#allocation6 + $0x10] sm:$0xff]  ;;  %v2883_v3 = vld [vmem:[#allocation6 + $0x20] sm:$0xff]  ;;  %v2886_v57 = vld [vmem:[#allocation6 + $0x38] sm:$0xff] }
 0x91a   :  { %v2823_v43 = vadd.f32 %v2807_v22, %v2702_v23  ;;  %v2855_v5 = vadd.f32 %v2854_v62, %v2853_v50  ;;  %v2703_v61 = vadd.f32 %v2687_v30, %v2493_v1  ;;  %v3261_v13 = vpop.permute.xlu0 %3260  ;;  %6403 = vmatpush3.msra.mxu1 %v4509_v58  ;;  %v2884_v23 = vld [vmem:[#allocation6 + $0x28] sm:$0xff]  ;;  %v2885_v34 = vld [vmem:[#allocation6 + $0x30] sm:$0xff]  ;;  %v2903_v1 = vld [vmem:[#allocation6 + $0x58] sm:$0xff] }
 0x91b   :  { %v2598_v27 = vadd.f32 %v2582_v15, %v2388_v49  ;;  %6404 = vmatprep.subr.mxu1 %v4508_v45  ;;  %v2901_v22 = vld [vmem:[#allocation6 + $0x48] sm:$0xff]  ;;  %v2902_v62 = vld [vmem:[#allocation6 + $0x50] sm:$0xff]  ;;  %v2904_v49 = vld [vmem:[#allocation6 + $0x60] sm:$0xff] }
 0x91c   :  { %v2856_v42 = vsel %vm873_vm14, %v2823_v43, 0.0  ;;  %6405 = vmatpush3.msra.mxu1 %v4508_v45 }
 0x91d   :  { %v2772_v19 = vpop.permute.xlu1 %2771  ;;  %v2857_v4 = vadd.f32 %v2856_v42, %v2855_v5  ;;  %v2923_v5 = vld [vmem:[#allocation6 + $0x88] sm:$0xff]  ;;  %v2924_v42 = vld [vmem:[#allocation6 + $0x90] sm:$0xff] }
 0x91e   :  { %v2792_v55 = vmul.f32 %v7198_v9, %v2772_v19  ;;  %v3321_v11 = vpop.permute.xlu0 %3320 }
 0x920   :  { %v2808_v12 = vadd.f32 %v2792_v55, %v2598_v27  ;;  %v2905_v27 = vld [vmem:[#allocation6 + $0x68] sm:$0xff]  ;;  %v2922_v55 = vld [vmem:[#allocation6 + $0x80] sm:$0xff] }
 0x921   :  { %v2909_v2 = vpop.permute.xlu1 %2908 }
 0x922   :  { %v2824_v31 = vadd.f32 %v2808_v12, %v2703_v61  ;;  %6566 = vpush %v2909_v2 }
 0x924   :  { %v2858_v14 = vsel %vm873_vm14, %v2824_v31, 0.0  ;;  %v2925_v31 = vld [vmem:[#allocation6 + $0x98] sm:$0xff] }
 0x925   :  { %v2859_v6 = vadd.f32 %v2858_v14, %v2857_v4  ;;  %v2931_v21 = vpop.permute.xlu1 %2930  ;;  %v2926_v4 = vld [vmem:[#allocation6 + $0xa0] sm:$0xff] }
 0x926   :  { %6568 = vpush %v2931_v21 }
 0x927   :  { %v2861_v52 = vadd.f32 %v2860_v63, %v2859_v6  ;;  %6570 = vpush %v9416_v46  ;;  %v3381_v46 = vpop.permute.xlu0 %3380  ;;  %v2927_v63 = vld [vmem:[#allocation6 + $0xa8] sm:$0xff] }
 0x929   :  { %v2862_v24 = vrot.slane %v2861_v52, 4  ;;  %v2991_v41 = vpop.permute.xlu1 %2990 }
 0x92a   :  { %6572 = vpush %v2991_v41  ;;  %v2906_v41 = vld [vmem:[#allocation6 + $0x70] sm:$0xff] }
 0x92b   :  { %v2863_v35 = vadd.f32 %v2862_v24, %v2861_v52  ;;  %6574 = vpush %v9433_v47  ;;  %v2928_v52 = vld [vmem:[#allocation6 + $0xb0] sm:$0xff] }
 0x92d   :  { %v2864_v17 = vrot.slane %v2863_v35, 2  ;;  %v3051_v20 = vpop.permute.xlu1 %3050 }
 0x92e   :  { %6576 = vpush %v3051_v20 }
 0x92f   :  { %v2865_v48 = vadd.f32 %v2864_v17, %v2863_v35  ;;  %6578 = vpush %v9450_v29  ;;  %v3441_v29 = vpop.permute.xlu0 %3440  ;;  %v2907_v35 = vld [vmem:[#allocation6 + $0x78] sm:$0xff] }
 0x931   :  { %v2866_v10 = vrot.slane %v2865_v48, 1  ;;  %v3111_v16 = vpop.permute.xlu1 %3110 }
 0x932   :  { %6580 = vpush %v3111_v16 }
 0x933   :  { %v2867_v40 = vadd.f32 %v2866_v10, %v2865_v48  ;;  %6582 = vpush %v3141_v0  ;;  %v3501_v37 = vpop.permute.xlu0 %3500  ;;  %v2900_v0 = vld [vmem:[#allocation6 + $0x40] sm:$0xff] }
 0x935   :  { %v9468_v25 = vadd.f32 %v7199_v56, %v2867_v40  ;;  %v3171_v26 = vpop.permute.xlu1 %3170 }
 0x936   :  { %6584 = vpush %v3171_v26 }
 0x937   :  { %6586 = vpush %v3201_v8  ;;  %3862 = vrot.lane.b32.xlu0 %v9468_v25, %s7569_s26  ;;  %3849 = vrot.lane.b32.xlu1 %v9468_v25, %s7536_s3  ;;  %v3561_v36 = vpop.permute.xlu0 %3560 }
 0x939   :  { %v3231_v47 = vpop.permute.xlu1 %3230 }
 0x93a   :  { %6588 = vpush %v3231_v47 }
 0x93b   :  { %6590 = vpush %v3261_v13  ;;  %3904 = vrot.lane.b32.xlu0 %v9468_v25, %s7570_s27  ;;  %3883 = vrot.lane.b32.xlu1 %v9468_v25, %s7555_s12  ;;  %v3621_v32 = vpop.permute.xlu0 %3620  ;;  %s6565_s12 = spop %6564  ;;  %v2929_v13 = vld [vmem:[#allocation6 + $0xb8] sm:$0xff] }
 0x93c   :  { %v2889_v59 = vstv %s6565_s12 }
 0x93d   :  { %v3291_v33 = vpop.permute.xlu1 %3290  ;;  %v2891_v19 = vmul.f32 %v2889_v59, %v2879_v53  ;;  %v2892_v39 = vmul.f32 %v2889_v59, %v2880_v38  ;;  %v2893_v30 = vmul.f32 %v2889_v59, %v2881_v54  ;;  %v2894_v43 = vmul.f32 %v2889_v59, %v2882_v28 }
 0x93e   :  { %6592 = vpush %v3291_v33  ;;  %v2895_v61 = vmul.f32 %v2889_v59, %v2883_v3  ;;  %v2896_v12 = vmul.f32 %v2889_v59, %v2884_v23  ;;  %v2897_v2 = vmul.f32 %v2889_v59, %v2885_v34  ;;  %v2898_v8 = vmul.f32 %v2889_v59, %v2886_v57  ;;  %v2958_v3 = vld [vmem:[#allocation6 + $0xf0] sm:$0xff]  ;;  %v2959_v23 = vld [vmem:[#allocation6 + $0xf8] sm:$0xff] }
 0x93f   :  { %6594 = vpush %v3321_v11  ;;  %3946 = vrot.lane.b32.xlu0 %v9468_v25, %s7571_s28  ;;  %3925 = vrot.lane.b32.xlu1 %v9468_v25, %s7556_s13  ;;  %v3681_v15 = vpop.permute.xlu0 %3680 }
 0x941   :  { %v3351_v51 = vpop.permute.xlu1 %3350 }
 0x942   :  { %6596 = vpush %v3351_v51  ;;  %v2953_v51 = vld [vmem:[#allocation6 + $0xc8] sm:$0xff] }
 0x943   :  { %6598 = vpush %v3381_v46  ;;  %3988 = vrot.lane.b32.xlu0 %v9468_v25, %s7572_s29  ;;  %3967 = vrot.lane.b32.xlu1 %v9468_v25, %s7557_s14  ;;  %v3741_v24 = vpop.permute.xlu0 %3740 }
 0x945   :  { %v3411_v44 = vpop.permute.xlu1 %3410 }
 0x946   :  { %6600 = vpush %v3411_v44 }
 0x947   :  { %6602 = vpush %v3441_v29  ;;  %4030 = vrot.lane.b32.xlu0 %v9468_v25, %s7573_s30  ;;  %4009 = vrot.lane.b32.xlu1 %v9468_v25, %s7558_s15 }
 0x949   :  { %v3471_v18 = vpop.permute.xlu1 %3470 }
 0x94a   :  { %6604 = vpush %v3471_v18  ;;  %v2954_v18 = vld [vmem:[#allocation6 + $0xd0] sm:$0xff] }
 0x94b   :  { %6606 = vpush %v3501_v37  ;;  %4072 = vrot.lane.b32.xlu0 %v9468_v25, %s7574_s2  ;;  %4051 = vrot.lane.b32.xlu1 %v9468_v25, %s7559_s16  ;;  %v2952_v37 = vld [vmem:[#allocation6 + $0xc0] sm:$0xff] }
 0x94d   :  { %v3531_v7 = vpop.permute.xlu1 %3530 }
 0x94e   :  { %6608 = vpush %v3531_v7  ;;  %v2956_v7 = vld [vmem:[#allocation6 + $0xe0] sm:$0xff] }
 0x94f   :  { %6610 = vpush %v3561_v36  ;;  %4114 = vrot.lane.b32.xlu0 %v9468_v25, %s7575_s5  ;;  %4093 = vrot.lane.b32.xlu1 %v9468_v25, %s7560_s17 }
 0x951   :  { %v3591_v60 = vpop.permute.xlu1 %3590 }
 0x952   :  { %6612 = vpush %v3591_v60  ;;  %v2957_v60 = vld [vmem:[#allocation6 + $0xe8] sm:$0xff] }
 0x953   :  { %6614 = vpush %v3621_v32  ;;  %s6567_s13 = spop %6566  ;;  %4156 = vrot.lane.b32.xlu0 %v9468_v25, %s7576_s6  ;;  %4135 = vrot.lane.b32.xlu1 %v9468_v25, %s7561_s18  ;;  %v2955_v32 = vld [vmem:[#allocation6 + $0xd8] sm:$0xff] }
 0x954   :  { %v2911_v50 = vstv %s6567_s13 }
 0x955   :  { %v3651_v9 = vpop.permute.xlu1 %3650  ;;  %v9502_v14 = vmul.f32 %v2911_v50, %v2900_v0  ;;  %v9504_v6 = vmul.f32 %v2911_v50, %v2901_v22  ;;  %v9506_v21 = vmul.f32 %v2911_v50, %v2902_v62  ;;  %v9512_v17 = vmul.f32 %v2911_v50, %v2903_v1  ;;  %v3801_v22 = vpop.permute.xlu0 %3800 }
 0x956   :  { %6616 = vpush %v3651_v9  ;;  %v9514_v20 = vmul.f32 %v2911_v50, %v2904_v49  ;;  %v9516_v11 = vmul.f32 %v2911_v50, %v2905_v27  ;;  %v2919_v44 = vmul.f32 %v2911_v50, %v2906_v41  ;;  %v2920_v58 = vmul.f32 %v2911_v50, %v2907_v35  ;;  %v2983_v9 = vld [vmem:[#allocation6 + $0x108] sm:$0xff]  ;;  %v2989_v41 = vld [vmem:[#allocation6 + $0x138] sm:$0xff] }
 0x957   :  { %6618 = vpush %v3681_v15  ;;  %s6569_s14 = spop %6568  ;;  %4198 = vrot.lane.b32.xlu0 %v9468_v25, %s7577_s1  ;;  %4177 = vrot.lane.b32.xlu1 %v9468_v25, %s7562_s19 }
 0x958   :  { %v2933_v48 = vstv %s6569_s14  ;;  %s6571_s15 = spop %6570 }
 0x959   :  { %v2935_v10 = vmul.f32 %v2933_v48, %v2922_v55  ;;  %v2936_v16 = vmul.f32 %v2933_v48, %v2923_v5  ;;  %v2937_v40 = vmul.f32 %v2933_v48, %v2924_v42  ;;  %v2938_v46 = vmul.f32 %v2933_v48, %v2925_v31  ;;  %v3711_v56 = vpop.permute.xlu1 %3710  ;;  %v2984_v55 = vld [vmem:[#allocation6 + $0x110] sm:$0xff]  ;;  %v2985_v5 = vld [vmem:[#allocation6 + $0x118] sm:$0xff]  ;;  %v2987_v42 = vld [vmem:[#allocation6 + $0x128] sm:$0xff] }
 0x95a   :  { %v2939_v26 = vmul.f32 %v2933_v48, %v2926_v4  ;;  %v2940_v47 = vmul.f32 %v2933_v48, %v2927_v63  ;;  %v2941_v29 = vmul.f32 %v2933_v48, %v2928_v52  ;;  %v2942_v33 = vmul.f32 %v2933_v48, %v2929_v13  ;;  %6620 = vpush %v3711_v56  ;;  %v2988_v31 = vld [vmem:[#allocation6 + $0x130] sm:$0xff]  ;;  %v3012_v48 = vld [vmem:[#allocation6 + $0x140] sm:$0xff] }
 0x95b   :  { %v9518_v36 = vadd.f32 %v2935_v10, %v2891_v19  ;;  %v9520_v45 = vadd.f32 %v2936_v16, %v2892_v39  ;;  %6622 = vpush %v3741_v24  ;;  %s6573_s16 = spop %6572  ;;  %v2945_v53 = vadd.f32 %v2937_v40, %v2893_v30  ;;  %v9522_v38 = vadd.f32 %v2938_v46, %v2894_v43  ;;  %v2982_v19 = vld [vmem:[#allocation6 + $0x100] sm:$0xff]  ;;  %v3013_v10 = vld [vmem:[#allocation6 + $0x148] sm:$0xff]  ;;  %v3014_v46 = vld [vmem:[#allocation6 + $0x150] sm:$0xff] }
 0x95c   :  { %v9524_v54 = vadd.f32 %v2939_v26, %v2895_v61  ;;  %v9526_v28 = vadd.f32 %v2940_v47, %v2896_v12  ;;  %4240 = vrot.lane.b32.xlu0 %v9468_v25, %s7578_s7  ;;  %v2949_v34 = vadd.f32 %v2941_v29, %v2897_v2  ;;  %v9530_v59 = vadd.f32 %v2942_v33, %v2898_v8  ;;  %s6575_s17 = spop %6574  ;;  %v2986_v8 = vld [vmem:[#allocation6 + $0x120] sm:$0xff] }
 0x95d   :  { %v2963_v15 = vstv %s6571_s15  ;;  %4219 = vrot.lane.b32.xlu1 %v9468_v25, %s7563_s20  ;;  %v2993_v57 = vstv %s6573_s16  ;;  %v3771_v0 = vpop.permute.xlu1 %3770  ;;  %v3023_v4 = vstv %s6575_s17  ;;  %v3016_v56 = vld [vmem:[#allocation6 + $0x160] sm:$0xff] }
 0x95e   :  { %v2965_v62 = vmul.f32 %v2963_v15, %v2952_v37  ;;  %v2966_v1 = vmul.f32 %v2963_v15, %v2953_v51  ;;  %v2967_v49 = vmul.f32 %v2963_v15, %v2954_v18  ;;  %v2968_v50 = vmul.f32 %v2963_v15, %v2955_v32  ;;  %6624 = vpush %v3771_v0  ;;  %v3017_v37 = vld [vmem:[#allocation6 + $0x168] sm:$0xff]  ;;  %v3018_v51 = vld [vmem:[#allocation6 + $0x170] sm:$0xff] }
 0x95f   :  { %v2969_v39 = vmul.f32 %v2963_v15, %v2956_v7  ;;  %v2970_v30 = vmul.f32 %v2963_v15, %v2957_v60  ;;  %v2971_v43 = vmul.f32 %v2963_v15, %v2958_v3  ;;  %v2972_v27 = vmul.f32 %v2963_v15, %v2959_v23  ;;  %6626 = vpush %v3801_v22  ;;  %s9547_s18 = spop %6576  ;;  %v3043_v22 = vld [vmem:[#allocation6 + $0x188] sm:$0xff] }
 0x960   :  { %v2973_v61 = vadd.f32 %v2965_v62, %v9502_v14  ;;  %v2974_v12 = vadd.f32 %v2966_v1, %v9504_v6  ;;  %v2975_v2 = vadd.f32 %v2967_v49, %v9506_v21  ;;  %6628 = vpush %v9468_v25  ;;  %v2976_v63 = vadd.f32 %v2968_v50, %v9512_v17  ;;  %s6579_s19 = spop %6578  ;;  %v3044_v62 = vld [vmem:[#allocation6 + $0x190] sm:$0xff]  ;;  %v3045_v1 = vld [vmem:[#allocation6 + $0x198] sm:$0xff] }
 0x961   :  { %v2977_v52 = vadd.f32 %v2969_v39, %v9514_v20  ;;  %v2978_v13 = vadd.f32 %v2970_v30, %v9516_v11  ;;  %v2979_v24 = vadd.f32 %v2971_v43, %v2919_v44  ;;  %4282 = vrot.lane.b32.xlu0 %v9468_v25, %s7579_s8  ;;  %v2995_v14 = vmul.f32 %v2993_v57, %v2982_v19  ;;  %v3015_v11 = vld [vmem:[#allocation6 + $0x158] sm:$0xff]  ;;  %v3046_v30 = vld [vmem:[#allocation6 + $0x1a0] sm:$0xff]  ;;  %v3047_v43 = vld [vmem:[#allocation6 + $0x1a8] sm:$0xff] }
 0x962   :  { %v2996_v6 = vmul.f32 %v2993_v57, %v2983_v9  ;;  %v2997_v21 = vmul.f32 %v2993_v57, %v2984_v55  ;;  %v2998_v35 = vmul.f32 %v2993_v57, %v2985_v5  ;;  %4261 = vrot.lane.b32.xlu1 %v9468_v25, %s7564_s21  ;;  %v2980_v16 = vadd.f32 %v2972_v27, %v2920_v58  ;;  %v3019_v44 = vld [vmem:[#allocation6 + $0x178] sm:$0xff]  ;;  %v3048_v27 = vld [vmem:[#allocation6 + $0x1b0] sm:$0xff] }
 0x963   :  { %v2999_v17 = vmul.f32 %v2993_v57, %v2986_v8  ;;  %v3000_v40 = vmul.f32 %v2993_v57, %v2987_v42  ;;  %v3001_v20 = vmul.f32 %v2993_v57, %v2988_v31  ;;  %v3002_v26 = vmul.f32 %v2993_v57, %v2989_v41  ;;  %v3042_v57 = vld [vmem:[#allocation6 + $0x180] sm:$0xff]  ;;  %s6581_s20 = spop %6580  ;;  %v3075_v41 = vld [vmem:[#allocation6 + $0x1d8] sm:$0xff] }
 0x964   :  { %v3003_v47 = vadd.f32 %v2995_v14, %v9518_v36  ;;  %v3004_v29 = vadd.f32 %v2996_v6, %v9520_v45  ;;  %v3005_v33 = vadd.f32 %v2997_v21, %v2945_v53  ;;  %v3006_v18 = vadd.f32 %v2998_v35, %v9522_v38  ;;  %s6583_s21 = spop %6582  ;;  %v3072_v31 = vld [vmem:[#allocation6 + $0x1c0] sm:$0xff] }
 0x965   :  { %v3007_v58 = vadd.f32 %v2999_v17, %v9524_v54  ;;  %v3008_v32 = vadd.f32 %v3000_v40, %v9526_v28  ;;  %v3009_v7 = vadd.f32 %v3001_v20, %v2949_v34  ;;  %4324 = vrot.lane.b32.xlu0 %v9468_v25, %s7580_s9  ;;  %v3025_v60 = vmul.f32 %v3023_v4, %v3012_v48  ;;  %v3076_v14 = vld [vmem:[#allocation6 + $0x1e0] sm:$0xff]  ;;  %v3078_v17 = vld [vmem:[#allocation6 + $0x1f0] sm:$0xff]  ;;  %v3079_v40 = vld [vmem:[#allocation6 + $0x1f8] sm:$0xff] }
 0x966   :  { %v3026_v36 = vmul.f32 %v3023_v4, %v3013_v10  ;;  %v3027_v3 = vmul.f32 %v3023_v4, %v3014_v46  ;;  %v3028_v45 = vmul.f32 %v3023_v4, %v3015_v11  ;;  %4303 = vrot.lane.b32.xlu1 %v9468_v25, %s7565_s22  ;;  %v3029_v53 = vmul.f32 %v3023_v4, %v3016_v56 }
 0x967   :  { %v3030_v23 = vmul.f32 %v3023_v4, %v3017_v37  ;;  %v3031_v15 = vmul.f32 %v3023_v4, %v3018_v51  ;;  %v3032_v38 = vmul.f32 %v3023_v4, %v3019_v44  ;;  %v3010_v54 = vadd.f32 %v3002_v26, %v9530_v59  ;;  %v3049_v59 = vld [vmem:[#allocation6 + $0x1b8] sm:$0xff]  ;;  %v3073_v4 = vld [vmem:[#allocation6 + $0x1c8] sm:$0xff] }
 0x968   :  { %v3033_v28 = vadd.f32 %v3025_v60, %v2973_v61  ;;  %v3034_v34 = vadd.f32 %v3026_v36, %v2974_v12  ;;  %v3035_v0 = vadd.f32 %v3027_v3, %v2975_v2  ;;  %v3036_v49 = vadd.f32 %v3028_v45, %v2976_v63  ;;  %v3102_v60 = vld [vmem:[#allocation6 + $0x200] sm:$0xff]  ;;  %v3103_v3 = vld [vmem:[#allocation6 + $0x208] sm:$0xff]  ;;  %v3104_v45 = vld [vmem:[#allocation6 + $0x210] sm:$0xff] }
 0x969   :  { %v3037_v50 = vadd.f32 %v3029_v53, %v2977_v52  ;;  %v3038_v19 = vadd.f32 %v3030_v23, %v2978_v13  ;;  %v3039_v39 = vadd.f32 %v3031_v15, %v2979_v24  ;;  %4366 = vrot.lane.b32.xlu0 %v9468_v25, %s7581_s10  ;;  %v9559_v9 = vadd.f32 %v3032_v38, %v2980_v16  ;;  %v3074_v24 = vld [vmem:[#allocation6 + $0x1d0] sm:$0xff]  ;;  %v3077_v16 = vld [vmem:[#allocation6 + $0x1e8] sm:$0xff]  ;;  %v3105_v53 = vld [vmem:[#allocation6 + $0x218] sm:$0xff]  ;;  %s9585_s10 = spop %6584 }
 0x96a   :  { %v3053_v55 = vstv %s9547_s18  ;;  %v3083_v5 = vstv %s6579_s19  ;;  %v9562_v61 = vstv %s6581_s20  ;;  %4345 = vrot.lane.b32.xlu1 %v9468_v25, %s7566_s23  ;;  %v3107_v15 = vld [vmem:[#allocation6 + $0x228] sm:$0xff]  ;;  %v3108_v38 = vld [vmem:[#allocation6 + $0x230] sm:$0xff] }
 0x96b   :  { %v3055_v12 = vmul.f32 %v3053_v55, %v3042_v57  ;;  %v3056_v2 = vmul.f32 %v3053_v55, %v3043_v22  ;;  %v3057_v8 = vmul.f32 %v3053_v55, %v3044_v62  ;;  %v3058_v42 = vmul.f32 %v3053_v55, %v3045_v1 }
 0x96c   :  { %v3059_v63 = vmul.f32 %v3053_v55, %v3046_v30  ;;  %v3060_v52 = vmul.f32 %v3053_v55, %v3047_v43  ;;  %v3061_v13 = vmul.f32 %v3053_v55, %v3048_v27  ;;  %v9566_v6 = vstv %s6583_s21  ;;  %v3109_v30 = vld [vmem:[#allocation6 + $0x238] sm:$0xff] }
 0x96d   :  { %v3062_v21 = vmul.f32 %v3053_v55, %v3049_v59  ;;  %v3063_v35 = vadd.f32 %v3055_v12, %v3003_v47  ;;  %v3064_v48 = vadd.f32 %v3056_v2, %v3004_v29  ;;  %v3065_v10 = vadd.f32 %v3057_v8, %v3005_v33  ;;  %4408 = vrot.lane.b32.xlu0 %v9468_v25, %s7582_s0  ;;  %v3135_v55 = vld [vmem:[#allocation6 + $0x258] sm:$0xff]  ;;  %s6587_s0 = spop %6586 }
 0x96e   :  { %v3066_v20 = vadd.f32 %v3058_v42, %v3006_v18  ;;  %v3067_v46 = vadd.f32 %v3059_v63, %v3007_v58  ;;  %v3068_v11 = vadd.f32 %v3060_v52, %v3008_v32  ;;  %v3069_v56 = vadd.f32 %v3061_v13, %v3009_v7  ;;  %4387 = vrot.lane.b32.xlu1 %v9468_v25, %s7567_s24  ;;  %v3106_v7 = vld [vmem:[#allocation6 + $0x220] sm:$0xff]  ;;  %v3139_v63 = vld [vmem:[#allocation6 + $0x278] sm:$0xff]  ;;  %s6589_s22 = spop %6588 }
 0x96f   :  { %v3085_v26 = vmul.f32 %v3083_v5, %v3072_v31  ;;  %v3086_v37 = vmul.f32 %v3083_v5, %v3073_v4  ;;  %v3087_v51 = vmul.f32 %v3083_v5, %v3074_v24  ;;  %v3088_v44 = vmul.f32 %v3083_v5, %v3075_v41  ;;  %v3137_v31 = vld [vmem:[#allocation6 + $0x268] sm:$0xff]  ;;  %v3138_v4 = vld [vmem:[#allocation6 + $0x270] sm:$0xff]  ;;  %s6591_s23 = spop %6590 }
 0x970   :  { %v3089_v47 = vmul.f32 %v3083_v5, %v3076_v14  ;;  %v3090_v29 = vmul.f32 %v3083_v5, %v3077_v16  ;;  %v3091_v33 = vmul.f32 %v3083_v5, %v3078_v17  ;;  %v3092_v36 = vmul.f32 %v3083_v5, %v3079_v40  ;;  %v3136_v5 = vld [vmem:[#allocation6 + $0x260] sm:$0xff]  ;;  %s9600_s24 = spop %6592 }
 0x971   :  { %v3070_v23 = vadd.f32 %v3062_v21, %v3010_v54  ;;  %v3093_v18 = vadd.f32 %v3085_v26, %v3033_v28  ;;  %v3094_v58 = vadd.f32 %v3086_v37, %v3034_v34  ;;  %v3095_v32 = vadd.f32 %v3087_v51, %v3035_v0  ;;  %4450 = vrot.lane.b32.xlu0 %v9468_v25, %s7583_s11  ;;  %v3132_v34 = vld [vmem:[#allocation6 + $0x240] sm:$0xff]  ;;  %v3133_v0 = vld [vmem:[#allocation6 + $0x248] sm:$0xff]  ;;  %s11268_s11 = smov 97   ;;  %v3164_v26 = vld [vmem:[#allocation6 + $0x290] sm:$0xff] }
 0x972   :  { %v3096_v57 = vadd.f32 %v3088_v44, %v3036_v49  ;;  %v3097_v22 = vadd.f32 %v3089_v47, %v3037_v50  ;;  %v3098_v62 = vadd.f32 %v3090_v29, %v3038_v19  ;;  %v3099_v1 = vadd.f32 %v3091_v33, %v3039_v39  ;;  %4429 = vrot.lane.b32.xlu1 %v9468_v25, %s7568_s25  ;;  %v3134_v39 = vld [vmem:[#allocation6 + $0x250] sm:$0xff]  ;;  %v3162_v17 = vld [vmem:[#allocation6 + $0x280] sm:$0xff]  ;;  %v3165_v37 = vld [vmem:[#allocation6 + $0x298] sm:$0xff]  ;;  %s6595_s25 = spop %6594 }
 0x973   :  { %v3115_v43 = vmul.f32 %v9562_v61, %v3102_v60  ;;  %v3116_v27 = vmul.f32 %v9562_v61, %v3103_v3  ;;  %v3117_v54 = vmul.f32 %v9562_v61, %v3104_v45  ;;  %v3118_v28 = vmul.f32 %v9562_v61, %v3105_v53  ;;  %v3166_v47 = vld [vmem:[#allocation6 + $0x2a0] sm:$0xff]  ;;  %v3167_v29 = vld [vmem:[#allocation6 + $0x2a8] sm:$0xff]  ;;  %v3168_v33 = vld [vmem:[#allocation6 + $0x2b0] sm:$0xff]  ;;  %s6597_s26 = spop %6596 }
 0x974   :  { %v3100_v59 = vadd.f32 %v3092_v36, %v9559_v9  ;;  %v3119_v49 = vmul.f32 %v9562_v61, %v3106_v7  ;;  %v3120_v50 = vmul.f32 %v9562_v61, %v3107_v15  ;;  %v3121_v19 = vmul.f32 %v9562_v61, %v3108_v38  ;;  %v3192_v7 = vld [vmem:[#allocation6 + $0x2c0] sm:$0xff]  ;;  %v3193_v15 = vld [vmem:[#allocation6 + $0x2c8] sm:$0xff]  ;;  %s6599_s27 = spop %6598 }
 0x975   :  { %v3122_v12 = vmul.f32 %v9562_v61, %v3109_v30  ;;  %v3123_v2 = vadd.f32 %v3115_v43, %v3063_v35  ;;  %v3124_v8 = vadd.f32 %v3116_v27, %v3064_v48  ;;  %v3125_v42 = vadd.f32 %v3117_v54, %v3065_v10  ;;  %v3196_v30 = vld [vmem:[#allocation6 + $0x2e0] sm:$0xff] }
 0x976   :  { %v3126_v9 = vadd.f32 %v3118_v28, %v3066_v20  ;;  %v3127_v52 = vadd.f32 %v3119_v49, %v3067_v46  ;;  %v3128_v13 = vadd.f32 %v3120_v50, %v3068_v11  ;;  %v3129_v24 = vadd.f32 %v3121_v19, %v3069_v56  ;;  %4471 = vrot.lane.b32.xlu1 %v9468_v25, %s11268_s11  ;;  %v3163_v56 = vld [vmem:[#allocation6 + $0x288] sm:$0xff]  ;;  %v3199_v49 = vld [vmem:[#allocation6 + $0x2f8] sm:$0xff] }
 0x977   :  { %v3145_v41 = vmul.f32 %v9566_v6, %v3132_v34  ;;  %v3146_v14 = vmul.f32 %v9566_v6, %v3133_v0  ;;  %v3147_v21 = vmul.f32 %v9566_v6, %v3134_v39  ;;  %v3148_v61 = vmul.f32 %v9566_v6, %v3135_v55  ;;  %v3197_v0 = vld [vmem:[#allocation6 + $0x2e8] sm:$0xff]  ;;  %s9613_s28 = spop %6600 }
 0x978   :  { %v3149_v35 = vmul.f32 %v9566_v6, %v3136_v5  ;;  %v3150_v48 = vmul.f32 %v9566_v6, %v3137_v31  ;;  %v3151_v10 = vmul.f32 %v9566_v6, %v3138_v4  ;;  %v3152_v16 = vmul.f32 %v9566_v6, %v3139_v63  ;;  %v3169_v6 = vld [vmem:[#allocation6 + $0x2b8] sm:$0xff]  ;;  %v3222_v63 = vld [vmem:[#allocation6 + $0x300] sm:$0xff]  ;;  %s6603_s29 = spop %6602 }
 0x979   :  { %v3130_v40 = vadd.f32 %v3122_v12, %v3070_v23  ;;  %v3153_v20 = vadd.f32 %v3145_v41, %v3093_v18  ;;  %v3154_v46 = vadd.f32 %v3146_v14, %v3094_v58  ;;  %v3155_v11 = vadd.f32 %v3147_v21, %v3095_v32 }
 0x97a   :  { %v3156_v51 = vadd.f32 %v3148_v61, %v3096_v57  ;;  %v3157_v25 = vadd.f32 %v3149_v35, %v3097_v22  ;;  %v3158_v44 = vadd.f32 %v3150_v48, %v3098_v62  ;;  %v3159_v60 = vadd.f32 %v3151_v10, %v3099_v1  ;;  %v3194_v62 = vld [vmem:[#allocation6 + $0x2d0] sm:$0xff]  ;;  %v3195_v1 = vld [vmem:[#allocation6 + $0x2d8] sm:$0xff]  ;;  %v3223_v35 = vld [vmem:[#allocation6 + $0x308] sm:$0xff] }
 0x97b   :  { %v3160_v36 = vadd.f32 %v3152_v16, %v3100_v59  ;;  %v3173_v3 = vstv %s9585_s10  ;;  %v3203_v45 = vstv %s6587_s0  ;;  %v3233_v53 = vstv %s6589_s22  ;;  %v3198_v59 = vld [vmem:[#allocation6 + $0x2f0] sm:$0xff]  ;;  %s6605_s30 = spop %6604 }
 0x97c   :  { %v3175_v23 = vmul.f32 %v3173_v3, %v3162_v17  ;;  %v3176_v18 = vmul.f32 %v3173_v3, %v3163_v56  ;;  %v3177_v58 = vmul.f32 %v3173_v3, %v3164_v26  ;;  %v3178_v32 = vmul.f32 %v3173_v3, %v3165_v37  ;;  %v3229_v37 = vld [vmem:[#allocation6 + $0x338] sm:$0xff]  ;;  %s6607_s2 = spop %6606 }
 0x97d   :  { %v3179_v38 = vmul.f32 %v3173_v3, %v3166_v47  ;;  %v3180_v57 = vmul.f32 %v3173_v3, %v3167_v29  ;;  %v3181_v22 = vmul.f32 %v3173_v3, %v3168_v33  ;;  %v9598_v43 = vstv %s6591_s23 }
 0x97e   :  { %v3182_v27 = vmul.f32 %v3173_v3, %v3169_v6  ;;  %v3183_v54 = vadd.f32 %v3175_v23, %v3123_v2  ;;  %v3184_v28 = vadd.f32 %v3176_v18, %v3124_v8  ;;  %v3185_v34 = vadd.f32 %v3177_v58, %v3125_v42  ;;  %v3224_v2 = vld [vmem:[#allocation6 + $0x310] sm:$0xff]  ;;  %v3225_v8 = vld [vmem:[#allocation6 + $0x318] sm:$0xff]  ;;  %v3252_v3 = vld [vmem:[#allocation6 + $0x340] sm:$0xff] }
 0x97f   :  { %v3186_v50 = vadd.f32 %v3178_v32, %v3126_v9  ;;  %v3187_v19 = vadd.f32 %v3179_v38, %v3127_v52  ;;  %v3188_v39 = vadd.f32 %v3180_v57, %v3128_v13  ;;  %v3189_v55 = vadd.f32 %v3181_v22, %v3129_v24  ;;  %v3226_v9 = vld [vmem:[#allocation6 + $0x320] sm:$0xff]  ;;  %v3227_v52 = vld [vmem:[#allocation6 + $0x328] sm:$0xff]  ;;  %v3228_v13 = vld [vmem:[#allocation6 + $0x330] sm:$0xff]  ;;  %s9632_s5 = spop %6608 }
 0x980   :  { %v3205_v5 = vmul.f32 %v3203_v45, %v3192_v7  ;;  %v3206_v12 = vmul.f32 %v3203_v45, %v3193_v15  ;;  %v3207_v31 = vmul.f32 %v3203_v45, %v3194_v62  ;;  %v3208_v4 = vmul.f32 %v3203_v45, %v3195_v1  ;;  %v3256_v58 = vld [vmem:[#allocation6 + $0x360] sm:$0xff]  ;;  %v3259_v15 = vld [vmem:[#allocation6 + $0x378] sm:$0xff]  ;;  %s6611_s6 = spop %6610 }
 0x981   :  { %v3209_v41 = vmul.f32 %v3203_v45, %v3196_v30  ;;  %v3210_v14 = vmul.f32 %v3203_v45, %v3197_v0  ;;  %v3211_v21 = vmul.f32 %v3203_v45, %v3198_v59  ;;  %v3212_v61 = vmul.f32 %v3203_v45, %v3199_v49  ;;  %v3253_v45 = vld [vmem:[#allocation6 + $0x348] sm:$0xff]  ;;  %v3282_v0 = vld [vmem:[#allocation6 + $0x380] sm:$0xff] }
 0x982   :  { %v3190_v42 = vadd.f32 %v3182_v27, %v3130_v40  ;;  %v3213_v48 = vadd.f32 %v3205_v5, %v3153_v20  ;;  %v3214_v10 = vadd.f32 %v3206_v12, %v3154_v46  ;;  %v3215_v16 = vadd.f32 %v3207_v31, %v3155_v11  ;;  %v3254_v46 = vld [vmem:[#allocation6 + $0x350] sm:$0xff]  ;;  %v3255_v11 = vld [vmem:[#allocation6 + $0x358] sm:$0xff] }
 0x983   :  { %v3216_v24 = vadd.f32 %v3208_v4, %v3156_v51  ;;  %v3217_v17 = vadd.f32 %v3209_v41, %v3157_v25  ;;  %v3218_v56 = vadd.f32 %v3210_v14, %v3158_v44  ;;  %v3219_v26 = vadd.f32 %v3211_v21, %v3159_v60  ;;  %v3257_v44 = vld [vmem:[#allocation6 + $0x368] sm:$0xff]  ;;  %v3258_v60 = vld [vmem:[#allocation6 + $0x370] sm:$0xff]  ;;  %v3285_v5 = vld [vmem:[#allocation6 + $0x398] sm:$0xff]  ;;  %s6613_s1 = spop %6612 }
 0x984   :  { %v3235_v47 = vmul.f32 %v3233_v53, %v3222_v63  ;;  %v3236_v29 = vmul.f32 %v3233_v53, %v3223_v35  ;;  %v3237_v33 = vmul.f32 %v3233_v53, %v3224_v2  ;;  %v3238_v6 = vmul.f32 %v3233_v53, %v3225_v8  ;;  %v3286_v41 = vld [vmem:[#allocation6 + $0x3a0] sm:$0xff]  ;;  %v3287_v14 = vld [vmem:[#allocation6 + $0x3a8] sm:$0xff]  ;;  %v3288_v21 = vld [vmem:[#allocation6 + $0x3b0] sm:$0xff]  ;;  %s6615_s7 = spop %6614 }
 0x985   :  { %v3220_v23 = vadd.f32 %v3212_v61, %v3160_v36  ;;  %v3239_v18 = vmul.f32 %v3233_v53, %v3226_v9  ;;  %v3240_v40 = vmul.f32 %v3233_v53, %v3227_v52  ;;  %v3241_v20 = vmul.f32 %v3233_v53, %v3228_v13  ;;  %v3312_v9 = vld [vmem:[#allocation6 + $0x3c0] sm:$0xff]  ;;  %v3313_v52 = vld [vmem:[#allocation6 + $0x3c8] sm:$0xff] }
 0x986   :  { %v3242_v32 = vmul.f32 %v3233_v53, %v3229_v37  ;;  %v3243_v7 = vadd.f32 %v3235_v47, %v3183_v54  ;;  %v3244_v51 = vadd.f32 %v3236_v29, %v3184_v28  ;;  %v3245_v25 = vadd.f32 %v3237_v33, %v3185_v34  ;;  %v3316_v37 = vld [vmem:[#allocation6 + $0x3e0] sm:$0xff] }
 0x987   :  { %v3246_v38 = vadd.f32 %v3238_v6, %v3186_v50  ;;  %v3247_v57 = vadd.f32 %v3239_v18, %v3187_v19  ;;  %v3248_v22 = vadd.f32 %v3240_v40, %v3188_v39  ;;  %v3249_v62 = vadd.f32 %v3241_v20, %v3189_v55  ;;  %v3283_v39 = vld [vmem:[#allocation6 + $0x388] sm:$0xff]  ;;  %v3284_v55 = vld [vmem:[#allocation6 + $0x390] sm:$0xff]  ;;  %v3319_v18 = vld [vmem:[#allocation6 + $0x3f8] sm:$0xff]  ;;  %s9704_s8 = spop %6616 }
 0x988   :  { %v3265_v36 = vmul.f32 %v9598_v43, %v3252_v3  ;;  %v3266_v1 = vmul.f32 %v9598_v43, %v3253_v45  ;;  %v3267_v30 = vmul.f32 %v9598_v43, %v3254_v46  ;;  %v3268_v53 = vmul.f32 %v9598_v43, %v3255_v11  ;;  %v3317_v45 = vld [vmem:[#allocation6 + $0x3e8] sm:$0xff]  ;;  %s9728_s9 = spop %6618 }
 0x989   :  { %v3269_v27 = vmul.f32 %v9598_v43, %v3256_v58  ;;  %v3270_v54 = vmul.f32 %v9598_v43, %v3257_v44  ;;  %v3271_v28 = vmul.f32 %v9598_v43, %v3258_v60  ;;  %v3272_v34 = vmul.f32 %v9598_v43, %v3259_v15  ;;  %v3289_v43 = vld [vmem:[#allocation6 + $0x3b8] sm:$0xff]  ;;  %v3342_v15 = vld [vmem:[#allocation6 + $0x400] sm:$0xff] }
 0x98a   :  { %v3250_v59 = vadd.f32 %v3242_v32, %v3190_v42  ;;  %v3273_v49 = vadd.f32 %v3265_v36, %v3213_v48  ;;  %v3274_v50 = vadd.f32 %v3266_v1, %v3214_v10  ;;  %v3275_v19 = vadd.f32 %v3267_v30, %v3215_v16 }
 0x98b   :  { %v3276_v12 = vadd.f32 %v3268_v53, %v3216_v24  ;;  %v3277_v31 = vadd.f32 %v3269_v27, %v3217_v17  ;;  %v3278_v4 = vadd.f32 %v3270_v54, %v3218_v56  ;;  %v3279_v63 = vadd.f32 %v3271_v28, %v3219_v26  ;;  %v3314_v56 = vld [vmem:[#allocation6 + $0x3d0] sm:$0xff]  ;;  %v3315_v26 = vld [vmem:[#allocation6 + $0x3d8] sm:$0xff]  ;;  %v3343_v27 = vld [vmem:[#allocation6 + $0x408] sm:$0xff]  ;;  %s9742_s12 = spop %6620 }
 0x98c   :  { %v3280_v61 = vadd.f32 %v3272_v34, %v3220_v23  ;;  %v3293_v35 = vstv %s9600_s24  ;;  %v3323_v2 = vstv %s6595_s25  ;;  %v3353_v8 = vstv %s6597_s26  ;;  %v3318_v23 = vld [vmem:[#allocation6 + $0x3f0] sm:$0xff]  ;;  %s9764_s13 = spop %6622 }
 0x98d   :  { %v3295_v42 = vmul.f32 %v3293_v35, %v3282_v0  ;;  %v3296_v48 = vmul.f32 %v3293_v35, %v3283_v39  ;;  %v3297_v10 = vmul.f32 %v3293_v35, %v3284_v55  ;;  %v3298_v16 = vmul.f32 %v3293_v35, %v3285_v5  ;;  %v3349_v5 = vld [vmem:[#allocation6 + $0x438] sm:$0xff] }
 0x98e   :  { %v3299_v13 = vmul.f32 %v3293_v35, %v3286_v41  ;;  %v3300_v24 = vmul.f32 %v3293_v35, %v3287_v14  ;;  %v3301_v17 = vmul.f32 %v3293_v35, %v3288_v21  ;;  %v9611_v47 = vstv %s6599_s27 }
 0x98f   :  { %v3302_v29 = vmul.f32 %v3293_v35, %v3289_v43  ;;  %v3303_v33 = vadd.f32 %v3295_v42, %v3243_v7  ;;  %v3304_v6 = vadd.f32 %v3296_v48, %v3244_v51  ;;  %v3305_v3 = vadd.f32 %v3297_v10, %v3245_v25  ;;  %v3344_v7 = vld [vmem:[#allocation6 + $0x410] sm:$0xff]  ;;  %v3345_v51 = vld [vmem:[#allocation6 + $0x418] sm:$0xff]  ;;  %v3372_v35 = vld [vmem:[#allocation6 + $0x440] sm:$0xff]  ;;  %s9774_s14 = spop %6624 }
 0x990   :  { %v3306_v40 = vadd.f32 %v3298_v16, %v3246_v38  ;;  %v3307_v20 = vadd.f32 %v3299_v13, %v3247_v57  ;;  %v3308_v46 = vadd.f32 %v3300_v24, %v3248_v22  ;;  %v3309_v11 = vadd.f32 %v3301_v17, %v3249_v62  ;;  %v3346_v38 = vld [vmem:[#allocation6 + $0x420] sm:$0xff]  ;;  %v3347_v57 = vld [vmem:[#allocation6 + $0x428] sm:$0xff]  ;;  %v3348_v22 = vld [vmem:[#allocation6 + $0x430] sm:$0xff]  ;;  %s6627_s15 = spop %6626 }
 0x991   :  { %v3325_v58 = vmul.f32 %v3323_v2, %v3312_v9  ;;  %v3326_v32 = vmul.f32 %v3323_v2, %v3313_v52  ;;  %v3327_v44 = vmul.f32 %v3323_v2, %v3314_v56  ;;  %v3328_v60 = vmul.f32 %v3323_v2, %v3315_v26  ;;  %v3376_v10 = vld [vmem:[#allocation6 + $0x460] sm:$0xff]  ;;  %v3379_v52 = vld [vmem:[#allocation6 + $0x478] sm:$0xff]  ;;  %s6629_s16 = spop %6628 }
 0x992   :  { %v3329_v36 = vmul.f32 %v3323_v2, %v3316_v37  ;;  %v3330_v1 = vmul.f32 %v3323_v2, %v3317_v45  ;;  %v3331_v30 = vmul.f32 %v3323_v2, %v3318_v23  ;;  %v3332_v53 = vmul.f32 %v3323_v2, %v3319_v18  ;;  %v3373_v2 = vld [vmem:[#allocation6 + $0x448] sm:$0xff]  ;;  %v3402_v45 = vld [vmem:[#allocation6 + $0x480] sm:$0xff] }
 0x993   :  { %v3310_v25 = vadd.f32 %v3302_v29, %v3250_v59  ;;  %v3333_v54 = vadd.f32 %v3325_v58, %v3273_v49  ;;  %v3334_v28 = vadd.f32 %v3326_v32, %v3274_v50  ;;  %v3335_v34 = vadd.f32 %v3327_v44, %v3275_v19  ;;  %v3374_v50 = vld [vmem:[#allocation6 + $0x450] sm:$0xff]  ;;  %v3375_v19 = vld [vmem:[#allocation6 + $0x458] sm:$0xff] }
 0x994   :  { %v3336_v62 = vadd.f32 %v3328_v60, %v3276_v12  ;;  %v3337_v0 = vadd.f32 %v3329_v36, %v3277_v31  ;;  %v3338_v39 = vadd.f32 %v3330_v1, %v3278_v4  ;;  %v3339_v55 = vadd.f32 %v3331_v30, %v3279_v63  ;;  %v3377_v4 = vld [vmem:[#allocation6 + $0x468] sm:$0xff]  ;;  %v3378_v63 = vld [vmem:[#allocation6 + $0x470] sm:$0xff]  ;;  %v3405_v58 = vld [vmem:[#allocation6 + $0x498] sm:$0xff] }
 0x995   :  { %v3355_v41 = vmul.f32 %v3353_v8, %v3342_v15  ;;  %v3356_v14 = vmul.f32 %v3353_v8, %v3343_v27  ;;  %v3357_v21 = vmul.f32 %v3353_v8, %v3344_v7  ;;  %v3358_v43 = vmul.f32 %v3353_v8, %v3345_v51  ;;  %v3406_v36 = vld [vmem:[#allocation6 + $0x4a0] sm:$0xff]  ;;  %v3407_v1 = vld [vmem:[#allocation6 + $0x4a8] sm:$0xff]  ;;  %v3408_v30 = vld [vmem:[#allocation6 + $0x4b0] sm:$0xff] }
 0x996   :  { %v3340_v42 = vadd.f32 %v3332_v53, %v3280_v61  ;;  %v3359_v48 = vmul.f32 %v3353_v8, %v3346_v38  ;;  %v3360_v59 = vmul.f32 %v3353_v8, %v3347_v57  ;;  %v3361_v49 = vmul.f32 %v3353_v8, %v3348_v22  ;;  %v3432_v38 = vld [vmem:[#allocation6 + $0x4c0] sm:$0xff]  ;;  %v3433_v57 = vld [vmem:[#allocation6 + $0x4c8] sm:$0xff] }
 0x997   :  { %v3362_v16 = vmul.f32 %v3353_v8, %v3349_v5  ;;  %v3363_v9 = vadd.f32 %v3355_v41, %v3303_v33  ;;  %v3364_v12 = vadd.f32 %v3356_v14, %v3304_v6  ;;  %v3365_v31 = vadd.f32 %v3357_v21, %v3305_v3  ;;  %v3436_v5 = vld [vmem:[#allocation6 + $0x4e0] sm:$0xff] }
 0x998   :  { %v3366_v13 = vadd.f32 %v3358_v43, %v3306_v40  ;;  %v3367_v24 = vadd.f32 %v3359_v48, %v3307_v20  ;;  %v3368_v17 = vadd.f32 %v3360_v59, %v3308_v46  ;;  %v3369_v56 = vadd.f32 %v3361_v49, %v3309_v11  ;;  %v3403_v46 = vld [vmem:[#allocation6 + $0x488] sm:$0xff]  ;;  %v3404_v11 = vld [vmem:[#allocation6 + $0x490] sm:$0xff]  ;;  %v3439_v48 = vld [vmem:[#allocation6 + $0x4f8] sm:$0xff] }
 0x999   :  { %v3385_v61 = vmul.f32 %v9611_v47, %v3372_v35  ;;  %v3386_v26 = vmul.f32 %v9611_v47, %v3373_v2  ;;  %v3387_v37 = vmul.f32 %v9611_v47, %v3374_v50  ;;  %v3388_v8 = vmul.f32 %v9611_v47, %v3375_v19  ;;  %v3437_v2 = vld [vmem:[#allocation6 + $0x4e8] sm:$0xff] }
 0x99a   :  { %v3389_v29 = vmul.f32 %v9611_v47, %v3376_v10  ;;  %v3390_v33 = vmul.f32 %v9611_v47, %v3377_v4  ;;  %v3391_v6 = vmul.f32 %v9611_v47, %v3378_v63  ;;  %v3392_v3 = vmul.f32 %v9611_v47, %v3379_v52  ;;  %v3409_v47 = vld [vmem:[#allocation6 + $0x4b8] sm:$0xff]  ;;  %v3462_v52 = vld [vmem:[#allocation6 + $0x500] sm:$0xff] }
 0x99b   :  { %v3370_v23 = vadd.f32 %v3362_v16, %v3310_v25  ;;  %v3393_v18 = vadd.f32 %v3385_v61, %v3333_v54  ;;  %v3394_v40 = vadd.f32 %v3386_v26, %v3334_v28  ;;  %v3395_v20 = vadd.f32 %v3387_v37, %v3335_v34 }
 0x99c   :  { %v3396_v32 = vadd.f32 %v3388_v8, %v3336_v62  ;;  %v3397_v44 = vadd.f32 %v3389_v29, %v3337_v0  ;;  %v3398_v60 = vadd.f32 %v3390_v33, %v3338_v39  ;;  %v3399_v15 = vadd.f32 %v3391_v6, %v3339_v55  ;;  %v3434_v39 = vld [vmem:[#allocation6 + $0x4d0] sm:$0xff]  ;;  %v3435_v55 = vld [vmem:[#allocation6 + $0x4d8] sm:$0xff]  ;;  %v3463_v29 = vld [vmem:[#allocation6 + $0x508] sm:$0xff] }
 0x99d   :  { %v3400_v53 = vadd.f32 %v3392_v3, %v3340_v42  ;;  %v3413_v27 = vstv %s9613_s28  ;;  %v3443_v7 = vstv %s6603_s29  ;;  %v3473_v51 = vstv %s6605_s30  ;;  %v3438_v42 = vld [vmem:[#allocation6 + $0x4f0] sm:$0xff] }
 0x99e   :  { %v3415_v25 = vmul.f32 %v3413_v27, %v3402_v45  ;;  %v3416_v54 = vmul.f32 %v3413_v27, %v3403_v46  ;;  %v3417_v28 = vmul.f32 %v3413_v27, %v3404_v11  ;;  %v3418_v34 = vmul.f32 %v3413_v27, %v3405_v58  ;;  %v3469_v58 = vld [vmem:[#allocation6 + $0x538] sm:$0xff] }
 0x99f   :  { %v3419_v22 = vmul.f32 %v3413_v27, %v3406_v36  ;;  %v3420_v62 = vmul.f32 %v3413_v27, %v3407_v1  ;;  %v3421_v0 = vmul.f32 %v3413_v27, %v3408_v30  ;;  %v9624_v41 = vstv %s6607_s2 }
 0x9a0   :  { %v3422_v14 = vmul.f32 %v3413_v27, %v3409_v47  ;;  %v3423_v21 = vadd.f32 %v3415_v25, %v3363_v9  ;;  %v3424_v43 = vadd.f32 %v3416_v54, %v3364_v12  ;;  %v3425_v35 = vadd.f32 %v3417_v28, %v3365_v31  ;;  %v3464_v9 = vld [vmem:[#allocation6 + $0x510] sm:$0xff]  ;;  %v3465_v12 = vld [vmem:[#allocation6 + $0x518] sm:$0xff]  ;;  %v3492_v27 = vld [vmem:[#allocation6 + $0x540] sm:$0xff] }
 0x9a1   :  { %v3426_v59 = vadd.f32 %v3418_v34, %v3366_v13  ;;  %v3427_v49 = vadd.f32 %v3419_v22, %v3367_v24  ;;  %v3428_v50 = vadd.f32 %v3420_v62, %v3368_v17  ;;  %v3429_v19 = vadd.f32 %v3421_v0, %v3369_v56  ;;  %v3466_v13 = vld [vmem:[#allocation6 + $0x520] sm:$0xff]  ;;  %v3467_v24 = vld [vmem:[#allocation6 + $0x528] sm:$0xff]  ;;  %v3468_v17 = vld [vmem:[#allocation6 + $0x530] sm:$0xff] }
 0x9a2   :  { %v3445_v10 = vmul.f32 %v3443_v7, %v3432_v38  ;;  %v3446_v16 = vmul.f32 %v3443_v7, %v3433_v57  ;;  %v3447_v4 = vmul.f32 %v3443_v7, %v3434_v39  ;;  %v3448_v63 = vmul.f32 %v3443_v7, %v3435_v55  ;;  %v3496_v28 = vld [vmem:[#allocation6 + $0x560] sm:$0xff]  ;;  %v3499_v57 = vld [vmem:[#allocation6 + $0x578] sm:$0xff] }
 0x9a3   :  { %v3449_v61 = vmul.f32 %v3443_v7, %v3436_v5  ;;  %v3450_v26 = vmul.f32 %v3443_v7, %v3437_v2  ;;  %v3451_v37 = vmul.f32 %v3443_v7, %v3438_v42  ;;  %v3452_v8 = vmul.f32 %v3443_v7, %v3439_v48  ;;  %v3493_v7 = vld [vmem:[#allocation6 + $0x548] sm:$0xff]  ;;  %v3522_v48 = vld [vmem:[#allocation6 + $0x580] sm:$0xff] }
 0x9a4   :  { %v3430_v31 = vadd.f32 %v3422_v14, %v3370_v23  ;;  %v3453_v33 = vadd.f32 %v3445_v10, %v3393_v18  ;;  %v3454_v6 = vadd.f32 %v3446_v16, %v3394_v40  ;;  %v3455_v3 = vadd.f32 %v3447_v4, %v3395_v20  ;;  %v3494_v40 = vld [vmem:[#allocation6 + $0x550] sm:$0xff]  ;;  %v3495_v20 = vld [vmem:[#allocation6 + $0x558] sm:$0xff]  ;;  %v3523_v10 = vld [vmem:[#allocation6 + $0x588] sm:$0xff] }
 0x9a5   :  { %v3456_v56 = vadd.f32 %v3448_v63, %v3396_v32  ;;  %v3457_v45 = vadd.f32 %v3449_v61, %v3397_v44  ;;  %v3458_v46 = vadd.f32 %v3450_v26, %v3398_v60  ;;  %v3459_v11 = vadd.f32 %v3451_v37, %v3399_v15  ;;  %v3497_v60 = vld [vmem:[#allocation6 + $0x568] sm:$0xff]  ;;  %v3498_v15 = vld [vmem:[#allocation6 + $0x570] sm:$0xff]  ;;  %v3525_v4 = vld [vmem:[#allocation6 + $0x598] sm:$0xff] }
 0x9a6   :  { %v3475_v36 = vmul.f32 %v3473_v51, %v3462_v52  ;;  %v3476_v1 = vmul.f32 %v3473_v51, %v3463_v29  ;;  %v3477_v30 = vmul.f32 %v3473_v51, %v3464_v9  ;;  %v3478_v47 = vmul.f32 %v3473_v51, %v3465_v12  ;;  %v3524_v16 = vld [vmem:[#allocation6 + $0x590] sm:$0xff]  ;;  %v3526_v26 = vld [vmem:[#allocation6 + $0x5a0] sm:$0xff]  ;;  %v3527_v37 = vld [vmem:[#allocation6 + $0x5a8] sm:$0xff] }
 0x9a7   :  { %v3460_v25 = vadd.f32 %v3452_v8, %v3400_v53  ;;  %v3479_v54 = vmul.f32 %v3473_v51, %v3466_v13  ;;  %v3480_v23 = vmul.f32 %v3473_v51, %v3467_v24  ;;  %v3481_v18 = vmul.f32 %v3473_v51, %v3468_v17  ;;  %v3528_v8 = vld [vmem:[#allocation6 + $0x5b0] sm:$0xff] }
 0x9a8   :  { %v3482_v34 = vmul.f32 %v3473_v51, %v3469_v58  ;;  %v9626_v38 = vadd.f32 %v3475_v36, %v3423_v21  ;;  %v9628_v32 = vadd.f32 %v3476_v1, %v3424_v43  ;;  %v9630_v44 = vadd.f32 %v3477_v30, %v3425_v35  ;;  %v3554_v1 = vld [vmem:[#allocation6 + $0x5d0] sm:$0xff]  ;;  %v3555_v30 = vld [vmem:[#allocation6 + $0x5d8] sm:$0xff] }
 0x9a9   :  { %v9634_v22 = vadd.f32 %v3478_v47, %v3426_v59  ;;  %v9636_v53 = vadd.f32 %v3479_v54, %v3427_v49  ;;  %v9638_v62 = vadd.f32 %v3480_v23, %v3428_v50  ;;  %v9640_v0 = vadd.f32 %v3481_v18, %v3429_v19  ;;  %v3850_v51 = vpop.permute.xlu1 %3849  ;;  %v3863_v39 = vpop.permute.xlu0 %3862  ;;  %v3556_v47 = vld [vmem:[#allocation6 + $0x5e0] sm:$0xff]  ;;  %v3557_v18 = vld [vmem:[#allocation6 + $0x5e8] sm:$0xff] }
 0x9aa   :  { %v3505_v55 = vmul.f32 %v9624_v41, %v3492_v27  ;;  %v3506_v5 = vmul.f32 %v9624_v41, %v3493_v7  ;;  %v3507_v14 = vmul.f32 %v9624_v41, %v3494_v40  ;;  %v3508_v21 = vmul.f32 %v9624_v41, %v3495_v20  ;;  %6630 = vpush %v3850_v51  ;;  %v3558_v40 = vld [vmem:[#allocation6 + $0x5f0] sm:$0xff]  ;;  %v3559_v20 = vld [vmem:[#allocation6 + $0x5f8] sm:$0xff] }
 0x9ab   :  { %v3509_v43 = vmul.f32 %v9624_v41, %v3496_v28  ;;  %v3510_v35 = vmul.f32 %v9624_v41, %v3497_v60  ;;  %v3511_v2 = vmul.f32 %v9624_v41, %v3498_v15  ;;  %v3512_v42 = vmul.f32 %v9624_v41, %v3499_v57  ;;  %6632 = vpush %v3863_v39 }
 0x9ac   :  { %v9650_v59 = vadd.f32 %v3482_v34, %v3430_v31  ;;  %v9652_v49 = vadd.f32 %v3505_v55, %v3453_v33  ;;  %v9654_v50 = vadd.f32 %v3506_v5, %v3454_v6  ;;  %v9656_v19 = vadd.f32 %v3507_v14, %v3455_v3  ;;  %v3529_v31 = vld [vmem:[#allocation6 + $0x5b8] sm:$0xff]  ;;  %v3582_v55 = vld [vmem:[#allocation6 + $0x600] sm:$0xff]  ;;  %v3583_v5 = vld [vmem:[#allocation6 + $0x608] sm:$0xff] }
 0x9ad   :  { %v9658_v63 = vadd.f32 %v3508_v21, %v3456_v56  ;;  %v9660_v52 = vadd.f32 %v3509_v43, %v3457_v45  ;;  %v9662_v41 = vadd.f32 %v3510_v35, %v3458_v46  ;;  %v9664_v61 = vadd.f32 %v3511_v2, %v3459_v11  ;;  %v3884_v29 = vpop.permute.xlu1 %3883  ;;  %v3905_v9 = vpop.permute.xlu0 %3904  ;;  %v3552_v45 = vld [vmem:[#allocation6 + $0x5c0] sm:$0xff]  ;;  %v3553_v46 = vld [vmem:[#allocation6 + $0x5c8] sm:$0xff]  ;;  %v3584_v14 = vld [vmem:[#allocation6 + $0x610] sm:$0xff] }
 0x9ae   :  { %v9666_v12 = vadd.f32 %v3512_v42, %v3460_v25  ;;  %v3533_v33 = vstv %s9632_s5  ;;  %v3563_v6 = vstv %s6611_s6  ;;  %v9669_v3 = vstv %s6613_s1  ;;  %6634 = vpush %v3884_v29  ;;  %v3585_v35 = vld [vmem:[#allocation6 + $0x618] sm:$0xff]  ;;  %v3586_v2 = vld [vmem:[#allocation6 + $0x620] sm:$0xff] }
 0x9af   :  { %v3535_v13 = vmul.f32 %v3533_v33, %v3522_v48  ;;  %v3536_v24 = vmul.f32 %v3533_v33, %v3523_v10  ;;  %v3537_v17 = vmul.f32 %v3533_v33, %v3524_v16  ;;  %v3538_v56 = vmul.f32 %v3533_v33, %v3525_v4  ;;  %6636 = vpush %v3905_v9  ;;  %v3588_v16 = vld [vmem:[#allocation6 + $0x630] sm:$0xff]  ;;  %v3589_v4 = vld [vmem:[#allocation6 + $0x638] sm:$0xff] }
 0x9b0   :  { %v3539_v11 = vmul.f32 %v3533_v33, %v3526_v26  ;;  %v3540_v58 = vmul.f32 %v3533_v33, %v3527_v37  ;;  %v3541_v36 = vmul.f32 %v3533_v33, %v3528_v8  ;;  %v9671_v27 = vstv %s6615_s7  ;;  %v3612_v26 = vld [vmem:[#allocation6 + $0x640] sm:$0xff]  ;;  %v3614_v9 = vld [vmem:[#allocation6 + $0x650] sm:$0xff] }
 0x9b1   :  { %v3542_v7 = vmul.f32 %v3533_v33, %v3529_v31  ;;  %v9674_v25 = vadd.f32 %v3535_v13, %v9626_v38  ;;  %v9677_v54 = vadd.f32 %v3536_v24, %v9628_v32  ;;  %v9680_v23 = vadd.f32 %v3537_v17, %v9630_v44  ;;  %v3926_v28 = vpop.permute.xlu1 %3925  ;;  %v3947_v34 = vpop.permute.xlu0 %3946  ;;  %v3615_v31 = vld [vmem:[#allocation6 + $0x658] sm:$0xff]  ;;  %v3617_v13 = vld [vmem:[#allocation6 + $0x668] sm:$0xff]  ;;  %v3618_v24 = vld [vmem:[#allocation6 + $0x670] sm:$0xff] }
 0x9b2   :  { %v9683_v60 = vadd.f32 %v3538_v56, %v9634_v22  ;;  %v9686_v15 = vadd.f32 %v3539_v11, %v9636_v53  ;;  %v9689_v38 = vadd.f32 %v3540_v58, %v9638_v62  ;;  %v9692_v32 = vadd.f32 %v3541_v36, %v9640_v0  ;;  %6638 = vpush %v3926_v28  ;;  %v3587_v62 = vld [vmem:[#allocation6 + $0x628] sm:$0xff] }
 0x9b3   :  { %v3565_v44 = vmul.f32 %v3563_v6, %v3552_v45  ;;  %v3566_v57 = vmul.f32 %v3563_v6, %v3553_v46  ;;  %v3567_v51 = vmul.f32 %v3563_v6, %v3554_v1  ;;  %v3568_v39 = vmul.f32 %v3563_v6, %v3555_v30  ;;  %6640 = vpush %v3947_v34  ;;  %v3619_v45 = vld [vmem:[#allocation6 + $0x678] sm:$0xff]  ;;  %v3642_v46 = vld [vmem:[#allocation6 + $0x680] sm:$0xff]  ;;  %v3643_v11 = vld [vmem:[#allocation6 + $0x688] sm:$0xff] }
 0x9b4   :  { %v3569_v22 = vmul.f32 %v3563_v6, %v3556_v47  ;;  %v3570_v21 = vmul.f32 %v3563_v6, %v3557_v18  ;;  %v3571_v43 = vmul.f32 %v3563_v6, %v3558_v40  ;;  %v3572_v53 = vmul.f32 %v3563_v6, %v3559_v20  ;;  %v3644_v47 = vld [vmem:[#allocation6 + $0x690] sm:$0xff]  ;;  %v3646_v18 = vld [vmem:[#allocation6 + $0x6a0] sm:$0xff] }
 0x9b5   :  { %v9695_v42 = vadd.f32 %v3542_v7, %v9650_v59  ;;  %v9698_v0 = vadd.f32 %v3565_v44, %v9652_v49  ;;  %v3574_v48 = vadd.f32 %v3566_v57, %v9654_v50  ;;  %v9702_v10 = vadd.f32 %v3567_v51, %v9656_v19  ;;  %v3968_v37 = vpop.permute.xlu1 %3967  ;;  %v3989_v8 = vpop.permute.xlu0 %3988  ;;  %v3613_v19 = vld [vmem:[#allocation6 + $0x648] sm:$0xff]  ;;  %v3645_v7 = vld [vmem:[#allocation6 + $0x698] sm:$0xff]  ;;  %v3648_v57 = vld [vmem:[#allocation6 + $0x6b0] sm:$0xff] }
 0x9b6   :  { %v9707_v29 = vadd.f32 %v3568_v39, %v9658_v63  ;;  %v9710_v59 = vadd.f32 %v3569_v22, %v9660_v52  ;;  %v9713_v49 = vadd.f32 %v3570_v21, %v9662_v41  ;;  %v9716_v50 = vadd.f32 %v3571_v43, %v9664_v61  ;;  %6642 = vpush %v3968_v37  ;;  %v3616_v41 = vld [vmem:[#allocation6 + $0x660] sm:$0xff]  ;;  %v3647_v44 = vld [vmem:[#allocation6 + $0x6a8] sm:$0xff]  ;;  %v3649_v51 = vld [vmem:[#allocation6 + $0x6b8] sm:$0xff] }
 0x9b7   :  { %v9719_v33 = vadd.f32 %v3572_v53, %v9666_v12  ;;  %v9722_v6 = vmul.f32 %v9669_v3, %v3582_v55  ;;  %v3596_v63 = vmul.f32 %v9669_v3, %v3583_v5  ;;  %v9726_v52 = vmul.f32 %v9669_v3, %v3584_v14  ;;  %6644 = vpush %v3989_v8  ;;  %v3672_v14 = vld [vmem:[#allocation6 + $0x6c0] sm:$0xff]  ;;  %v3673_v22 = vld [vmem:[#allocation6 + $0x6c8] sm:$0xff]  ;;  %v3674_v21 = vld [vmem:[#allocation6 + $0x6d0] sm:$0xff] }
 0x9b8   :  { %v9731_v61 = vmul.f32 %v9669_v3, %v3585_v35  ;;  %v9734_v12 = vmul.f32 %v9669_v3, %v3586_v2  ;;  %v9737_v17 = vmul.f32 %v9669_v3, %v3587_v62  ;;  %v9740_v56 = vmul.f32 %v9669_v3, %v3588_v16  ;;  %v3675_v16 = vld [vmem:[#allocation6 + $0x6d8] sm:$0xff] }
 0x9b9   :  { %v9745_v58 = vmul.f32 %v9669_v3, %v3589_v4  ;;  %v3604_v36 = vadd.f32 %v3596_v63, %v9677_v54  ;;  %v9749_v1 = vmul.f32 %v9671_v27, %v3612_v26  ;;  %v3626_v30 = vmul.f32 %v9671_v27, %v3613_v19  ;;  %v4010_v40 = vpop.permute.xlu1 %4009  ;;  %v4031_v20 = vpop.permute.xlu0 %4030  ;;  %v3676_v4 = vld [vmem:[#allocation6 + $0x6e0] sm:$0xff]  ;;  %v3677_v26 = vld [vmem:[#allocation6 + $0x6e8] sm:$0xff] }
 0x9ba   :  { %v9753_v28 = vmul.f32 %v9671_v27, %v3614_v9  ;;  %v9756_v3 = vmul.f32 %v9671_v27, %v3615_v31  ;;  %v9759_v54 = vmul.f32 %v9671_v27, %v3616_v41  ;;  %v9762_v34 = vmul.f32 %v9671_v27, %v3617_v13  ;;  %6646 = vpush %v4010_v40  ;;  %v3678_v9 = vld [vmem:[#allocation6 + $0x6f0] sm:$0xff]  ;;  %v3763_v40 = vld [vmem:[#allocation6 + $0x788] sm:$0xff] }
 0x9bb   :  { %v9767_v39 = vmul.f32 %v9671_v27, %v3618_v24  ;;  %v9770_v55 = vmul.f32 %v9671_v27, %v3619_v45  ;;  %v3653_v5 = vstv %s9704_s8  ;;  %v3683_v43 = vstv %s9728_s9  ;;  %6648 = vpush %v4031_v20  ;;  %v3703_v45 = vld [vmem:[#allocation6 + $0x708] sm:$0xff] }
 0x9bc   :  { %v3634_v53 = vadd.f32 %v3626_v30, %v3574_v48  ;;  %v9776_v35 = vmul.f32 %v3653_v5, %v3642_v46  ;;  %v3656_v2 = vmul.f32 %v3653_v5, %v3643_v11  ;;  %v9778_v62 = vmul.f32 %v3653_v5, %v3644_v47  ;;  %v3733_v46 = vld [vmem:[#allocation6 + $0x748] sm:$0xff]  ;;  %v3679_v11 = vld [vmem:[#allocation6 + $0x6f8] sm:$0xff] }
 0x9bd   :  { %11269 = vst [vmem:[#allocation51_spill] sm:$0xff] %v9770_v55  ;;  %v9780_v37 = vmul.f32 %v3653_v5, %v3645_v7  ;;  %v9782_v27 = vmul.f32 %v3653_v5, %v3646_v18  ;;  %v9784_v8 = vmul.f32 %v3653_v5, %v3647_v44  ;;  %v9786_v19 = vmul.f32 %v3653_v5, %v3648_v57  ;;  %v4052_v31 = vpop.permute.xlu1 %4051  ;;  %v4073_v48 = vpop.permute.xlu0 %4072  ;;  %v3732_v55 = vld [vmem:[#allocation6 + $0x740] sm:$0xff] }
 0x9be   :  { %v9788_v63 = vmul.f32 %v3653_v5, %v3649_v51  ;;  %v3664_v41 = vadd.f32 %v3656_v2, %v3604_v36  ;;  %v9790_v13 = vmul.f32 %v3683_v43, %v3672_v14  ;;  %v3686_v24 = vmul.f32 %v3683_v43, %v3673_v22  ;;  %6650 = vpush %v4052_v31  ;;  %v3793_v36 = vld [vmem:[#allocation6 + $0x7c8] sm:$0xff] }
 0x9bf   :  { %v9792_v30 = vmul.f32 %v3683_v43, %v3674_v21  ;;  %v9794_v47 = vmul.f32 %v3683_v43, %v3675_v16  ;;  %v9796_v7 = vmul.f32 %v3683_v43, %v3676_v4  ;;  %v9798_v18 = vmul.f32 %v3683_v43, %v3677_v26  ;;  %6652 = vpush %v4073_v48 }
 0x9c0   :  { %11270 = vst [vmem:[#allocation60_spill] sm:$0xff] %v9788_v63  ;;  %v9800_v20 = vmul.f32 %v3683_v43, %v3678_v9  ;;  %v3694_v44 = vadd.f32 %v3686_v24, %v3634_v53  ;;  %v9803_v57 = vstv %s9742_s12  ;;  %v9806_v51 = vstv %s9764_s13  ;;  %v7200_v24 = vld [vmem:[#allocation6] sm:$0xff] }
 0x9c1   :  { %v3716_v5 = vmul.f32 %v9803_v57, %v3703_v45  ;;  %v3746_v14 = vmul.f32 %v9806_v51, %v3733_v46  ;;  %v9811_v22 = vstv %s9774_s14  ;;  %v9813_v21 = vstv %s6627_s15  ;;  %v4094_v2 = vpop.permute.xlu1 %4093  ;;  %v4115_v16 = vpop.permute.xlu0 %4114  ;;  %v3702_v63 = vld [vmem:[#allocation6 + $0x700] sm:$0xff] }
 0x9c2   :  { %v9815_v4 = vmul.f32 %v3683_v43, %v3679_v11  ;;  %v3776_v26 = vmul.f32 %v9811_v22, %v3763_v40  ;;  %v3806_v53 = vmul.f32 %v9813_v21, %v3793_v36  ;;  %v9819_v9 = vstv %s6629_s16  ;;  %6654 = vpush %v4094_v2  ;;  %v7201_v43 = vld [vmem:[#allocation6 + $0x8] sm:$0xff]  ;;  %v7202_v40 = vld [vmem:[#allocation6 + $0x10] sm:$0xff] }
 0x9c3   :  { %v3724_v31 = vadd.f32 %v3716_v5, %v3664_v41  ;;  %v3754_v48 = vadd.f32 %v3746_v14, %v3694_v44  ;;  %v9822_v45 = vmul.f32 %v7200_v24, %v9819_v9  ;;  %v3603_v46 = vadd.f32 %v9722_v6, %v9674_v25  ;;  %6656 = vpush %v4115_v16  ;;  %v7203_v41 = vld [vmem:[#allocation6 + $0x18] sm:$0xff]  ;;  %v7204_v5 = vld [vmem:[#allocation6 + $0x20] sm:$0xff]  ;;  %v7205_v24 = vld [vmem:[#allocation6 + $0x28] sm:$0xff] }
 0x9c4   :  { %v9827_v11 = vmul.f32 %v7201_v43, %v9819_v9  ;;  %v9830_v36 = vmul.f32 %v7202_v40, %v9819_v9  ;;  %v9833_v44 = vmul.f32 %v7203_v41, %v9819_v9  ;;  %v9836_v14 = vmul.f32 %v7204_v5, %v9819_v9  ;;  %v3762_v25 = vld [vmem:[#allocation6 + $0x780] sm:$0xff] }
 0x9c5   :  { %11271 = vst [vmem:[#allocation66_spill] sm:$0xff] %v9822_v45  ;;  %v3792_v6 = vld [vmem:[#allocation6 + $0x7c0] sm:$0xff]  ;;  %v3784_v2 = vadd.f32 %v3776_v26, %v3724_v31  ;;  %v3814_v16 = vadd.f32 %v3806_v53, %v3754_v48  ;;  %v9839_v43 = vmul.f32 %v7205_v24, %v9819_v9  ;;  %v4136_v45 = vpop.permute.xlu1 %4135  ;;  %v4157_v41 = vpop.permute.xlu0 %4156  ;;  %v3663_v5 = vadd.f32 %v9776_v35, %v3603_v46  ;;  %v2872_v53 = vld [vmem:[#allocation2 + $0x300] sm:$0xff] }
 0x9c6   :  { %11272 = vst [vmem:[#allocation10_spill] sm:$0xff] %v9827_v11  ;;  %11273 = vst [vmem:[#allocation21_spill] sm:$0xff] %v9830_v36  ;;  %v7206_v11 = vld [vmem:[#allocation6 + $0x30] sm:$0xff]  ;;  %v3745_v26 = vmul.f32 %v9806_v51, %v3732_v55  ;;  %v3775_v24 = vmul.f32 %v9811_v22, %v3762_v25  ;;  %v3635_v55 = vadd.f32 %v9753_v28, %v9702_v10  ;;  %v3795_v28 = vld [vmem:[#allocation6 + $0x7d8] sm:$0xff] }
 0x9c7   :  { %11274 = vst [vmem:[#allocation24_spill] sm:$0xff] %v9833_v44  ;;  %11275 = vst [vmem:[#allocation11_spill] sm:$0xff] %v9836_v14  ;;  %v9842_v40 = vmul.f32 %v7206_v11, %v9819_v9  ;;  %v3704_v36 = vld [vmem:[#allocation6 + $0x710] sm:$0xff]  ;;  %v3633_v44 = vadd.f32 %v9749_v1, %v9698_v0  ;;  %v3715_v14 = vmul.f32 %v9803_v57, %v3702_v63 }
 0x9c8   :  { %11276 = vst [vmem:[#allocation12_spill] sm:$0xff] %v9839_v43  ;;  %v3734_v31 = vld [vmem:[#allocation6 + $0x750] sm:$0xff]  ;;  %6658 = vpush %v4136_v45  ;;  %v3805_v11 = vmul.f32 %v9813_v21, %v3792_v6  ;;  %v3605_v43 = vadd.f32 %v9726_v52, %v9680_v23  ;;  %v3717_v63 = vmul.f32 %v9803_v57, %v3704_v36  ;;  %v3705_v45 = vld [vmem:[#allocation6 + $0x718] sm:$0xff] }
 0x9c9   :  { %11277 = vst [vmem:[#allocation34_spill] sm:$0xff] %v9842_v40  ;;  %v3764_v48 = vld [vmem:[#allocation6 + $0x790] sm:$0xff]  ;;  %v3822_v40 = vadd.f32 %v3814_v16, %v3784_v2  ;;  %6660 = vpush %v4157_v41  ;;  %v3693_v1 = vadd.f32 %v9790_v13, %v3633_v44  ;;  %v3723_v35 = vadd.f32 %v3715_v14, %v3663_v5  ;;  %v3735_v23 = vld [vmem:[#allocation6 + $0x758] sm:$0xff]  ;;  %v4178_v16 = vpop.permute.xlu1 %4177  ;;  %v4199_v41 = vpop.permute.xlu0 %4198 }
 0x9ca   :  { %v3794_v0 = vld [vmem:[#allocation6 + $0x7d0] sm:$0xff]  ;;  %v3665_v25 = vadd.f32 %v9778_v62, %v3605_v43  ;;  %v3747_v6 = vmul.f32 %v9806_v51, %v3734_v31  ;;  %v3777_v2 = vmul.f32 %v9811_v22, %v3764_v48  ;;  %v3765_v52 = vld [vmem:[#allocation6 + $0x798] sm:$0xff]  ;;  %v3695_v14 = vadd.f32 %v9792_v30, %v3635_v55  ;;  %6662 = vpush %v4178_v16  ;;  %v3706_v31 = vld [vmem:[#allocation6 + $0x720] sm:$0xff] }
 0x9cb   :  { %v9857_v46 = vadd.f32 %v3822_v40, %v2872_v53  ;;  %v3753_v13 = vadd.f32 %v3745_v26, %v3693_v1  ;;  %v3783_v44 = vadd.f32 %v3775_v24, %v3723_v35  ;;  %v3807_v10 = vmul.f32 %v9813_v21, %v3794_v0  ;;  %6664 = vpush %v4199_v41  ;;  %v3736_v48 = vld [vmem:[#allocation6 + $0x760] sm:$0xff] }
 0x9cc   :  { %v3725_v36 = vadd.f32 %v3717_v63, %v3665_v25  ;;  %v3606_v62 = vadd.f32 %v9731_v61, %v9683_v60  ;;  %v3636_v43 = vadd.f32 %v9756_v3, %v9707_v29  ;;  %v3718_v40 = vmul.f32 %v9803_v57, %v3705_v45  ;;  %v2871_v24 = vld [vmem:[#allocation2 + $0x2f0] sm:$0xff] }
 0x9cd   :  { %v3813_v5 = vadd.f32 %v3805_v11, %v3753_v13  ;;  %v3755_v53 = vadd.f32 %v3747_v6, %v3695_v14  ;;  %v3748_v26 = vmul.f32 %v9806_v51, %v3735_v23  ;;  %v3778_v30 = vmul.f32 %v9811_v22, %v3765_v52  ;;  %v3766_v55 = vld [vmem:[#allocation6 + $0x7a0] sm:$0xff]  ;;  %v3737_v13 = vld [vmem:[#allocation6 + $0x768] sm:$0xff] }
 0x9ce   :  { %v3785_v0 = vadd.f32 %v3777_v2, %v3725_v36  ;;  %v3666_v1 = vadd.f32 %v9780_v37, %v3606_v62  ;;  %v3696_v60 = vadd.f32 %v9794_v47, %v3636_v43  ;;  %v3808_v61 = vmul.f32 %v9813_v21, %v3795_v28  ;;  %v3796_v63 = vld [vmem:[#allocation6 + $0x7e0] sm:$0xff]  ;;  %v4241_v45 = vpop.permute.xlu0 %4240  ;;  %v2874_v36 = vld [vmem:[#allocation2 + $0x320] sm:$0xff] }
 0x9cf   :  { %v3821_v29 = vadd.f32 %v3813_v5, %v3783_v44  ;;  %v3815_v3 = vadd.f32 %v3807_v10, %v3755_v53  ;;  %v3607_v11 = vadd.f32 %v9734_v12, %v9686_v15  ;;  %v3637_v35 = vadd.f32 %v9759_v54, %v9710_v59  ;;  %v2873_v25 = vld [vmem:[#allocation2 + $0x310] sm:$0xff]  ;;  %v4220_v23 = vpop.permute.xlu1 %4219  ;;  %v3707_v12 = vld [vmem:[#allocation6 + $0x728] sm:$0xff] }
 0x9d0   :  { %v3726_v6 = vadd.f32 %v3718_v40, %v3666_v1  ;;  %v3756_v2 = vadd.f32 %v3748_v26, %v3696_v60  ;;  %v3719_v37 = vmul.f32 %v9803_v57, %v3706_v31  ;;  %v3749_v47 = vmul.f32 %v9806_v51, %v3736_v48  ;;  %6666 = vpush %v4220_v23  ;;  %v3767_v10 = vld [vmem:[#allocation6 + $0x7a8] sm:$0xff] }
 0x9d1   :  { %v3829_v52 = vadd.f32 %v3821_v29, %v2871_v24  ;;  %v3823_v16 = vadd.f32 %v3815_v3, %v3785_v0  ;;  %v3667_v41 = vadd.f32 %v9782_v27, %v3607_v11  ;;  %v3697_v15 = vadd.f32 %v9796_v7, %v3637_v35  ;;  %6668 = vpush %v4241_v45  ;;  %v3797_v7 = vld [vmem:[#allocation6 + $0x7e8] sm:$0xff]  ;;  %v3738_v0 = vld [vmem:[#allocation6 + $0x770] sm:$0xff] }
 0x9d2   :  { %v3786_v59 = vadd.f32 %v3778_v30, %v3726_v6  ;;  %v3816_v54 = vadd.f32 %v3808_v61, %v3756_v2  ;;  %v3779_v44 = vmul.f32 %v9811_v22, %v3766_v55  ;;  %v3809_v14 = vmul.f32 %v9813_v21, %v3796_v63  ;;  %v3708_v30 = vld [vmem:[#allocation6 + $0x730] sm:$0xff]  ;;  %v2875_v61 = vld [vmem:[#allocation2 + $0x330] sm:$0xff]  ;;  %v3769_v6 = vld [vmem:[#allocation6 + $0x7b8] sm:$0xff] }
 0x9d3   :  { %6406 = vmatprep.mubr.msk.f32.mxu1 %vm4511_vm7, %v3829_v52  ;;  %v3831_v28 = vadd.f32 %v3823_v16, %v2873_v25  ;;  %v3727_v62 = vadd.f32 %v3719_v37, %v3667_v41  ;;  %v3757_v43 = vadd.f32 %v3749_v47, %v3697_v15  ;;  %v3608_v27 = vadd.f32 %v9737_v17, %v9689_v38  ;;  %v4283_v31 = vpop.permute.xlu0 %4282  ;;  %v3798_v3 = vld [vmem:[#allocation6 + $0x7f0] sm:$0xff] }
 0x9d4   :  { %6407 = vmatmul.mubr.msk.f32.vlgmr.msra.gmra.mxu1 %vm4511_vm7, %v9857_v46  ;;  %v3824_v40 = vadd.f32 %v3816_v54, %v3786_v59  ;;  %v3638_v5 = vadd.f32 %v9762_v34, %v9713_v49  ;;  %v3720_v53 = vmul.f32 %v9803_v57, %v3707_v12  ;;  %v3750_v26 = vmul.f32 %v9806_v51, %v3737_v13  ;;  %v3768_v46 = vld [vmem:[#allocation6 + $0x7b0] sm:$0xff]  ;;  %v4262_v1 = vpop.permute.xlu1 %4261  ;;  %v3799_v12 = vld [vmem:[#allocation6 + $0x7f8] sm:$0xff] }
 0x9d5   :  { %6409 = vmatprep.mubr.msk.f32.mxu1 %vm4511_vm7, %v3831_v28  ;;  %v3787_v48 = vadd.f32 %v3779_v44, %v3727_v62  ;;  %v3817_v24 = vadd.f32 %v3809_v14, %v3757_v43  ;;  %v3668_v38 = vadd.f32 %v9784_v8, %v3608_v27  ;;  %v3780_v17 = vmul.f32 %v9811_v22, %v3767_v10  ;;  %v11278_v41 = vld [vmem:[#allocation51_spill] sm:$0xff]  ;;  %v11279_v28 = vld [vmem:[#allocation60_spill] sm:$0xff] }
 0x9d6   :  { %v3832_v60 = vadd.f32 %v3824_v40, %v2874_v36  ;;  %v3698_v49 = vadd.f32 %v9798_v18, %v3638_v5  ;;  %v3810_v34 = vmul.f32 %v9813_v21, %v3797_v7  ;;  %v3609_v29 = vadd.f32 %v9740_v56, %v9692_v32  ;;  %6670 = vpush %v4262_v1  ;;  %v3709_v32 = vld [vmem:[#allocation6 + $0x738] sm:$0xff]  ;;  %v2876_v13 = vld [vmem:[#allocation2 + $0x340] sm:$0xff] }
 0x9d7   :  { %v3825_v11 = vadd.f32 %v3817_v24, %v3787_v48  ;;  %v3728_v35 = vadd.f32 %v3720_v53, %v3668_v38  ;;  %v3639_v8 = vadd.f32 %v9767_v39, %v9716_v50  ;;  %v3721_v55 = vmul.f32 %v9803_v57, %v3708_v30  ;;  %6672 = vpush %v4283_v31  ;;  %v3739_v56 = vld [vmem:[#allocation6 + $0x778] sm:$0xff]  ;;  %v4325_v2 = vpop.permute.xlu0 %4324  ;;  %v7208_v53 = vld [vmem:[#allocation6 + $0x40] sm:$0xff]  ;;  %v7209_v30 = vld [vmem:[#allocation6 + $0x48] sm:$0xff] }
 0x9d8   :  { %6410 = vmatmul.mubr.msk.f32.gmra.mxu1 %vm4511_vm7, %v3832_v60  ;;  %v3758_v63 = vadd.f32 %v3750_v26, %v3698_v49  ;;  %v3669_v18 = vadd.f32 %v9786_v19, %v3609_v29  ;;  %v3751_v45 = vmul.f32 %v9806_v51, %v3738_v0  ;;  %v3781_v25 = vmul.f32 %v9811_v22, %v3768_v46  ;;  %v4304_v23 = vpop.permute.xlu1 %4303  ;;  %v7211_v24 = vld [vmem:[#allocation6 + $0x58] sm:$0xff]  ;;  %v7212_v0 = vld [vmem:[#allocation6 + $0x60] sm:$0xff]  ;;  %v2878_v49 = vld [vmem:[#allocation2 + $0x360] sm:$0xff] }
 0x9d9   :  { %v3833_v37 = vadd.f32 %v3825_v11, %v2875_v61  ;;  %v3788_v47 = vadd.f32 %v3780_v17, %v3728_v35  ;;  %v3699_v50 = vadd.f32 %v9800_v20, %v3639_v8  ;;  %v3811_v39 = vmul.f32 %v9813_v21, %v3798_v3  ;;  %6674 = vpush %v4304_v23  ;;  %v7214_v3 = vld [vmem:[#allocation6 + $0x70] sm:$0xff]  ;;  %v7215_v35 = vld [vmem:[#allocation6 + $0x78] sm:$0xff] }
 0x9da   :  { %v3818_v52 = vadd.f32 %v3810_v34, %v3758_v63  ;;  %v3729_v16 = vadd.f32 %v3721_v55, %v3669_v18  ;;  %v3610_v19 = vadd.f32 %v9745_v58, %v9695_v42  ;;  %v3640_v15 = vadd.f32 %v11278_v41, %v9719_v33  ;;  %6676 = vpush %v4325_v2  ;;  %v7207_v58 = vld [vmem:[#allocation6 + $0x38] sm:$0xff]  ;;  %v7213_v34 = vld [vmem:[#allocation6 + $0x68] sm:$0xff]  ;;  %v7216_v63 = vld [vmem:[#allocation6 + $0x80] sm:$0xff] }
 0x9db   :  { %6412 = vmatprep.mubr.msk.f32.mxu1 %vm4511_vm7, %v3833_v37  ;;  %v3759_v59 = vadd.f32 %v3751_v45, %v3699_v50  ;;  %v3722_v54 = vmul.f32 %v9803_v57, %v3709_v32  ;;  %v3752_v20 = vmul.f32 %v9806_v51, %v3739_v56  ;;  %v3782_v44 = vmul.f32 %v9811_v22, %v3769_v6  ;;  %v4367_v33 = vpop.permute.xlu0 %4366  ;;  %s6631_s17 = spop %6630  ;;  %v2877_v22 = vld [vmem:[#allocation2 + $0x350] sm:$0xff]  ;;  %v7217_v45 = vld [vmem:[#allocation6 + $0x88] sm:$0xff]  ;;  %v7218_v32 = vld [vmem:[#allocation6 + $0x90] sm:$0xff] }
 0x9dc   :  { %v3826_v14 = vadd.f32 %v3818_v52, %v3788_v47  ;;  %v3789_v10 = vadd.f32 %v3781_v25, %v3729_v16  ;;  %v3670_v36 = vadd.f32 %v11279_v28, %v3610_v19  ;;  %v3700_v42 = vadd.f32 %v9815_v4, %v3640_v15  ;;  %s6633_s18 = spop %6632  ;;  %v4346_v5 = vpop.permute.xlu1 %4345  ;;  %v7219_v2 = vld [vmem:[#allocation6 + $0x98] sm:$0xff]  ;;  %v7220_v47 = vld [vmem:[#allocation6 + $0xa0] sm:$0xff]  ;;  %v7222_v52 = vld [vmem:[#allocation6 + $0xb0] sm:$0xff] }
 0x9dd   :  { %v9920_v62 = vmul.f32 %v7207_v58, %v9819_v9  ;;  %v3819_v43 = vadd.f32 %v3811_v39, %v3759_v59  ;;  %v3812_v57 = vmul.f32 %v9813_v21, %v3799_v12  ;;  %v3852_v27 = vstv %s6631_s17  ;;  %6678 = vpush %v4346_v5  ;;  %v7210_v9 = vld [vmem:[#allocation6 + $0x50] sm:$0xff]  ;;  %v7221_v39 = vld [vmem:[#allocation6 + $0xa8] sm:$0xff]  ;;  %v7223_v41 = vld [vmem:[#allocation6 + $0xb8] sm:$0xff] }
 0x9de   :  { %v3834_v51 = vadd.f32 %v3826_v14, %v2876_v13  ;;  %v3730_v7 = vadd.f32 %v3722_v54, %v3670_v36  ;;  %v3760_v40 = vadd.f32 %v3752_v20, %v3700_v42  ;;  %v9923_v26 = vmul.f32 %v7208_v53, %v3852_v27  ;;  %6680 = vpush %v4367_v33  ;;  %v11280_v12 = vld [vmem:[#allocation66_spill] sm:$0xff]  ;;  %v11282_v20 = vld [vmem:[#allocation21_spill] sm:$0xff]  ;;  %v11283_v14 = vld [vmem:[#allocation24_spill] sm:$0xff] }
 0x9df   :  { %v3827_v4 = vadd.f32 %v3819_v43, %v3789_v10  ;;  %v9925_v31 = vmul.f32 %v7209_v30, %v3852_v27  ;;  %v9927_v48 = vmul.f32 %v7210_v9, %v3852_v27  ;;  %v9929_v21 = vmul.f32 %v7211_v24, %v3852_v27  ;;  %v4409_v60 = vpop.permute.xlu0 %4408  ;;  %s9940_s19 = spop %6634  ;;  %v11281_v59 = vld [vmem:[#allocation10_spill] sm:$0xff]  ;;  %v11284_v28 = vld [vmem:[#allocation11_spill] sm:$0xff]  ;;  %v11285_v42 = vld [vmem:[#allocation12_spill] sm:$0xff] }
 0x9e0   :  { %6413 = vmatmul.mubr.msk.f32.gmra.mxu1 %vm4511_vm7, %v3834_v51  ;;  %v3790_v38 = vadd.f32 %v3782_v44, %v3730_v7  ;;  %v3820_v17 = vadd.f32 %v3812_v57, %v3760_v40  ;;  %v9932_v46 = vmul.f32 %v7212_v0, %v3852_v27  ;;  %v3865_v1 = vstv %s6633_s18  ;;  %v4388_v6 = vpop.permute.xlu1 %4387  ;;  %s6637_s20 = spop %6636  ;;  %v11286_v43 = vld [vmem:[#allocation34_spill] sm:$0xff]  ;;  %v7224_v40 = vld [vmem:[#allocation6 + $0xc0] sm:$0xff]  ;;  %v7226_v30 = vld [vmem:[#allocation6 + $0xd0] sm:$0xff] }
 0x9e1   :  { %v3835_v61 = vadd.f32 %v3827_v4, %v2877_v22  ;;  %v9934_v29 = vmul.f32 %v7213_v34, %v3852_v27  ;;  %v9936_v11 = vmul.f32 %v7214_v3, %v3852_v27  ;;  %v9938_v8 = vmul.f32 %v7215_v35, %v3852_v27  ;;  %6682 = vpush %v4388_v6  ;;  %v7225_v53 = vld [vmem:[#allocation6 + $0xc8] sm:$0xff]  ;;  %v7227_v24 = vld [vmem:[#allocation6 + $0xd8] sm:$0xff]  ;;  %v7232_v6 = vld [vmem:[#allocation6 + $0x100] sm:$0xff] }
 0x9e2   :  { %v3828_v55 = vadd.f32 %v3820_v17, %v3790_v38  ;;  %v3867_v18 = vmul.f32 %v7216_v63, %v3865_v1  ;;  %v3868_v25 = vmul.f32 %v7217_v45, %v3865_v1  ;;  %v3869_v56 = vmul.f32 %v7218_v32, %v3865_v1  ;;  %6684 = vpush %v4409_v60  ;;  %v7228_v17 = vld [vmem:[#allocation6 + $0xe0] sm:$0xff] }
 0x9e3   :  { %6415 = vmatprep.mubr.msk.f32.mxu1 %vm4511_vm7, %v3835_v61  ;;  %v3870_v37 = vmul.f32 %v7219_v2, %v3865_v1  ;;  %v3871_v50 = vmul.f32 %v7220_v47, %v3865_v1  ;;  %v3872_v23 = vmul.f32 %v7221_v39, %v3865_v1  ;;  %v3873_v16 = vmul.f32 %v7222_v52, %v3865_v1  ;;  %v4451_v58 = vpop.permute.xlu0 %4450  ;;  %s9957_s21 = spop %6638  ;;  %v7230_v61 = vld [vmem:[#allocation6 + $0xf0] sm:$0xff]  ;;  %v7233_v2 = vld [vmem:[#allocation6 + $0x108] sm:$0xff]  ;;  %v7235_v47 = vld [vmem:[#allocation6 + $0x118] sm:$0xff] }
 0x9e4   :  { %v3836_v19 = vadd.f32 %v3828_v55, %v2878_v49  ;;  %v3874_v15 = vmul.f32 %v7223_v41, %v3865_v1  ;;  %v9944_v13 = vadd.f32 %v3867_v18, %v11280_v12  ;;  %v9947_v54 = vadd.f32 %v3868_v25, %v11281_v59  ;;  %v4430_v7 = vpop.permute.xlu1 %4429  ;;  %v7229_v1 = vld [vmem:[#allocation6 + $0xe8] sm:$0xff]  ;;  %v7231_v49 = vld [vmem:[#allocation6 + $0xf8] sm:$0xff]  ;;  %s9963_s10 = spop %6640 }
 0x9e5   :  { %v3877_v44 = vadd.f32 %v3869_v56, %v11282_v20  ;;  %v3878_v10 = vadd.f32 %v3870_v37, %v11283_v14  ;;  %v3879_v36 = vadd.f32 %v3871_v50, %v11284_v28  ;;  %v3880_v33 = vadd.f32 %v3872_v23, %v11285_v42  ;;  %6686 = vpush %v4430_v7  ;;  %v7234_v37 = vld [vmem:[#allocation6 + $0x110] sm:$0xff]  ;;  %v7236_v50 = vld [vmem:[#allocation6 + $0x120] sm:$0xff] }
 0x9e6   :  { %6416 = vmatmul.mubr.msk.f32.gmra.mxu1 %vm4511_vm7, %v3836_v19  ;;  %v3881_v57 = vadd.f32 %v3873_v16, %v11286_v43  ;;  %v3882_v27 = vadd.f32 %v3874_v15, %v9920_v62  ;;  %v3886_v51 = vstv %s9940_s19  ;;  %v3907_v22 = vstv %s6637_s20  ;;  %6688 = vpush %v4451_v58  ;;  %s11293_s20 = smov 32  }
 0x9e7   :  { %v3888_v5 = vmul.f32 %v7224_v40, %v3886_v51  ;;  %v3889_v4 = vmul.f32 %v7225_v53, %v3886_v51  ;;  %v3890_v9 = vmul.f32 %v7226_v30, %v3886_v51  ;;  %v3891_v38 = vmul.f32 %v7227_v24, %v3886_v51  ;;  %s6643_s0 = spop %6642  ;;  %v7243_v53 = vld [vmem:[#allocation6 + $0x158] sm:$0xff] }
 0x9e8   :  { %v3892_v0 = vmul.f32 %v7228_v17, %v3886_v51  ;;  %v3893_v60 = vmul.f32 %v7229_v1, %v3886_v51  ;;  %v3894_v62 = vmul.f32 %v7230_v61, %v3886_v51  ;;  %v3895_v34 = vmul.f32 %v7231_v49, %v3886_v51  ;;  %v4472_v56 = vpop.permute.xlu1 %4471  ;;  %s6645_s22 = spop %6644  ;;  %v7240_v51 = vld [vmem:[#allocation6 + $0x140] sm:$0xff] }
 0x9e9   :  { %v3896_v3 = vadd.f32 %v3888_v5, %v9923_v26  ;;  %v3897_v35 = vadd.f32 %v3889_v4, %v9925_v31  ;;  %v3898_v55 = vadd.f32 %v3890_v9, %v9927_v48  ;;  %v3899_v63 = vadd.f32 %v3891_v38, %v9929_v21  ;;  %6690 = vpush %v4472_v56  ;;  %v7242_v5 = vld [vmem:[#allocation6 + $0x150] sm:$0xff]  ;;  %v7247_v4 = vld [vmem:[#allocation6 + $0x178] sm:$0xff] }
 0x9ea   :  { %v3900_v18 = vadd.f32 %v3892_v0, %v9932_v46  ;;  %v3901_v45 = vadd.f32 %v3893_v60, %v9934_v29  ;;  %v3902_v25 = vadd.f32 %v3894_v62, %v9936_v11  ;;  %v3903_v32 = vadd.f32 %v3895_v34, %v9938_v8  ;;  %v7237_v46 = vld [vmem:[#allocation6 + $0x128] sm:$0xff]  ;;  %v7238_v11 = vld [vmem:[#allocation6 + $0x130] sm:$0xff]  ;;  %v7239_v8 = vld [vmem:[#allocation6 + $0x138] sm:$0xff] }
 0x9eb   :  { %v3909_v26 = vmul.f32 %v7232_v6, %v3907_v22  ;;  %v3910_v31 = vmul.f32 %v7233_v2, %v3907_v22  ;;  %v3911_v48 = vmul.f32 %v7234_v37, %v3907_v22  ;;  %v3912_v21 = vmul.f32 %v7235_v47, %v3907_v22  ;;  %v7248_v62 = vld [vmem:[#allocation6 + $0x180] sm:$0xff]  ;;  %v7249_v34 = vld [vmem:[#allocation6 + $0x188] sm:$0xff]  ;;  %v7250_v6 = vld [vmem:[#allocation6 + $0x190] sm:$0xff]  ;;  %s9981_s23 = spop %6646 }
 0x9ec   :  { %v3913_v39 = vmul.f32 %v7236_v50, %v3907_v22  ;;  %v3914_v29 = vmul.f32 %v7237_v46, %v3907_v22  ;;  %v3915_v23 = vmul.f32 %v7238_v11, %v3907_v22  ;;  %v3916_v52 = vmul.f32 %v7239_v8, %v3907_v22  ;;  %v7241_v22 = vld [vmem:[#allocation6 + $0x148] sm:$0xff]  ;;  %v7251_v2 = vld [vmem:[#allocation6 + $0x198] sm:$0xff]  ;;  %v7252_v37 = vld [vmem:[#allocation6 + $0x1a0] sm:$0xff]  ;;  %s9987_s24 = spop %6648 }
 0x9ed   :  { %v3917_v16 = vadd.f32 %v3909_v26, %v9944_v13  ;;  %v3918_v19 = vadd.f32 %v3910_v31, %v9947_v54  ;;  %v3919_v41 = vadd.f32 %v3911_v48, %v3877_v44  ;;  %v3920_v15 = vadd.f32 %v3912_v21, %v3878_v10  ;;  %v7244_v44 = vld [vmem:[#allocation6 + $0x160] sm:$0xff]  ;;  %v7253_v47 = vld [vmem:[#allocation6 + $0x1a8] sm:$0xff] }
 0x9ee   :  { %v3921_v12 = vadd.f32 %v3913_v39, %v3879_v36  ;;  %v3922_v59 = vadd.f32 %v3914_v29, %v3880_v33  ;;  %v3923_v20 = vadd.f32 %v3915_v23, %v3881_v57  ;;  %v3924_v14 = vadd.f32 %v3916_v52, %v3882_v27  ;;  %v7245_v36 = vld [vmem:[#allocation6 + $0x168] sm:$0xff]  ;;  %v7246_v57 = vld [vmem:[#allocation6 + $0x170] sm:$0xff]  ;;  %v7256_v11 = vld [vmem:[#allocation6 + $0x1c0] sm:$0xff] }
 0x9ef   :  { %v3928_v28 = vstv %s9957_s21  ;;  %v3949_v42 = vstv %s9963_s10  ;;  %v9973_v58 = vstv %s6643_s0  ;;  %v9975_v43 = vstv %s6645_s22  ;;  %v7257_v8 = vld [vmem:[#allocation6 + $0x1c8] sm:$0xff]  ;;  %s6651_s25 = spop %6650 }
 0x9f0   :  { %v3930_v7 = vmul.f32 %v7240_v51, %v3928_v28  ;;  %v3931_v40 = vmul.f32 %v7241_v22, %v3928_v28  ;;  %v3932_v13 = vmul.f32 %v7242_v5, %v3928_v28  ;;  %v3933_v54 = vmul.f32 %v7243_v53, %v3928_v28  ;;  %s6653_s26 = spop %6652 }
 0x9f1   :  { %v3934_v10 = vmul.f32 %v7244_v44, %v3928_v28  ;;  %v3935_v33 = vmul.f32 %v7245_v36, %v3928_v28  ;;  %v3936_v27 = vmul.f32 %v7246_v57, %v3928_v28  ;;  %v3937_v30 = vmul.f32 %v7247_v4, %v3928_v28  ;;  %v7258_v28 = vld [vmem:[#allocation6 + $0x1d0] sm:$0xff]  ;;  %v7264_v36 = vld [vmem:[#allocation6 + $0x200] sm:$0xff]  ;;  %v7265_v57 = vld [vmem:[#allocation6 + $0x208] sm:$0xff] }
 0x9f2   :  { %v3938_v9 = vadd.f32 %v3930_v7, %v3896_v3  ;;  %v3939_v24 = vadd.f32 %v3931_v40, %v3897_v35  ;;  %v3940_v38 = vadd.f32 %v3932_v13, %v3898_v55  ;;  %v3941_v17 = vadd.f32 %v3933_v54, %v3899_v63  ;;  %v7254_v3 = vld [vmem:[#allocation6 + $0x1b0] sm:$0xff]  ;;  %v7255_v55 = vld [vmem:[#allocation6 + $0x1b8] sm:$0xff] }
 0x9f3   :  { %v3942_v0 = vadd.f32 %v3934_v10, %v3900_v18  ;;  %v3943_v1 = vadd.f32 %v3935_v33, %v3901_v45  ;;  %v3944_v60 = vadd.f32 %v3936_v27, %v3902_v25  ;;  %v3945_v61 = vadd.f32 %v3937_v30, %v3903_v32  ;;  %v7259_v7 = vld [vmem:[#allocation6 + $0x1d8] sm:$0xff]  ;;  %v7266_v4 = vld [vmem:[#allocation6 + $0x210] sm:$0xff]  ;;  %s10007_s27 = spop %6654 }
 0x9f4   :  { %v3951_v49 = vmul.f32 %v7248_v62, %v3949_v42  ;;  %v3952_v56 = vmul.f32 %v7249_v34, %v3949_v42  ;;  %v3953_v26 = vmul.f32 %v7250_v6, %v3949_v42  ;;  %v3954_v31 = vmul.f32 %v7251_v2, %v3949_v42  ;;  %v7267_v30 = vld [vmem:[#allocation6 + $0x218] sm:$0xff]  ;;  %s10013_s28 = spop %6656 }
 0x9f5   :  { %v3955_v48 = vmul.f32 %v7252_v37, %v3949_v42  ;;  %v3956_v21 = vmul.f32 %v7253_v47, %v3949_v42  ;;  %v3957_v35 = vmul.f32 %v7254_v3, %v3949_v42  ;;  %v3958_v63 = vmul.f32 %v7255_v55, %v3949_v42 }
 0x9f6   :  { %v3959_v18 = vadd.f32 %v3951_v49, %v3917_v16  ;;  %v3960_v45 = vadd.f32 %v3952_v56, %v3918_v19  ;;  %v3961_v25 = vadd.f32 %v3953_v26, %v3919_v41  ;;  %v3962_v32 = vadd.f32 %v3954_v31, %v3920_v15  ;;  %v7260_v16 = vld [vmem:[#allocation6 + $0x1e0] sm:$0xff]  ;;  %v7261_v41 = vld [vmem:[#allocation6 + $0x1e8] sm:$0xff] }
 0x9f7   :  { %v3963_v50 = vadd.f32 %v3955_v48, %v3921_v12  ;;  %v3964_v39 = vadd.f32 %v3956_v21, %v3922_v59  ;;  %v3965_v46 = vadd.f32 %v3957_v35, %v3923_v20  ;;  %v3966_v29 = vadd.f32 %v3958_v63, %v3924_v14  ;;  %v7262_v12 = vld [vmem:[#allocation6 + $0x1f0] sm:$0xff]  ;;  %v7263_v20 = vld [vmem:[#allocation6 + $0x1f8] sm:$0xff]  ;;  %v7272_v35 = vld [vmem:[#allocation6 + $0x240] sm:$0xff] }
 0x9f8   :  { %v3972_v23 = vmul.f32 %v7256_v11, %v9973_v58  ;;  %v3973_v52 = vmul.f32 %v7257_v8, %v9973_v58  ;;  %v3974_v51 = vmul.f32 %v7258_v28, %v9973_v58  ;;  %v3975_v42 = vmul.f32 %v7259_v7, %v9973_v58  ;;  %v7273_v63 = vld [vmem:[#allocation6 + $0x248] sm:$0xff]  ;;  %v7279_v8 = vld [vmem:[#allocation6 + $0x278] sm:$0xff] }
 0x9f9   :  { %v3976_v19 = vmul.f32 %v7260_v16, %v9973_v58  ;;  %v3977_v15 = vmul.f32 %v7261_v41, %v9973_v58  ;;  %v3978_v59 = vmul.f32 %v7262_v12, %v9973_v58  ;;  %v3979_v14 = vmul.f32 %v7263_v20, %v9973_v58  ;;  %v7280_v12 = vld [vmem:[#allocation6 + $0x280] sm:$0xff]  ;;  %v7281_v20 = vld [vmem:[#allocation6 + $0x288] sm:$0xff]  ;;  %s6659_s29 = spop %6658 }
 0x9fa   :  { %v3980_v22 = vadd.f32 %v3972_v23, %v3938_v9  ;;  %v3981_v40 = vadd.f32 %v3973_v52, %v3939_v24  ;;  %v3982_v5 = vadd.f32 %v3974_v51, %v3940_v38  ;;  %v3983_v13 = vadd.f32 %v3975_v42, %v3941_v17  ;;  %v7268_v24 = vld [vmem:[#allocation6 + $0x220] sm:$0xff]  ;;  %v7269_v17 = vld [vmem:[#allocation6 + $0x228] sm:$0xff]  ;;  %s6661_s30 = spop %6660 }
 0x9fb   :  { %v3984_v53 = vadd.f32 %v3976_v19, %v3942_v0  ;;  %v3985_v54 = vadd.f32 %v3977_v15, %v3943_v1  ;;  %v3986_v44 = vadd.f32 %v3978_v59, %v3944_v60  ;;  %v3987_v10 = vadd.f32 %v3979_v14, %v3945_v61  ;;  %v7270_v1 = vld [vmem:[#allocation6 + $0x230] sm:$0xff]  ;;  %v7271_v61 = vld [vmem:[#allocation6 + $0x238] sm:$0xff]  ;;  %s10033_s2 = spop %6662 }
 0x9fc   :  { %v3993_v33 = vmul.f32 %v7264_v36, %v9975_v43  ;;  %v3994_v27 = vmul.f32 %v7265_v57, %v9975_v43  ;;  %v3995_v58 = vmul.f32 %v7266_v4, %v9975_v43  ;;  %v3996_v9 = vmul.f32 %v7267_v30, %v9975_v43  ;;  %v7282_v36 = vld [vmem:[#allocation6 + $0x290] sm:$0xff]  ;;  %v7283_v57 = vld [vmem:[#allocation6 + $0x298] sm:$0xff]  ;;  %v7284_v4 = vld [vmem:[#allocation6 + $0x2a0] sm:$0xff]  ;;  %s10039_s5 = spop %6664 }
 0x9fd   :  { %v3997_v38 = vmul.f32 %v7268_v24, %v9975_v43  ;;  %v3998_v0 = vmul.f32 %v7269_v17, %v9975_v43  ;;  %v3999_v60 = vmul.f32 %v7270_v1, %v9975_v43  ;;  %v4000_v62 = vmul.f32 %v7271_v61, %v9975_v43  ;;  %v7274_v43 = vld [vmem:[#allocation6 + $0x250] sm:$0xff]  ;;  %v7285_v30 = vld [vmem:[#allocation6 + $0x2a8] sm:$0xff]  ;;  %v7288_v1 = vld [vmem:[#allocation6 + $0x2c0] sm:$0xff] }
 0x9fe   :  { %v4001_v49 = vadd.f32 %v3993_v33, %v3959_v18  ;;  %v4002_v34 = vadd.f32 %v3994_v27, %v3960_v45  ;;  %v4003_v56 = vadd.f32 %v3995_v58, %v3961_v25  ;;  %v4004_v6 = vadd.f32 %v3996_v9, %v3962_v32  ;;  %v7275_v18 = vld [vmem:[#allocation6 + $0x258] sm:$0xff]  ;;  %v7276_v25 = vld [vmem:[#allocation6 + $0x260] sm:$0xff]  ;;  %v7289_v61 = vld [vmem:[#allocation6 + $0x2c8] sm:$0xff] }
 0x9ff   :  { %v4005_v26 = vadd.f32 %v3997_v38, %v3963_v50  ;;  %v4006_v2 = vadd.f32 %v3998_v0, %v3964_v39  ;;  %v4007_v31 = vadd.f32 %v3999_v60, %v3965_v46  ;;  %v4008_v37 = vadd.f32 %v4000_v62, %v3966_v29  ;;  %v7277_v50 = vld [vmem:[#allocation6 + $0x268] sm:$0xff]  ;;  %v7278_v46 = vld [vmem:[#allocation6 + $0x270] sm:$0xff] }
 0xa00   :  { %v4012_v48 = vstv %s9981_s23  ;;  %v4033_v47 = vstv %s9987_s24  ;;  %v9999_v21 = vstv %s6651_s25  ;;  %v10001_v3 = vstv %s6653_s26 }
 0xa01   :  { %v4014_v55 = vmul.f32 %v7272_v35, %v4012_v48  ;;  %v4015_v11 = vmul.f32 %v7273_v63, %v4012_v48  ;;  %v4016_v23 = vmul.f32 %v7274_v43, %v4012_v48  ;;  %v4017_v45 = vmul.f32 %v7275_v18, %v4012_v48  ;;  %s6667_s6 = spop %6666 }
 0xa02   :  { %v4018_v32 = vmul.f32 %v7276_v25, %v4012_v48  ;;  %v4019_v39 = vmul.f32 %v7277_v50, %v4012_v48  ;;  %v4020_v29 = vmul.f32 %v7278_v46, %v4012_v48  ;;  %v4021_v52 = vmul.f32 %v7279_v8, %v4012_v48  ;;  %v7290_v48 = vld [vmem:[#allocation6 + $0x2d0] sm:$0xff]  ;;  %v7296_v50 = vld [vmem:[#allocation6 + $0x300] sm:$0xff]  ;;  %v7297_v46 = vld [vmem:[#allocation6 + $0x308] sm:$0xff]  ;;  %s6669_s1 = spop %6668 }
 0xa03   :  { %v4022_v28 = vadd.f32 %v4014_v55, %v3980_v22  ;;  %v4023_v51 = vadd.f32 %v4015_v11, %v3981_v40  ;;  %v4024_v7 = vadd.f32 %v4016_v23, %v3982_v5  ;;  %v4025_v42 = vadd.f32 %v4017_v45, %v3983_v13  ;;  %v7286_v22 = vld [vmem:[#allocation6 + $0x2b0] sm:$0xff]  ;;  %v7287_v5 = vld [vmem:[#allocation6 + $0x2b8] sm:$0xff] }
 0xa04   :  { %v4026_v16 = vadd.f32 %v4018_v32, %v3984_v53  ;;  %v4027_v19 = vadd.f32 %v4019_v39, %v3985_v54  ;;  %v4028_v41 = vadd.f32 %v4020_v29, %v3986_v44  ;;  %v4029_v15 = vadd.f32 %v4021_v52, %v3987_v10  ;;  %v7291_v55 = vld [vmem:[#allocation6 + $0x2d8] sm:$0xff]  ;;  %v7298_v8 = vld [vmem:[#allocation6 + $0x310] sm:$0xff] }
 0xa05   :  { %v4035_v59 = vmul.f32 %v7280_v12, %v4033_v47  ;;  %v4036_v14 = vmul.f32 %v7281_v20, %v4033_v47  ;;  %v4037_v33 = vmul.f32 %v7282_v36, %v4033_v47  ;;  %v4038_v27 = vmul.f32 %v7283_v57, %v4033_v47  ;;  %v7299_v52 = vld [vmem:[#allocation6 + $0x318] sm:$0xff] }
 0xa06   :  { %v4039_v58 = vmul.f32 %v7284_v4, %v4033_v47  ;;  %v4040_v9 = vmul.f32 %v7285_v30, %v4033_v47  ;;  %v4041_v40 = vmul.f32 %v7286_v22, %v4033_v47  ;;  %v4042_v13 = vmul.f32 %v7287_v5, %v4033_v47 }
 0xa07   :  { %v4043_v53 = vadd.f32 %v4035_v59, %v4001_v49  ;;  %v4044_v54 = vadd.f32 %v4036_v14, %v4002_v34  ;;  %v4045_v44 = vadd.f32 %v4037_v33, %v4003_v56  ;;  %v4046_v10 = vadd.f32 %v4038_v27, %v4004_v6  ;;  %v7292_v49 = vld [vmem:[#allocation6 + $0x2e0] sm:$0xff]  ;;  %v7293_v56 = vld [vmem:[#allocation6 + $0x2e8] sm:$0xff]  ;;  %s10059_s7 = spop %6670 }
 0xa08   :  { %v4047_v24 = vadd.f32 %v4039_v58, %v4005_v26  ;;  %v4048_v38 = vadd.f32 %v4040_v9, %v4006_v2  ;;  %v4049_v17 = vadd.f32 %v4041_v40, %v4007_v31  ;;  %v4050_v0 = vadd.f32 %v4042_v13, %v4008_v37  ;;  %v7294_v26 = vld [vmem:[#allocation6 + $0x2f0] sm:$0xff]  ;;  %v7295_v31 = vld [vmem:[#allocation6 + $0x2f8] sm:$0xff]  ;;  %v7304_v40 = vld [vmem:[#allocation6 + $0x340] sm:$0xff]  ;;  %s10065_s8 = spop %6672 }
 0xa09   :  { %v4056_v60 = vmul.f32 %v7288_v1, %v9999_v21  ;;  %v4057_v62 = vmul.f32 %v7289_v61, %v9999_v21  ;;  %v4058_v35 = vmul.f32 %v7290_v48, %v9999_v21  ;;  %v4059_v47 = vmul.f32 %v7291_v55, %v9999_v21  ;;  %v7305_v13 = vld [vmem:[#allocation6 + $0x348] sm:$0xff]  ;;  %v7311_v61 = vld [vmem:[#allocation6 + $0x378] sm:$0xff] }
 0xa0a   :  { %v4060_v34 = vmul.f32 %v7292_v49, %v9999_v21  ;;  %v4061_v6 = vmul.f32 %v7293_v56, %v9999_v21  ;;  %v4062_v2 = vmul.f32 %v7294_v26, %v9999_v21  ;;  %v4063_v37 = vmul.f32 %v7295_v31, %v9999_v21  ;;  %v7312_v26 = vld [vmem:[#allocation6 + $0x380] sm:$0xff]  ;;  %v7313_v31 = vld [vmem:[#allocation6 + $0x388] sm:$0xff]  ;;  %s6675_s9 = spop %6674 }
 0xa0b   :  { %v4064_v63 = vadd.f32 %v4056_v60, %v4022_v28  ;;  %v4065_v11 = vadd.f32 %v4057_v62, %v4023_v51  ;;  %v4066_v43 = vadd.f32 %v4058_v35, %v4024_v7  ;;  %v4067_v23 = vadd.f32 %v4059_v47, %v4025_v42  ;;  %v7300_v51 = vld [vmem:[#allocation6 + $0x320] sm:$0xff]  ;;  %v7301_v42 = vld [vmem:[#allocation6 + $0x328] sm:$0xff]  ;;  %s6677_s12 = spop %6676 }
 0xa0c   :  { %v4068_v18 = vadd.f32 %v4060_v34, %v4026_v16  ;;  %v4069_v45 = vadd.f32 %v4061_v6, %v4027_v19  ;;  %v4070_v25 = vadd.f32 %v4062_v2, %v4028_v41  ;;  %v4071_v32 = vadd.f32 %v4063_v37, %v4029_v15  ;;  %v7302_v19 = vld [vmem:[#allocation6 + $0x330] sm:$0xff]  ;;  %v7303_v15 = vld [vmem:[#allocation6 + $0x338] sm:$0xff] }
 0xa0d   :  { %v4077_v39 = vmul.f32 %v7296_v50, %v10001_v3  ;;  %v4078_v29 = vmul.f32 %v7297_v46, %v10001_v3  ;;  %v4079_v21 = vmul.f32 %v7298_v8, %v10001_v3  ;;  %v4080_v28 = vmul.f32 %v7299_v52, %v10001_v3  ;;  %v7314_v50 = vld [vmem:[#allocation6 + $0x390] sm:$0xff]  ;;  %v7315_v46 = vld [vmem:[#allocation6 + $0x398] sm:$0xff]  ;;  %v7316_v8 = vld [vmem:[#allocation6 + $0x3a0] sm:$0xff] }
 0xa0e   :  { %v4081_v7 = vmul.f32 %v7300_v51, %v10001_v3  ;;  %v4082_v16 = vmul.f32 %v7301_v42, %v10001_v3  ;;  %v4083_v41 = vmul.f32 %v7302_v19, %v10001_v3  ;;  %v4084_v12 = vmul.f32 %v7303_v15, %v10001_v3  ;;  %v7306_v3 = vld [vmem:[#allocation6 + $0x350] sm:$0xff]  ;;  %v7317_v52 = vld [vmem:[#allocation6 + $0x3a8] sm:$0xff]  ;;  %v7320_v19 = vld [vmem:[#allocation6 + $0x3c0] sm:$0xff]  ;;  %s10089_s13 = spop %6678 }
 0xa0f   :  { %v4085_v59 = vadd.f32 %v4077_v39, %v4043_v53  ;;  %v4086_v20 = vadd.f32 %v4078_v29, %v4044_v54  ;;  %v4087_v14 = vadd.f32 %v4079_v21, %v4045_v44  ;;  %v4088_v36 = vadd.f32 %v4080_v28, %v4046_v10  ;;  %v7307_v53 = vld [vmem:[#allocation6 + $0x358] sm:$0xff]  ;;  %v7308_v44 = vld [vmem:[#allocation6 + $0x360] sm:$0xff]  ;;  %v7321_v15 = vld [vmem:[#allocation6 + $0x3c8] sm:$0xff]  ;;  %s10103_s14 = spop %6680 }
 0xa10   :  { %v4089_v33 = vadd.f32 %v4081_v7, %v4047_v24  ;;  %v4090_v57 = vadd.f32 %v4082_v16, %v4048_v38  ;;  %v4091_v27 = vadd.f32 %v4083_v41, %v4049_v17  ;;  %v4092_v4 = vadd.f32 %v4084_v12, %v4050_v0  ;;  %v7309_v24 = vld [vmem:[#allocation6 + $0x368] sm:$0xff]  ;;  %v7310_v17 = vld [vmem:[#allocation6 + $0x370] sm:$0xff] }
 0xa11   :  { %v4096_v58 = vstv %s10007_s27  ;;  %v4117_v30 = vstv %s10013_s28  ;;  %v10025_v9 = vstv %s6659_s29  ;;  %v10027_v22 = vstv %s6661_s30 }
 0xa12   :  { %v4098_v5 = vmul.f32 %v7304_v40, %v4096_v58  ;;  %v4099_v1 = vmul.f32 %v7305_v13, %v4096_v58  ;;  %v4100_v60 = vmul.f32 %v7306_v3, %v4096_v58  ;;  %v4101_v54 = vmul.f32 %v7307_v53, %v4096_v58  ;;  %s6683_s15 = spop %6682 }
 0xa13   :  { %v4102_v10 = vmul.f32 %v7308_v44, %v4096_v58  ;;  %v4103_v38 = vmul.f32 %v7309_v24, %v4096_v58  ;;  %v4104_v0 = vmul.f32 %v7310_v17, %v4096_v58  ;;  %v4105_v62 = vmul.f32 %v7311_v61, %v4096_v58  ;;  %v7322_v58 = vld [vmem:[#allocation6 + $0x3d0] sm:$0xff]  ;;  %v7328_v24 = vld [vmem:[#allocation6 + $0x400] sm:$0xff]  ;;  %v7329_v17 = vld [vmem:[#allocation6 + $0x408] sm:$0xff]  ;;  %s6685_s16 = spop %6684 }
 0xa14   :  { %v4106_v48 = vadd.f32 %v4098_v5, %v4064_v63  ;;  %v4107_v35 = vadd.f32 %v4099_v1, %v4065_v11  ;;  %v4108_v55 = vadd.f32 %v4100_v60, %v4066_v43  ;;  %v4109_v47 = vadd.f32 %v4101_v54, %v4067_v23  ;;  %v7318_v63 = vld [vmem:[#allocation6 + $0x3b0] sm:$0xff]  ;;  %v7319_v43 = vld [vmem:[#allocation6 + $0x3b8] sm:$0xff] }
 0xa15   :  { %v4110_v49 = vadd.f32 %v4102_v10, %v4068_v18  ;;  %v4111_v34 = vadd.f32 %v4103_v38, %v4069_v45  ;;  %v4112_v56 = vadd.f32 %v4104_v0, %v4070_v25  ;;  %v4113_v6 = vadd.f32 %v4105_v62, %v4071_v32  ;;  %v7323_v5 = vld [vmem:[#allocation6 + $0x3d8] sm:$0xff]  ;;  %v7330_v61 = vld [vmem:[#allocation6 + $0x410] sm:$0xff] }
 0xa16   :  { %v4119_v2 = vmul.f32 %v7312_v26, %v4117_v30  ;;  %v4120_v37 = vmul.f32 %v7313_v31, %v4117_v30  ;;  %v4121_v39 = vmul.f32 %v7314_v50, %v4117_v30  ;;  %v4122_v29 = vmul.f32 %v7315_v46, %v4117_v30  ;;  %v7331_v62 = vld [vmem:[#allocation6 + $0x418] sm:$0xff]  ;;  %s10159_s17 = spop %6686 }
 0xa17   :  { %v4123_v21 = vmul.f32 %v7316_v8, %v4117_v30  ;;  %v4124_v28 = vmul.f32 %v7317_v52, %v4117_v30  ;;  %v4125_v11 = vmul.f32 %v7318_v63, %v4117_v30  ;;  %v4126_v23 = vmul.f32 %v7319_v43, %v4117_v30  ;;  %s6689_s18 = spop %6688 }
 0xa18   :  { %v4127_v18 = vadd.f32 %v4119_v2, %v4085_v59  ;;  %v4128_v45 = vadd.f32 %v4120_v37, %v4086_v20  ;;  %v4129_v25 = vadd.f32 %v4121_v39, %v4087_v14  ;;  %v4130_v32 = vadd.f32 %v4122_v29, %v4088_v36  ;;  %v7324_v59 = vld [vmem:[#allocation6 + $0x3e0] sm:$0xff]  ;;  %v7325_v14 = vld [vmem:[#allocation6 + $0x3e8] sm:$0xff] }
 0xa19   :  { %v4131_v51 = vadd.f32 %v4123_v21, %v4089_v33  ;;  %v4132_v7 = vadd.f32 %v4124_v28, %v4090_v57  ;;  %v4133_v42 = vadd.f32 %v4125_v11, %v4091_v27  ;;  %v4134_v16 = vadd.f32 %v4126_v23, %v4092_v4  ;;  %v7326_v33 = vld [vmem:[#allocation6 + $0x3f0] sm:$0xff]  ;;  %v7327_v27 = vld [vmem:[#allocation6 + $0x3f8] sm:$0xff]  ;;  %v7336_v11 = vld [vmem:[#allocation6 + $0x440] sm:$0xff] }
 0xa1a   :  { %v4140_v41 = vmul.f32 %v7320_v19, %v10025_v9  ;;  %v4141_v12 = vmul.f32 %v7321_v15, %v10025_v9  ;;  %v4142_v40 = vmul.f32 %v7322_v58, %v10025_v9  ;;  %v4143_v30 = vmul.f32 %v7323_v5, %v10025_v9  ;;  %v7337_v23 = vld [vmem:[#allocation6 + $0x448] sm:$0xff]  ;;  %v7343_v15 = vld [vmem:[#allocation6 + $0x478] sm:$0xff]  ;;  %s6691_s19 = spop %6690 }
 0xa1b   :  { %v4144_v20 = vmul.f32 %v7324_v59, %v10025_v9  ;;  %v4145_v36 = vmul.f32 %v7325_v14, %v10025_v9  ;;  %v4146_v57 = vmul.f32 %v7326_v33, %v10025_v9  ;;  %v4147_v4 = vmul.f32 %v7327_v27, %v10025_v9  ;;  %v7344_v33 = vld [vmem:[#allocation6 + $0x480] sm:$0xff]  ;;  %v7345_v27 = vld [vmem:[#allocation6 + $0x488] sm:$0xff] }
 0xa1c   :  { %v4148_v13 = vadd.f32 %v4140_v41, %v4106_v48  ;;  %v4149_v1 = vadd.f32 %v4141_v12, %v4107_v35  ;;  %v4150_v3 = vadd.f32 %v4142_v40, %v4108_v55  ;;  %v4151_v60 = vadd.f32 %v4143_v30, %v4109_v47  ;;  %v7332_v35 = vld [vmem:[#allocation6 + $0x420] sm:$0xff]  ;;  %v7333_v47 = vld [vmem:[#allocation6 + $0x428] sm:$0xff] }
 0xa1d   :  { %v4152_v53 = vadd.f32 %v4144_v20, %v4110_v49  ;;  %v4153_v54 = vadd.f32 %v4145_v36, %v4111_v34  ;;  %v4154_v44 = vadd.f32 %v4146_v57, %v4112_v56  ;;  %v4155_v10 = vadd.f32 %v4147_v4, %v4113_v6  ;;  %v7334_v34 = vld [vmem:[#allocation6 + $0x430] sm:$0xff]  ;;  %v7335_v6 = vld [vmem:[#allocation6 + $0x438] sm:$0xff] }
 0xa1e   :  { %v4161_v38 = vmul.f32 %v7328_v24, %v10027_v22  ;;  %v4162_v0 = vmul.f32 %v7329_v17, %v10027_v22  ;;  %v4163_v9 = vmul.f32 %v7330_v61, %v10027_v22  ;;  %v4164_v48 = vmul.f32 %v7331_v62, %v10027_v22  ;;  %v7346_v24 = vld [vmem:[#allocation6 + $0x490] sm:$0xff]  ;;  %v7347_v17 = vld [vmem:[#allocation6 + $0x498] sm:$0xff]  ;;  %v7348_v61 = vld [vmem:[#allocation6 + $0x4a0] sm:$0xff] }
 0xa1f   :  { %v4165_v55 = vmul.f32 %v7332_v35, %v10027_v22  ;;  %v4166_v49 = vmul.f32 %v7333_v47, %v10027_v22  ;;  %v4167_v56 = vmul.f32 %v7334_v34, %v10027_v22  ;;  %v4168_v26 = vmul.f32 %v7335_v6, %v10027_v22  ;;  %v7338_v22 = vld [vmem:[#allocation6 + $0x450] sm:$0xff]  ;;  %v7349_v62 = vld [vmem:[#allocation6 + $0x4a8] sm:$0xff]  ;;  %v7352_v34 = vld [vmem:[#allocation6 + $0x4c0] sm:$0xff] }
 0xa20   :  { %v4169_v2 = vadd.f32 %v4161_v38, %v4127_v18  ;;  %v4170_v31 = vadd.f32 %v4162_v0, %v4128_v45  ;;  %v4171_v37 = vadd.f32 %v4163_v9, %v4129_v25  ;;  %v4172_v50 = vadd.f32 %v4164_v48, %v4130_v32  ;;  %v7339_v18 = vld [vmem:[#allocation6 + $0x458] sm:$0xff]  ;;  %v7340_v25 = vld [vmem:[#allocation6 + $0x460] sm:$0xff]  ;;  %v7353_v6 = vld [vmem:[#allocation6 + $0x4c8] sm:$0xff] }
 0xa21   :  { %v4173_v39 = vadd.f32 %v4165_v55, %v4131_v51  ;;  %v4174_v46 = vadd.f32 %v4166_v49, %v4132_v7  ;;  %v4175_v29 = vadd.f32 %v4167_v56, %v4133_v42  ;;  %v4176_v8 = vadd.f32 %v4168_v26, %v4134_v16  ;;  %v7341_v51 = vld [vmem:[#allocation6 + $0x468] sm:$0xff]  ;;  %v7342_v42 = vld [vmem:[#allocation6 + $0x470] sm:$0xff] }
 0xa22   :  { %v4180_v21 = vstv %s10033_s2  ;;  %v4201_v52 = vstv %s10039_s5  ;;  %v10051_v28 = vstv %s6667_s6  ;;  %v10053_v63 = vstv %s6669_s1 }
 0xa23   :  { %v4182_v43 = vmul.f32 %v7336_v11, %v4180_v21  ;;  %v4183_v19 = vmul.f32 %v7337_v23, %v4180_v21  ;;  %v4184_v41 = vmul.f32 %v7338_v22, %v4180_v21  ;;  %v4185_v45 = vmul.f32 %v7339_v18, %v4180_v21 }
 0xa24   :  { %v4186_v32 = vmul.f32 %v7340_v25, %v4180_v21  ;;  %v4187_v7 = vmul.f32 %v7341_v51, %v4180_v21  ;;  %v4188_v16 = vmul.f32 %v7342_v42, %v4180_v21  ;;  %v4189_v12 = vmul.f32 %v7343_v15, %v4180_v21  ;;  %v7354_v21 = vld [vmem:[#allocation6 + $0x4d0] sm:$0xff]  ;;  %v7360_v51 = vld [vmem:[#allocation6 + $0x500] sm:$0xff]  ;;  %v7361_v42 = vld [vmem:[#allocation6 + $0x508] sm:$0xff] }
 0xa25   :  { %v4190_v58 = vadd.f32 %v4182_v43, %v4148_v13  ;;  %v4191_v40 = vadd.f32 %v4183_v19, %v4149_v1  ;;  %v4192_v5 = vadd.f32 %v4184_v41, %v4150_v3  ;;  %v4193_v30 = vadd.f32 %v4185_v45, %v4151_v60  ;;  %v7350_v13 = vld [vmem:[#allocation6 + $0x4b0] sm:$0xff]  ;;  %v7351_v3 = vld [vmem:[#allocation6 + $0x4b8] sm:$0xff] }
 0xa26   :  { %v4194_v59 = vadd.f32 %v4186_v32, %v4152_v53  ;;  %v4195_v20 = vadd.f32 %v4187_v7, %v4153_v54  ;;  %v4196_v14 = vadd.f32 %v4188_v16, %v4154_v44  ;;  %v4197_v36 = vadd.f32 %v4189_v12, %v4155_v10  ;;  %v7355_v43 = vld [vmem:[#allocation6 + $0x4d8] sm:$0xff]  ;;  %v7362_v15 = vld [vmem:[#allocation6 + $0x510] sm:$0xff] }
 0xa27   :  { %v4203_v57 = vmul.f32 %v7344_v33, %v4201_v52  ;;  %v4204_v4 = vmul.f32 %v7345_v27, %v4201_v52  ;;  %v4205_v38 = vmul.f32 %v7346_v24, %v4201_v52  ;;  %v4206_v0 = vmul.f32 %v7347_v17, %v4201_v52  ;;  %v7363_v12 = vld [vmem:[#allocation6 + $0x518] sm:$0xff] }
 0xa28   :  { %v4207_v9 = vmul.f32 %v7348_v61, %v4201_v52  ;;  %v4208_v48 = vmul.f32 %v7349_v62, %v4201_v52  ;;  %v4209_v1 = vmul.f32 %v7350_v13, %v4201_v52  ;;  %v4210_v60 = vmul.f32 %v7351_v3, %v4201_v52 }
 0xa29   :  { %v4211_v53 = vadd.f32 %v4203_v57, %v4169_v2  ;;  %v4212_v54 = vadd.f32 %v4204_v4, %v4170_v31  ;;  %v4213_v44 = vadd.f32 %v4205_v38, %v4171_v37  ;;  %v4214_v10 = vadd.f32 %v4206_v0, %v4172_v50  ;;  %v7356_v2 = vld [vmem:[#allocation6 + $0x4e0] sm:$0xff]  ;;  %v7357_v37 = vld [vmem:[#allocation6 + $0x4e8] sm:$0xff] }
 0xa2a   :  { %v4215_v35 = vadd.f32 %v4207_v9, %v4173_v39  ;;  %v4216_v55 = vadd.f32 %v4208_v48, %v4174_v46  ;;  %v4217_v47 = vadd.f32 %v4209_v1, %v4175_v29  ;;  %v4218_v49 = vadd.f32 %v4210_v60, %v4176_v8  ;;  %v7358_v39 = vld [vmem:[#allocation6 + $0x4f0] sm:$0xff]  ;;  %v7359_v29 = vld [vmem:[#allocation6 + $0x4f8] sm:$0xff]  ;;  %v7368_v1 = vld [vmem:[#allocation6 + $0x540] sm:$0xff] }
 0xa2b   :  { %v4224_v56 = vmul.f32 %v7352_v34, %v10051_v28  ;;  %v4225_v26 = vmul.f32 %v7353_v6, %v10051_v28  ;;  %v4226_v11 = vmul.f32 %v7354_v21, %v10051_v28  ;;  %v4227_v52 = vmul.f32 %v7355_v43, %v10051_v28  ;;  %v7369_v60 = vld [vmem:[#allocation6 + $0x548] sm:$0xff]  ;;  %v7375_v6 = vld [vmem:[#allocation6 + $0x578] sm:$0xff] }
 0xa2c   :  { %v4228_v31 = vmul.f32 %v7356_v2, %v10051_v28  ;;  %v4229_v50 = vmul.f32 %v7357_v37, %v10051_v28  ;;  %v4230_v46 = vmul.f32 %v7358_v39, %v10051_v28  ;;  %v4231_v8 = vmul.f32 %v7359_v29, %v10051_v28  ;;  %v7376_v39 = vld [vmem:[#allocation6 + $0x580] sm:$0xff]  ;;  %v7377_v29 = vld [vmem:[#allocation6 + $0x588] sm:$0xff] }
 0xa2d   :  { %v4232_v23 = vadd.f32 %v4224_v56, %v4190_v58  ;;  %v4233_v19 = vadd.f32 %v4225_v26, %v4191_v40  ;;  %v4234_v22 = vadd.f32 %v4226_v11, %v4192_v5  ;;  %v4235_v41 = vadd.f32 %v4227_v52, %v4193_v30  ;;  %v7364_v40 = vld [vmem:[#allocation6 + $0x520] sm:$0xff]  ;;  %v7365_v30 = vld [vmem:[#allocation6 + $0x528] sm:$0xff] }
 0xa2e   :  { %v4236_v18 = vadd.f32 %v4228_v31, %v4194_v59  ;;  %v4237_v45 = vadd.f32 %v4229_v50, %v4195_v20  ;;  %v4238_v25 = vadd.f32 %v4230_v46, %v4196_v14  ;;  %v4239_v32 = vadd.f32 %v4231_v8, %v4197_v36  ;;  %v7366_v20 = vld [vmem:[#allocation6 + $0x530] sm:$0xff]  ;;  %v7367_v36 = vld [vmem:[#allocation6 + $0x538] sm:$0xff] }
 0xa2f   :  { %v4245_v7 = vmul.f32 %v7360_v51, %v10053_v63  ;;  %v4246_v16 = vmul.f32 %v7361_v42, %v10053_v63  ;;  %v4247_v28 = vmul.f32 %v7362_v15, %v10053_v63  ;;  %v4248_v58 = vmul.f32 %v7363_v12, %v10053_v63  ;;  %v7378_v51 = vld [vmem:[#allocation6 + $0x590] sm:$0xff]  ;;  %v7379_v42 = vld [vmem:[#allocation6 + $0x598] sm:$0xff]  ;;  %v7380_v15 = vld [vmem:[#allocation6 + $0x5a0] sm:$0xff] }
 0xa30   :  { %v4249_v5 = vmul.f32 %v7364_v40, %v10053_v63  ;;  %v4250_v59 = vmul.f32 %v7365_v30, %v10053_v63  ;;  %v4251_v14 = vmul.f32 %v7366_v20, %v10053_v63  ;;  %v4252_v33 = vmul.f32 %v7367_v36, %v10053_v63  ;;  %v7370_v63 = vld [vmem:[#allocation6 + $0x550] sm:$0xff]  ;;  %v7381_v12 = vld [vmem:[#allocation6 + $0x5a8] sm:$0xff]  ;;  %v7384_v20 = vld [vmem:[#allocation6 + $0x5c0] sm:$0xff] }
 0xa31   :  { %v4253_v57 = vadd.f32 %v4245_v7, %v4211_v53  ;;  %v4254_v27 = vadd.f32 %v4246_v16, %v4212_v54  ;;  %v4255_v4 = vadd.f32 %v4247_v28, %v4213_v44  ;;  %v4256_v24 = vadd.f32 %v4248_v58, %v4214_v10  ;;  %v7371_v53 = vld [vmem:[#allocation6 + $0x558] sm:$0xff]  ;;  %v7372_v44 = vld [vmem:[#allocation6 + $0x560] sm:$0xff]  ;;  %v7385_v36 = vld [vmem:[#allocation6 + $0x5c8] sm:$0xff] }
 0xa32   :  { %v4257_v38 = vadd.f32 %v4249_v5, %v4215_v35  ;;  %v4258_v17 = vadd.f32 %v4250_v59, %v4216_v55  ;;  %v4259_v0 = vadd.f32 %v4251_v14, %v4217_v47  ;;  %v4260_v61 = vadd.f32 %v4252_v33, %v4218_v49  ;;  %v7373_v35 = vld [vmem:[#allocation6 + $0x568] sm:$0xff]  ;;  %v7374_v47 = vld [vmem:[#allocation6 + $0x570] sm:$0xff] }
 0xa33   :  { %v4264_v9 = vstv %s10059_s7  ;;  %v4285_v62 = vstv %s10065_s8  ;;  %v10077_v48 = vstv %s6675_s9  ;;  %v10079_v13 = vstv %s6677_s12 }
 0xa34   :  { %v4266_v3 = vmul.f32 %v7368_v1, %v4264_v9  ;;  %v4267_v34 = vmul.f32 %v7369_v60, %v4264_v9  ;;  %v4268_v56 = vmul.f32 %v7370_v63, %v4264_v9  ;;  %v4269_v54 = vmul.f32 %v7371_v53, %v4264_v9  ;;  %v7391_v1 = vld [vmem:[#allocation6 + $0x5f8] sm:$0xff] }
 0xa35   :  { %v4270_v10 = vmul.f32 %v7372_v44, %v4264_v9  ;;  %v4271_v55 = vmul.f32 %v7373_v35, %v4264_v9  ;;  %v4272_v49 = vmul.f32 %v7374_v47, %v4264_v9  ;;  %v4273_v26 = vmul.f32 %v7375_v6, %v4264_v9  ;;  %v7390_v9 = vld [vmem:[#allocation6 + $0x5f0] sm:$0xff]  ;;  %v7392_v35 = vld [vmem:[#allocation6 + $0x600] sm:$0xff] }
 0xa36   :  { %v4274_v21 = vadd.f32 %v4266_v3, %v4232_v23  ;;  %v4275_v11 = vadd.f32 %v4267_v34, %v4233_v19  ;;  %v4276_v43 = vadd.f32 %v4268_v56, %v4234_v22  ;;  %v4277_v52 = vadd.f32 %v4269_v54, %v4235_v41  ;;  %v7382_v23 = vld [vmem:[#allocation6 + $0x5b0] sm:$0xff]  ;;  %v7383_v22 = vld [vmem:[#allocation6 + $0x5b8] sm:$0xff] }
 0xa37   :  { %v4278_v2 = vadd.f32 %v4270_v10, %v4236_v18  ;;  %v4279_v31 = vadd.f32 %v4271_v55, %v4237_v45  ;;  %v4280_v37 = vadd.f32 %v4272_v49, %v4238_v25  ;;  %v4281_v50 = vadd.f32 %v4273_v26, %v4239_v32  ;;  %v7393_v55 = vld [vmem:[#allocation6 + $0x608] sm:$0xff]  ;;  %v7394_v49 = vld [vmem:[#allocation6 + $0x610] sm:$0xff]  ;;  %v7395_v26 = vld [vmem:[#allocation6 + $0x618] sm:$0xff] }
 0xa38   :  { %v4287_v46 = vmul.f32 %v7376_v39, %v4285_v62  ;;  %v4288_v8 = vmul.f32 %v7377_v29, %v4285_v62  ;;  %v4289_v7 = vmul.f32 %v7378_v51, %v4285_v62  ;;  %v4290_v16 = vmul.f32 %v7379_v42, %v4285_v62 }
 0xa39   :  { %v4291_v28 = vmul.f32 %v7380_v15, %v4285_v62  ;;  %v4292_v58 = vmul.f32 %v7381_v12, %v4285_v62  ;;  %v4293_v19 = vmul.f32 %v7382_v23, %v4285_v62  ;;  %v4294_v41 = vmul.f32 %v7383_v22, %v4285_v62  ;;  %v7405_v22 = vld [vmem:[#allocation6 + $0x668] sm:$0xff] }
 0xa3a   :  { %v10081_v18 = vadd.f32 %v4287_v46, %v4253_v57  ;;  %v10083_v45 = vadd.f32 %v4288_v8, %v4254_v27  ;;  %v10085_v25 = vadd.f32 %v4289_v7, %v4255_v4  ;;  %v10087_v32 = vadd.f32 %v4290_v16, %v4256_v24  ;;  %v7386_v57 = vld [vmem:[#allocation6 + $0x5d0] sm:$0xff]  ;;  %v7387_v4 = vld [vmem:[#allocation6 + $0x5d8] sm:$0xff]  ;;  %v7400_v7 = vld [vmem:[#allocation6 + $0x640] sm:$0xff] }
 0xa3b   :  { %v10091_v40 = vadd.f32 %v4291_v28, %v4257_v38  ;;  %v10093_v5 = vadd.f32 %v4292_v58, %v4258_v17  ;;  %v10095_v30 = vadd.f32 %v4293_v19, %v4259_v0  ;;  %v10097_v59 = vadd.f32 %v4294_v41, %v4260_v61  ;;  %v7388_v38 = vld [vmem:[#allocation6 + $0x5e0] sm:$0xff]  ;;  %v7389_v0 = vld [vmem:[#allocation6 + $0x5e8] sm:$0xff]  ;;  %v7402_v28 = vld [vmem:[#allocation6 + $0x650] sm:$0xff] }
 0xa3c   :  { %v4308_v14 = vmul.f32 %v7384_v20, %v10077_v48  ;;  %v4309_v33 = vmul.f32 %v7385_v36, %v10077_v48  ;;  %v4310_v27 = vmul.f32 %v7386_v57, %v10077_v48  ;;  %v4311_v24 = vmul.f32 %v7387_v4, %v10077_v48  ;;  %v7401_v16 = vld [vmem:[#allocation6 + $0x648] sm:$0xff]  ;;  %v7403_v58 = vld [vmem:[#allocation6 + $0x658] sm:$0xff]  ;;  %v7406_v20 = vld [vmem:[#allocation6 + $0x670] sm:$0xff] }
 0xa3d   :  { %v4312_v17 = vmul.f32 %v7388_v38, %v10077_v48  ;;  %v4313_v61 = vmul.f32 %v7389_v0, %v10077_v48  ;;  %v4314_v62 = vmul.f32 %v7390_v9, %v10077_v48  ;;  %v4315_v3 = vmul.f32 %v7391_v1, %v10077_v48  ;;  %v7407_v36 = vld [vmem:[#allocation6 + $0x678] sm:$0xff]  ;;  %v7408_v57 = vld [vmem:[#allocation6 + $0x680] sm:$0xff]  ;;  %v7409_v4 = vld [vmem:[#allocation6 + $0x688] sm:$0xff] }
 0xa3e   :  { %v10109_v60 = vadd.f32 %v4308_v14, %v4274_v21  ;;  %v10111_v34 = vadd.f32 %v4309_v33, %v4275_v11  ;;  %v10113_v63 = vadd.f32 %v4310_v27, %v4276_v43  ;;  %v10115_v56 = vadd.f32 %v4311_v24, %v4277_v52  ;;  %v7396_v11 = vld [vmem:[#allocation6 + $0x620] sm:$0xff]  ;;  %v7397_v52 = vld [vmem:[#allocation6 + $0x628] sm:$0xff]  ;;  %v7410_v38 = vld [vmem:[#allocation6 + $0x690] sm:$0xff] }
 0xa3f   :  { %v10117_v53 = vadd.f32 %v4312_v17, %v4278_v2  ;;  %v10119_v54 = vadd.f32 %v4313_v61, %v4279_v31  ;;  %v10121_v44 = vadd.f32 %v4314_v62, %v4280_v37  ;;  %v10123_v10 = vadd.f32 %v4315_v3, %v4281_v50  ;;  %v7398_v31 = vld [vmem:[#allocation6 + $0x630] sm:$0xff]  ;;  %v7399_v50 = vld [vmem:[#allocation6 + $0x638] sm:$0xff]  ;;  %v7412_v9 = vld [vmem:[#allocation6 + $0x6a0] sm:$0xff] }
 0xa40   :  { %v10126_v48 = vmul.f32 %v7392_v35, %v10079_v13  ;;  %v10129_v47 = vmul.f32 %v7393_v55, %v10079_v13  ;;  %v10132_v6 = vmul.f32 %v7394_v49, %v10079_v13  ;;  %v10135_v21 = vmul.f32 %v7395_v26, %v10079_v13  ;;  %v7411_v0 = vld [vmem:[#allocation6 + $0x698] sm:$0xff]  ;;  %v7413_v1 = vld [vmem:[#allocation6 + $0x6a8] sm:$0xff]  ;;  %v7414_v35 = vld [vmem:[#allocation6 + $0x6b0] sm:$0xff] }
 0xa41   :  { %v10138_v43 = vmul.f32 %v7396_v11, %v10079_v13  ;;  %v10141_v2 = vmul.f32 %v7397_v52, %v10079_v13  ;;  %v10144_v37 = vmul.f32 %v7398_v31, %v10079_v13  ;;  %v10147_v39 = vmul.f32 %v7399_v50, %v10079_v13  ;;  %v7404_v13 = vld [vmem:[#allocation6 + $0x660] sm:$0xff]  ;;  %v7415_v49 = vld [vmem:[#allocation6 + $0x6b8] sm:$0xff]  ;;  %v7417_v31 = vld [vmem:[#allocation6 + $0x6c8] sm:$0xff] }
 0xa42   :  { %v4348_v46 = vstv %s10089_s13  ;;  %v4369_v29 = vstv %s10103_s14  ;;  %v4390_v8 = vstv %s6683_s15  ;;  %v10151_v51 = vstv %s6685_s16  ;;  %v7416_v11 = vld [vmem:[#allocation6 + $0x6c0] sm:$0xff] }
 0xa43   :  { %v4350_v42 = vmul.f32 %v7400_v7, %v4348_v46  ;;  %v10153_v15 = vmul.f32 %v7401_v16, %v4348_v46  ;;  %v10155_v12 = vmul.f32 %v7402_v28, %v4348_v46  ;;  %v10157_v23 = vmul.f32 %v7403_v58, %v4348_v46  ;;  %v7419_v16 = vld [vmem:[#allocation6 + $0x6d8] sm:$0xff]  ;;  %v7420_v58 = vld [vmem:[#allocation6 + $0x6e0] sm:$0xff] }
 0xa44   :  { %v10161_v19 = vmul.f32 %v7404_v13, %v4348_v46  ;;  %v10163_v41 = vmul.f32 %v7405_v22, %v4348_v46  ;;  %v10165_v14 = vmul.f32 %v7406_v20, %v4348_v46  ;;  %v10167_v33 = vmul.f32 %v7407_v36, %v4348_v46  ;;  %v7418_v46 = vld [vmem:[#allocation6 + $0x6d0] sm:$0xff]  ;;  %v7421_v22 = vld [vmem:[#allocation6 + $0x6e8] sm:$0xff] }
 0xa45   :  { %v4371_v27 = vmul.f32 %v7408_v57, %v4369_v29  ;;  %v4372_v24 = vmul.f32 %v7409_v4, %v4369_v29  ;;  %v10169_v17 = vmul.f32 %v7410_v38, %v4369_v29  ;;  %v10171_v61 = vmul.f32 %v7411_v0, %v4369_v29  ;;  %v7422_v36 = vld [vmem:[#allocation6 + $0x6f0] sm:$0xff]  ;;  %v7423_v57 = vld [vmem:[#allocation6 + $0x6f8] sm:$0xff] }
 0xa46   :  { %11287 = vst [vmem:[#allocation22_spill] sm:$0xff] %v10167_v33  ;;  %v10173_v62 = vmul.f32 %v7412_v9, %v4369_v29  ;;  %v10175_v3 = vmul.f32 %v7413_v1, %v4369_v29  ;;  %v10177_v55 = vmul.f32 %v7414_v35, %v4369_v29  ;;  %v10179_v26 = vmul.f32 %v7415_v49, %v4369_v29  ;;  %v7424_v49 = vld [vmem:[#allocation6 + $0x700] sm:$0xff] }
 0xa47   :  { %v4392_v52 = vmul.f32 %v7416_v11, %v4390_v8  ;;  %v4393_v50 = vmul.f32 %v7417_v31, %v4390_v8  ;;  %v4394_v7 = vmul.f32 %v7418_v46, %v4390_v8  ;;  %v10181_v28 = vmul.f32 %v7419_v16, %v4390_v8  ;;  %v7425_v31 = vld [vmem:[#allocation6 + $0x740] sm:$0xff] }
 0xa48   :  { %11288 = vst [vmem:[#allocation23_spill] sm:$0xff] %v10179_v26  ;;  %v10183_v13 = vmul.f32 %v7420_v58, %v4390_v8  ;;  %v10185_v20 = vmul.f32 %v7421_v22, %v4390_v8  ;;  %v10187_v29 = vmul.f32 %v7422_v36, %v4390_v8  ;;  %v10189_v4 = vmul.f32 %v7423_v57, %v4390_v8  ;;  %v7426_v16 = vld [vmem:[#allocation6 + $0x780] sm:$0xff] }
 0xa49   :  { %v10192_v38 = vstv %s10159_s17  ;;  %v10194_v0 = vstv %s6689_s18  ;;  %v10196_v9 = vstv %s6691_s19  ;;  %v4337_v1 = vadd.f32 %v10126_v48, %v10081_v18  ;;  %v7427_v22 = vld [vmem:[#allocation6 + $0x7c0] sm:$0xff]  ;;  %v7428_v48 = vld [vmem:[#allocation6 + $0x708] sm:$0xff] }
 0xa4a   :  { %11289 = vst [vmem:[#allocation89_spill] sm:$0xff] %v10189_v4  ;;  %v4358_v35 = vadd.f32 %v4350_v42, %v10109_v60  ;;  %v4413_v11 = vmul.f32 %v7424_v49, %v10151_v51  ;;  %v4434_v46 = vmul.f32 %v7425_v31, %v10192_v38  ;;  %v4455_v8 = vmul.f32 %v7426_v16, %v10194_v0  ;;  %v7429_v49 = vld [vmem:[#allocation6 + $0x748] sm:$0xff] }
 0xa4b   :  { %v4379_v58 = vadd.f32 %v4371_v27, %v4337_v1  ;;  %v4476_v36 = vmul.f32 %v7427_v22, %v10196_v9  ;;  %v4338_v57 = vadd.f32 %v10129_v47, %v10083_v45  ;;  %v4359_v18 = vadd.f32 %v10153_v15, %v10111_v34  ;;  %v7430_v4 = vld [vmem:[#allocation6 + $0x788] sm:$0xff]  ;;  %v7432_v15 = vld [vmem:[#allocation6 + $0x710] sm:$0xff] }
 0xa4c   :  { %v4400_v60 = vadd.f32 %v4392_v52, %v4358_v35  ;;  %v4414_v42 = vmul.f32 %v7428_v48, %v10151_v51  ;;  %v4435_v31 = vmul.f32 %v7429_v49, %v10192_v38  ;;  %v4456_v16 = vmul.f32 %v7430_v4, %v10194_v0  ;;  %v7431_v22 = vld [vmem:[#allocation6 + $0x7c8] sm:$0xff]  ;;  %v7433_v4 = vld [vmem:[#allocation6 + $0x750] sm:$0xff] }
 0xa4d   :  { %v4421_v27 = vadd.f32 %v4413_v11, %v4379_v58  ;;  %v4380_v1 = vadd.f32 %v4372_v24, %v4338_v57  ;;  %v4401_v26 = vadd.f32 %v4393_v50, %v4359_v18  ;;  %v4477_v33 = vmul.f32 %v7431_v22, %v10196_v9  ;;  %v7435_v18 = vld [vmem:[#allocation6 + $0x7d0] sm:$0xff] }
 0xa4e   :  { %v4442_v45 = vadd.f32 %v4434_v46, %v4400_v60  ;;  %v4339_v34 = vadd.f32 %v10132_v6, %v10085_v25  ;;  %v4360_v47 = vadd.f32 %v10155_v12, %v10113_v63  ;;  %v4415_v52 = vmul.f32 %v7432_v15, %v10151_v51  ;;  %v7434_v46 = vld [vmem:[#allocation6 + $0x790] sm:$0xff]  ;;  %v7440_v15 = vld [vmem:[#allocation6 + $0x798] sm:$0xff] }
 0xa4f   :  { %v4463_v35 = vadd.f32 %v4455_v8, %v4421_v27  ;;  %v4422_v48 = vadd.f32 %v4414_v42, %v4380_v1  ;;  %v4443_v49 = vadd.f32 %v4435_v31, %v4401_v26  ;;  %v4436_v24 = vmul.f32 %v7433_v4, %v10192_v38  ;;  %v7438_v27 = vld [vmem:[#allocation2 + $0x2f0] sm:$0xff] }
 0xa50   :  { %v4484_v50 = vadd.f32 %v4476_v36, %v4442_v45  ;;  %v4381_v11 = vadd.f32 %v10169_v17, %v4339_v34  ;;  %v4402_v58 = vadd.f32 %v4394_v7, %v4360_v47  ;;  %v4457_v57 = vmul.f32 %v7434_v46, %v10194_v0  ;;  %v7436_v7 = vld [vmem:[#allocation6 + $0x718] sm:$0xff]  ;;  %v7442_v4 = vld [vmem:[#allocation6 + $0x720] sm:$0xff] }
 0xa51   :  { %v4464_v25 = vadd.f32 %v4456_v16, %v4422_v48  ;;  %v4485_v6 = vadd.f32 %v4477_v33, %v4443_v49  ;;  %v4478_v63 = vmul.f32 %v7435_v18, %v10196_v9  ;;  %v4340_v12 = vadd.f32 %v10135_v21, %v10087_v32  ;;  %v7437_v16 = vld [vmem:[#allocation6 + $0x758] sm:$0xff]  ;;  %v7439_v21 = vld [vmem:[#allocation2 + $0x300] sm:$0xff] }
 0xa52   :  { %v4492_v8 = vadd.f32 %v4484_v50, %v4463_v35  ;;  %v4423_v26 = vadd.f32 %v4415_v52, %v4381_v11  ;;  %v4444_v60 = vadd.f32 %v4436_v24, %v4402_v58  ;;  %v4361_v36 = vadd.f32 %v10157_v23, %v10115_v56  ;;  %v7441_v23 = vld [vmem:[#allocation6 + $0x7d8] sm:$0xff]  ;;  %v7443_v50 = vld [vmem:[#allocation6 + $0x760] sm:$0xff] }
 0xa53   :  { %v4493_v42 = vadd.f32 %v4485_v6, %v4464_v25  ;;  %v4382_v17 = vadd.f32 %v10171_v61, %v4340_v12  ;;  %v4416_v31 = vmul.f32 %v7436_v7, %v10151_v51  ;;  %v4437_v33 = vmul.f32 %v7437_v16, %v10192_v38  ;;  %v7444_v58 = vld [vmem:[#allocation6 + $0x7a0] sm:$0xff]  ;;  %v7447_v12 = vld [vmem:[#allocation6 + $0x728] sm:$0xff] }
 0xa54   :  { %v4500_v1 = vadd.f32 %v7438_v27, %v4492_v8  ;;  %v4465_v22 = vadd.f32 %v4457_v57, %v4423_v26  ;;  %v4486_v45 = vadd.f32 %v4478_v63, %v4444_v60  ;;  %v4403_v32 = vadd.f32 %v10181_v28, %v4361_v36  ;;  %v7445_v57 = vld [vmem:[#allocation2 + $0x310] sm:$0xff]  ;;  %v7449_v7 = vld [vmem:[#allocation6 + $0x7a8] sm:$0xff] }
 0xa55   :  { %v4501_v34 = vadd.f32 %v7439_v21, %v4493_v42  ;;  %v4424_v47 = vadd.f32 %v4416_v31, %v4382_v17  ;;  %v4458_v56 = vmul.f32 %v7440_v15, %v10194_v0  ;;  %v4479_v61 = vmul.f32 %v7441_v23, %v10196_v9  ;;  %v7454_v15 = vld [vmem:[#allocation6 + $0x7b0] sm:$0xff] }
 0xa56   :  { %6418 = vmatprep.mubr.msk.f32.mxu1 %vm4511_vm7, %v4500_v1  ;;  %v4494_v52 = vadd.f32 %v4486_v45, %v4465_v22  ;;  %v4445_v35 = vadd.f32 %v4437_v33, %v4403_v32  ;;  %v4341_v48 = vadd.f32 %v10138_v43, %v10091_v40  ;;  %v4362_v49 = vadd.f32 %v10161_v19, %v10117_v53  ;;  %v7446_v53 = vld [vmem:[#allocation6 + $0x7e0] sm:$0xff]  ;;  %v7452_v45 = vld [vmem:[#allocation6 + $0x730] sm:$0xff] }
 0xa57   :  { %6419 = vmatmul.mubr.msk.f32.gmra.mxu1 %vm4511_vm7, %v4501_v34  ;;  %v4466_v28 = vadd.f32 %v4458_v56, %v4424_v47  ;;  %v4417_v24 = vmul.f32 %v7442_v4, %v10151_v51  ;;  %v4438_v11 = vmul.f32 %v7443_v50, %v10192_v38  ;;  %v4459_v46 = vmul.f32 %v7444_v58, %v10194_v0  ;;  %v7453_v34 = vld [vmem:[#allocation6 + $0x770] sm:$0xff] }
 0xa58   :  { %v4502_v25 = vadd.f32 %v7445_v57, %v4494_v52  ;;  %v4487_v6 = vadd.f32 %v4479_v61, %v4445_v35  ;;  %v4383_v40 = vadd.f32 %v10173_v62, %v4341_v48  ;;  %v4404_v43 = vadd.f32 %v10183_v13, %v4362_v49  ;;  %v7448_v62 = vld [vmem:[#allocation6 + $0x768] sm:$0xff]  ;;  %v7455_v61 = vld [vmem:[#allocation6 + $0x7f0] sm:$0xff] }
 0xa59   :  { %v4480_v19 = vmul.f32 %v7446_v53, %v10196_v9  ;;  %v4342_v18 = vadd.f32 %v10141_v2, %v10093_v5  ;;  %v4363_v63 = vadd.f32 %v10163_v41, %v10119_v54  ;;  %v4418_v8 = vmul.f32 %v7447_v12, %v10151_v51  ;;  %v7450_v2 = vld [vmem:[#allocation6 + $0x7e8] sm:$0xff]  ;;  %v7451_v41 = vld [vmem:[#allocation2 + $0x320] sm:$0xff]  ;;  %v7461_v53 = vld [vmem:[#allocation6 + $0x7f8] sm:$0xff] }
 0xa5a   :  { %6421 = vmatprep.mubr.msk.f32.mxu1 %vm4511_vm7, %v4502_v25  ;;  %v4495_v26 = vadd.f32 %v4487_v6, %v4466_v28  ;;  %v4425_v60 = vadd.f32 %v4417_v24, %v4383_v40  ;;  %v4446_v36 = vadd.f32 %v4438_v11, %v4404_v43  ;;  %v4439_v13 = vmul.f32 %v7448_v62, %v10192_v38  ;;  %v7457_v24 = vld [vmem:[#allocation6 + $0x738] sm:$0xff]  ;;  %v11292_v25 = vld [vmem:[#allocation89_spill] sm:$0xff] }
 0xa5b   :  { %v4384_v42 = vadd.f32 %v10175_v3, %v4342_v18  ;;  %v4405_v17 = vadd.f32 %v10185_v20, %v4363_v63  ;;  %v4460_v5 = vmul.f32 %v7449_v7, %v10194_v0  ;;  %v4481_v54 = vmul.f32 %v7450_v2, %v10196_v9  ;;  %v7458_v11 = vld [vmem:[#allocation6 + $0x778] sm:$0xff] }
 0xa5c   :  { %v4503_v31 = vadd.f32 %v7451_v41, %v4495_v26  ;;  %v4467_v16 = vadd.f32 %v4459_v46, %v4425_v60  ;;  %v4488_v33 = vadd.f32 %v4480_v19, %v4446_v36  ;;  %v4343_v27 = vadd.f32 %v10144_v37, %v10095_v30  ;;  %v11291_v46 = vld [vmem:[#allocation23_spill] sm:$0xff]  ;;  %v7459_v40 = vld [vmem:[#allocation6 + $0x7b8] sm:$0xff]  ;;  %v7462_v26 = vld [vmem:[#allocation2 + $0x350] sm:$0xff] }
 0xa5d   :  { %v4426_v1 = vadd.f32 %v4418_v8, %v4384_v42  ;;  %v4447_v22 = vadd.f32 %v4439_v13, %v4405_v17  ;;  %v4364_v3 = vadd.f32 %v10165_v14, %v10121_v44  ;;  %v4419_v20 = vmul.f32 %v7452_v45, %v10151_v51  ;;  %v7456_v14 = vld [vmem:[#allocation2 + $0x330] sm:$0xff]  ;;  %v7463_v36 = vld [vmem:[#allocation2 + $0x360] sm:$0xff] }
 0xa5e   :  { %6422 = vmatmul.mubr.msk.f32.gmra.mxu1 %vm4511_vm7, %v4503_v31  ;;  %v4496_v32 = vadd.f32 %v4488_v33, %v4467_v16  ;;  %v4385_v21 = vadd.f32 %v10177_v55, %v4343_v27  ;;  %v4440_v47 = vmul.f32 %v7453_v34, %v10192_v38  ;;  %v4461_v56 = vmul.f32 %v7454_v15, %v10194_v0  ;;  %v11290_v55 = vld [vmem:[#allocation22_spill] sm:$0xff]  ;;  %v10282_v42 = vld [vmem:[#allocation2 + $0x390] ss:$0 sm:$0xff] }
 0xa5f   :  { %v4468_v30 = vadd.f32 %v4460_v5, %v4426_v1  ;;  %v4489_v37 = vadd.f32 %v4481_v54, %v4447_v22  ;;  %v4406_v23 = vadd.f32 %v10187_v29, %v4364_v3  ;;  %v4482_v44 = vmul.f32 %v7455_v61, %v10196_v9 }
 0xa60   :  { %v4504_v52 = vadd.f32 %v7456_v14, %v4496_v32  ;;  %v4427_v35 = vadd.f32 %v4419_v20, %v4385_v21  ;;  %v4344_v48 = vadd.f32 %v10147_v39, %v10097_v59  ;;  %v4365_v49 = vadd.f32 %v11290_v55, %v10123_v10  ;;  %v7460_v39 = vld [vmem:[#allocation2 + $0x340] sm:$0xff] }
 0xa61   :  { %v4497_v28 = vadd.f32 %v4489_v37, %v4468_v30  ;;  %v4448_v4 = vadd.f32 %v4440_v47, %v4406_v23  ;;  %v4420_v50 = vmul.f32 %v7457_v24, %v10151_v51  ;;  %v4441_v29 = vmul.f32 %v7458_v11, %v10192_v38 }
 0xa62   :  { %6424 = vmatprep.mubr.msk.f32.mxu1 %vm4511_vm7, %v4504_v52  ;;  %v4469_v58 = vadd.f32 %v4461_v56, %v4427_v35  ;;  %v4386_v57 = vadd.f32 %v11291_v46, %v4344_v48  ;;  %v4407_v6 = vadd.f32 %v11292_v25, %v4365_v49  ;;  %v4462_v59 = vmul.f32 %v7459_v40, %v10194_v0 }
 0xa63   :  { %v4505_v10 = vadd.f32 %v7460_v39, %v4497_v28  ;;  %v4490_v43 = vadd.f32 %v4482_v44, %v4448_v4  ;;  %v4483_v19 = vmul.f32 %v7461_v53, %v10196_v9  ;;  %v7584_v63 = vmov 0.0  }
 0xa64   :  { %v4428_v51 = vadd.f32 %v4420_v50, %v4386_v57  ;;  %v4449_v18 = vadd.f32 %v4441_v29, %v4407_v6  ;;  %4990 = vmatprep.subr.mxu0 %v7584_v63  ;;  %5075 = vmatprep.subr.mxu1 %v7584_v63 }
 0xa65   :  { %6425 = vmatmul.mubr.msk.f32.gmra.mxu1 %vm4511_vm7, %v4505_v10  ;;  %v4498_v38 = vadd.f32 %v4490_v43, %v4469_v58 }
 0xa66   :  { %v4470_v12 = vadd.f32 %v4462_v59, %v4428_v51  ;;  %v4491_v8 = vadd.f32 %v4483_v19, %v4449_v18 }
 0xa67   :  { %v4506_v0 = vadd.f32 %v7462_v26, %v4498_v38 }
 0xa68   :  { %v4499_v60 = vadd.f32 %v4491_v8, %v4470_v12 }
 0xa69   :  { %6427 = vmatprep.mubr.msk.f32.mxu1 %vm4511_vm7, %v4506_v0 }
 0xa6a   :  { %v4507_v62 = vadd.f32 %v7463_v36, %v4499_v60 }
 0xa6c   :  { %6428 = vmatmul.mubr.msk.f32.gmra.mxu1 %vm4511_vm7, %v4507_v62 }
 0xa94   :  { %v6408_v9 = vpop.f32.mrf.mxu1 }
 0xa95   :  { %v10321_v3 = vadd.f32 %v6408_v9, %v10282_v42 }
 0xa96   :  { %v4626_v13 = vpop.f32.mrf.mxu1 }
 0xa97   :  { %v10330_v45 = vadd.f32 %v4626_v13, %v10282_v42 }
 0xa98   :  { %v6411_v17 = vpop.f32.mrf.mxu1 }
 0xa99   :  { %v10285_v7 = vadd.f32 %v6411_v17, %v10282_v42 }
 0xa9a   :  { %v4636_v5 = vpop.f32.mrf.mxu1 }
 0xa9b   :  { %4726 = vrot.lane.b32.xlu0 %v10285_v7, %s11293_s20  ;;  %v10310_v22 = vadd.f32 %v4636_v5, %v10282_v42 }
 0xaa0   :  { %v6414_v2 = vpop.f32.mrf.mxu1 }
 0xaa1   :  { %v10290_v54 = vadd.f32 %v6414_v2, %v10282_v42 }
 0xaa2   :  { %v4646_v41 = vpop.f32.mrf.mxu1 }
 0xaa3   :  { %v10293_v31 = vadd.f32 %v4646_v41, %v10282_v42  ;;  %4732 = vrot.lane.b32.xlu0 %v10290_v54, %s11293_s20 }
 0xaa5   :  { %4729 = vrot.lane.b32.xlu1 %v10293_v31, %s11293_s20 }
 0xaa6   :  { %v6417_v16 = vpop.f32.mrf.mxu1 }
 0xaa7   :  { %v10300_v33 = vadd.f32 %v6417_v16, %v10282_v42 }
 0xaa8   :  { %v4656_v27 = vpop.f32.mrf.mxu1 }
 0xaa9   :  { %v10303_v1 = vadd.f32 %v4656_v27, %v10282_v42  ;;  %4738 = vrot.lane.b32.xlu0 %v10300_v33, %s11293_s20  ;;  %4991 = vmatpush1.msra.mxu0 %v10300_v33 }
 0xaaa   :  { %4992 = vmatprep.subr.mxu0 %v7584_v63 }
 0xaab   :  { %4993 = vmatpush1.msra.mxu0 %v10303_v1  ;;  %4735 = vrot.lane.b32.xlu1 %v10303_v1, %s11293_s20 }
 0xaac   :  { %4994 = vmatprep.subr.mxu0 %v7584_v63 }
 0xaad   :  { %4995 = vmatpush1.msra.mxu0 %v10290_v54  ;;  %4723 = vrot.lane.b32.xlu0 %v10310_v22, %s11293_s20 }
 0xaae   :  { %4996 = vmatprep.subr.mxu0 %v7584_v63 }
 0xaaf   :  { %4997 = vmatpush1.msra.mxu0 %v10293_v31 }
 0xab0   :  { %4998 = vmatprep.subr.mxu0 %v7584_v63 }
 0xab1   :  { %4999 = vmatpush1.msra.mxu0 %v10285_v7  ;;  %4720 = vrot.lane.b32.xlu0 %v10321_v3, %s11293_s20 }
 0xab2   :  { %5000 = vmatprep.subr.mxu0 %v7584_v63 }
 0xab3   :  { %5001 = vmatpush1.msra.mxu0 %v10310_v22 }
 0xab4   :  { %5002 = vmatprep.subr.mxu0 %v7584_v63 }
 0xab5   :  { %5003 = vmatpush1.msra.mxu0 %v10321_v3  ;;  %4717 = vrot.lane.b32.xlu0 %v10330_v45, %s11293_s20 }
 0xab6   :  { %5004 = vmatprep.subr.mxu0 %v7584_v63 }
 0xab7   :  { %5005 = vmatpush1.msra.mxu0 %v10330_v45 }
 0xab8   :  { %5006 = vmatprep.subr.mxu0 %v7584_v63 }
 0xb0d   :  { %v4727_v21 = vpop.permute.xlu0 %4726 }
 0xb0e   :  { %v4728_v44 = vsel %vm470_vm11, %v4727_v21, %v10285_v7 }
 0xb15   :  { %v4733_v15 = vpop.permute.xlu0 %4732 }
 0xb16   :  { %v4734_v52 = vsel %vm470_vm11, %v4733_v15, %v10290_v54 }
 0xb17   :  { %v6420_v20 = vpop.f32.mrf.mxu1  ;;  %v4730_v6 = vpop.permute.xlu1 %4729 }
 0xb18   :  { %v10346_v30 = vadd.f32 %v6420_v20, %v10282_v42  ;;  %v4731_v40 = vsel %vm470_vm11, %v4730_v6, %v10293_v31 }
 0xb19   :  { %v4666_v32 = vpop.f32.mrf.mxu1 }
 0xb1a   :  { %v10401_v57 = vadd.f32 %v4666_v32, %v10282_v42 }
 0xb1b   :  { %v4739_v61 = vpop.permute.xlu0 %4738 }
 0xb1c   :  { %v4740_v4 = vsel %vm470_vm11, %v4739_v61, %v10300_v33 }
 0xb1d   :  { %v4736_v59 = vpop.permute.xlu1 %4735 }
 0xb1e   :  { %v6423_v34 = vpop.f32.mrf.mxu1  ;;  %v4737_v39 = vsel %vm470_vm11, %v4736_v59, %v10303_v1  ;;  %v4713_v59 = vld [vmem:[#allocation2 + $0x3e0] sm:$0xff] }
 0xb1f   :  { %v10341_v47 = vadd.f32 %v6423_v34, %v10282_v42  ;;  %v4724_v48 = vpop.permute.xlu0 %4723 }
 0xb20   :  { %v4676_v56 = vpop.f32.mrf.mxu1  ;;  %v4725_v11 = vsel %vm470_vm11, %v4724_v48, %v10310_v22 }
 0xb21   :  { %4750 = vrot.lane.b32.xlu0 %v10341_v47, %s11293_s20  ;;  %v10389_v29 = vadd.f32 %v4676_v56, %v10282_v42 }
 0xb23   :  { %v4721_v24 = vpop.permute.xlu0 %4720 }
 0xb24   :  { %v4722_v58 = vsel %vm470_vm11, %v4721_v24, %v10321_v3 }
 0xb25   :  { %v6426_v37 = vpop.f32.mrf.mxu1  ;;  %4744 = vrot.lane.b32.xlu0 %v10346_v30, %s11293_s20 }
 0xb26   :  { %v10351_v23 = vadd.f32 %v6426_v37, %v10282_v42 }
 0xb27   :  { %v4686_v14 = vpop.f32.mrf.mxu1  ;;  %v4718_v46 = vpop.permute.xlu0 %4717 }
 0xb28   :  { %4756 = vrot.lane.b32.xlu1 %v10351_v23, %s11293_s20  ;;  %v10377_v50 = vadd.f32 %v4686_v14, %v10282_v42  ;;  %v4719_v25 = vsel %vm470_vm11, %v4718_v46, %v10330_v45 }
 0xb29   :  { %4771 = vrot.lane.b32.xlu0 %v4728_v44, %s11293_s20 }
 0xb2c   :  { %v6429_v35 = vpop.f32.mrf.mxu1 }
 0xb2d   :  { %v10361_v55 = vadd.f32 %v6429_v35, %v10282_v42  ;;  %4775 = vrot.lane.b32.xlu0 %v4734_v52, %s11293_s20 }
 0xb2e   :  { %v4696_v49 = vpop.f32.mrf.mxu1 }
 0xb2f   :  { %v10365_v28 = vadd.f32 %v4696_v49, %v10282_v42  ;;  %4762 = vrot.lane.b32.xlu1 %v10361_v55, %s11293_s20  ;;  %5076 = vmatpush1.msra.mxu1 %v10361_v55 }
 0xb30   :  { %5077 = vmatprep.subr.mxu1 %v7584_v63 }
 0xb31   :  { %5078 = vmatpush1.msra.mxu1 %v10365_v28  ;;  %4779 = vrot.lane.b32.xlu0 %v4740_v4, %s11293_s20 }
 0xb32   :  { %5079 = vmatprep.subr.mxu1 %v7584_v63 }
 0xb33   :  { %4759 = vrot.lane.b32.xlu1 %v10365_v28, %s11293_s20  ;;  %5080 = vmatpush1.msra.mxu1 %v10351_v23 }
 0xb34   :  { %5081 = vmatprep.subr.mxu1 %v7584_v63 }
 0xb35   :  { %5082 = vmatpush1.msra.mxu1 %v10377_v50  ;;  %4769 = vrot.lane.b32.xlu0 %v4725_v11, %s11293_s20 }
 0xb36   :  { %5083 = vmatprep.subr.mxu1 %v7584_v63 }
 0xb37   :  { %4753 = vrot.lane.b32.xlu1 %v10377_v50, %s11293_s20  ;;  %5084 = vmatpush1.msra.mxu1 %v10341_v47 }
 0xb38   :  { %5085 = vmatprep.subr.mxu1 %v7584_v63 }
 0xb39   :  { %5086 = vmatpush1.msra.mxu1 %v10389_v29  ;;  %4767 = vrot.lane.b32.xlu0 %v4722_v58, %s11293_s20 }
 0xb3a   :  { %5087 = vmatprep.subr.mxu1 %v7584_v63 }
 0xb3b   :  { %4747 = vrot.lane.b32.xlu1 %v10389_v29, %s11293_s20  ;;  %5088 = vmatpush1.msra.mxu1 %v10346_v30 }
 0xb3c   :  { %5089 = vmatprep.subr.mxu1 %v7584_v63 }
 0xb3d   :  { %5090 = vmatpush1.msra.mxu1 %v10401_v57  ;;  %4765 = vrot.lane.b32.xlu0 %v4719_v25, %s11293_s20  ;;  %v4706_v25 = vld [vmem:[#allocation2 + $0x3a8] sm:$0xff] }
 0xb3e   :  { %5091 = vmatprep.subr.mxu1 %v7584_v63  ;;  %5954 = vmatprep.mubr.msk.f32.mxu0 %vm4977_vm8, %v4706_v25 }
 0xb3f   :  { %4741 = vrot.lane.b32.xlu1 %v10401_v57, %s11293_s20  ;;  %5974 = vmatprep.mubr.msk.f32.mxu1 %vm4977_vm8, %v4706_v25 }
 0xb43   :  { %4773 = vrot.lane.b32.xlu1 %v4731_v40, %s11293_s20 }
 0xb47   :  { %4777 = vrot.lane.b32.xlu1 %v4737_v39, %s11293_s20  ;;  %v4714_v39 = vld [vmem:[#allocation2 + $0x3f0] sm:$0xff] }
 0xb93   :  { %v4751_v10 = vpop.permute.xlu0 %4750 }
 0xb94   :  { %v4752_v43 = vsel %vm470_vm11, %v4751_v10, %v10341_v47  ;;  %v4715_v10 = vld [vmem:[#allocation2 + $0x400] sm:$0xff] }
 0xb95   :  { %4787 = vrot.lane.b32.xlu0 %v4752_v43, %s11293_s20  ;;  %v4716_v43 = vld [vmem:[#allocation2 + $0x410] sm:$0xff] }
 0xb97   :  { %v4745_v53 = vpop.permute.xlu0 %4744 }
 0xb98   :  { %v4746_v19 = vsel %vm470_vm11, %v4745_v53, %v10346_v30 }
 0xb99   :  { %4783 = vrot.lane.b32.xlu0 %v4746_v19, %s11293_s20 }
 0xb9a   :  { %v4757_v51 = vpop.permute.xlu1 %4756 }
 0xb9b   :  { %v4758_v18 = vsel %vm470_vm11, %v4757_v51, %v10351_v23  ;;  %v4772_v38 = vpop.permute.xlu0 %4771 }
 0xb9c   :  { %4791 = vrot.lane.b32.xlu1 %v4758_v18, %s11293_s20  ;;  %v4800_v20 = vsel %vm470_vm11, %v4772_v38, %v10285_v7 }
 0xb9f   :  { %v4776_v12 = vpop.permute.xlu0 %4775 }
 0xba0   :  { %v4802_v32 = vsel %vm470_vm11, %v4776_v12, %v10290_v54 }
 0xba1   :  { %v4763_v8 = vpop.permute.xlu1 %4762 }
 0xba2   :  { %v4764_v26 = vsel %vm470_vm11, %v4763_v8, %v10361_v55 }
 0xba3   :  { %4795 = vrot.lane.b32.xlu1 %v4764_v26, %s11293_s20  ;;  %v4780_v0 = vpop.permute.xlu0 %4779 }
 0xba4   :  { %v4804_v7 = vsel %vm470_vm11, %v4780_v0, %v10300_v33 }
 0xba5   :  { %v4760_v60 = vpop.permute.xlu1 %4759 }
 0xba6   :  { %v4761_v36 = vsel %vm470_vm11, %v4760_v60, %v10365_v28 }
 0xba7   :  { %4793 = vrot.lane.b32.xlu1 %v4761_v36, %s11293_s20  ;;  %v4770_v62 = vpop.permute.xlu0 %4769 }
 0xba9   :  { %v4754_v9 = vpop.permute.xlu1 %4753 }
 0xbaa   :  { %v4755_v13 = vsel %vm470_vm11, %v4754_v9, %v10377_v50 }
 0xbab   :  { %4789 = vrot.lane.b32.xlu1 %v4755_v13, %s11293_s20  ;;  %v4768_v42 = vpop.permute.xlu0 %4767 }
 0xbac   :  { %v10440_v17 = vsel %vm470_vm11, %v4768_v42, %v10321_v3 }
 0xbad   :  { %v4748_v5 = vpop.permute.xlu1 %4747  ;;  %4831 = vrot.lane.b32.xlu0 %v10440_v17, %s11268_s11 }
 0xbae   :  { %v4749_v2 = vsel %vm470_vm11, %v4748_v5, %v10389_v29  ;;  %v4705_v5 = vld [vmem:[#allocation2 + $0x3a0] sm:$0xff] }
 0xbaf   :  { %4785 = vrot.lane.b32.xlu1 %v4749_v2, %s11293_s20  ;;  %v4766_v41 = vpop.permute.xlu0 %4765 }
 0xbb0   :  { %v10449_v16 = vsel %vm470_vm11, %v4766_v41, %v10330_v45  ;;  %v4799_v45 = vsel %vm470_vm11, %v4770_v62, %v10310_v22  ;;  %v4708_v41 = vld [vmem:[#allocation2 + $0x3b8] sm:$0xff] }
 0xbb1   :  { %v4742_v27 = vpop.permute.xlu1 %4741  ;;  %4829 = vrot.lane.b32.xlu0 %v10449_v16, %s11268_s11 }
 0xbb2   :  { %v4743_v3 = vsel %vm470_vm11, %v4742_v27, %v10401_v57 }
 0xbb3   :  { %4781 = vrot.lane.b32.xlu1 %v4743_v3, %s11293_s20 }
 0xbb5   :  { %4835 = vrot.lane.b32.xlu0 %v4800_v20, %s11268_s11  ;;  %v4774_v21 = vpop.permute.xlu1 %4773 }
 0xbb6   :  { %v4801_v34 = vsel %vm470_vm11, %v4774_v21, %v10293_v31 }
 0xbb7   :  { %4903 = vrot.lane.b32.xlu1 %v4802_v32, %s7536_s3 }
 0xbb9   :  { %4833 = vrot.lane.b32.xlu0 %v4799_v45, %s11268_s11  ;;  %v4778_v15 = vpop.permute.xlu1 %4777 }
 0xbba   :  { %v4803_v54 = vsel %vm470_vm11, %v4778_v15, %v10303_v1  ;;  %v5203_v15 = vld [vmem:[#allocation2 + $0x450] sm:$0xff] }
 0xbbb   :  { %4837 = vrot.lane.b32.xlu1 %v4801_v34, %s11268_s11 }
 0xbbd   :  { %4839 = vrot.lane.b32.xlu0 %v4802_v32, %s11268_s11  ;;  %v4709_v32 = vld [vmem:[#allocation2 + $0x3c0] sm:$0xff] }
 0xbbf   :  { %4907 = vrot.lane.b32.xlu1 %v4804_v7, %s7536_s3 }
 0xbc1   :  { %4843 = vrot.lane.b32.xlu0 %v4804_v7, %s11268_s11  ;;  %v4711_v7 = vld [vmem:[#allocation2 + $0x3d0] sm:$0xff] }
 0xbc3   :  { %4841 = vrot.lane.b32.xlu1 %v4803_v54, %s11268_s11 }
 0xbc7   :  { %4905 = vrot.lane.b32.xlu1 %v4803_v54, %s7536_s3  ;;  %v5202_v54 = vld [vmem:[#allocation2 + $0x440] sm:$0xff] }
 0xc07   :  { %v4788_v31 = vpop.permute.xlu0 %4787 }
 0xc08   :  { %v4808_v11 = vsel %vm470_vm11, %v4788_v31, %v10341_v47  ;;  %v5201_v31 = vld [vmem:[#allocation2 + $0x430] sm:$0xff] }
 0xc0b   :  { %v4784_v22 = vpop.permute.xlu0 %4783 }
 0xc0c   :  { %v10479_v56 = vsel %vm470_vm11, %v4784_v22, %v10346_v30  ;;  %v5200_v22 = vld [vmem:[#allocation2 + $0x420] sm:$0xff] }
 0xc0d   :  { %4847 = vrot.lane.b32.xlu0 %v10479_v56, %s11268_s11 }
 0xc0e   :  { %v4792_v33 = vpop.permute.xlu1 %4791 }
 0xc0f   :  { %v4810_v37 = vsel %vm470_vm11, %v4792_v33, %v10351_v23 }
 0xc10   :  { %4855 = vrot.lane.b32.xlu1 %v4810_v37, %s11268_s11 }
 0xc15   :  { %v4796_v1 = vpop.permute.xlu1 %4795 }
 0xc16   :  { %v4812_v35 = vsel %vm470_vm11, %v4796_v1, %v10361_v55 }
 0xc19   :  { %v4794_v61 = vpop.permute.xlu1 %4793 }
 0xc1a   :  { %v4811_v23 = vsel %vm470_vm11, %v4794_v61, %v10365_v28 }
 0xc1d   :  { %v4790_v44 = vpop.permute.xlu1 %4789 }
 0xc1e   :  { %v4809_v14 = vsel %vm470_vm11, %v4790_v44, %v10377_v50 }
 0xc1f   :  { %4853 = vrot.lane.b32.xlu1 %v4809_v14, %s11268_s11  ;;  %v4832_v52 = vpop.permute.xlu0 %4831 }
 0xc21   :  { %v4786_v30 = vpop.permute.xlu1 %4785 }
 0xc22   :  { %v4807_v28 = vsel %vm470_vm11, %v4786_v30, %v10389_v29 }
 0xc23   :  { %4859 = vrot.lane.b32.xlu1 %v4812_v35, %s11268_s11  ;;  %v4830_v48 = vpop.permute.xlu0 %4829 }
 0xc25   :  { %v4782_v49 = vpop.permute.xlu1 %4781 }
 0xc26   :  { %v4805_v4 = vsel %vm470_vm11, %v4782_v49, %v10401_v57 }
 0xc27   :  { %4857 = vrot.lane.b32.xlu1 %v4811_v23, %s11268_s11  ;;  %4845 = vrot.lane.b32.xlu0 %v4805_v4, %s11268_s11  ;;  %v4836_v24 = vpop.permute.xlu0 %4835 }
 0xc29   :  { %v4904_v50 = vpop.permute.xlu1 %4903 }
 0xc2b   :  { %4901 = vrot.lane.b32.xlu1 %v4801_v34, %s7536_s3  ;;  %4851 = vrot.lane.b32.xlu0 %v4808_v11, %s11268_s11  ;;  %v4834_v55 = vpop.permute.xlu0 %4833 }
 0xc2d   :  { %v4838_v58 = vpop.permute.xlu1 %4837 }
 0xc2f   :  { %4923 = vrot.lane.b32.xlu1 %v4812_v35, %s7536_s3  ;;  %4849 = vrot.lane.b32.xlu0 %v4807_v28, %s11268_s11  ;;  %v4840_v46 = vpop.permute.xlu0 %4839  ;;  %s11295_s11 = smov 1  }
 0xc31   :  { %v4908_v57 = vpop.permute.xlu1 %4907 }
 0xc33   :  { %4919 = vrot.lane.b32.xlu1 %v4810_v37, %s7536_s3  ;;  %4899 = vrot.lane.b32.xlu0 %v4800_v20, %s7536_s3  ;;  %v4844_v47 = vpop.permute.xlu0 %4843  ;;  %v4710_v20 = vld [vmem:[#allocation2 + $0x3c8] sm:$0xff] }
 0xc34   :  { %5938 = vmatpush1.msk.msra.mxu0 %vm60_vm2, %v4844_v47 }
 0xc35   :  { %v4842_v40 = vpop.permute.xlu1 %4841  ;;  %5008 = vmatprep.subr.mxu0 %v7584_v63 }
 0xc36   :  { %5939 = vmatpush1.msk.msra.mxu0 %vm60_vm2, %v4842_v40 }
 0xc37   :  { %4921 = vrot.lane.b32.xlu1 %v4811_v23, %s7536_s3  ;;  %4897 = vrot.lane.b32.xlu0 %v4799_v45, %s7536_s3  ;;  %v4712_v45 = vld [vmem:[#allocation2 + $0x3d8] sm:$0xff] }
 0xc38   :  { %5010 = vmatprep.subr.mxu0 %v7584_v63 }
 0xc39   :  { %5940 = vmatpush1.msk.msra.mxu0 %vm60_vm2, %v4840_v46  ;;  %v4906_v29 = vpop.permute.xlu1 %4905 }
 0xc3a   :  { %5012 = vmatprep.subr.mxu0 %v7584_v63 }
 0xc3b   :  { %4917 = vrot.lane.b32.xlu1 %v4809_v14, %s7536_s3  ;;  %4895 = vrot.lane.b32.xlu0 %v10440_v17, %s7536_s3 }
 0xc3c   :  { %5941 = vmatpush1.msk.msra.mxu0 %vm60_vm2, %v4838_v58 }
 0xc3d   :  { %5014 = vmatprep.subr.mxu0 %v7584_v63 }
 0xc3e   :  { %5942 = vmatpush1.msk.msra.mxu0 %vm60_vm2, %v4836_v24 }
 0xc3f   :  { %4913 = vrot.lane.b32.xlu1 %v4807_v28, %s7536_s3  ;;  %4893 = vrot.lane.b32.xlu0 %v10449_v16, %s7536_s3  ;;  %v4707_v16 = vld [vmem:[#allocation2 + $0x3b0] sm:$0xff] }
 0xc40   :  { %5016 = vmatprep.subr.mxu0 %v7584_v63 }
 0xc41   :  { %5943 = vmatpush1.msk.msra.mxu0 %vm60_vm2, %v4834_v55 }
 0xc42   :  { %5018 = vmatprep.subr.mxu0 %v7584_v63 }
 0xc43   :  { %4909 = vrot.lane.b32.xlu1 %v4805_v4, %s7536_s3  ;;  %4915 = vrot.lane.b32.xlu0 %v4808_v11, %s7536_s3 }
 0xc44   :  { %5944 = vmatpush1.msk.msra.mxu0 %vm60_vm2, %v4832_v52 }
 0xc45   :  { %5020 = vmatprep.subr.mxu0 %v7584_v63 }
 0xc46   :  { %5945 = vmatpush1.msk.msra.mxu0 %vm60_vm2, %v4830_v48 }
 0xc47   :  { %4911 = vrot.lane.b32.xlu0 %v10479_v56, %s7536_s3  ;;  %5038 = vmatprep.subr.mxu0 %v7584_v63 }
 0xc48   :  { %5946 = vmatpush2.msk.msra.mxu0 %vm62_vm13, %v4908_v57  ;;  %4964 = vperm.xlu1 %7008, %v4714_v39  }
 0xc49   :  { %5040 = vmatprep.subr.mxu0 %v7584_v63 }
 0xc4a   :  { %5947 = vmatpush2.msk.msra.mxu0 %vm62_vm13, %v4906_v29 }
 0xc4b   :  { %5042 = vmatprep.subr.mxu0 %v7584_v63  ;;  %4959 = vperm.xlu0 %7007, %v4713_v59  }
 0xc4c   :  { %5948 = vmatpush2.msk.msra.mxu0 %vm62_vm13, %v4904_v50  ;;  %4969 = vperm.xlu1 %7008, %v4715_v10  }
 0xc4d   :  { %5044 = vmatprep.subr.mxu0 %v7584_v63 }
 0xc4f   :  { %4974 = vperm.xlu0 %7007, %v4716_v43  }
 0xc7f   :  { %v4848_v51 = vpop.permute.xlu0 %4847 }
 0xc82   :  { %v4856_v53 = vpop.permute.xlu1 %4855 }
 0xc91   :  { %v4854_v19 = vpop.permute.xlu1 %4853 }
 0xc95   :  { %v4860_v18 = vpop.permute.xlu1 %4859 }
 0xc96   :  { %5958 = vmatpush1.msk.msra.mxu1 %vm60_vm2, %v4860_v18 }
 0xc97   :  { %5093 = vmatprep.subr.mxu1 %v7584_v63 }
 0xc99   :  { %v4858_v38 = vpop.permute.xlu1 %4857  ;;  %v4846_v12 = vpop.permute.xlu0 %4845 }
 0xc9a   :  { %5959 = vmatpush1.msk.msra.mxu1 %vm60_vm2, %v4858_v38 }
 0xc9b   :  { %5095 = vmatprep.subr.mxu1 %v7584_v63 }
 0xc9c   :  { %5960 = vmatpush1.msk.msra.mxu1 %vm60_vm2, %v4856_v53 }
 0xc9d   :  { %5097 = vmatprep.subr.mxu1 %v7584_v63  ;;  %v4902_v8 = vpop.permute.xlu1 %4901  ;;  %v4852_v26 = vpop.permute.xlu0 %4851 }
 0xc9e   :  { %5949 = vmatpush2.msk.msra.mxu0 %vm62_vm13, %v4902_v8  ;;  %5961 = vmatpush1.msk.msra.mxu1 %vm60_vm2, %v4854_v19 }
 0xc9f   :  { %5099 = vmatprep.subr.mxu1 %v7584_v63  ;;  %5046 = vmatprep.subr.mxu0 %v7584_v63 }
 0xca0   :  { %5962 = vmatpush1.msk.msra.mxu1 %vm60_vm2, %v4852_v26 }
 0xca1   :  { %v4924_v0 = vpop.permute.xlu1 %4923  ;;  %5101 = vmatprep.subr.mxu1 %v7584_v63  ;;  %v4850_v60 = vpop.permute.xlu0 %4849 }
 0xca2   :  { %5963 = vmatpush1.msk.msra.mxu1 %vm60_vm2, %v4850_v60 }
 0xca3   :  { %5103 = vmatprep.subr.mxu1 %v7584_v63 }
 0xca4   :  { %5964 = vmatpush1.msk.msra.mxu1 %vm60_vm2, %v4848_v51 }
 0xca5   :  { %v4920_v36 = vpop.permute.xlu1 %4919  ;;  %5105 = vmatprep.subr.mxu1 %v7584_v63  ;;  %v4900_v62 = vpop.permute.xlu0 %4899 }
 0xca6   :  { %5950 = vmatpush2.msk.msra.mxu0 %vm62_vm13, %v4900_v62  ;;  %5965 = vmatpush1.msk.msra.mxu1 %vm60_vm2, %v4846_v12 }
 0xca7   :  { %5123 = vmatprep.subr.mxu1 %v7584_v63  ;;  %5048 = vmatprep.subr.mxu0 %v7584_v63 }
 0xca8   :  { %5966 = vmatpush2.msk.msra.mxu1 %vm62_vm13, %v4924_v0 }
 0xca9   :  { %v4922_v9 = vpop.permute.xlu1 %4921  ;;  %5125 = vmatprep.subr.mxu1 %v7584_v63  ;;  %v4898_v13 = vpop.permute.xlu0 %4897 }
 0xcaa   :  { %5951 = vmatpush2.msk.msra.mxu0 %vm62_vm13, %v4898_v13  ;;  %5967 = vmatpush2.msk.msra.mxu1 %vm62_vm13, %v4922_v9 }
 0xcab   :  { %5127 = vmatprep.subr.mxu1 %v7584_v63  ;;  %5050 = vmatprep.subr.mxu0 %v7584_v63 }
 0xcac   :  { %5968 = vmatpush2.msk.msra.mxu1 %vm62_vm13, %v4920_v36 }
 0xcad   :  { %v4918_v42 = vpop.permute.xlu1 %4917  ;;  %5129 = vmatprep.subr.mxu1 %v7584_v63  ;;  %v4896_v17 = vpop.permute.xlu0 %4895 }
 0xcae   :  { %5952 = vmatpush2.msk.msra.mxu0 %vm62_vm13, %v4896_v17  ;;  %5969 = vmatpush2.msk.msra.mxu1 %vm62_vm13, %v4918_v42 }
 0xcaf   :  { %5052 = vmatprep.subr.mxu0 %v7584_v63  ;;  %5131 = vmatprep.subr.mxu1 %v7584_v63 }
 0xcb1   :  { %v4894_v2 = vpop.permute.xlu0 %4893  ;;  %v4914_v27 = vpop.permute.xlu1 %4913 }
 0xcb2   :  { %5953 = vmatpush2.msk.msra.mxu0 %vm62_vm13, %v4894_v2 }
 0xcb3   :  { %5055 = vmatmul.mubr.f32.vlgmr.msra.gmra.mxu0 %v4705_v5  ;;  %6430 = vmatprep.subr.mxu0 %v5203_v15 }
 0xcb4   :  { %5955 = vmatprep.mubr.msk.f32.mxu0 %vm4977_vm8, %v4708_v41  ;;  %6431 = vmatpush3.msra.mxu0 %v5203_v15 }
 0xcb5   :  { %v4916_v3 = vpop.permute.xlu0 %4915  ;;  %v4910_v34 = vpop.permute.xlu1 %4909  ;;  %6432 = vmatprep.subr.mxu0 %v5202_v54 }
 0xcb6   :  { %5970 = vmatpush2.msk.msra.mxu1 %vm62_vm13, %v4916_v3  ;;  %6433 = vmatpush3.msra.mxu0 %v5202_v54 }
 0xcb7   :  { %5060 = vmatmul.mubr.f32.gmra.mxu0 %v4707_v16  ;;  %5133 = vmatprep.subr.mxu1 %v7584_v63 }
 0xcb8   :  { %5971 = vmatpush2.msk.msra.mxu1 %vm62_vm13, %v4914_v27  ;;  %5956 = vmatprep.mubr.msk.f32.mxu0 %vm4977_vm8, %v4710_v20 }
 0xcb9   :  { %5135 = vmatprep.subr.mxu1 %v7584_v63  ;;  %v4912_v21 = vpop.permute.xlu0 %4911  ;;  %6434 = vmatprep.subr.mxu0 %v5201_v31 }
 0xcba   :  { %5972 = vmatpush2.msk.msra.mxu1 %vm62_vm13, %v4912_v21  ;;  %6435 = vmatpush3.msra.mxu0 %v5201_v31  ;;  %v5204_v31 = vld [vmem:[#allocation2 + $0x460] ss:$0 sm:$0xff] }
 0xcbb   :  { %5065 = vmatmul.mubr.f32.gmra.mxu0 %v4709_v32  ;;  %5137 = vmatprep.subr.mxu1 %v7584_v63 }
 0xcbc   :  { %5973 = vmatpush2.msk.msra.mxu1 %vm62_vm13, %v4910_v34  ;;  %5957 = vmatprep.mubr.msk.f32.mxu0 %vm4977_vm8, %v4712_v45 }
 0xcbd   :  { %5140 = vmatmul.mubr.f32.vlgmr.msra.gmra.mxu1 %v4705_v5  ;;  %6436 = vmatprep.subr.mxu0 %v5200_v22 }
 0xcbe   :  { %5975 = vmatprep.mubr.msk.f32.mxu1 %vm4977_vm8, %v4708_v41  ;;  %6437 = vmatpush3.msra.mxu0 %v5200_v22 }
 0xcbf   :  { %5070 = vmatmul.mubr.f32.gmra.mxu0 %v4711_v7 }
 0xcc1   :  { %5145 = vmatmul.mubr.f32.gmra.mxu1 %v4707_v16 }
 0xcc2   :  { %5976 = vmatprep.mubr.msk.f32.mxu1 %vm4977_vm8, %v4710_v20 }
 0xcc3   :  { %v4965_v37 = vpop.permute.xlu1 %4964 }
 0xcc5   :  { %5150 = vmatmul.mubr.f32.gmra.mxu1 %v4709_v32 }
 0xcc6   :  { %5977 = vmatprep.mubr.msk.f32.mxu1 %vm4977_vm8, %v4712_v45  ;;  %v4960_v56 = vpop.permute.xlu0 %4959 }
 0xcc7   :  { %v4970_v35 = vpop.permute.xlu1 %4969 }
 0xcc9   :  { %5155 = vmatmul.mubr.f32.gmra.mxu1 %v4711_v7 }
 0xcca   :  { %v4975_v11 = vpop.permute.xlu0 %4974 }
 0xd73   :  { %v5056_v33 = vpop.f32.mrf.mxu0 }
 0xd74   :  { %v5057_v1 = vadd.f32 %v5056_v33, %v4960_v56 }
 0xd75   :  { %v5058_v61 = vpop.f32.mrf.mxu0 }
 0xd76   :  { %v5168_v44 = vmul.f32 1.442695, %v5057_v1  ;;  %vm5160_vm11 = vcmp.gt.f32.partialorder %v5057_v1, 0.0 }
 0xd77   :  { %v5061_v14 = vpop.f32.mrf.mxu0 }
 0xd78   :  { %7057 = vpow2.f32 %v5168_v44  ;;  %v5062_v52 = vadd.f32 %v5061_v14, %v4965_v37 }
 0xd79   :  { %v5063_v30 = vpop.f32.mrf.mxu0 }
 0xd7a   :  { %v5170_v48 = vmul.f32 1.442695, %v5062_v52  ;;  %vm5161_vm13 = vcmp.gt.f32.partialorder %v5062_v52, 0.0 }
 0xd7b   :  { %v5066_v49 = vpop.f32.mrf.mxu0 }
 0xd7c   :  { %7059 = vpow2.f32 %v5170_v48  ;;  %v5067_v23 = vadd.f32 %v5066_v49, %v4970_v35 }
 0xd7d   :  { %v5068_v4 = vpop.f32.mrf.mxu0  ;;  %v5141_v24 = vpop.f32.mrf.mxu1 }
 0xd7e   :  { %v5172_v50 = vmul.f32 1.442695, %v5067_v23  ;;  %v5142_v55 = vadd.f32 %v5141_v24, %v4960_v56  ;;  %vm5162_vm9 = vcmp.gt.f32.partialorder %v5067_v23, 0.0  ;;  %v5334_v4 = vld [vmem:[#allocation2 + $0x470] sm:$0xff] }
 0xd7f   :  { %v5071_v58 = vpop.f32.mrf.mxu0  ;;  %v5143_v28 = vpop.f32.mrf.mxu1  ;;  %6504 = vmatprep.mubr.msk.f32.mxu1 %vm633_vm12, %v5334_v4 }
 0xd80   :  { %7061 = vpow2.f32 %v5172_v50  ;;  %v5176_v46 = vmul.f32 1.442695, %v5142_v55  ;;  %v5072_v57 = vadd.f32 %v5071_v58, %v4975_v11  ;;  %vm5164_vm15 = vcmp.gt.f32.partialorder %v5142_v55, 0.0  ;;  %v5340_v58 = vld [vmem:[#allocation2 + $0x4d0] sm:$0xff] }
 0xd81   :  { %v5073_v25 = vpop.f32.mrf.mxu0  ;;  %v5146_v47 = vpop.f32.mrf.mxu1  ;;  %v5338_v28 = vld [vmem:[#allocation2 + $0x4b0] sm:$0xff] }
 0xd82   :  { %7063 = vpow2.f32 %v5176_v46  ;;  %v5174_v40 = vmul.f32 1.442695, %v5072_v57  ;;  %v5147_v29 = vadd.f32 %v5146_v47, %v4965_v37  ;;  %vm5163_vm10 = vcmp.gt.f32.partialorder %v5072_v57, 0.0 }
 0xd83   :  { %v5148_v59 = vpop.f32.mrf.mxu1 }
 0xd84   :  { %7065 = vpow2.f32 %v5174_v40  ;;  %v5178_v39 = vmul.f32 1.442695, %v5147_v29  ;;  %vm5165_vm0 = vcmp.gt.f32.partialorder %v5147_v29, 0.0 }
 0xd85   :  { %v7058_v10 = vpop.eup %7057  ;;  %v5151_v43 = vpop.f32.mrf.mxu1 }
 0xd86   :  { %7067 = vpow2.f32 %v5178_v39  ;;  %v5152_v53 = vadd.f32 %v5151_v43, %v4970_v35  ;;  %v5978_v19 = vadd.f32 -1.0, %v7058_v10 }
 0xd87   :  { %v5153_v51 = vpop.f32.mrf.mxu1 }
 0xd88   :  { %v5180_v18 = vmul.f32 1.442695, %v5152_v53  ;;  %v5192_v38 = vsel %vm5160_vm11, %v5057_v1, %v5978_v19  ;;  %vm5166_vm3 = vcmp.gt.f32.partialorder %v5152_v53, 0.0 }
 0xd89   :  { %v7060_v12 = vpop.eup %7059  ;;  %v5156_v8 = vpop.f32.mrf.mxu1  ;;  %6438 = vmatprep.mubr.msk.f32.mxu0 %vm873_vm14, %v5192_v38  ;;  %v5336_v38 = vld [vmem:[#allocation2 + $0x490] sm:$0xff] }
 0xd8a   :  { %v5979_v26 = vadd.f32 -1.0, %v7060_v12  ;;  %7069 = vpow2.f32 %v5180_v18  ;;  %v5157_v0 = vadd.f32 %v5156_v8, %v4975_v11  ;;  %v5341_v11 = vld [vmem:[#allocation2 + $0x4e0] sm:$0xff] }
 0xd8b   :  { %v5158_v60 = vpop.f32.mrf.mxu1  ;;  %v5335_v18 = vld [vmem:[#allocation2 + $0x480] sm:$0xff] }
 0xd8c   :  { %v5193_v36 = vsel %vm5161_vm13, %v5062_v52, %v5979_v26  ;;  %v5182_v62 = vmul.f32 1.442695, %v5157_v0  ;;  %vm5167_vm4 = vcmp.gt.f32.partialorder %v5157_v0, 0.0  ;;  %v5337_v8 = vld [vmem:[#allocation2 + $0x4a0] sm:$0xff] }
 0xd8d   :  { %v7062_v9 = vpop.eup %7061  ;;  %6439 = vmatmul.mubr.msk.f32.vlgmr.msra.gmra.mxu0 %vm873_vm14, %v5193_v36 }
 0xd8e   :  { %7071 = vpow2.f32 %v5182_v62  ;;  %v5980_v13 = vadd.f32 -1.0, %v7062_v9 }
 0xd8f   :  { %v7064_v42 = vpop.eup %7063 }
 0xd90   :  { %v5194_v17 = vsel %vm5162_vm9, %v5067_v23, %v5980_v13  ;;  %v5982_v2 = vadd.f32 -1.0, %v7064_v42  ;;  %vm7585_vm9 = vmmov 0  }
 0xd91   :  { %v7066_v5 = vpop.eup %7065  ;;  %6441 = vmatprep.mubr.msk.f32.mxu0 %vm873_vm14, %v5194_v17 }
 0xd92   :  { %v5981_v41 = vadd.f32 -1.0, %v7066_v5  ;;  %v5196_v20 = vsel %vm5164_vm15, %v5142_v55, %v5982_v2  ;;  %v5339_v55 = vld [vmem:[#allocation2 + $0x4c0] sm:$0xff] }
 0xd93   :  { %v7068_v16 = vpop.eup %7067 }
 0xd94   :  { %v5195_v27 = vsel %vm5163_vm10, %v5072_v57, %v5981_v41  ;;  %v5983_v3 = vadd.f32 -1.0, %v7068_v16 }
 0xd95   :  { %6442 = vmatmul.mubr.msk.f32.gmra.mxu0 %vm873_vm14, %v5195_v27 }
 0xd96   :  { %6444 = vmatprep.mubr.msk.f32.mxu0 %vm873_vm14, %v5196_v20  ;;  %v5197_v21 = vsel %vm5165_vm0, %v5147_v29, %v5983_v3 }
 0xd97   :  { %v7070_v32 = vpop.eup %7069 }
 0xd98   :  { %v5984_v45 = vadd.f32 -1.0, %v7070_v32 }
 0xd99   :  { %6445 = vmatmul.mubr.msk.f32.gmra.mxu0 %vm873_vm14, %v5197_v21 }
 0xd9a   :  { %v5198_v34 = vsel %vm5166_vm3, %v5152_v53, %v5984_v45 }
 0xd9b   :  { %v7072_v7 = vpop.eup %7071  ;;  %6447 = vmatprep.mubr.msk.f32.mxu0 %vm873_vm14, %v5198_v34 }
 0xd9c   :  { %v5985_v15 = vadd.f32 -1.0, %v7072_v7 }
 0xd9e   :  { %v5199_v54 = vsel %vm5167_vm4, %v5157_v0, %v5985_v15 }
 0xd9f   :  { %6448 = vmatmul.mubr.msk.f32.gmra.mxu0 %vm873_vm14, %v5199_v54 }
 0xda0   :  { %6474 = vmatprep.mubr.msk.f32.mxu0 %vm633_vm12, %v5334_v4 }
 0xe4d   :  { %v6440_v22 = vpop.f32.mrf.mxu0 }
 0xe4e   :  { %v10630_v56 = vadd.f32 %v6440_v22, %v5204_v31 }
 0xe4f   :  { %v5295_v33 = vpop.f32.mrf.mxu0 }
 0xe50   :  { %5368 = vrot.lane.b32.xlu1 %v10630_v56, %s7536_s3  ;;  %v5296_v35 = vadd.f32 %v5295_v33, %v5204_v31 }
 0xe55   :  { %v6443_v37 = vpop.f32.mrf.mxu0 }
 0xe56   :  { %v5311_v1 = vadd.f32 %v6443_v37, %v5204_v31 }
 0xe57   :  { %v5305_v61 = vpop.f32.mrf.mxu0 }
 0xe58   :  { %5372 = vrot.lane.b32.xlu1 %v5311_v1, %s7536_s3  ;;  %v5306_v14 = vadd.f32 %v5305_v61, %v5204_v31 }
 0xe59   :  { %v6446_v44 = vpop.f32.mrf.mxu0 }
 0xe5a   :  { %v10635_v52 = vadd.f32 %v6446_v44, %v5204_v31 }
 0xe5b   :  { %v5315_v30 = vpop.f32.mrf.mxu0 }
 0xe5c   :  { %5376 = vrot.lane.b32.xlu0 %v10635_v52, %s7536_s3  ;;  %5370 = vrot.lane.b32.xlu1 %v5306_v14, %s7536_s3  ;;  %v10652_v50 = vadd.f32 %v5315_v30, %v5204_v31 }
 0xe5f   :  { %v6449_v48 = vpop.f32.mrf.mxu0 }
 0xe60   :  { %v10640_v49 = vadd.f32 %v6449_v48, %v5204_v31  ;;  %5366 = vrot.lane.b32.xlu1 %v5296_v35, %s7536_s3 }
 0xe61   :  { %v5325_v23 = vpop.f32.mrf.mxu0 }
 0xe62   :  { %5380 = vrot.lane.b32.xlu0 %v10640_v49, %s7536_s3  ;;  %v10645_v24 = vadd.f32 %v5325_v23, %v5204_v31 }
 0xe64   :  { %5348 = vrot.lane.b32.xlu1 %v5311_v1, %s11295_s11 }
 0xe66   :  { %5378 = vrot.lane.b32.xlu0 %v10645_v24, %s7536_s3 }
 0xe68   :  { %5346 = vrot.lane.b32.xlu1 %v5306_v14, %s11295_s11 }
 0xe6a   :  { %5374 = vrot.lane.b32.xlu0 %v10652_v50, %s7536_s3 }
 0xe6c   :  { %5344 = vrot.lane.b32.xlu1 %v10630_v56, %s11295_s11 }
 0xe6e   :  { %5356 = vrot.lane.b32.xlu0 %v10640_v49, %s11295_s11 }
 0xe70   :  { %5342 = vrot.lane.b32.xlu1 %v5296_v35, %s11295_s11 }
 0xe72   :  { %5352 = vrot.lane.b32.xlu0 %v10635_v52, %s11295_s11 }
 0xe74   :  { %5407 = vperm.xlu1 %7008, %v5341_v11  }
 0xe76   :  { %5354 = vrot.lane.b32.xlu0 %v10645_v24, %s11295_s11 }
 0xe78   :  { %5397 = vperm.xlu1 %7008, %v5339_v55  }
 0xe7a   :  { %5350 = vrot.lane.b32.xlu0 %v10652_v50, %s11295_s11 }
 0xe7e   :  { %5402 = vperm.xlu0 %7007, %v5340_v58  }
 0xe82   :  { %5392 = vperm.xlu0 %7007, %v5338_v28  }
 0xec2   :  { %v5369_v46 = vpop.permute.xlu1 %5368 }
 0xeca   :  { %v5373_v57 = vpop.permute.xlu1 %5372 }
 0xecb   :  { %6450 = vmatprep.subr.msk.mxu0 %vm61_vm1, %v5373_v57 }
 0xecc   :  { %6451 = vmatpush3.msk.msra.mxu0 %vm61_vm1, %v5373_v57 }
 0xece   :  { %v5371_v25 = vpop.permute.xlu1 %5370  ;;  %v5377_v47 = vpop.permute.xlu0 %5376 }
 0xecf   :  { %6452 = vmatprep.subr.msk.mxu0 %vm61_vm1, %v5371_v25 }
 0xed0   :  { %6453 = vmatpush3.msk.msra.mxu0 %vm61_vm1, %v5371_v25 }
 0xed1   :  { %6454 = vmatprep.subr.msk.mxu0 %vm61_vm1, %v5369_v46 }
 0xed2   :  { %6455 = vmatpush3.msk.msra.mxu0 %vm61_vm1, %v5369_v46  ;;  %v5367_v40 = vpop.permute.xlu1 %5366 }
 0xed3   :  { %6456 = vmatprep.subr.msk.mxu0 %vm61_vm1, %v5367_v40 }
 0xed4   :  { %v5381_v29 = vpop.permute.xlu0 %5380  ;;  %6457 = vmatpush3.msk.msra.mxu0 %vm61_vm1, %v5367_v40 }
 0xed5   :  { %6458 = vmatprep.subr.mxu0 %v5311_v1  ;;  %6480 = vmatprep.subr.msk.mxu1 %vm61_vm1, %v5381_v29 }
 0xed6   :  { %6459 = vmatpush3.msra.mxu0 %v5311_v1  ;;  %6481 = vmatpush3.msk.msra.mxu1 %vm61_vm1, %v5381_v29  ;;  %v5349_v59 = vpop.permute.xlu1 %5348 }
 0xed7   :  { %6460 = vmatprep.subr.mxu0 %v5306_v14 }
 0xed8   :  { %v5379_v39 = vpop.permute.xlu0 %5378  ;;  %6461 = vmatpush3.msra.mxu0 %v5306_v14 }
 0xed9   :  { %6462 = vmatprep.subr.mxu0 %v10630_v56  ;;  %6482 = vmatprep.subr.msk.mxu1 %vm61_vm1, %v5379_v39 }
 0xeda   :  { %6463 = vmatpush3.msra.mxu0 %v10630_v56  ;;  %6483 = vmatpush3.msk.msra.mxu1 %vm61_vm1, %v5379_v39  ;;  %v5347_v10 = vpop.permute.xlu1 %5346 }
 0xedb   :  { %6464 = vmatprep.subr.mxu0 %v5296_v35  ;;  %6484 = vmatprep.subr.msk.mxu1 %vm61_vm1, %v5377_v47 }
 0xedc   :  { %6485 = vmatpush3.msk.msra.mxu1 %vm61_vm1, %v5377_v47  ;;  %v5375_v43 = vpop.permute.xlu0 %5374  ;;  %6465 = vmatpush3.msra.mxu0 %v5296_v35 }
 0xedd   :  { %6466 = vmatprep.subr.msk.mxu0 %vm60_vm2, %v5349_v59  ;;  %6486 = vmatprep.subr.msk.mxu1 %vm61_vm1, %v5375_v43 }
 0xede   :  { %6467 = vmatpush3.msk.msra.mxu0 %vm60_vm2, %v5349_v59  ;;  %6487 = vmatpush3.msk.msra.mxu1 %vm61_vm1, %v5375_v43  ;;  %v5345_v53 = vpop.permute.xlu1 %5344  ;;  %v5633_v43 = vld [vmem:[#allocation2 + $0x500] sm:$0xff] }
 0xedf   :  { %6468 = vmatprep.subr.msk.mxu0 %vm60_vm2, %v5347_v10  ;;  %6488 = vmatprep.subr.mxu1 %v10640_v49 }
 0xee0   :  { %6489 = vmatpush3.msra.mxu1 %v10640_v49  ;;  %v5357_v19 = vpop.permute.xlu0 %5356  ;;  %6469 = vmatpush3.msk.msra.mxu0 %vm60_vm2, %v5347_v10 }
 0xee1   :  { %6470 = vmatprep.subr.msk.mxu0 %vm60_vm2, %v5345_v53  ;;  %6490 = vmatprep.subr.mxu1 %v10645_v24 }
 0xee2   :  { %6471 = vmatpush3.msk.msra.mxu0 %vm60_vm2, %v5345_v53  ;;  %6491 = vmatpush3.msra.mxu1 %v10645_v24  ;;  %v5343_v51 = vpop.permute.xlu1 %5342 }
 0xee3   :  { %6472 = vmatprep.subr.msk.mxu0 %vm60_vm2, %v5343_v51  ;;  %6492 = vmatprep.subr.mxu1 %v10635_v52 }
 0xee4   :  { %6493 = vmatpush3.msra.mxu1 %v10635_v52  ;;  %v5353_v12 = vpop.permute.xlu0 %5352  ;;  %6473 = vmatpush3.msk.msra.mxu0 %vm60_vm2, %v5343_v51 }
 0xee5   :  { %6475 = vmatmul.mubr.msk.f32.vlgmr.msra.gmra.mxu0 %vm633_vm12, %v5335_v18  ;;  %6494 = vmatprep.subr.mxu1 %v10652_v50 }
 0xee6   :  { %6495 = vmatpush3.msra.mxu1 %v10652_v50  ;;  %6477 = vmatprep.mubr.msk.f32.mxu0 %vm633_vm12, %v5336_v38 }
 0xee7   :  { %6496 = vmatprep.subr.msk.mxu1 %vm60_vm2, %v5357_v19  ;;  %6510 = vmatprep.subr.mxu0 %v7584_v63 }
 0xee8   :  { %6497 = vmatpush3.msk.msra.mxu1 %vm60_vm2, %v5357_v19  ;;  %v5355_v26 = vpop.permute.xlu0 %5354 }
 0xee9   :  { %6478 = vmatmul.mubr.msk.f32.gmra.mxu0 %vm633_vm12, %v5337_v8  ;;  %6498 = vmatprep.subr.msk.mxu1 %vm60_vm2, %v5355_v26 }
 0xeea   :  { %6499 = vmatpush3.msk.msra.mxu1 %vm60_vm2, %v5355_v26  ;;  %6534 = vmatprep.mubr.msk.f32.mxu0 %vm7585_vm9, %v7584_v63 }
 0xeeb   :  { %6500 = vmatprep.subr.msk.mxu1 %vm60_vm2, %v5353_v12 }
 0xeec   :  { %6501 = vmatpush3.msk.msra.mxu1 %vm60_vm2, %v5353_v12  ;;  %v5351_v0 = vpop.permute.xlu0 %5350 }
 0xeed   :  { %6502 = vmatprep.subr.msk.mxu1 %vm60_vm2, %v5351_v0 }
 0xeee   :  { %6503 = vmatpush3.msk.msra.mxu1 %vm60_vm2, %v5351_v0 }
 0xeef   :  { %6505 = vmatmul.mubr.msk.f32.vlgmr.msra.gmra.mxu1 %vm633_vm12, %v5335_v18  ;;  %6537 = vmatprep.subr.mxu1 %v7584_v63  ;;  %v5408_v60 = vpop.permute.xlu1 %5407 }
 0xef0   :  { %6507 = vmatprep.mubr.msk.f32.mxu1 %vm633_vm12, %v5336_v38 }
 0xef3   :  { %6508 = vmatmul.mubr.msk.f32.gmra.mxu1 %vm633_vm12, %v5337_v8  ;;  %v5398_v62 = vpop.permute.xlu1 %5397 }
 0xef4   :  { %6561 = vmatprep.mubr.msk.f32.mxu1 %vm7585_vm9, %v7584_v63 }
 0xef9   :  { %v5403_v36 = vpop.permute.xlu0 %5402 }
 0xefd   :  { %v5393_v5 = vpop.permute.xlu0 %5392 }
 0xfa5   :  { %v6476_v9 = vpop.f32.mrf.mxu0 }
 0xfa6   :  { %v5494_v13 = vadd.f32 %v6476_v9, %v5398_v62  ;;  %v5632_v9 = vld [vmem:[#allocation2 + $0x4f0] sm:$0xff] }
 0xfa7   :  { %v5488_v42 = vpop.f32.mrf.mxu0 }
 0xfa8   :  { %v5602_v17 = vmul.f32 1.442695, %v5494_v13  ;;  %v5489_v41 = vadd.f32 %v5488_v42, %v5393_v5  ;;  %vm5593_vm14 = vcmp.gt.f32.partialorder %v5494_v13, 0.0 }
 0xfa9   :  { %v6479_v2 = vpop.f32.mrf.mxu0 }
 0xfaa   :  { %7073 = vpow2.f32 %v5602_v17  ;;  %v5504_v16 = vadd.f32 %v6479_v2, %v5408_v60  ;;  %v5600_v32 = vmul.f32 1.442695, %v5489_v41  ;;  %vm5592_vm8 = vcmp.gt.f32.partialorder %v5489_v41, 0.0 }
 0xfab   :  { %v5498_v27 = vpop.f32.mrf.mxu0 }
 0xfac   :  { %v5606_v3 = vmul.f32 1.442695, %v5504_v16  ;;  %v5499_v20 = vadd.f32 %v5498_v27, %v5403_v36  ;;  %vm5595_vm5 = vcmp.gt.f32.partialorder %v5504_v16, 0.0 }
 0xfae   :  { %7075 = vpow2.f32 %v5606_v3  ;;  %v5604_v21 = vmul.f32 1.442695, %v5499_v20  ;;  %vm5594_vm6 = vcmp.gt.f32.partialorder %v5499_v20, 0.0 }
 0xfaf   :  { %v6506_v45 = vpop.f32.mrf.mxu1 }
 0xfb0   :  { %7077 = vpow2.f32 %v5604_v21  ;;  %v5579_v34 = vadd.f32 %v6506_v45, %v5398_v62 }
 0xfb1   :  { %v5573_v7 = vpop.f32.mrf.mxu1  ;;  %7079 = vpow2.f32 %v5600_v32 }
 0xfb2   :  { %v5610_v15 = vmul.f32 1.442695, %v5579_v34  ;;  %v5574_v31 = vadd.f32 %v5573_v7, %v5393_v5  ;;  %vm5597_vm7 = vcmp.gt.f32.partialorder %v5579_v34, 0.0 }
 0xfb3   :  { %v6509_v54 = vpop.f32.mrf.mxu1 }
 0xfb4   :  { %7081 = vpow2.f32 %v5610_v15  ;;  %v5589_v22 = vadd.f32 %v6509_v54, %v5408_v60  ;;  %v5608_v61 = vmul.f32 1.442695, %v5574_v31  ;;  %vm5596_vm10 = vcmp.gt.f32.partialorder %v5574_v31, 0.0 }
 0xfb5   :  { %v5583_v56 = vpop.f32.mrf.mxu1 }
 0xfb6   :  { %v5614_v33 = vmul.f32 1.442695, %v5589_v22  ;;  %v5584_v37 = vadd.f32 %v5583_v56, %v5403_v36  ;;  %vm5599_vm11 = vcmp.gt.f32.partialorder %v5589_v22, 0.0 }
 0xfb7   :  { %v7074_v1 = vpop.eup %7073 }
 0xfb8   :  { %7083 = vpow2.f32 %v5614_v33  ;;  %v5612_v44 = vmul.f32 1.442695, %v5584_v37  ;;  %v6019_v14 = vadd.f32 -1.0, %v7074_v1  ;;  %vm5598_vm13 = vcmp.gt.f32.partialorder %v5584_v37, 0.0 }
 0xfba   :  { %7085 = vpow2.f32 %v5612_v44  ;;  %v10750_v52 = vsel %vm5593_vm14, %v5494_v13, %v6019_v14 }
 0xfbb   :  { %v7076_v30 = vpop.eup %7075  ;;  %5660 = vrot.lane.b32.xlu1 %v10750_v52, %s7536_s3  ;;  %7087 = vpow2.f32 %v5608_v61 }
 0xfbc   :  { %v6021_v35 = vadd.f32 -1.0, %v7076_v30 }
 0xfbd   :  { %v7078_v48 = vpop.eup %7077 }
 0xfbe   :  { %v5627_v49 = vsel %vm5595_vm5, %v5504_v16, %v6021_v35  ;;  %v6020_v23 = vadd.f32 -1.0, %v7078_v48  ;;  %v7080_v4 = vpop.eup %7079 }
 0xfbf   :  { %5664 = vrot.lane.b32.xlu1 %v5627_v49, %s7536_s3  ;;  %v6018_v55 = vadd.f32 -1.0, %v7080_v4 }
 0xfc0   :  { %v5626_v50 = vsel %vm5594_vm6, %v5499_v20, %v6020_v23 }
 0xfc1   :  { %v7082_v24 = vpop.eup %7081  ;;  %v5624_v46 = vsel %vm5592_vm8, %v5489_v41, %v6018_v55 }
 0xfc2   :  { %v6023_v11 = vadd.f32 -1.0, %v7082_v24 }
 0xfc3   :  { %5662 = vrot.lane.b32.xlu1 %v5626_v50, %s7536_s3 }
 0xfc4   :  { %v10756_v58 = vsel %vm5597_vm7, %v5579_v34, %v6023_v11 }
 0xfc5   :  { %v7084_v28 = vpop.eup %7083  ;;  %5668 = vrot.lane.b32.xlu0 %v10756_v58, %s7536_s3 }
 0xfc6   :  { %v6025_v57 = vadd.f32 -1.0, %v7084_v28 }
 0xfc7   :  { %v7086_v25 = vpop.eup %7085  ;;  %5658 = vrot.lane.b32.xlu1 %v5624_v46, %s7536_s3 }
 0xfc8   :  { %v5631_v47 = vsel %vm5599_vm11, %v5589_v22, %v6025_v57  ;;  %v6024_v40 = vadd.f32 -1.0, %v7086_v25  ;;  %v7088_v29 = vpop.eup %7087 }
 0xfc9   :  { %5672 = vrot.lane.b32.xlu0 %v5631_v47, %s7536_s3  ;;  %v6022_v39 = vadd.f32 -1.0, %v7088_v29 }
 0xfca   :  { %v5630_v59 = vsel %vm5598_vm13, %v5584_v37, %v6024_v40 }
 0xfcb   :  { %5640 = vrot.lane.b32.xlu1 %v5627_v49, %s11295_s11  ;;  %v10767_v10 = vsel %vm5596_vm10, %v5574_v31, %v6022_v39 }
 0xfcd   :  { %5670 = vrot.lane.b32.xlu0 %v5630_v59, %s7536_s3 }
 0xfcf   :  { %5638 = vrot.lane.b32.xlu1 %v5626_v50, %s11295_s11 }
 0xfd1   :  { %5666 = vrot.lane.b32.xlu0 %v10767_v10, %s7536_s3 }
 0xfd3   :  { %5636 = vrot.lane.b32.xlu1 %v10750_v52, %s11295_s11 }
 0xfd5   :  { %5648 = vrot.lane.b32.xlu0 %v5631_v47, %s11295_s11 }
 0xfd7   :  { %5634 = vrot.lane.b32.xlu1 %v5624_v46, %s11295_s11 }
 0xfd9   :  { %5644 = vrot.lane.b32.xlu0 %v10756_v58, %s11295_s11 }
 0xfdb   :  { %5684 = vperm.xlu1 %7008, %v5633_v43  }
 0xfdd   :  { %5646 = vrot.lane.b32.xlu0 %v5630_v59, %s11295_s11 }
 0xfe1   :  { %5642 = vrot.lane.b32.xlu0 %v10767_v10, %s11295_s11 }
0x102d   :  { %v5661_v53 = vpop.permute.xlu1 %5660 }
0x1031   :  { %v5665_v19 = vpop.permute.xlu1 %5664 }
0x1032   :  { %6511 = vmatpush3.msk.msra.mxu0 %vm61_vm1, %v5665_v19 }
0x1033   :  { %6512 = vmatprep.subr.mxu0 %v7584_v63 }
0x1035   :  { %v5663_v51 = vpop.permute.xlu1 %5662 }
0x1036   :  { %6513 = vmatpush3.msk.msra.mxu0 %vm61_vm1, %v5663_v51 }
0x1037   :  { %v5669_v18 = vpop.permute.xlu0 %5668  ;;  %6514 = vmatprep.subr.mxu0 %v7584_v63 }
0x1038   :  { %6515 = vmatpush3.msk.msra.mxu0 %vm61_vm1, %v5661_v53 }
0x1039   :  { %6516 = vmatprep.subr.mxu0 %v7584_v63  ;;  %v5659_v38 = vpop.permute.xlu1 %5658 }
0x103a   :  { %6517 = vmatpush3.msk.msra.mxu0 %vm61_vm1, %v5659_v38 }
0x103b   :  { %v5673_v12 = vpop.permute.xlu0 %5672  ;;  %6518 = vmatprep.subr.mxu0 %v7584_v63 }
0x103c   :  { %6519 = vmatpush3.msra.mxu0 %v5627_v49  ;;  %6538 = vmatpush3.msk.msra.mxu1 %vm61_vm1, %v5673_v12 }
0x103d   :  { %6520 = vmatprep.subr.mxu0 %v7584_v63  ;;  %v5641_v8 = vpop.permute.xlu1 %5640  ;;  %6539 = vmatprep.subr.mxu1 %v7584_v63 }
0x103e   :  { %6521 = vmatpush3.msra.mxu0 %v5626_v50 }
0x103f   :  { %v5671_v26 = vpop.permute.xlu0 %5670  ;;  %6522 = vmatprep.subr.mxu0 %v7584_v63 }
0x1040   :  { %6523 = vmatpush3.msra.mxu0 %v10750_v52  ;;  %6540 = vmatpush3.msk.msra.mxu1 %vm61_vm1, %v5671_v26 }
0x1041   :  { %6524 = vmatprep.subr.mxu0 %v7584_v63  ;;  %6541 = vmatprep.subr.mxu1 %v7584_v63  ;;  %v5639_v0 = vpop.permute.xlu1 %5638 }
0x1042   :  { %6525 = vmatpush3.msra.mxu0 %v5624_v46  ;;  %6542 = vmatpush3.msk.msra.mxu1 %vm61_vm1, %v5669_v18 }
0x1043   :  { %6543 = vmatprep.subr.mxu1 %v7584_v63  ;;  %v5667_v60 = vpop.permute.xlu0 %5666  ;;  %6526 = vmatprep.subr.mxu0 %v7584_v63 }
0x1044   :  { %6527 = vmatpush3.msk.msra.mxu0 %vm60_vm2, %v5641_v8  ;;  %6544 = vmatpush3.msk.msra.mxu1 %vm61_vm1, %v5667_v60 }
0x1045   :  { %6528 = vmatprep.subr.mxu0 %v7584_v63  ;;  %6545 = vmatprep.subr.mxu1 %v7584_v63  ;;  %v5637_v36 = vpop.permute.xlu1 %5636 }
0x1046   :  { %6529 = vmatpush3.msk.msra.mxu0 %vm60_vm2, %v5639_v0  ;;  %6546 = vmatpush3.msra.mxu1 %v5631_v47 }
0x1047   :  { %6547 = vmatprep.subr.mxu1 %v7584_v63  ;;  %v5649_v62 = vpop.permute.xlu0 %5648  ;;  %6530 = vmatprep.subr.mxu0 %v7584_v63 }
0x1048   :  { %6531 = vmatpush3.msk.msra.mxu0 %vm60_vm2, %v5637_v36  ;;  %6548 = vmatpush3.msra.mxu1 %v5630_v59 }
0x1049   :  { %6532 = vmatprep.subr.mxu0 %v7584_v63  ;;  %6549 = vmatprep.subr.mxu1 %v7584_v63  ;;  %v5635_v13 = vpop.permute.xlu1 %5634 }
0x104a   :  { %6533 = vmatpush3.msk.msra.mxu0 %vm60_vm2, %v5635_v13  ;;  %6550 = vmatpush3.msra.mxu1 %v10756_v58 }
0x104b   :  { %6551 = vmatprep.subr.mxu1 %v7584_v63  ;;  %v5645_v42 = vpop.permute.xlu0 %5644  ;;  %6535 = vmatmul.mubr.msk.f32.vlgmr.msra.gmra.mxu0 %vm633_vm12, %v5632_v9 }
0x104c   :  { %6552 = vmatpush3.msra.mxu1 %v10767_v10 }
0x104d   :  { %6553 = vmatprep.subr.mxu1 %v7584_v63 }
0x104e   :  { %6554 = vmatpush3.msk.msra.mxu1 %vm60_vm2, %v5649_v62 }
0x104f   :  { %6555 = vmatprep.subr.mxu1 %v7584_v63  ;;  %v5647_v17 = vpop.permute.xlu0 %5646 }
0x1050   :  { %6556 = vmatpush3.msk.msra.mxu1 %vm60_vm2, %v5647_v17 }
0x1051   :  { %6557 = vmatprep.subr.mxu1 %v7584_v63 }
0x1052   :  { %6558 = vmatpush3.msk.msra.mxu1 %vm60_vm2, %v5645_v42 }
0x1053   :  { %6559 = vmatprep.subr.mxu1 %v7584_v63  ;;  %v5643_v5 = vpop.permute.xlu0 %5642 }
0x1054   :  { %6560 = vmatpush3.msk.msra.mxu1 %vm60_vm2, %v5643_v5 }
0x1055   :  { %6562 = vmatmul.mubr.msk.f32.vlgmr.msra.gmra.mxu1 %vm633_vm12, %v5632_v9 }
0x1056   :  { %v5685_v2 = vpop.permute.xlu1 %5684 }
0x110b   :  { %v5756_v41 = vpop.f32.mrf.mxu0 }
0x110c   :  { %v5757_v16 = vadd.f32 %v5756_v41, %v5685_v2 }
0x110d   :  { %v6536_v27 = vpop.f32.mrf.mxu0 }
0x110e   :  { %5830 = vst [vmem:[%s10849_s4] sm:$0xff] %v5757_v16 }
0x1115   :  { %v5826_v3 = vpop.f32.mrf.mxu1 }
0x1116   :  { %v5827_v20 = vadd.f32 %v5826_v3, %v5685_v2 }
0x1117   :  { %v6563_v32 = vpop.f32.mrf.mxu1 }
0x1118   :  { %5831 = vst [vmem:[%s10849_s4 + $0x8] sm:$0xff] %v5827_v20 }
0x1119   :  { %5836 = vsyncpa [#allocation3], 1 }
0x111a   :  { %5837 = vsyncpa [#allocation5], 1 }

</bundles_post_ra>
